<compile_context>
chip_gen: v6e
topology: v6e:2x2x1
jax: 0.10.0
libtpu: 0.0.40
codegen_flags: <defaults>
</compile_context>

<pallas_src>
import functools

import jax
import jax.numpy as jnp
from jax import lax
from jax.experimental import pallas as pl
from jax.experimental.pallas import tpu as pltpu

LANES = 128

# Generation-aware VMEM limit: ~half of physical capacity, clamped to
# [32 MiB, 96 MiB]  (v7x: 64 MiB physical -> 32 MiB; v5e/v6e: 128 -> 64 MiB).
try:
    _VMEM_CAP = int(pltpu.get_tpu_info().vmem_capacity_bytes)
except Exception:  # pragma: no cover - conservative fallback
    _VMEM_CAP = 64 * 1024 * 1024
_VMEM_LIMIT = int(min(96 * 1024 * 1024, max(32 * 1024 * 1024, _VMEM_CAP // 2)))


def _pick_bt(batch, rows_per_img, target_rows=256, max_rows=2048):
    """Images per grid block: fill the MXU M dimension (~target_rows) without
    blowing VMEM; stop growing once the target is reached so the grid keeps
    some length for megacore."""
    best = 1
    for bt in range(1, batch + 1):
        if batch % bt:
            continue
        if bt * rows_per_img > max_rows:
            break
        best = bt
        if bt * rows_per_img >= target_rows:
            break
    return best


# --------------------------------------------------------------------------- #
# K1: Linear (z @ W + b) fused with BatchNorm2d(128) (training-mode batch stats)
# --------------------------------------------------------------------------- #
def linear_bn_kernel(z_ref, w_ref, b_ref, g_ref, be_ref, o_ref, *, s2, eps):
    # bf16 operands on the MXU, f32 accumulate + f32 epilogue.
    h = jnp.dot(z_ref[...].astype(jnp.bfloat16), w_ref[...],
                preferred_element_type=jnp.float32) + b_ref[...]   # (B, s2*128)
    bsz = h.shape[0]
    # Per-channel batch stats: sum the 128-lane-aligned slices (VPU adds only,
    # no lane-group -> sublane relayout).
    ssum = jnp.zeros((1, LANES), jnp.float32)
    ssq = jnp.zeros((1, LANES), jnp.float32)
    for p in range(s2):
        blk = h[:, LANES * p:LANES * (p + 1)]
        ssum = ssum + jnp.sum(blk, axis=0, keepdims=True)
        ssq = ssq + jnp.sum(blk * blk, axis=0, keepdims=True)
    count = bsz * s2
    mean = ssum / count
    var = jnp.maximum(ssq / count - mean * mean, 0.0)
    scale = g_ref[...] * lax.rsqrt(var + eps)
    shift = be_ref[...] - mean * scale
    outs = [h[:, LANES * p:LANES * (p + 1)] * scale + shift for p in range(s2)]
    o_ref[...] = jnp.concatenate(outs, axis=-1).astype(o_ref.dtype)


def linear_bn_call(z, w, b, gamma, beta, s2, eps):
    B = z.shape[0]
    return pl.pallas_call(
        functools.partial(linear_bn_kernel, s2=s2, eps=eps),
        out_shape=jax.ShapeDtypeStruct((B, s2 * LANES), jnp.bfloat16),
        in_specs=[pl.BlockSpec(memory_space=pltpu.MemorySpace.VMEM)] * 5,
        out_specs=pl.BlockSpec(memory_space=pltpu.MemorySpace.VMEM),
        compiler_params=pltpu.CompilerParams(vmem_limit_bytes=_VMEM_LIMIT),
    )(z, w, b, gamma, beta)


# --------------------------------------------------------------------------- #
# In-kernel helper: per-image zero pad of an NHWC block (bf16)
# --------------------------------------------------------------------------- #
def _pad1_nhwc(x):
    Bt, H, W, C = x.shape
    zc = jnp.zeros((Bt, H, 1, C), x.dtype)
    x = jnp.concatenate([zc, x, zc], axis=2)                  # (Bt, H, W+2, C)
    zr = jnp.zeros((Bt, 1, W + 2, C), x.dtype)
    return jnp.concatenate([zr, x, zr], axis=1)               # (Bt, H+2, W+2, C)


# --------------------------------------------------------------------------- #
# K2/K3: [BN-affine + LeakyReLU] + (Upsample(x2)+Conv3x3 via 4-phase 2x2 conv)
#        + BN-stat accumulation.  Output slab (Bt, H, 2, W, 2*Cout): a free
#        row-major reshape in the wrapper gives the interleaved (2H, 2W, Cout).
# --------------------------------------------------------------------------- #
def up_conv_stage_kernel(x_ref, w_ref, sc_ref, sh_ref, o_ref, st_ref, *,
                         input_act, slope):
    x = x_ref[...]                                            # (Bt, H, W, 128) bf16
    if input_act:
        xf = x.astype(jnp.float32) * sc_ref[...] + sh_ref[...]
        xf = jnp.where(xf >= 0, xf, slope * xf)
        x = xf.astype(jnp.bfloat16)
    else:
        x = x.astype(jnp.bfloat16)
    Bt, H, W, C = x.shape
    xp = _pad1_nhwc(x)                                        # (Bt, H+2, W+2, C)

    ssum = jnp.zeros((1, LANES), jnp.float32)
    ssq = jnp.zeros((1, LANES), jnp.float32)
    rows = []
    for py in range(2):
        cols = []
        for px in range(2):
            taps = [xp[:, py + a:py + a + H, px + b:px + b + W, :]
                    for a in range(2) for b in range(2)]
            patches = jnp.concatenate(taps, axis=-1).reshape(Bt * H * W, 4 * C)
            # NOTE: conv bias intentionally dropped -- a per-channel constant
            # is exactly cancelled by the following BatchNorm's mean subtract.
            acc = jnp.dot(patches, w_ref[2 * py + px],
                          preferred_element_type=jnp.float32)   # (M, 128) f32
            ssum = ssum + jnp.sum(acc, axis=0, keepdims=True)
            ssq = ssq + jnp.sum(acc * acc, axis=0, keepdims=True)
            cols.append(acc.astype(o_ref.dtype).reshape(Bt, H, W, LANES))
        rows.append(jnp.concatenate(cols, axis=-1))           # (Bt, H, W, 256)
    y = jnp.concatenate([rows[0][:, :, None], rows[1][:, :, None]], axis=2)
    o_ref[...] = y                                            # (Bt, H, 2, W, 256)
    st_ref[...] = jnp.concatenate([ssum, ssq], axis=0)        # (2, 128)


def up_conv_stage_call(x, w_phases, scale, shift, *, input_act):
    B, H, W, C = x.shape
    Bt = _pick_bt(B, H * W)
    nblk = B // Bt
    kern = functools.partial(up_conv_stage_kernel, input_act=input_act,
                             slope=0.2)
    out, stats = pl.pallas_call(
        kern,
        grid=(nblk,),
        in_specs=[
            pl.BlockSpec((Bt, H, W, C), lambda b: (b, 0, 0, 0)),
            pl.BlockSpec(w_phases.shape, lambda b: (0, 0, 0)),
            pl.BlockSpec(scale.shape, lambda b: (0, 0)),
            pl.BlockSpec(shift.shape, lambda b: (0, 0)),
        ],
        out_specs=[
            pl.BlockSpec((Bt, H, 2, W, 2 * LANES), lambda b: (b, 0, 0, 0, 0)),
            pl.BlockSpec((None, 2, LANES), lambda b: (b, 0, 0)),
        ],
        out_shape=[
            jax.ShapeDtypeStruct((B, H, 2, W, 2 * LANES), jnp.bfloat16),
            jax.ShapeDtypeStruct((nblk, 2, LANES), jnp.float32),
        ],
        compiler_params=pltpu.CompilerParams(
            dimension_semantics=("parallel",),
            vmem_limit_bytes=_VMEM_LIMIT),
    )(x, w_phases, scale, shift)
    # Row-major identity reshape: (B, H, 2, W, 2*C) -> (B, 2H, 2W, C).
    y = out.reshape(B, 2 * H, 2 * W, LANES)
    return y, stats


# --------------------------------------------------------------------------- #
# K4: BN-affine + LeakyReLU + Conv3x3(->channels) + Tanh, channels-only output
# --------------------------------------------------------------------------- #
def final_conv_kernel(x_ref, w_ref, sc_ref, sh_ref, b_ref, o_ref, *,
                      slope, channels):
    xf = x_ref[...].astype(jnp.float32) * sc_ref[...] + sh_ref[...]
    xf = jnp.where(xf >= 0, xf, slope * xf)
    x = xf.astype(jnp.bfloat16)
    Bt, H, W, C = x.shape
    xp = _pad1_nhwc(x)
    taps = [xp[:, dy:dy + H, dx:dx + W, :] for dy in range(3) for dx in range(3)]
    patches = jnp.concatenate(taps, axis=-1).reshape(Bt * H * W, 9 * C)
    acc = jnp.dot(patches, w_ref[...],
                  preferred_element_type=jnp.float32) + b_ref[...]
    img = jnp.tanh(acc[:, :channels])
    o_ref[...] = img.reshape(Bt, H, W, channels)


def final_conv_call(x, w, scale, shift, bias, channels):
    B, H, W, C = x.shape
    Bt = _pick_bt(B, H * W)
    nblk = B // Bt
    kern = functools.partial(final_conv_kernel, slope=0.2, channels=channels)
    return pl.pallas_call(
        kern,
        grid=(nblk,),
        in_specs=[
            pl.BlockSpec((Bt, H, W, C), lambda b: (b, 0, 0, 0)),
            pl.BlockSpec(w.shape, lambda b: (0, 0)),
            pl.BlockSpec(scale.shape, lambda b: (0, 0)),
            pl.BlockSpec(shift.shape, lambda b: (0, 0)),
            pl.BlockSpec(bias.shape, lambda b: (0, 0)),
        ],
        out_specs=pl.BlockSpec((Bt, H, W, channels), lambda b: (b, 0, 0, 0)),
        out_shape=jax.ShapeDtypeStruct((B, H, W, channels), jnp.float32),
        compiler_params=pltpu.CompilerParams(
            dimension_semantics=("parallel",),
            vmem_limit_bytes=_VMEM_LIMIT),
    )(x, w, scale, shift, bias)


# --------------------------------------------------------------------------- #
# Tiny glue on (nblk, 2, C) stats: turn sum / sum-of-squares into a BN affine
# --------------------------------------------------------------------------- #
def bn_affine_from_stats(stats, gamma, beta, count, eps):
    # E[x^2]-E[x]^2 in f32; fine here (near-zero-mean activations, eps=0.8).
    tot = jnp.sum(stats, axis=0)                # (2, C)
    mean = tot[0] / count
    var = jnp.maximum(tot[1] / count - mean * mean, 0.0)
    scale = gamma.reshape(-1) * lax.rsqrt(var + eps)
    shift = beta.reshape(-1) - mean * scale
    return scale.reshape(1, -1), shift.reshape(1, -1)


# --------------------------------------------------------------------------- #
# Parameters
# --------------------------------------------------------------------------- #
def init_params(key, img_shape, latent_dim, channels):
    """Deterministic parameter init with PyTorch-style shapes."""
    s = img_shape // 4
    ks = jax.random.split(key, 14)

    def u(k, shape, fan_in):
        bound = 1.0 / jnp.sqrt(jnp.float32(fan_in))
        return jax.random.uniform(k, shape, jnp.float32, -bound, bound)

    return {
        "fc_w": u(ks[0], (128 * s * s, latent_dim), latent_dim),
        "fc_b": u(ks[1], (128 * s * s,), latent_dim),
        "bn1_g": jax.random.uniform(ks[2], (128,), jnp.float32, 0.5, 1.5),
        "bn1_b": jax.random.uniform(ks[3], (128,), jnp.float32, -0.5, 0.5),
        "c1_w": u(ks[4], (128, 128, 3, 3), 128 * 9),
        "c1_b": u(ks[5], (128,), 128 * 9),
        "bn2_g": jax.random.uniform(ks[6], (128,), jnp.float32, 0.5, 1.5),
        "bn2_b": jax.random.uniform(ks[7], (128,), jnp.float32, -0.5, 0.5),
        "c2_w": u(ks[8], (64, 128, 3, 3), 128 * 9),
        "c2_b": u(ks[9], (64,), 128 * 9),
        "bn3_g": jax.random.uniform(ks[10], (64,), jnp.float32, 0.5, 1.5),
        "bn3_b": jax.random.uniform(ks[11], (64,), jnp.float32, -0.5, 0.5),
        "c3_w": u(ks[12], (channels, 64, 3, 3), 64 * 9),
        "c3_b": u(ks[13], (channels,), 64 * 9),
    }


def to_kernel_params(p, img_shape, latent_dim):
    """Rearrange PyTorch-shaped params for the NHWC / lane-padded Pallas kernels."""
    s = img_shape // 4

    def lane_pad_3x3(w):
        # (Cout, Cin, 3, 3) -> (3, 3, 128, 128) f32, zero lane padding.
        cout, cin = w.shape[0], w.shape[1]
        wt = jnp.transpose(w, (2, 3, 1, 0))                   # (3, 3, Cin, Cout)
        return jnp.zeros((3, 3, LANES, LANES),
                         jnp.float32).at[:, :, :cin, :cout].set(wt)

    def conv_w(w):
        # Plain 'same' 3x3 conv weights as one deep-K matrix (9*128, 128) bf16.
        return lane_pad_3x3(w).reshape(9 * LANES, LANES).astype(jnp.bfloat16)

    def conv_w_phases(w):
        # Upsample(x2)+Conv3x3 folded into four effective 2x2 kernels:
        # phase (py, px), tap (a, b) sums the original taps
        #   ky in S(py,a), kx in S(px,b)   with S(0,*)=[{0},{1,2}], S(1,*)=[{0,1},{2}]
        wp = lane_pad_3x3(w)
        sets = {0: ([0], [1, 2]), 1: ([0, 1], [2])}
        phases = []
        for py in range(2):
            for px in range(2):
                taps = []
                for a in range(2):
                    for b in range(2):
                        acc = jnp.zeros((LANES, LANES), jnp.float32)
                        for ky in sets[py][a]:
                            for kx in sets[px][b]:
                                acc = acc + wp[ky, kx]
                        taps.append(acc)
                phases.append(jnp.concatenate(taps, axis=0))   # (4*128, 128)
        return jnp.stack(phases, axis=0).astype(jnp.bfloat16)  # (4, 512, 128)

    def pad_vec(v):
        return jnp.zeros((1, LANES), jnp.float32).at[0, :v.shape[0]].set(v)

    kp = {}
    # Linear: output ordering (h, w, c) so a free reshape gives NHWC.
    wfc = (p["fc_w"].reshape(128, s, s, latent_dim)
           .transpose(1, 2, 0, 3)
           .reshape(128 * s * s, latent_dim))
    kp["fc_w"] = wfc.T.astype(jnp.bfloat16)                    # (latent, s*s*128)
    kp["fc_b"] = (p["fc_b"].reshape(128, s, s).transpose(1, 2, 0)
                  .reshape(1, 128 * s * s))
    kp["bn1_g"] = p["bn1_g"].reshape(1, -1)
    kp["bn1_b"] = p["bn1_b"].reshape(1, -1)

    kp["c1_wp"] = conv_w_phases(p["c1_w"])
    kp["c2_wp"] = conv_w_phases(p["c2_w"])    # Cout 64 -> 128 (lane padding)
    kp["c3_w"] = conv_w(p["c3_w"])            # Cin 64 -> 128, Cout ch -> 128
    kp["c3_b"] = pad_vec(p["c3_b"])
    kp["bn2_g"] = p["bn2_g"].reshape(1, -1)
    kp["bn2_b"] = p["bn2_b"].reshape(1, -1)
    # Invariant: bn3 gamma/beta zero-padded so padded channels stay exactly 0.
    kp["bn3_g"] = pad_vec(p["bn3_g"])
    kp["bn3_b"] = pad_vec(p["bn3_b"])
    # conv1/conv2 biases intentionally dropped (cancelled by the following BN).
    return kp


# --------------------------------------------------------------------------- #
# Forward pass
# --------------------------------------------------------------------------- #
def generator_forward(z, kp, img_shape, channels):
    s = img_shape // 4
    B = z.shape[0]
    dummy = jnp.zeros((1, LANES), jnp.float32)

    # Linear + BatchNorm2d(128) fused; bf16 NHWC output.
    x = linear_bn_call(z, kp["fc_w"], kp["fc_b"], kp["bn1_g"], kp["bn1_b"],
                       s * s, eps=1e-5)
    x = x.reshape(B, s, s, LANES)                              # free reshape

    # Upsample(x2)+Conv(128->128) via 4-phase conv; BN2 stats per block.
    y1, st1 = up_conv_stage_call(x, kp["c1_wp"], dummy, dummy, input_act=False)
    sc2, sh2 = bn_affine_from_stats(st1, kp["bn2_g"], kp["bn2_b"],
                                    count=B * (2 * s) * (2 * s), eps=0.8)

    # BN2 + LeakyReLU + Upsample(x2)+Conv(128->64, lane-padded) fused.
    y2, st2 = up_conv_stage_call(y1, kp["c2_wp"], sc2, sh2, input_act=True)
    sc3, sh3 = bn_affine_from_stats(st2, kp["bn3_g"], kp["bn3_b"],
                                    count=B * (4 * s) * (4 * s), eps=0.8)

    # BN3 + LeakyReLU + Conv(64->channels) + Tanh; channels-only f32 output.
    img = final_conv_call(y2, kp["c3_w"], sc3, sh3, kp["c3_b"], channels)
    return jnp.transpose(img, (0, 3, 1, 2))                    # NCHW like PyTorch


# --------------------------------------------------------------------------- #
# Pure-JAX reference (PyTorch semantics, f32 HIGHEST) for correctness checking
# --------------------------------------------------------------------------- #
def reference_forward(z, p, img_shape):
    s = img_shape // 4
    B = z.shape[0]
    h = z @ p["fc_w"].T + p["fc_b"]
    x = h.reshape(B, 128, s, s)

    def bn(x, g, b, eps):
        m = x.mean(axis=(0, 2, 3), keepdims=True)
        v = ((x - m) ** 2).mean(axis=(0, 2, 3), keepdims=True)
        return ((x - m) * lax.rsqrt(v + eps) * g.reshape(1, -1, 1, 1)
                + b.reshape(1, -1, 1, 1))

    def up(x):
        return jnp.repeat(jnp.repeat(x, 2, axis=2), 2, axis=3)

    def conv(x, w, b):
        y = lax.conv_general_dilated(
            x, w, (1, 1), ((1, 1), (1, 1)),
            dimension_numbers=("NCHW", "OIHW", "NCHW"),
            precision=lax.Precision.HIGHEST)
        return y + b.reshape(1, -1, 1, 1)

    x = bn(x, p["bn1_g"], p["bn1_b"], 1e-5)
    x = up(x)
    x = conv(x, p["c1_w"], p["c1_b"])
    x = bn(x, p["bn2_g"], p["bn2_b"], 0.8)
    x = jnp.where(x >= 0, x, 0.2 * x)
    x = up(x)
    x = conv(x, p["c2_w"], p["c2_b"])
    x = bn(x, p["bn3_g"], p["bn3_b"], 0.8)
    x = jnp.where(x >= 0, x, 0.2 * x)
    x = conv(x, p["c3_w"], p["c3_b"])
    return jnp.tanh(x)


if __name__ == "__main__":
    img_shape, latent_dim, channels, batch = 16, 32, 3, 2

    key = jax.random.PRNGKey(0)
    kz, kparam = jax.random.split(key)
    z = jax.random.normal(kz, (batch, latent_dim), jnp.float32)

    p_torch = init_params(kparam, img_shape, latent_dim, channels)
    kp = to_kernel_params(p_torch, img_shape, latent_dim)

    fwd = jax.jit(functools.partial(generator_forward,
                                    img_shape=img_shape, channels=channels))
    out = jax.block_until_ready(fwd(z, kp))

    assert out.shape == (batch, channels, img_shape, img_shape), out.shape
    assert jnp.all(jnp.isfinite(out)), "non-finite output"

    ref = reference_forward(z, p_torch, img_shape)
    max_err = float(jnp.max(jnp.abs(out - ref)))
    # bf16 MXU operands + bf16 inter-stage activations vs f32 HIGHEST reference.
    assert max_err < 4e-2, f"mismatch vs reference: {max_err}"

    print("KERNEL_OK")
</pallas_src>

<mosaic_0001>
module attributes {stable_mosaic.version = 11 : i64} {
  func.func @up_conv_stage_kernel(%arg0: i32, %arg1: memref<2x4x4x128xbf16, #tpu.memory_space<vmem>>, %arg2: memref<4x512x128xbf16, #tpu.memory_space<vmem>>, %arg3: memref<1x128xf32, #tpu.memory_space<vmem>>, %arg4: memref<1x128xf32, #tpu.memory_space<vmem>>, %arg5: memref<2x4x2x4x256xbf16, #tpu.memory_space<vmem>>, %arg6: memref<1x2x128xf32, #tpu.memory_space<vmem>>) attributes {dimension_semantics = [#tpu.dimension_semantics<parallel>], iteration_bounds = array<i64: 1>, scalar_prefetch = 0 : i64, scratch_operands = 0 : i64, tpu.core_type = #tpu.core_type<tc>, window_params = [{transform_indices = @transform_0, window_bounds = array<i64: 2, 4, 4, 128>}, {pipeline_mode = #tpu.pipeline_mode<synchronous>, transform_indices = @transform_1, window_bounds = array<i64: 4, 512, 128>}, {pipeline_mode = #tpu.pipeline_mode<synchronous>, transform_indices = @transform_2, window_bounds = array<i64: 1, 128>}, {pipeline_mode = #tpu.pipeline_mode<synchronous>, transform_indices = @transform_3, window_bounds = array<i64: 1, 128>}, {transform_indices = @transform_4, window_bounds = array<i64: 2, 4, 2, 4, 256>}, {transform_indices = @transform_5, window_bounds = array<i64: 1, 2, 128>}]} {
    %c0 = arith.constant 0 : index
    %c0_0 = arith.constant 0 : index
    %c0_1 = arith.constant 0 : index
    %c0_2 = arith.constant 0 : index
    %0 = vector.load %arg1[%c0, %c0_0, %c0_1, %c0_2] : memref<2x4x4x128xbf16, #tpu.memory_space<vmem>>, vector<2x4x4x128xbf16>
    %cst = arith.constant 0.000000e+00 : bf16
    %1 = vector.broadcast %cst : bf16 to vector<2x4x1x128xbf16>
    %2 = tpu.concatenate %1, %0, %1 in 2 : vector<2x4x1x128xbf16>, vector<2x4x4x128xbf16>, vector<2x4x1x128xbf16> -> vector<2x4x6x128xbf16>
    %cst_3 = arith.constant 0.000000e+00 : bf16
    %3 = vector.broadcast %cst_3 : bf16 to vector<2x1x6x128xbf16>
    %4 = tpu.concatenate %3, %2, %3 in 1 : vector<2x1x6x128xbf16>, vector<2x4x6x128xbf16>, vector<2x1x6x128xbf16> -> vector<2x6x6x128xbf16>
    %cst_4 = arith.constant 0.000000e+00 : f32
    %5 = vector.broadcast %cst_4 : f32 to vector<1x128xf32>
    %cst_5 = arith.constant 0.000000e+00 : f32
    %6 = vector.broadcast %cst_5 : f32 to vector<1x128xf32>
    %7 = vector.extract_strided_slice %4 {offsets = [0, 0, 0, 0], sizes = [2, 4, 4, 128], strides = [1, 1, 1, 1]} : vector<2x6x6x128xbf16> to vector<2x4x4x128xbf16>
    %8 = vector.extract_strided_slice %4 {offsets = [0, 0, 1, 0], sizes = [2, 4, 4, 128], strides = [1, 1, 1, 1]} : vector<2x6x6x128xbf16> to vector<2x4x4x128xbf16>
    %9 = vector.extract_strided_slice %4 {offsets = [0, 1, 0, 0], sizes = [2, 4, 4, 128], strides = [1, 1, 1, 1]} : vector<2x6x6x128xbf16> to vector<2x4x4x128xbf16>
    %10 = vector.extract_strided_slice %4 {offsets = [0, 1, 1, 0], sizes = [2, 4, 4, 128], strides = [1, 1, 1, 1]} : vector<2x6x6x128xbf16> to vector<2x4x4x128xbf16>
    %11 = tpu.concatenate %7, %8, %9, %10 in 3 : vector<2x4x4x128xbf16>, vector<2x4x4x128xbf16>, vector<2x4x4x128xbf16>, vector<2x4x4x128xbf16> -> vector<2x4x4x512xbf16>
    %12 = vector.shape_cast %11 : vector<2x4x4x512xbf16> to vector<32x512xbf16>
    %c0_6 = arith.constant 0 : index
    %c0_7 = arith.constant 0 : index
    %c0_8 = arith.constant 0 : index
    %13 = vector.load %arg2[%c0_6, %c0_7, %c0_8] : memref<4x512x128xbf16, #tpu.memory_space<vmem>>, vector<1x512x128xbf16>
    %14 = vector.shape_cast %13 : vector<1x512x128xbf16> to vector<512x128xbf16>
    %cst_9 = arith.constant dense<0.000000e+00> : vector<32x128xf32>
    %15 = tpu.matmul %12, %14, %cst_9 {dimension_numbers = #tpu.dot_dimension_numbers<[1], [0], [0], [1], [0, 0, 1, 1], [], []>} : vector<32x512xbf16>, vector<512x128xbf16>, vector<32x128xf32> -> vector<32x128xf32>
    %cst_10 = arith.constant dense<0.000000e+00> : vector<128xf32>
    %16 = vector.multi_reduction <add>, %15, %cst_10 [0] : vector<32x128xf32> to vector<128xf32>
    %17 = vector.shape_cast %16 : vector<128xf32> to vector<1x128xf32>
    %18 = arith.addf %5, %17 : vector<1x128xf32>
    %19 = arith.mulf %15, %15 : vector<32x128xf32>
    %cst_11 = arith.constant dense<0.000000e+00> : vector<128xf32>
    %20 = vector.multi_reduction <add>, %19, %cst_11 [0] : vector<32x128xf32> to vector<128xf32>
    %21 = vector.shape_cast %20 : vector<128xf32> to vector<1x128xf32>
    %22 = arith.addf %6, %21 : vector<1x128xf32>
    %23 = arith.truncf %15 : vector<32x128xf32> to vector<32x128xbf16>
    %24 = vector.shape_cast %23 : vector<32x128xbf16> to vector<2x4x4x128xbf16>
    %25 = vector.extract_strided_slice %4 {offsets = [0, 0, 1, 0], sizes = [2, 4, 4, 128], strides = [1, 1, 1, 1]} : vector<2x6x6x128xbf16> to vector<2x4x4x128xbf16>
    %26 = vector.extract_strided_slice %4 {offsets = [0, 0, 2, 0], sizes = [2, 4, 4, 128], strides = [1, 1, 1, 1]} : vector<2x6x6x128xbf16> to vector<2x4x4x128xbf16>
    %27 = vector.extract_strided_slice %4 {offsets = [0, 1, 1, 0], sizes = [2, 4, 4, 128], strides = [1, 1, 1, 1]} : vector<2x6x6x128xbf16> to vector<2x4x4x128xbf16>
    %28 = vector.extract_strided_slice %4 {offsets = [0, 1, 2, 0], sizes = [2, 4, 4, 128], strides = [1, 1, 1, 1]} : vector<2x6x6x128xbf16> to vector<2x4x4x128xbf16>
    %29 = tpu.concatenate %25, %26, %27, %28 in 3 : vector<2x4x4x128xbf16>, vector<2x4x4x128xbf16>, vector<2x4x4x128xbf16>, vector<2x4x4x128xbf16> -> vector<2x4x4x512xbf16>
    %30 = vector.shape_cast %29 : vector<2x4x4x512xbf16> to vector<32x512xbf16>
    %c1 = arith.constant 1 : index
    %c0_12 = arith.constant 0 : index
    %c0_13 = arith.constant 0 : index
    %31 = vector.load %arg2[%c1, %c0_12, %c0_13] : memref<4x512x128xbf16, #tpu.memory_space<vmem>>, vector<1x512x128xbf16>
    %32 = vector.shape_cast %31 : vector<1x512x128xbf16> to vector<512x128xbf16>
    %cst_14 = arith.constant dense<0.000000e+00> : vector<32x128xf32>
    %33 = tpu.matmul %30, %32, %cst_14 {dimension_numbers = #tpu.dot_dimension_numbers<[1], [0], [0], [1], [0, 0, 1, 1], [], []>} : vector<32x512xbf16>, vector<512x128xbf16>, vector<32x128xf32> -> vector<32x128xf32>
    %cst_15 = arith.constant dense<0.000000e+00> : vector<128xf32>
    %34 = vector.multi_reduction <add>, %33, %cst_15 [0] : vector<32x128xf32> to vector<128xf32>
    %35 = vector.shape_cast %34 : vector<128xf32> to vector<1x128xf32>
    %36 = arith.addf %18, %35 : vector<1x128xf32>
    %37 = arith.mulf %33, %33 : vector<32x128xf32>
    %cst_16 = arith.constant dense<0.000000e+00> : vector<128xf32>
    %38 = vector.multi_reduction <add>, %37, %cst_16 [0] : vector<32x128xf32> to vector<128xf32>
    %39 = vector.shape_cast %38 : vector<128xf32> to vector<1x128xf32>
    %40 = arith.addf %22, %39 : vector<1x128xf32>
    %41 = arith.truncf %33 : vector<32x128xf32> to vector<32x128xbf16>
    %42 = vector.shape_cast %41 : vector<32x128xbf16> to vector<2x4x4x128xbf16>
    %43 = tpu.concatenate %24, %42 in 3 : vector<2x4x4x128xbf16>, vector<2x4x4x128xbf16> -> vector<2x4x4x256xbf16>
    %44 = vector.extract_strided_slice %4 {offsets = [0, 1, 0, 0], sizes = [2, 4, 4, 128], strides = [1, 1, 1, 1]} : vector<2x6x6x128xbf16> to vector<2x4x4x128xbf16>
    %45 = vector.extract_strided_slice %4 {offsets = [0, 1, 1, 0], sizes = [2, 4, 4, 128], strides = [1, 1, 1, 1]} : vector<2x6x6x128xbf16> to vector<2x4x4x128xbf16>
    %46 = vector.extract_strided_slice %4 {offsets = [0, 2, 0, 0], sizes = [2, 4, 4, 128], strides = [1, 1, 1, 1]} : vector<2x6x6x128xbf16> to vector<2x4x4x128xbf16>
    %47 = vector.extract_strided_slice %4 {offsets = [0, 2, 1, 0], sizes = [2, 4, 4, 128], strides = [1, 1, 1, 1]} : vector<2x6x6x128xbf16> to vector<2x4x4x128xbf16>
    %48 = tpu.concatenate %44, %45, %46, %47 in 3 : vector<2x4x4x128xbf16>, vector<2x4x4x128xbf16>, vector<2x4x4x128xbf16>, vector<2x4x4x128xbf16> -> vector<2x4x4x512xbf16>
    %49 = vector.shape_cast %48 : vector<2x4x4x512xbf16> to vector<32x512xbf16>
    %c2 = arith.constant 2 : index
    %c0_17 = arith.constant 0 : index
    %c0_18 = arith.constant 0 : index
    %50 = vector.load %arg2[%c2, %c0_17, %c0_18] : memref<4x512x128xbf16, #tpu.memory_space<vmem>>, vector<1x512x128xbf16>
    %51 = vector.shape_cast %50 : vector<1x512x128xbf16> to vector<512x128xbf16>
    %cst_19 = arith.constant dense<0.000000e+00> : vector<32x128xf32>
    %52 = tpu.matmul %49, %51, %cst_19 {dimension_numbers = #tpu.dot_dimension_numbers<[1], [0], [0], [1], [0, 0, 1, 1], [], []>} : vector<32x512xbf16>, vector<512x128xbf16>, vector<32x128xf32> -> vector<32x128xf32>
    %cst_20 = arith.constant dense<0.000000e+00> : vector<128xf32>
    %53 = vector.multi_reduction <add>, %52, %cst_20 [0] : vector<32x128xf32> to vector<128xf32>
    %54 = vector.shape_cast %53 : vector<128xf32> to vector<1x128xf32>
    %55 = arith.addf %36, %54 : vector<1x128xf32>
    %56 = arith.mulf %52, %52 : vector<32x128xf32>
    %cst_21 = arith.constant dense<0.000000e+00> : vector<128xf32>
    %57 = vector.multi_reduction <add>, %56, %cst_21 [0] : vector<32x128xf32> to vector<128xf32>
    %58 = vector.shape_cast %57 : vector<128xf32> to vector<1x128xf32>
    %59 = arith.addf %40, %58 : vector<1x128xf32>
    %60 = arith.truncf %52 : vector<32x128xf32> to vector<32x128xbf16>
    %61 = vector.shape_cast %60 : vector<32x128xbf16> to vector<2x4x4x128xbf16>
    %62 = vector.extract_strided_slice %4 {offsets = [0, 1, 1, 0], sizes = [2, 4, 4, 128], strides = [1, 1, 1, 1]} : vector<2x6x6x128xbf16> to vector<2x4x4x128xbf16>
    %63 = vector.extract_strided_slice %4 {offsets = [0, 1, 2, 0], sizes = [2, 4, 4, 128], strides = [1, 1, 1, 1]} : vector<2x6x6x128xbf16> to vector<2x4x4x128xbf16>
    %64 = vector.extract_strided_slice %4 {offsets = [0, 2, 1, 0], sizes = [2, 4, 4, 128], strides = [1, 1, 1, 1]} : vector<2x6x6x128xbf16> to vector<2x4x4x128xbf16>
    %65 = vector.extract_strided_slice %4 {offsets = [0, 2, 2, 0], sizes = [2, 4, 4, 128], strides = [1, 1, 1, 1]} : vector<2x6x6x128xbf16> to vector<2x4x4x128xbf16>
    %66 = tpu.concatenate %62, %63, %64, %65 in 3 : vector<2x4x4x128xbf16>, vector<2x4x4x128xbf16>, vector<2x4x4x128xbf16>, vector<2x4x4x128xbf16> -> vector<2x4x4x512xbf16>
    %67 = vector.shape_cast %66 : vector<2x4x4x512xbf16> to vector<32x512xbf16>
    %c3 = arith.constant 3 : index
    %c0_22 = arith.constant 0 : index
    %c0_23 = arith.constant 0 : index
    %68 = vector.load %arg2[%c3, %c0_22, %c0_23] : memref<4x512x128xbf16, #tpu.memory_space<vmem>>, vector<1x512x128xbf16>
    %69 = vector.shape_cast %68 : vector<1x512x128xbf16> to vector<512x128xbf16>
    %cst_24 = arith.constant dense<0.000000e+00> : vector<32x128xf32>
    %70 = tpu.matmul %67, %69, %cst_24 {dimension_numbers = #tpu.dot_dimension_numbers<[1], [0], [0], [1], [0, 0, 1, 1], [], []>} : vector<32x512xbf16>, vector<512x128xbf16>, vector<32x128xf32> -> vector<32x128xf32>
    %cst_25 = arith.constant dense<0.000000e+00> : vector<128xf32>
    %71 = vector.multi_reduction <add>, %70, %cst_25 [0] : vector<32x128xf32> to vector<128xf32>
    %72 = vector.shape_cast %71 : vector<128xf32> to vector<1x128xf32>
    %73 = arith.addf %55, %72 : vector<1x128xf32>
    %74 = arith.mulf %70, %70 : vector<32x128xf32>
    %cst_26 = arith.constant dense<0.000000e+00> : vector<128xf32>
    %75 = vector.multi_reduction <add>, %74, %cst_26 [0] : vector<32x128xf32> to vector<128xf32>
    %76 = vector.shape_cast %75 : vector<128xf32> to vector<1x128xf32>
    %77 = arith.addf %59, %76 : vector<1x128xf32>
    %78 = arith.truncf %70 : vector<32x128xf32> to vector<32x128xbf16>
    %79 = vector.shape_cast %78 : vector<32x128xbf16> to vector<2x4x4x128xbf16>
    %80 = tpu.concatenate %61, %79 in 3 : vector<2x4x4x128xbf16>, vector<2x4x4x128xbf16> -> vector<2x4x4x256xbf16>
    %81 = vector.shape_cast %43 : vector<2x4x4x256xbf16> to vector<2x4x1x4x256xbf16>
    %82 = vector.shape_cast %80 : vector<2x4x4x256xbf16> to vector<2x4x1x4x256xbf16>
    %83 = tpu.concatenate %81, %82 in 2 : vector<2x4x1x4x256xbf16>, vector<2x4x1x4x256xbf16> -> vector<2x4x2x4x256xbf16>
    %c0_27 = arith.constant 0 : index
    %c0_28 = arith.constant 0 : index
    %c0_29 = arith.constant 0 : index
    %c0_30 = arith.constant 0 : index
    %c0_31 = arith.constant 0 : index
    %84 = vector.load %arg5[%c0_27, %c0_28, %c0_29, %c0_30, %c0_31] : memref<2x4x2x4x256xbf16, #tpu.memory_space<vmem>>, vector<2x4x2x4x256xbf16>
    tpu.vector_store %arg5[%c0_27, %c0_28, %c0_29, %c0_30, %c0_31], %83 {strides = array<i32>} : memref<2x4x2x4x256xbf16, #tpu.memory_space<vmem>>, vector<2x4x2x4x256xbf16>,
    %85 = tpu.concatenate %73, %77 in 0 : vector<1x128xf32>, vector<1x128xf32> -> vector<2x128xf32>
    %c0_32 = arith.constant 0 : index
    %c0_33 = arith.constant 0 : index
    %c0_34 = arith.constant 0 : index
    %86 = vector.load %arg6[%c0_32, %c0_33, %c0_34] : memref<1x2x128xf32, #tpu.memory_space<vmem>>, vector<1x2x128xf32>
    %87 = vector.shape_cast %86 : vector<1x2x128xf32> to vector<2x128xf32>
    %88 = vector.shape_cast %85 : vector<2x128xf32> to vector<1x2x128xf32>
    tpu.vector_store %arg6[%c0_32, %c0_33, %c0_34], %88 {strides = array<i32>} : memref<1x2x128xf32, #tpu.memory_space<vmem>>, vector<1x2x128xf32>,
    return
  }
  func.func @transform_0(%arg0: i32) -> (i32, i32, i32, i32) {
    %c0_i32 = arith.constant 0 : i32
    %c0_i32_0 = arith.constant 0 : i32
    %c0_i32_1 = arith.constant 0 : i32
    %c0_i32_2 = arith.constant 0 : i32
    return %arg0, %c0_i32, %c0_i32_0, %c0_i32_1 : i32, i32, i32, i32
  }
  func.func @transform_1(%arg0: i32) -> (i32, i32, i32) {
    %c0_i32 = arith.constant 0 : i32
    %c0_i32_0 = arith.constant 0 : i32
    %c0_i32_1 = arith.constant 0 : i32
    %c0_i32_2 = arith.constant 0 : i32
    return %c0_i32, %c0_i32_0, %c0_i32_1 : i32, i32, i32
  }
  func.func @transform_2(%arg0: i32) -> (i32, i32) {
    %c0_i32 = arith.constant 0 : i32
    %c0_i32_0 = arith.constant 0 : i32
    %c0_i32_1 = arith.constant 0 : i32
    return %c0_i32, %c0_i32_0 : i32, i32
  }
  func.func @transform_3(%arg0: i32) -> (i32, i32) {
    %c0_i32 = arith.constant 0 : i32
    %c0_i32_0 = arith.constant 0 : i32
    %c0_i32_1 = arith.constant 0 : i32
    return %c0_i32, %c0_i32_0 : i32, i32
  }
  func.func @transform_4(%arg0: i32) -> (i32, i32, i32, i32, i32) {
    %c0_i32 = arith.constant 0 : i32
    %c0_i32_0 = arith.constant 0 : i32
    %c0_i32_1 = arith.constant 0 : i32
    %c0_i32_2 = arith.constant 0 : i32
    %c0_i32_3 = arith.constant 0 : i32
    return %arg0, %c0_i32, %c0_i32_0, %c0_i32_1, %c0_i32_2 : i32, i32, i32, i32, i32
  }
  func.func @transform_5(%arg0: i32) -> (i32, i32, i32) {
    %c0_i32 = arith.constant 0 : i32
    %c0_i32_0 = arith.constant 0 : i32
    %c0_i32_1 = arith.constant 0 : i32
    return %arg0, %c0_i32, %c0_i32_0 : i32, i32, i32
  }
}

module attributes {stable_mosaic.version = 11 : i64} {
  func.func @linear_bn_kernel(%arg0: memref<2x32xf32, #tpu.memory_space<vmem>>, %arg1: memref<32x2048xbf16, #tpu.memory_space<vmem>>, %arg2: memref<1x2048xf32, #tpu.memory_space<vmem>>, %arg3: memref<1x128xf32, #tpu.memory_space<vmem>>, %arg4: memref<1x128xf32, #tpu.memory_space<vmem>>, %arg5: memref<2x2048xbf16, #tpu.memory_space<vmem>>) attributes {dimension_semantics = [], scalar_prefetch = 0 : i64, scratch_operands = 0 : i64, tpu.core_type = #tpu.core_type<tc>} {
    %c0 = arith.constant 0 : index
    %c0_0 = arith.constant 0 : index
    %0 = vector.load %arg0[%c0, %c0_0] : memref<2x32xf32, #tpu.memory_space<vmem>>, vector<2x32xf32>
    %1 = arith.truncf %0 : vector<2x32xf32> to vector<2x32xbf16>
    %c0_1 = arith.constant 0 : index
    %c0_2 = arith.constant 0 : index
    %2 = vector.load %arg1[%c0_1, %c0_2] : memref<32x2048xbf16, #tpu.memory_space<vmem>>, vector<32x2048xbf16>
    %cst = arith.constant dense<0.000000e+00> : vector<2x2048xf32>
    %3 = tpu.matmul %1, %2, %cst {dimension_numbers = #tpu.dot_dimension_numbers<[1], [0], [0], [1], [0, 0, 1, 1], [], []>} : vector<2x32xbf16>, vector<32x2048xbf16>, vector<2x2048xf32> -> vector<2x2048xf32>
    %c0_3 = arith.constant 0 : index
    %c0_4 = arith.constant 0 : index
    %4 = vector.load %arg2[%c0_3, %c0_4] : memref<1x2048xf32, #tpu.memory_space<vmem>>, vector<1x2048xf32>
    %5 = vector.broadcast %4 : vector<1x2048xf32> to vector<2x2048xf32>
    %6 = arith.addf %3, %5 : vector<2x2048xf32>
    %cst_5 = arith.constant 0.000000e+00 : f32
    %7 = vector.broadcast %cst_5 : f32 to vector<1x128xf32>
    %cst_6 = arith.constant 0.000000e+00 : f32
    %8 = vector.broadcast %cst_6 : f32 to vector<1x128xf32>
    %9 = vector.extract_strided_slice %6 {offsets = [0, 0], sizes = [2, 128], strides = [1, 1]} : vector<2x2048xf32> to vector<2x128xf32>
    %cst_7 = arith.constant dense<0.000000e+00> : vector<128xf32>
    %10 = vector.multi_reduction <add>, %9, %cst_7 [0] : vector<2x128xf32> to vector<128xf32>
    %11 = vector.shape_cast %10 : vector<128xf32> to vector<1x128xf32>
    %12 = arith.addf %7, %11 : vector<1x128xf32>
    %13 = arith.mulf %9, %9 : vector<2x128xf32>
    %cst_8 = arith.constant dense<0.000000e+00> : vector<128xf32>
    %14 = vector.multi_reduction <add>, %13, %cst_8 [0] : vector<2x128xf32> to vector<128xf32>
    %15 = vector.shape_cast %14 : vector<128xf32> to vector<1x128xf32>
    %16 = arith.addf %8, %15 : vector<1x128xf32>
    %17 = vector.extract_strided_slice %6 {offsets = [0, 128], sizes = [2, 128], strides = [1, 1]} : vector<2x2048xf32> to vector<2x128xf32>
    %cst_9 = arith.constant dense<0.000000e+00> : vector<128xf32>
    %18 = vector.multi_reduction <add>, %17, %cst_9 [0] : vector<2x128xf32> to vector<128xf32>
    %19 = vector.shape_cast %18 : vector<128xf32> to vector<1x128xf32>
    %20 = arith.addf %12, %19 : vector<1x128xf32>
    %21 = arith.mulf %17, %17 : vector<2x128xf32>
    %cst_10 = arith.constant dense<0.000000e+00> : vector<128xf32>
    %22 = vector.multi_reduction <add>, %21, %cst_10 [0] : vector<2x128xf32> to vector<128xf32>
    %23 = vector.shape_cast %22 : vector<128xf32> to vector<1x128xf32>
    %24 = arith.addf %16, %23 : vector<1x128xf32>
    %25 = vector.extract_strided_slice %6 {offsets = [0, 256], sizes = [2, 128], strides = [1, 1]} : vector<2x2048xf32> to vector<2x128xf32>
    %cst_11 = arith.constant dense<0.000000e+00> : vector<128xf32>
    %26 = vector.multi_reduction <add>, %25, %cst_11 [0] : vector<2x128xf32> to vector<128xf32>
    %27 = vector.shape_cast %26 : vector<128xf32> to vector<1x128xf32>
    %28 = arith.addf %20, %27 : vector<1x128xf32>
    %29 = arith.mulf %25, %25 : vector<2x128xf32>
    %cst_12 = arith.constant dense<0.000000e+00> : vector<128xf32>
    %30 = vector.multi_reduction <add>, %29, %cst_12 [0] : vector<2x128xf32> to vector<128xf32>
    %31 = vector.shape_cast %30 : vector<128xf32> to vector<1x128xf32>
    %32 = arith.addf %24, %31 : vector<1x128xf32>
    %33 = vector.extract_strided_slice %6 {offsets = [0, 384], sizes = [2, 128], strides = [1, 1]} : vector<2x2048xf32> to vector<2x128xf32>
    %cst_13 = arith.constant dense<0.000000e+00> : vector<128xf32>
    %34 = vector.multi_reduction <add>, %33, %cst_13 [0] : vector<2x128xf32> to vector<128xf32>
    %35 = vector.shape_cast %34 : vector<128xf32> to vector<1x128xf32>
    %36 = arith.addf %28, %35 : vector<1x128xf32>
    %37 = arith.mulf %33, %33 : vector<2x128xf32>
    %cst_14 = arith.constant dense<0.000000e+00> : vector<128xf32>
    %38 = vector.multi_reduction <add>, %37, %cst_14 [0] : vector<2x128xf32> to vector<128xf32>
    %39 = vector.shape_cast %38 : vector<128xf32> to vector<1x128xf32>
    %40 = arith.addf %32, %39 : vector<1x128xf32>
    %41 = vector.extract_strided_slice %6 {offsets = [0, 512], sizes = [2, 128], strides = [1, 1]} : vector<2x2048xf32> to vector<2x128xf32>
    %cst_15 = arith.constant dense<0.000000e+00> : vector<128xf32>
    %42 = vector.multi_reduction <add>, %41, %cst_15 [0] : vector<2x128xf32> to vector<128xf32>
    %43 = vector.shape_cast %42 : vector<128xf32> to vector<1x128xf32>
    %44 = arith.addf %36, %43 : vector<1x128xf32>
    %45 = arith.mulf %41, %41 : vector<2x128xf32>
    %cst_16 = arith.constant dense<0.000000e+00> : vector<128xf32>
    %46 = vector.multi_reduction <add>, %45, %cst_16 [0] : vector<2x128xf32> to vector<128xf32>
    %47 = vector.shape_cast %46 : vector<128xf32> to vector<1x128xf32>
    %48 = arith.addf %40, %47 : vector<1x128xf32>
    %49 = vector.extract_strided_slice %6 {offsets = [0, 640], sizes = [2, 128], strides = [1, 1]} : vector<2x2048xf32> to vector<2x128xf32>
    %cst_17 = arith.constant dense<0.000000e+00> : vector<128xf32>
    %50 = vector.multi_reduction <add>, %49, %cst_17 [0] : vector<2x128xf32> to vector<128xf32>
    %51 = vector.shape_cast %50 : vector<128xf32> to vector<1x128xf32>
    %52 = arith.addf %44, %51 : vector<1x128xf32>
    %53 = arith.mulf %49, %49 : vector<2x128xf32>
    %cst_18 = arith.constant dense<0.000000e+00> : vector<128xf32>
    %54 = vector.multi_reduction <add>, %53, %cst_18 [0] : vector<2x128xf32> to vector<128xf32>
    %55 = vector.shape_cast %54 : vector<128xf32> to vector<1x128xf32>
    %56 = arith.addf %48, %55 : vector<1x128xf32>
    %57 = vector.extract_strided_slice %6 {offsets = [0, 768], sizes = [2, 128], strides = [1, 1]} : vector<2x2048xf32> to vector<2x128xf32>
    %cst_19 = arith.constant dense<0.000000e+00> : vector<128xf32>
    %58 = vector.multi_reduction <add>, %57, %cst_19 [0] : vector<2x128xf32> to vector<128xf32>
    %59 = vector.shape_cast %58 : vector<128xf32> to vector<1x128xf32>
    %60 = arith.addf %52, %59 : vector<1x128xf32>
    %61 = arith.mulf %57, %57 : vector<2x128xf32>
    %cst_20 = arith.constant dense<0.000000e+00> : vector<128xf32>
    %62 = vector.multi_reduction <add>, %61, %cst_20 [0] : vector<2x128xf32> to vector<128xf32>
    %63 = vector.shape_cast %62 : vector<128xf32> to vector<1x128xf32>
    %64 = arith.addf %56, %63 : vector<1x128xf32>
    %65 = vector.extract_strided_slice %6 {offsets = [0, 896], sizes = [2, 128], strides = [1, 1]} : vector<2x2048xf32> to vector<2x128xf32>
    %cst_21 = arith.constant dense<0.000000e+00> : vector<128xf32>
    %66 = vector.multi_reduction <add>, %65, %cst_21 [0] : vector<2x128xf32> to vector<128xf32>
    %67 = vector.shape_cast %66 : vector<128xf32> to vector<1x128xf32>
    %68 = arith.addf %60, %67 : vector<1x128xf32>
    %69 = arith.mulf %65, %65 : vector<2x128xf32>
    %cst_22 = arith.constant dense<0.000000e+00> : vector<128xf32>
    %70 = vector.multi_reduction <add>, %69, %cst_22 [0] : vector<2x128xf32> to vector<128xf32>
    %71 = vector.shape_cast %70 : vector<128xf32> to vector<1x128xf32>
    %72 = arith.addf %64, %71 : vector<1x128xf32>
    %73 = vector.extract_strided_slice %6 {offsets = [0, 1024], sizes = [2, 128], strides = [1, 1]} : vector<2x2048xf32> to vector<2x128xf32>
    %cst_23 = arith.constant dense<0.000000e+00> : vector<128xf32>
    %74 = vector.multi_reduction <add>, %73, %cst_23 [0] : vector<2x128xf32> to vector<128xf32>
    %75 = vector.shape_cast %74 : vector<128xf32> to vector<1x128xf32>
    %76 = arith.addf %68, %75 : vector<1x128xf32>
    %77 = arith.mulf %73, %73 : vector<2x128xf32>
    %cst_24 = arith.constant dense<0.000000e+00> : vector<128xf32>
    %78 = vector.multi_reduction <add>, %77, %cst_24 [0] : vector<2x128xf32> to vector<128xf32>
    %79 = vector.shape_cast %78 : vector<128xf32> to vector<1x128xf32>
    %80 = arith.addf %72, %79 : vector<1x128xf32>
    %81 = vector.extract_strided_slice %6 {offsets = [0, 1152], sizes = [2, 128], strides = [1, 1]} : vector<2x2048xf32> to vector<2x128xf32>
    %cst_25 = arith.constant dense<0.000000e+00> : vector<128xf32>
    %82 = vector.multi_reduction <add>, %81, %cst_25 [0] : vector<2x128xf32> to vector<128xf32>
    %83 = vector.shape_cast %82 : vector<128xf32> to vector<1x128xf32>
    %84 = arith.addf %76, %83 : vector<1x128xf32>
    %85 = arith.mulf %81, %81 : vector<2x128xf32>
    %cst_26 = arith.constant dense<0.000000e+00> : vector<128xf32>
    %86 = vector.multi_reduction <add>, %85, %cst_26 [0] : vector<2x128xf32> to vector<128xf32>
    %87 = vector.shape_cast %86 : vector<128xf32> to vector<1x128xf32>
    %88 = arith.addf %80, %87 : vector<1x128xf32>
    %89 = vector.extract_strided_slice %6 {offsets = [0, 1280], sizes = [2, 128], strides = [1, 1]} : vector<2x2048xf32> to vector<2x128xf32>
    %cst_27 = arith.constant dense<0.000000e+00> : vector<128xf32>
    %90 = vector.multi_reduction <add>, %89, %cst_27 [0] : vector<2x128xf32> to vector<128xf32>
    %91 = vector.shape_cast %90 : vector<128xf32> to vector<1x128xf32>
    %92 = arith.addf %84, %91 : vector<1x128xf32>
    %93 = arith.mulf %89, %89 : vector<2x128xf32>
    %cst_28 = arith.constant dense<0.000000e+00> : vector<128xf32>
    %94 = vector.multi_reduction <add>, %93, %cst_28 [0] : vector<2x128xf32> to vector<128xf32>
    %95 = vector.shape_cast %94 : vector<128xf32> to vector<1x128xf32>
    %96 = arith.addf %88, %95 : vector<1x128xf32>
    %97 = vector.extract_strided_slice %6 {offsets = [0, 1408], sizes = [2, 128], strides = [1, 1]} : vector<2x2048xf32> to vector<2x128xf32>
    %cst_29 = arith.constant dense<0.000000e+00> : vector<128xf32>
    %98 = vector.multi_reduction <add>, %97, %cst_29 [0] : vector<2x128xf32> to vector<128xf32>
    %99 = vector.shape_cast %98 : vector<128xf32> to vector<1x128xf32>
    %100 = arith.addf %92, %99 : vector<1x128xf32>
    %101 = arith.mulf %97, %97 : vector<2x128xf32>
    %cst_30 = arith.constant dense<0.000000e+00> : vector<128xf32>
    %102 = vector.multi_reduction <add>, %101, %cst_30 [0] : vector<2x128xf32> to vector<128xf32>
    %103 = vector.shape_cast %102 : vector<128xf32> to vector<1x128xf32>
    %104 = arith.addf %96, %103 : vector<1x128xf32>
    %105 = vector.extract_strided_slice %6 {offsets = [0, 1536], sizes = [2, 128], strides = [1, 1]} : vector<2x2048xf32> to vector<2x128xf32>
    %cst_31 = arith.constant dense<0.000000e+00> : vector<128xf32>
    %106 = vector.multi_reduction <add>, %105, %cst_31 [0] : vector<2x128xf32> to vector<128xf32>
    %107 = vector.shape_cast %106 : vector<128xf32> to vector<1x128xf32>
    %108 = arith.addf %100, %107 : vector<1x128xf32>
    %109 = arith.mulf %105, %105 : vector<2x128xf32>
    %cst_32 = arith.constant dense<0.000000e+00> : vector<128xf32>
    %110 = vector.multi_reduction <add>, %109, %cst_32 [0] : vector<2x128xf32> to vector<128xf32>
    %111 = vector.shape_cast %110 : vector<128xf32> to vector<1x128xf32>
    %112 = arith.addf %104, %111 : vector<1x128xf32>
    %113 = vector.extract_strided_slice %6 {offsets = [0, 1664], sizes = [2, 128], strides = [1, 1]} : vector<2x2048xf32> to vector<2x128xf32>
    %cst_33 = arith.constant dense<0.000000e+00> : vector<128xf32>
    %114 = vector.multi_reduction <add>, %113, %cst_33 [0] : vector<2x128xf32> to vector<128xf32>
    %115 = vector.shape_cast %114 : vector<128xf32> to vector<1x128xf32>
    %116 = arith.addf %108, %115 : vector<1x128xf32>
    %117 = arith.mulf %113, %113 : vector<2x128xf32>
    %cst_34 = arith.constant dense<0.000000e+00> : vector<128xf32>
    %118 = vector.multi_reduction <add>, %117, %cst_34 [0] : vector<2x128xf32> to vector<128xf32>
    %119 = vector.shape_cast %118 : vector<128xf32> to vector<1x128xf32>
    %120 = arith.addf %112, %119 : vector<1x128xf32>
    %121 = vector.extract_strided_slice %6 {offsets = [0, 1792], sizes = [2, 128], strides = [1, 1]} : vector<2x2048xf32> to vector<2x128xf32>
    %cst_35 = arith.constant dense<0.000000e+00> : vector<128xf32>
    %122 = vector.multi_reduction <add>, %121, %cst_35 [0] : vector<2x128xf32> to vector<128xf32>
    %123 = vector.shape_cast %122 : vector<128xf32> to vector<1x128xf32>
    %124 = arith.addf %116, %123 : vector<1x128xf32>
    %125 = arith.mulf %121, %121 : vector<2x128xf32>
    %cst_36 = arith.constant dense<0.000000e+00> : vector<128xf32>
    %126 = vector.multi_reduction <add>, %125, %cst_36 [0] : vector<2x128xf32> to vector<128xf32>
    %127 = vector.shape_cast %126 : vector<128xf32> to vector<1x128xf32>
    %128 = arith.addf %120, %127 : vector<1x128xf32>
    %129 = vector.extract_strided_slice %6 {offsets = [0, 1920], sizes = [2, 128], strides = [1, 1]} : vector<2x2048xf32> to vector<2x128xf32>
    %cst_37 = arith.constant dense<0.000000e+00> : vector<128xf32>
    %130 = vector.multi_reduction <add>, %129, %cst_37 [0] : vector<2x128xf32> to vector<128xf32>
    %131 = vector.shape_cast %130 : vector<128xf32> to vector<1x128xf32>
    %132 = arith.addf %124, %131 : vector<1x128xf32>
    %133 = arith.mulf %129, %129 : vector<2x128xf32>
    %cst_38 = arith.constant dense<0.000000e+00> : vector<128xf32>
    %134 = vector.multi_reduction <add>, %133, %cst_38 [0] : vector<2x128xf32> to vector<128xf32>
    %135 = vector.shape_cast %134 : vector<128xf32> to vector<1x128xf32>
    %136 = arith.addf %128, %135 : vector<1x128xf32>
    %cst_39 = arith.constant 3.200000e+01 : f32
    %137 = vector.broadcast %cst_39 : f32 to vector<1x128xf32>
    %138 = arith.divf %132, %137 : vector<1x128xf32>
    %cst_40 = arith.constant 3.200000e+01 : f32
    %139 = vector.broadcast %cst_40 : f32 to vector<1x128xf32>
    %140 = arith.divf %136, %139 : vector<1x128xf32>
    %141 = arith.mulf %138, %138 : vector<1x128xf32>
    %142 = arith.subf %140, %141 : vector<1x128xf32>
    %cst_41 = arith.constant 0.000000e+00 : f32
    %143 = vector.broadcast %cst_41 : f32 to vector<1x128xf32>
    %144 = arith.maximumf %142, %143 : vector<1x128xf32>
    %c0_42 = arith.constant 0 : index
    %c0_43 = arith.constant 0 : index
    %145 = vector.load %arg3[%c0_42, %c0_43] : memref<1x128xf32, #tpu.memory_space<vmem>>, vector<1x128xf32>
    %cst_44 = arith.constant 9.99999974E-6 : f32
    %146 = vector.broadcast %cst_44 : f32 to vector<1x128xf32>
    %147 = arith.addf %144, %146 : vector<1x128xf32>
    %148 = math.rsqrt %147 : vector<1x128xf32>
    %149 = arith.mulf %145, %148 : vector<1x128xf32>
    %c0_45 = arith.constant 0 : index
    %c0_46 = arith.constant 0 : index
    %150 = vector.load %arg4[%c0_45, %c0_46] : memref<1x128xf32, #tpu.memory_space<vmem>>, vector<1x128xf32>
    %151 = arith.mulf %138, %149 : vector<1x128xf32>
    %152 = arith.subf %150, %151 : vector<1x128xf32>
    %153 = vector.extract_strided_slice %6 {offsets = [0, 0], sizes = [2, 128], strides = [1, 1]} : vector<2x2048xf32> to vector<2x128xf32>
    %154 = vector.broadcast %149 : vector<1x128xf32> to vector<2x128xf32>
    %155 = arith.mulf %153, %154 : vector<2x128xf32>
    %156 = vector.broadcast %152 : vector<1x128xf32> to vector<2x128xf32>
    %157 = arith.addf %155, %156 : vector<2x128xf32>
    %158 = vector.extract_strided_slice %6 {offsets = [0, 128], sizes = [2, 128], strides = [1, 1]} : vector<2x2048xf32> to vector<2x128xf32>
    %159 = vector.broadcast %149 : vector<1x128xf32> to vector<2x128xf32>
    %160 = arith.mulf %158, %159 : vector<2x128xf32>
    %161 = vector.broadcast %152 : vector<1x128xf32> to vector<2x128xf32>
    %162 = arith.addf %160, %161 : vector<2x128xf32>
    %163 = vector.extract_strided_slice %6 {offsets = [0, 256], sizes = [2, 128], strides = [1, 1]} : vector<2x2048xf32> to vector<2x128xf32>
    %164 = vector.broadcast %149 : vector<1x128xf32> to vector<2x128xf32>
    %165 = arith.mulf %163, %164 : vector<2x128xf32>
    %166 = vector.broadcast %152 : vector<1x128xf32> to vector<2x128xf32>
    %167 = arith.addf %165, %166 : vector<2x128xf32>
    %168 = vector.extract_strided_slice %6 {offsets = [0, 384], sizes = [2, 128], strides = [1, 1]} : vector<2x2048xf32> to vector<2x128xf32>
    %169 = vector.broadcast %149 : vector<1x128xf32> to vector<2x128xf32>
    %170 = arith.mulf %168, %169 : vector<2x128xf32>
    %171 = vector.broadcast %152 : vector<1x128xf32> to vector<2x128xf32>
    %172 = arith.addf %170, %171 : vector<2x128xf32>
    %173 = vector.extract_strided_slice %6 {offsets = [0, 512], sizes = [2, 128], strides = [1, 1]} : vector<2x2048xf32> to vector<2x128xf32>
    %174 = vector.broadcast %149 : vector<1x128xf32> to vector<2x128xf32>
    %175 = arith.mulf %173, %174 : vector<2x128xf32>
    %176 = vector.broadcast %152 : vector<1x128xf32> to vector<2x128xf32>
    %177 = arith.addf %175, %176 : vector<2x128xf32>
    %178 = vector.extract_strided_slice %6 {offsets = [0, 640], sizes = [2, 128], strides = [1, 1]} : vector<2x2048xf32> to vector<2x128xf32>
    %179 = vector.broadcast %149 : vector<1x128xf32> to vector<2x128xf32>
    %180 = arith.mulf %178, %179 : vector<2x128xf32>
    %181 = vector.broadcast %152 : vector<1x128xf32> to vector<2x128xf32>
    %182 = arith.addf %180, %181 : vector<2x128xf32>
    %183 = vector.extract_strided_slice %6 {offsets = [0, 768], sizes = [2, 128], strides = [1, 1]} : vector<2x2048xf32> to vector<2x128xf32>
    %184 = vector.broadcast %149 : vector<1x128xf32> to vector<2x128xf32>
    %185 = arith.mulf %183, %184 : vector<2x128xf32>
    %186 = vector.broadcast %152 : vector<1x128xf32> to vector<2x128xf32>
    %187 = arith.addf %185, %186 : vector<2x128xf32>
    %188 = vector.extract_strided_slice %6 {offsets = [0, 896], sizes = [2, 128], strides = [1, 1]} : vector<2x2048xf32> to vector<2x128xf32>
    %189 = vector.broadcast %149 : vector<1x128xf32> to vector<2x128xf32>
    %190 = arith.mulf %188, %189 : vector<2x128xf32>
    %191 = vector.broadcast %152 : vector<1x128xf32> to vector<2x128xf32>
    %192 = arith.addf %190, %191 : vector<2x128xf32>
    %193 = vector.extract_strided_slice %6 {offsets = [0, 1024], sizes = [2, 128], strides = [1, 1]} : vector<2x2048xf32> to vector<2x128xf32>
    %194 = vector.broadcast %149 : vector<1x128xf32> to vector<2x128xf32>
    %195 = arith.mulf %193, %194 : vector<2x128xf32>
    %196 = vector.broadcast %152 : vector<1x128xf32> to vector<2x128xf32>
    %197 = arith.addf %195, %196 : vector<2x128xf32>
    %198 = vector.extract_strided_slice %6 {offsets = [0, 1152], sizes = [2, 128], strides = [1, 1]} : vector<2x2048xf32> to vector<2x128xf32>
    %199 = vector.broadcast %149 : vector<1x128xf32> to vector<2x128xf32>
    %200 = arith.mulf %198, %199 : vector<2x128xf32>
    %201 = vector.broadcast %152 : vector<1x128xf32> to vector<2x128xf32>
    %202 = arith.addf %200, %201 : vector<2x128xf32>
    %203 = vector.extract_strided_slice %6 {offsets = [0, 1280], sizes = [2, 128], strides = [1, 1]} : vector<2x2048xf32> to vector<2x128xf32>
    %204 = vector.broadcast %149 : vector<1x128xf32> to vector<2x128xf32>
    %205 = arith.mulf %203, %204 : vector<2x128xf32>
    %206 = vector.broadcast %152 : vector<1x128xf32> to vector<2x128xf32>
    %207 = arith.addf %205, %206 : vector<2x128xf32>
    %208 = vector.extract_strided_slice %6 {offsets = [0, 1408], sizes = [2, 128], strides = [1, 1]} : vector<2x2048xf32> to vector<2x128xf32>
    %209 = vector.broadcast %149 : vector<1x128xf32> to vector<2x128xf32>
    %210 = arith.mulf %208, %209 : vector<2x128xf32>
    %211 = vector.broadcast %152 : vector<1x128xf32> to vector<2x128xf32>
    %212 = arith.addf %210, %211 : vector<2x128xf32>
    %213 = vector.extract_strided_slice %6 {offsets = [0, 1536], sizes = [2, 128], strides = [1, 1]} : vector<2x2048xf32> to vector<2x128xf32>
    %214 = vector.broadcast %149 : vector<1x128xf32> to vector<2x128xf32>
    %215 = arith.mulf %213, %214 : vector<2x128xf32>
    %216 = vector.broadcast %152 : vector<1x128xf32> to vector<2x128xf32>
    %217 = arith.addf %215, %216 : vector<2x128xf32>
    %218 = vector.extract_strided_slice %6 {offsets = [0, 1664], sizes = [2, 128], strides = [1, 1]} : vector<2x2048xf32> to vector<2x128xf32>
    %219 = vector.broadcast %149 : vector<1x128xf32> to vector<2x128xf32>
    %220 = arith.mulf %218, %219 : vector<2x128xf32>
    %221 = vector.broadcast %152 : vector<1x128xf32> to vector<2x128xf32>
    %222 = arith.addf %220, %221 : vector<2x128xf32>
    %223 = vector.extract_strided_slice %6 {offsets = [0, 1792], sizes = [2, 128], strides = [1, 1]} : vector<2x2048xf32> to vector<2x128xf32>
    %224 = vector.broadcast %149 : vector<1x128xf32> to vector<2x128xf32>
    %225 = arith.mulf %223, %224 : vector<2x128xf32>
    %226 = vector.broadcast %152 : vector<1x128xf32> to vector<2x128xf32>
    %227 = arith.addf %225, %226 : vector<2x128xf32>
    %228 = vector.extract_strided_slice %6 {offsets = [0, 1920], sizes = [2, 128], strides = [1, 1]} : vector<2x2048xf32> to vector<2x128xf32>
    %229 = vector.broadcast %149 : vector<1x128xf32> to vector<2x128xf32>
    %230 = arith.mulf %228, %229 : vector<2x128xf32>
    %231 = vector.broadcast %152 : vector<1x128xf32> to vector<2x128xf32>
    %232 = arith.addf %230, %231 : vector<2x128xf32>
    %233 = tpu.concatenate %157, %162, %167, %172, %177, %182, %187, %192, %197, %202, %207, %212, %217, %222, %227, %232 in 1 : vector<2x128xf32>, vector<2x128xf32>, vector<2x128xf32>, vector<2x128xf32>, vector<2x128xf32>, vector<2x128xf32>, vector<2x128xf32>, vector<2x128xf32>, vector<2x128xf32>, vector<2x128xf32>, vector<2x128xf32>, vector<2x128xf32>, vector<2x128xf32>, vector<2x128xf32>, vector<2x128xf32>, vector<2x128xf32> -> vector<2x2048xf32>
    %234 = arith.truncf %233 : vector<2x2048xf32> to vector<2x2048xbf16>
    %c0_47 = arith.constant 0 : index
    %c0_48 = arith.constant 0 : index
    %235 = vector.load %arg5[%c0_47, %c0_48] : memref<2x2048xbf16, #tpu.memory_space<vmem>>, vector<2x2048xbf16>
    tpu.vector_store %arg5[%c0_47, %c0_48], %234 {strides = array<i32>} : memref<2x2048xbf16, #tpu.memory_space<vmem>>, vector<2x2048xbf16>,
    return
  }
}

module attributes {stable_mosaic.version = 11 : i64} {
  func.func @up_conv_stage_kernel(%arg0: i32, %arg1: memref<2x8x8x128xbf16, #tpu.memory_space<vmem>>, %arg2: memref<4x512x128xbf16, #tpu.memory_space<vmem>>, %arg3: memref<1x128xf32, #tpu.memory_space<vmem>>, %arg4: memref<1x128xf32, #tpu.memory_space<vmem>>, %arg5: memref<2x8x2x8x256xbf16, #tpu.memory_space<vmem>>, %arg6: memref<1x2x128xf32, #tpu.memory_space<vmem>>) attributes {dimension_semantics = [#tpu.dimension_semantics<parallel>], iteration_bounds = array<i64: 1>, scalar_prefetch = 0 : i64, scratch_operands = 0 : i64, tpu.core_type = #tpu.core_type<tc>, window_params = [{transform_indices = @transform_0, window_bounds = array<i64: 2, 8, 8, 128>}, {pipeline_mode = #tpu.pipeline_mode<synchronous>, transform_indices = @transform_1, window_bounds = array<i64: 4, 512, 128>}, {pipeline_mode = #tpu.pipeline_mode<synchronous>, transform_indices = @transform_2, window_bounds = array<i64: 1, 128>}, {pipeline_mode = #tpu.pipeline_mode<synchronous>, transform_indices = @transform_3, window_bounds = array<i64: 1, 128>}, {transform_indices = @transform_4, window_bounds = array<i64: 2, 8, 2, 8, 256>}, {transform_indices = @transform_5, window_bounds = array<i64: 1, 2, 128>}]} {
    %c0 = arith.constant 0 : index
    %c0_0 = arith.constant 0 : index
    %c0_1 = arith.constant 0 : index
    %c0_2 = arith.constant 0 : index
    %0 = vector.load %arg1[%c0, %c0_0, %c0_1, %c0_2] : memref<2x8x8x128xbf16, #tpu.memory_space<vmem>>, vector<2x8x8x128xbf16>
    %1 = arith.extf %0 : vector<2x8x8x128xbf16> to vector<2x8x8x128xf32>
    %c0_3 = arith.constant 0 : index
    %c0_4 = arith.constant 0 : index
    %2 = vector.load %arg3[%c0_3, %c0_4] : memref<1x128xf32, #tpu.memory_space<vmem>>, vector<1x128xf32>
    %3 = vector.shape_cast %2 : vector<1x128xf32> to vector<1x1x1x128xf32>
    %4 = vector.broadcast %3 : vector<1x1x1x128xf32> to vector<2x8x8x128xf32>
    %5 = arith.mulf %1, %4 : vector<2x8x8x128xf32>
    %c0_5 = arith.constant 0 : index
    %c0_6 = arith.constant 0 : index
    %6 = vector.load %arg4[%c0_5, %c0_6] : memref<1x128xf32, #tpu.memory_space<vmem>>, vector<1x128xf32>
    %7 = vector.shape_cast %6 : vector<1x128xf32> to vector<1x1x1x128xf32>
    %8 = vector.broadcast %7 : vector<1x1x1x128xf32> to vector<2x8x8x128xf32>
    %9 = arith.addf %5, %8 : vector<2x8x8x128xf32>
    %cst = arith.constant 0.000000e+00 : f32
    %10 = vector.broadcast %cst : f32 to vector<2x8x8x128xf32>
    %11 = arith.cmpf oge, %9, %10 : vector<2x8x8x128xf32>
    %cst_7 = arith.constant 2.000000e-01 : f32
    %12 = vector.broadcast %cst_7 : f32 to vector<2x8x8x128xf32>
    %13 = arith.mulf %12, %9 : vector<2x8x8x128xf32>
    %14 = arith.select %11, %9, %13 : vector<2x8x8x128xi1>, vector<2x8x8x128xf32>
    %15 = arith.truncf %14 : vector<2x8x8x128xf32> to vector<2x8x8x128xbf16>
    %cst_8 = arith.constant 0.000000e+00 : bf16
    %16 = vector.broadcast %cst_8 : bf16 to vector<2x8x1x128xbf16>
    %17 = tpu.concatenate %16, %15, %16 in 2 : vector<2x8x1x128xbf16>, vector<2x8x8x128xbf16>, vector<2x8x1x128xbf16> -> vector<2x8x10x128xbf16>
    %cst_9 = arith.constant 0.000000e+00 : bf16
    %18 = vector.broadcast %cst_9 : bf16 to vector<2x1x10x128xbf16>
    %19 = tpu.concatenate %18, %17, %18 in 1 : vector<2x1x10x128xbf16>, vector<2x8x10x128xbf16>, vector<2x1x10x128xbf16> -> vector<2x10x10x128xbf16>
    %cst_10 = arith.constant 0.000000e+00 : f32
    %20 = vector.broadcast %cst_10 : f32 to vector<1x128xf32>
    %cst_11 = arith.constant 0.000000e+00 : f32
    %21 = vector.broadcast %cst_11 : f32 to vector<1x128xf32>
    %22 = vector.extract_strided_slice %19 {offsets = [0, 0, 0, 0], sizes = [2, 8, 8, 128], strides = [1, 1, 1, 1]} : vector<2x10x10x128xbf16> to vector<2x8x8x128xbf16>
    %23 = vector.extract_strided_slice %19 {offsets = [0, 0, 1, 0], sizes = [2, 8, 8, 128], strides = [1, 1, 1, 1]} : vector<2x10x10x128xbf16> to vector<2x8x8x128xbf16>
    %24 = vector.extract_strided_slice %19 {offsets = [0, 1, 0, 0], sizes = [2, 8, 8, 128], strides = [1, 1, 1, 1]} : vector<2x10x10x128xbf16> to vector<2x8x8x128xbf16>
    %25 = vector.extract_strided_slice %19 {offsets = [0, 1, 1, 0], sizes = [2, 8, 8, 128], strides = [1, 1, 1, 1]} : vector<2x10x10x128xbf16> to vector<2x8x8x128xbf16>
    %26 = tpu.concatenate %22, %23, %24, %25 in 3 : vector<2x8x8x128xbf16>, vector<2x8x8x128xbf16>, vector<2x8x8x128xbf16>, vector<2x8x8x128xbf16> -> vector<2x8x8x512xbf16>
    %27 = vector.shape_cast %26 : vector<2x8x8x512xbf16> to vector<128x512xbf16>
    %c0_12 = arith.constant 0 : index
    %c0_13 = arith.constant 0 : index
    %c0_14 = arith.constant 0 : index
    %28 = vector.load %arg2[%c0_12, %c0_13, %c0_14] : memref<4x512x128xbf16, #tpu.memory_space<vmem>>, vector<1x512x128xbf16>
    %29 = vector.shape_cast %28 : vector<1x512x128xbf16> to vector<512x128xbf16>
    %cst_15 = arith.constant dense<0.000000e+00> : vector<128x128xf32>
    %30 = tpu.matmul %27, %29, %cst_15 {dimension_numbers = #tpu.dot_dimension_numbers<[1], [0], [0], [1], [0, 0, 1, 1], [], []>} : vector<128x512xbf16>, vector<512x128xbf16>, vector<128x128xf32> -> vector<128x128xf32>
    %cst_16 = arith.constant dense<0.000000e+00> : vector<128xf32>
    %31 = vector.multi_reduction <add>, %30, %cst_16 [0] : vector<128x128xf32> to vector<128xf32>
    %32 = vector.shape_cast %31 : vector<128xf32> to vector<1x128xf32>
    %33 = arith.addf %20, %32 : vector<1x128xf32>
    %34 = arith.mulf %30, %30 : vector<128x128xf32>
    %cst_17 = arith.constant dense<0.000000e+00> : vector<128xf32>
    %35 = vector.multi_reduction <add>, %34, %cst_17 [0] : vector<128x128xf32> to vector<128xf32>
    %36 = vector.shape_cast %35 : vector<128xf32> to vector<1x128xf32>
    %37 = arith.addf %21, %36 : vector<1x128xf32>
    %38 = arith.truncf %30 : vector<128x128xf32> to vector<128x128xbf16>
    %39 = vector.shape_cast %38 : vector<128x128xbf16> to vector<2x8x8x128xbf16>
    %40 = vector.extract_strided_slice %19 {offsets = [0, 0, 1, 0], sizes = [2, 8, 8, 128], strides = [1, 1, 1, 1]} : vector<2x10x10x128xbf16> to vector<2x8x8x128xbf16>
    %41 = vector.extract_strided_slice %19 {offsets = [0, 0, 2, 0], sizes = [2, 8, 8, 128], strides = [1, 1, 1, 1]} : vector<2x10x10x128xbf16> to vector<2x8x8x128xbf16>
    %42 = vector.extract_strided_slice %19 {offsets = [0, 1, 1, 0], sizes = [2, 8, 8, 128], strides = [1, 1, 1, 1]} : vector<2x10x10x128xbf16> to vector<2x8x8x128xbf16>
    %43 = vector.extract_strided_slice %19 {offsets = [0, 1, 2, 0], sizes = [2, 8, 8, 128], strides = [1, 1, 1, 1]} : vector<2x10x10x128xbf16> to vector<2x8x8x128xbf16>
    %44 = tpu.concatenate %40, %41, %42, %43 in 3 : vector<2x8x8x128xbf16>, vector<2x8x8x128xbf16>, vector<2x8x8x128xbf16>, vector<2x8x8x128xbf16> -> vector<2x8x8x512xbf16>
    %45 = vector.shape_cast %44 : vector<2x8x8x512xbf16> to vector<128x512xbf16>
    %c1 = arith.constant 1 : index
    %c0_18 = arith.constant 0 : index
    %c0_19 = arith.constant 0 : index
    %46 = vector.load %arg2[%c1, %c0_18, %c0_19] : memref<4x512x128xbf16, #tpu.memory_space<vmem>>, vector<1x512x128xbf16>
    %47 = vector.shape_cast %46 : vector<1x512x128xbf16> to vector<512x128xbf16>
    %cst_20 = arith.constant dense<0.000000e+00> : vector<128x128xf32>
    %48 = tpu.matmul %45, %47, %cst_20 {dimension_numbers = #tpu.dot_dimension_numbers<[1], [0], [0], [1], [0, 0, 1, 1], [], []>} : vector<128x512xbf16>, vector<512x128xbf16>, vector<128x128xf32> -> vector<128x128xf32>
    %cst_21 = arith.constant dense<0.000000e+00> : vector<128xf32>
    %49 = vector.multi_reduction <add>, %48, %cst_21 [0] : vector<128x128xf32> to vector<128xf32>
    %50 = vector.shape_cast %49 : vector<128xf32> to vector<1x128xf32>
    %51 = arith.addf %33, %50 : vector<1x128xf32>
    %52 = arith.mulf %48, %48 : vector<128x128xf32>
    %cst_22 = arith.constant dense<0.000000e+00> : vector<128xf32>
    %53 = vector.multi_reduction <add>, %52, %cst_22 [0] : vector<128x128xf32> to vector<128xf32>
    %54 = vector.shape_cast %53 : vector<128xf32> to vector<1x128xf32>
    %55 = arith.addf %37, %54 : vector<1x128xf32>
    %56 = arith.truncf %48 : vector<128x128xf32> to vector<128x128xbf16>
    %57 = vector.shape_cast %56 : vector<128x128xbf16> to vector<2x8x8x128xbf16>
    %58 = tpu.concatenate %39, %57 in 3 : vector<2x8x8x128xbf16>, vector<2x8x8x128xbf16> -> vector<2x8x8x256xbf16>
    %59 = vector.extract_strided_slice %19 {offsets = [0, 1, 0, 0], sizes = [2, 8, 8, 128], strides = [1, 1, 1, 1]} : vector<2x10x10x128xbf16> to vector<2x8x8x128xbf16>
    %60 = vector.extract_strided_slice %19 {offsets = [0, 1, 1, 0], sizes = [2, 8, 8, 128], strides = [1, 1, 1, 1]} : vector<2x10x10x128xbf16> to vector<2x8x8x128xbf16>
    %61 = vector.extract_strided_slice %19 {offsets = [0, 2, 0, 0], sizes = [2, 8, 8, 128], strides = [1, 1, 1, 1]} : vector<2x10x10x128xbf16> to vector<2x8x8x128xbf16>
    %62 = vector.extract_strided_slice %19 {offsets = [0, 2, 1, 0], sizes = [2, 8, 8, 128], strides = [1, 1, 1, 1]} : vector<2x10x10x128xbf16> to vector<2x8x8x128xbf16>
    %63 = tpu.concatenate %59, %60, %61, %62 in 3 : vector<2x8x8x128xbf16>, vector<2x8x8x128xbf16>, vector<2x8x8x128xbf16>, vector<2x8x8x128xbf16> -> vector<2x8x8x512xbf16>
    %64 = vector.shape_cast %63 : vector<2x8x8x512xbf16> to vector<128x512xbf16>
    %c2 = arith.constant 2 : index
    %c0_23 = arith.constant 0 : index
    %c0_24 = arith.constant 0 : index
    %65 = vector.load %arg2[%c2, %c0_23, %c0_24] : memref<4x512x128xbf16, #tpu.memory_space<vmem>>, vector<1x512x128xbf16>
    %66 = vector.shape_cast %65 : vector<1x512x128xbf16> to vector<512x128xbf16>
    %cst_25 = arith.constant dense<0.000000e+00> : vector<128x128xf32>
    %67 = tpu.matmul %64, %66, %cst_25 {dimension_numbers = #tpu.dot_dimension_numbers<[1], [0], [0], [1], [0, 0, 1, 1], [], []>} : vector<128x512xbf16>, vector<512x128xbf16>, vector<128x128xf32> -> vector<128x128xf32>
    %cst_26 = arith.constant dense<0.000000e+00> : vector<128xf32>
    %68 = vector.multi_reduction <add>, %67, %cst_26 [0] : vector<128x128xf32> to vector<128xf32>
    %69 = vector.shape_cast %68 : vector<128xf32> to vector<1x128xf32>
    %70 = arith.addf %51, %69 : vector<1x128xf32>
    %71 = arith.mulf %67, %67 : vector<128x128xf32>
    %cst_27 = arith.constant dense<0.000000e+00> : vector<128xf32>
    %72 = vector.multi_reduction <add>, %71, %cst_27 [0] : vector<128x128xf32> to vector<128xf32>
    %73 = vector.shape_cast %72 : vector<128xf32> to vector<1x128xf32>
    %74 = arith.addf %55, %73 : vector<1x128xf32>
    %75 = arith.truncf %67 : vector<128x128xf32> to vector<128x128xbf16>
    %76 = vector.shape_cast %75 : vector<128x128xbf16> to vector<2x8x8x128xbf16>
    %77 = vector.extract_strided_slice %19 {offsets = [0, 1, 1, 0], sizes = [2, 8, 8, 128], strides = [1, 1, 1, 1]} : vector<2x10x10x128xbf16> to vector<2x8x8x128xbf16>
    %78 = vector.extract_strided_slice %19 {offsets = [0, 1, 2, 0], sizes = [2, 8, 8, 128], strides = [1, 1, 1, 1]} : vector<2x10x10x128xbf16> to vector<2x8x8x128xbf16>
    %79 = vector.extract_strided_slice %19 {offsets = [0, 2, 1, 0], sizes = [2, 8, 8, 128], strides = [1, 1, 1, 1]} : vector<2x10x10x128xbf16> to vector<2x8x8x128xbf16>
    %80 = vector.extract_strided_slice %19 {offsets = [0, 2, 2, 0], sizes = [2, 8, 8, 128], strides = [1, 1, 1, 1]} : vector<2x10x10x128xbf16> to vector<2x8x8x128xbf16>
    %81 = tpu.concatenate %77, %78, %79, %80 in 3 : vector<2x8x8x128xbf16>, vector<2x8x8x128xbf16>, vector<2x8x8x128xbf16>, vector<2x8x8x128xbf16> -> vector<2x8x8x512xbf16>
    %82 = vector.shape_cast %81 : vector<2x8x8x512xbf16> to vector<128x512xbf16>
    %c3 = arith.constant 3 : index
    %c0_28 = arith.constant 0 : index
    %c0_29 = arith.constant 0 : index
    %83 = vector.load %arg2[%c3, %c0_28, %c0_29] : memref<4x512x128xbf16, #tpu.memory_space<vmem>>, vector<1x512x128xbf16>
    %84 = vector.shape_cast %83 : vector<1x512x128xbf16> to vector<512x128xbf16>
    %cst_30 = arith.constant dense<0.000000e+00> : vector<128x128xf32>
    %85 = tpu.matmul %82, %84, %cst_30 {dimension_numbers = #tpu.dot_dimension_numbers<[1], [0], [0], [1], [0, 0, 1, 1], [], []>} : vector<128x512xbf16>, vector<512x128xbf16>, vector<128x128xf32> -> vector<128x128xf32>
    %cst_31 = arith.constant dense<0.000000e+00> : vector<128xf32>
    %86 = vector.multi_reduction <add>, %85, %cst_31 [0] : vector<128x128xf32> to vector<128xf32>
    %87 = vector.shape_cast %86 : vector<128xf32> to vector<1x128xf32>
    %88 = arith.addf %70, %87 : vector<1x128xf32>
    %89 = arith.mulf %85, %85 : vector<128x128xf32>
    %cst_32 = arith.constant dense<0.000000e+00> : vector<128xf32>
    %90 = vector.multi_reduction <add>, %89, %cst_32 [0] : vector<128x128xf32> to vector<128xf32>
    %91 = vector.shape_cast %90 : vector<128xf32> to vector<1x128xf32>
    %92 = arith.addf %74, %91 : vector<1x128xf32>
    %93 = arith.truncf %85 : vector<128x128xf32> to vector<128x128xbf16>
    %94 = vector.shape_cast %93 : vector<128x128xbf16> to vector<2x8x8x128xbf16>
    %95 = tpu.concatenate %76, %94 in 3 : vector<2x8x8x128xbf16>, vector<2x8x8x128xbf16> -> vector<2x8x8x256xbf16>
    %96 = vector.shape_cast %58 : vector<2x8x8x256xbf16> to vector<2x8x1x8x256xbf16>
    %97 = vector.shape_cast %95 : vector<2x8x8x256xbf16> to vector<2x8x1x8x256xbf16>
    %98 = tpu.concatenate %96, %97 in 2 : vector<2x8x1x8x256xbf16>, vector<2x8x1x8x256xbf16> -> vector<2x8x2x8x256xbf16>
    %c0_33 = arith.constant 0 : index
    %c0_34 = arith.constant 0 : index
    %c0_35 = arith.constant 0 : index
    %c0_36 = arith.constant 0 : index
    %c0_37 = arith.constant 0 : index
    %99 = vector.load %arg5[%c0_33, %c0_34, %c0_35, %c0_36, %c0_37] : memref<2x8x2x8x256xbf16, #tpu.memory_space<vmem>>, vector<2x8x2x8x256xbf16>
    tpu.vector_store %arg5[%c0_33, %c0_34, %c0_35, %c0_36, %c0_37], %98 {strides = array<i32>} : memref<2x8x2x8x256xbf16, #tpu.memory_space<vmem>>, vector<2x8x2x8x256xbf16>,
    %100 = tpu.concatenate %88, %92 in 0 : vector<1x128xf32>, vector<1x128xf32> -> vector<2x128xf32>
    %c0_38 = arith.constant 0 : index
    %c0_39 = arith.constant 0 : index
    %c0_40 = arith.constant 0 : index
    %101 = vector.load %arg6[%c0_38, %c0_39, %c0_40] : memref<1x2x128xf32, #tpu.memory_space<vmem>>, vector<1x2x128xf32>
    %102 = vector.shape_cast %101 : vector<1x2x128xf32> to vector<2x128xf32>
    %103 = vector.shape_cast %100 : vector<2x128xf32> to vector<1x2x128xf32>
    tpu.vector_store %arg6[%c0_38, %c0_39, %c0_40], %103 {strides = array<i32>} : memref<1x2x128xf32, #tpu.memory_space<vmem>>, vector<1x2x128xf32>,
    return
  }
  func.func @transform_0(%arg0: i32) -> (i32, i32, i32, i32) {
    %c0_i32 = arith.constant 0 : i32
    %c0_i32_0 = arith.constant 0 : i32
    %c0_i32_1 = arith.constant 0 : i32
    %c0_i32_2 = arith.constant 0 : i32
    return %arg0, %c0_i32, %c0_i32_0, %c0_i32_1 : i32, i32, i32, i32
  }
  func.func @transform_1(%arg0: i32) -> (i32, i32, i32) {
    %c0_i32 = arith.constant 0 : i32
    %c0_i32_0 = arith.constant 0 : i32
    %c0_i32_1 = arith.constant 0 : i32
    %c0_i32_2 = arith.constant 0 : i32
    return %c0_i32, %c0_i32_0, %c0_i32_1 : i32, i32, i32
  }
  func.func @transform_2(%arg0: i32) -> (i32, i32) {
    %c0_i32 = arith.constant 0 : i32
    %c0_i32_0 = arith.constant 0 : i32
    %c0_i32_1 = arith.constant 0 : i32
    return %c0_i32, %c0_i32_0 : i32, i32
  }
  func.func @transform_3(%arg0: i32) -> (i32, i32) {
    %c0_i32 = arith.constant 0 : i32
    %c0_i32_0 = arith.constant 0 : i32
    %c0_i32_1 = arith.constant 0 : i32
    return %c0_i32, %c0_i32_0 : i32, i32
  }
  func.func @transform_4(%arg0: i32) -> (i32, i32, i32, i32, i32) {
    %c0_i32 = arith.constant 0 : i32
    %c0_i32_0 = arith.constant 0 : i32
    %c0_i32_1 = arith.constant 0 : i32
    %c0_i32_2 = arith.constant 0 : i32
    %c0_i32_3 = arith.constant 0 : i32
    return %arg0, %c0_i32, %c0_i32_0, %c0_i32_1, %c0_i32_2 : i32, i32, i32, i32, i32
  }
  func.func @transform_5(%arg0: i32) -> (i32, i32, i32) {
    %c0_i32 = arith.constant 0 : i32
    %c0_i32_0 = arith.constant 0 : i32
    %c0_i32_1 = arith.constant 0 : i32
    return %arg0, %c0_i32, %c0_i32_0 : i32, i32, i32
  }
}

module attributes {stable_mosaic.version = 11 : i64} {
  func.func @final_conv_kernel(%arg0: i32, %arg1: memref<1x16x16x128xbf16, #tpu.memory_space<vmem>>, %arg2: memref<1152x128xbf16, #tpu.memory_space<vmem>>, %arg3: memref<1x128xf32, #tpu.memory_space<vmem>>, %arg4: memref<1x128xf32, #tpu.memory_space<vmem>>, %arg5: memref<1x128xf32, #tpu.memory_space<vmem>>, %arg6: memref<1x16x16x3xf32, #tpu.memory_space<vmem>>) attributes {dimension_semantics = [#tpu.dimension_semantics<parallel>], iteration_bounds = array<i64: 2>, scalar_prefetch = 0 : i64, scratch_operands = 0 : i64, tpu.core_type = #tpu.core_type<tc>, window_params = [{transform_indices = @transform_0, window_bounds = array<i64: 1, 16, 16, 128>}, {pipeline_mode = #tpu.pipeline_mode<synchronous>, transform_indices = @transform_1, window_bounds = array<i64: 1152, 128>}, {pipeline_mode = #tpu.pipeline_mode<synchronous>, transform_indices = @transform_2, window_bounds = array<i64: 1, 128>}, {pipeline_mode = #tpu.pipeline_mode<synchronous>, transform_indices = @transform_3, window_bounds = array<i64: 1, 128>}, {pipeline_mode = #tpu.pipeline_mode<synchronous>, transform_indices = @transform_4, window_bounds = array<i64: 1, 128>}, {transform_indices = @transform_5, window_bounds = array<i64: 1, 16, 16, 3>}]} {
    %c0 = arith.constant 0 : index
    %c0_0 = arith.constant 0 : index
    %c0_1 = arith.constant 0 : index
    %c0_2 = arith.constant 0 : index
    %0 = vector.load %arg1[%c0, %c0_0, %c0_1, %c0_2] : memref<1x16x16x128xbf16, #tpu.memory_space<vmem>>, vector<1x16x16x128xbf16>
    %1 = arith.extf %0 : vector<1x16x16x128xbf16> to vector<1x16x16x128xf32>
    %c0_3 = arith.constant 0 : index
    %c0_4 = arith.constant 0 : index
    %2 = vector.load %arg3[%c0_3, %c0_4] : memref<1x128xf32, #tpu.memory_space<vmem>>, vector<1x128xf32>
    %3 = vector.shape_cast %2 : vector<1x128xf32> to vector<1x1x1x128xf32>
    %4 = vector.broadcast %3 : vector<1x1x1x128xf32> to vector<1x16x16x128xf32>
    %5 = arith.mulf %1, %4 : vector<1x16x16x128xf32>
    %c0_5 = arith.constant 0 : index
    %c0_6 = arith.constant 0 : index
    %6 = vector.load %arg4[%c0_5, %c0_6] : memref<1x128xf32, #tpu.memory_space<vmem>>, vector<1x128xf32>
    %7 = vector.shape_cast %6 : vector<1x128xf32> to vector<1x1x1x128xf32>
    %8 = vector.broadcast %7 : vector<1x1x1x128xf32> to vector<1x16x16x128xf32>
    %9 = arith.addf %5, %8 : vector<1x16x16x128xf32>
    %cst = arith.constant 0.000000e+00 : f32
    %10 = vector.broadcast %cst : f32 to vector<1x16x16x128xf32>
    %11 = arith.cmpf oge, %9, %10 : vector<1x16x16x128xf32>
    %cst_7 = arith.constant 2.000000e-01 : f32
    %12 = vector.broadcast %cst_7 : f32 to vector<1x16x16x128xf32>
    %13 = arith.mulf %12, %9 : vector<1x16x16x128xf32>
    %14 = arith.select %11, %9, %13 : vector<1x16x16x128xi1>, vector<1x16x16x128xf32>
    %15 = arith.truncf %14 : vector<1x16x16x128xf32> to vector<1x16x16x128xbf16>
    %cst_8 = arith.constant 0.000000e+00 : bf16
    %16 = vector.broadcast %cst_8 : bf16 to vector<1x16x1x128xbf16>
    %17 = tpu.concatenate %16, %15, %16 in 2 : vector<1x16x1x128xbf16>, vector<1x16x16x128xbf16>, vector<1x16x1x128xbf16> -> vector<1x16x18x128xbf16>
    %cst_9 = arith.constant 0.000000e+00 : bf16
    %18 = vector.broadcast %cst_9 : bf16 to vector<1x1x18x128xbf16>
    %19 = tpu.concatenate %18, %17, %18 in 1 : vector<1x1x18x128xbf16>, vector<1x16x18x128xbf16>, vector<1x1x18x128xbf16> -> vector<1x18x18x128xbf16>
    %20 = vector.extract_strided_slice %19 {offsets = [0, 0, 0, 0], sizes = [1, 16, 16, 128], strides = [1, 1, 1, 1]} : vector<1x18x18x128xbf16> to vector<1x16x16x128xbf16>
    %21 = vector.extract_strided_slice %19 {offsets = [0, 0, 1, 0], sizes = [1, 16, 16, 128], strides = [1, 1, 1, 1]} : vector<1x18x18x128xbf16> to vector<1x16x16x128xbf16>
    %22 = vector.extract_strided_slice %19 {offsets = [0, 0, 2, 0], sizes = [1, 16, 16, 128], strides = [1, 1, 1, 1]} : vector<1x18x18x128xbf16> to vector<1x16x16x128xbf16>
    %23 = vector.extract_strided_slice %19 {offsets = [0, 1, 0, 0], sizes = [1, 16, 16, 128], strides = [1, 1, 1, 1]} : vector<1x18x18x128xbf16> to vector<1x16x16x128xbf16>
    %24 = vector.extract_strided_slice %19 {offsets = [0, 1, 1, 0], sizes = [1, 16, 16, 128], strides = [1, 1, 1, 1]} : vector<1x18x18x128xbf16> to vector<1x16x16x128xbf16>
    %25 = vector.extract_strided_slice %19 {offsets = [0, 1, 2, 0], sizes = [1, 16, 16, 128], strides = [1, 1, 1, 1]} : vector<1x18x18x128xbf16> to vector<1x16x16x128xbf16>
    %26 = vector.extract_strided_slice %19 {offsets = [0, 2, 0, 0], sizes = [1, 16, 16, 128], strides = [1, 1, 1, 1]} : vector<1x18x18x128xbf16> to vector<1x16x16x128xbf16>
    %27 = vector.extract_strided_slice %19 {offsets = [0, 2, 1, 0], sizes = [1, 16, 16, 128], strides = [1, 1, 1, 1]} : vector<1x18x18x128xbf16> to vector<1x16x16x128xbf16>
    %28 = vector.extract_strided_slice %19 {offsets = [0, 2, 2, 0], sizes = [1, 16, 16, 128], strides = [1, 1, 1, 1]} : vector<1x18x18x128xbf16> to vector<1x16x16x128xbf16>
    %29 = tpu.concatenate %20, %21, %22, %23, %24, %25, %26, %27, %28 in 3 : vector<1x16x16x128xbf16>, vector<1x16x16x128xbf16>, vector<1x16x16x128xbf16>, vector<1x16x16x128xbf16>, vector<1x16x16x128xbf16>, vector<1x16x16x128xbf16>, vector<1x16x16x128xbf16>, vector<1x16x16x128xbf16>, vector<1x16x16x128xbf16> -> vector<1x16x16x1152xbf16>
    %30 = vector.shape_cast %29 : vector<1x16x16x1152xbf16> to vector<256x1152xbf16>
    %c0_10 = arith.constant 0 : index
    %c0_11 = arith.constant 0 : index
    %31 = vector.load %arg2[%c0_10, %c0_11] : memref<1152x128xbf16, #tpu.memory_space<vmem>>, vector<1152x128xbf16>
    %cst_12 = arith.constant dense<0.000000e+00> : vector<256x128xf32>
    %32 = tpu.matmul %30, %31, %cst_12 {dimension_numbers = #tpu.dot_dimension_numbers<[1], [0], [0], [1], [0, 0, 1, 1], [], []>} : vector<256x1152xbf16>, vector<1152x128xbf16>, vector<256x128xf32> -> vector<256x128xf32>
    %c0_13 = arith.constant 0 : index
    %c0_14 = arith.constant 0 : index
    %33 = vector.load %arg5[%c0_13, %c0_14] : memref<1x128xf32, #tpu.memory_space<vmem>>, vector<1x128xf32>
    %34 = vector.broadcast %33 : vector<1x128xf32> to vector<256x128xf32>
    %35 = arith.addf %32, %34 : vector<256x128xf32>
    %36 = vector.extract_strided_slice %35 {offsets = [0, 0], sizes = [256, 3], strides = [1, 1]} : vector<256x128xf32> to vector<256x3xf32>
    %37 = math.tanh %36 : vector<256x3xf32>
    %38 = vector.shape_cast %37 : vector<256x3xf32> to vector<1x16x16x3xf32>
    %c0_15 = arith.constant 0 : index
    %c0_16 = arith.constant 0 : index
    %c0_17 = arith.constant 0 : index
    %c0_18 = arith.constant 0 : index
    %39 = vector.load %arg6[%c0_15, %c0_16, %c0_17, %c0_18] : memref<1x16x16x3xf32, #tpu.memory_space<vmem>>, vector<1x16x16x3xf32>
    tpu.vector_store %arg6[%c0_15, %c0_16, %c0_17, %c0_18], %38 {strides = array<i32>} : memref<1x16x16x3xf32, #tpu.memory_space<vmem>>, vector<1x16x16x3xf32>,
    return
  }
  func.func @transform_0(%arg0: i32) -> (i32, i32, i32, i32) {
    %c0_i32 = arith.constant 0 : i32
    %c0_i32_0 = arith.constant 0 : i32
    %c0_i32_1 = arith.constant 0 : i32
    %c0_i32_2 = arith.constant 0 : i32
    return %arg0, %c0_i32, %c0_i32_0, %c0_i32_1 : i32, i32, i32, i32
  }
  func.func @transform_1(%arg0: i32) -> (i32, i32) {
    %c0_i32 = arith.constant 0 : i32
    %c0_i32_0 = arith.constant 0 : i32
    %c0_i32_1 = arith.constant 0 : i32
    return %c0_i32, %c0_i32_0 : i32, i32
  }
  func.func @transform_2(%arg0: i32) -> (i32, i32) {
    %c0_i32 = arith.constant 0 : i32
    %c0_i32_0 = arith.constant 0 : i32
    %c0_i32_1 = arith.constant 0 : i32
    return %c0_i32, %c0_i32_0 : i32, i32
  }
  func.func @transform_3(%arg0: i32) -> (i32, i32) {
    %c0_i32 = arith.constant 0 : i32
    %c0_i32_0 = arith.constant 0 : i32
    %c0_i32_1 = arith.constant 0 : i32
    return %c0_i32, %c0_i32_0 : i32, i32
  }
  func.func @transform_4(%arg0: i32) -> (i32, i32) {
    %c0_i32 = arith.constant 0 : i32
    %c0_i32_0 = arith.constant 0 : i32
    %c0_i32_1 = arith.constant 0 : i32
    return %c0_i32, %c0_i32_0 : i32, i32
  }
  func.func @transform_5(%arg0: i32) -> (i32, i32, i32, i32) {
    %c0_i32 = arith.constant 0 : i32
    %c0_i32_0 = arith.constant 0 : i32
    %c0_i32_1 = arith.constant 0 : i32
    %c0_i32_2 = arith.constant 0 : i32
    return %arg0, %c0_i32, %c0_i32_0, %c0_i32_1 : i32, i32, i32, i32
  }
}

</mosaic_0001>

<bundles_post_ra>
// kernel: generator_forward.4
= control target key start
LH: loop header
LB: loop body
LE: loop exit
PB: predicated region body
PF: predicated region fallthrough
CT: control target
= control target key end

     0   :  { %10 = vsyncpa [#allocation3], 0  ;;  %s1608_s0 = inlined_call_operand.hbm [shape: f32[2,32], index: 0, kind: input, shape index: {}]   ;;  %s1609_s1 = inlined_call_operand.hbm [shape: bf16[32,2048], index: 1, kind: input, shape index: {}]   ;;  %s1610_s2 = inlined_call_operand.vmem [shape: f32[1,2048], index: 2, kind: input, shape index: {}]   ;;  %s1611_s3 = inlined_call_operand.hbm [shape: f32[1,128], index: 3, kind: input, shape index: {}]   ;;  %s1612_s4 = inlined_call_operand.hbm [shape: f32[1,128], index: 4, kind: input, shape index: {}]   ;;  %s1613_s5 = inlined_call_operand.vmem [shape: bf16[2,2048], index: 5, kind: output, shape index: {}]  }
   0x1   :  { %11 = vsyncpa [#allocation5], 0 }
   0x2   :  { %12 = vsyncpa [#allocation8], 0  ;;  %s1295_s18 = smov [#allocation4]  }
   0x3   :  { %s28_s19 = sshll.u32 %s1295_s18, 4  ;;  %s29_s19 = int_to_ptr.vmem [resolvable:$true] %s28_s19 }
   0x4   :  { %s1217_s20 = scalar_lea.vmem %s29_s19, 4096  ;;  %p1222_p1 = scmp.lt.s32.totalorder %s29_s19, %s29_s19 }
   0x5   :  { %p1218_p0 = scmp.ne.s32.totalorder %s29_s19, %s1217_s20  ;;  %p1223_p2 = scmp.lt.s32.totalorder %s1217_s20, %s1217_s20 }
   0x7   :  { %p1224_p3 = por %p1223_p2, %p1222_p1 }
   0x9   :  { %p1225_p4 = pnand %p1224_p3, %p1218_p0 }
   0xb   :  { %1228 = shalt.err (!%p1225_p4)
}
   0xc   :  { %s1296_s21 = smov 1024   ;;  %s1297_s22 = smov 64  }
   0xd   :  { %34 = dma.hbm_to_vmem [thread:$0]  %s1609_s1, 4096, %s29_s19, [#allocation5], %s1296_s21, %s1296_s21, %s1297_s22  }
   0xe   :  { %s1298_s25 = smov [#allocation2]   ;;  %s1299_s27 = smov [#allocation6]  }
   0xf   :  { %s19_s26 = sshll.u32 %s1298_s25, 4  ;;  %s43_s28 = sshll.u32 %s1299_s27, 4  ;;  %s20_s26 = int_to_ptr.vmem [resolvable:$true] %s19_s26  ;;  %s44_s28 = int_to_ptr.vmem [resolvable:$true] %s43_s28 }
  0x10   :  { %s1237_s29 = scalar_lea.vmem %s20_s26, 32  ;;  %p1242_p6 = scmp.lt.s32.totalorder %s20_s26, %s20_s26 }
  0x11   :  { %p1238_p5 = scmp.ne.s32.totalorder %s20_s26, %s1237_s29  ;;  %p1243_p7 = scmp.lt.s32.totalorder %s1237_s29, %s1237_s29 }
  0x13   :  { %p1244_p8 = por %p1243_p7, %p1242_p6 }
  0x15   :  { %p1245_p9 = pnand %p1244_p8, %p1238_p5 }
  0x17   :  { %1248 = shalt.err (!%p1245_p9)
}
  0x18   :  { %22 = dma.hbm_to_vmem [thread:$0]  %s1608_s0, 32, %s20_s26, [#allocation3]  }
  0x19   :  { %s1257_s7 = scalar_lea.vmem %s44_s28, 16  ;;  %s1261_s1 = scalar_lea.vmem %s44_s28, 32 }
  0x1a   :  { %p1258_p10 = scmp.ne.s32.totalorder %s44_s28, %s1257_s7  ;;  %p1262_p11 = scmp.lt.s32.totalorder %s44_s28, %s44_s28 }
  0x1b   :  { %p1263_p12 = scmp.lt.s32.totalorder %s1261_s1, %s1257_s7 }
  0x1d   :  { %p1264_p13 = por %p1263_p12, %p1262_p11 }
  0x1f   :  { %p1265_p0 = pnand %p1264_p13, %p1258_p10 }
  0x21   :  { %1268 = shalt.err (!%p1265_p0)
}
  0x22   :  { %46 = dma.hbm_to_vmem [thread:$0]  %s1611_s3, 16, %s44_s28, [#allocation5]  }
  0x23   :  { %s1300_s10 = smov [#allocation7]  }
  0x24   :  { %s53_s11 = sshll.u32 %s1300_s10, 4  ;;  %s54_s11 = int_to_ptr.vmem [resolvable:$true] %s53_s11 }
  0x25   :  { %s1277_s12 = scalar_lea.vmem %s54_s11, 16  ;;  %s1281_s13 = scalar_lea.vmem %s54_s11, 32 }
  0x26   :  { %p1278_p1 = scmp.ne.s32.totalorder %s54_s11, %s1277_s12  ;;  %p1282_p2 = scmp.lt.s32.totalorder %s54_s11, %s54_s11 }
  0x27   :  { %p1283_p3 = scmp.lt.s32.totalorder %s1281_s13, %s1277_s12 }
  0x29   :  { %p1284_p4 = por %p1283_p3, %p1282_p2 }
  0x2b   :  { %p1285_p5 = pnand %p1284_p4, %p1278_p1 }
  0x2d   :  { %1288 = shalt.err (!%p1285_p5)
}
  0x2e   :  { %56 = dma.hbm_to_vmem [thread:$0]  %s1612_s4, 16, %s54_s11, [#allocation8]  }
  0x2f   :  { %1289 = dma.done.wait [#allocation3], 32  }
  0x30   :  { %1290 = vsyncadd [#allocation3], 4294967264 }
  0x31   :  { %1291 = dma.done.wait [#allocation5], 4112  }
  0x32   :  { %1292 = vsyncadd [#allocation5], 4294963184 }
  0x33   :  { %1293 = dma.done.wait [#allocation8], 16  }
  0x34   :  { %1294 = vsyncadd [#allocation8], 4294967280  ;;  %v1301_v0 = vmov 0   ;;  %v88_v1 = vld [vmem:[#allocation4 + $0x80] sm:$0xff]  ;;  %v89_v3 = vld [vmem:[#allocation4 + $0x88] sm:$0xff]  ;;  %vm348_vm0 = vcmask 261120  }
  0x35   :  { %384 = vmatprep.mubr.bf16.mxu0 %v1301_v0  ;;  %425 = vmatprep.mubr.bf16.mxu1 %v1301_v0  ;;  %v96_v2 = vld [vmem:[#allocation4 + $0xc0] sm:$0xff]  ;;  %v97_v5 = vld [vmem:[#allocation4 + $0xc8] sm:$0xff]  ;;  %v90_v15 = vld [vmem:[#allocation4 + $0x90] sm:$0xff]  ;;  %vm680_vm1 = vcmask 1041408  }
  0x36   :  { %v1168_v4 = vcombine.high %v88_v1, %v96_v2  ;;  %v1167_v6 = vcombine.low %v88_v1, %v96_v2  ;;  %v72_v7 = vld [vmem:[#allocation4] sm:$0xff]  ;;  %v1170_v9 = vcombine.high %v89_v3, %v97_v5  ;;  %v1169_v10 = vcombine.low %v89_v3, %v97_v5  ;;  %v73_v12 = vld [vmem:[#allocation4 + $0x8] sm:$0xff]  ;;  %v98_v16 = vld [vmem:[#allocation4 + $0xd0] sm:$0xff] }
  0x37   :  { %v80_v8 = vld [vmem:[#allocation4 + $0x40] sm:$0xff]  ;;  %v81_v13 = vld [vmem:[#allocation4 + $0x48] sm:$0xff]  ;;  %v91_v17 = vld [vmem:[#allocation4 + $0x98] sm:$0xff]  ;;  %v1172_v22 = vcombine.high %v90_v15, %v98_v16  ;;  %v1171_v29 = vcombine.low %v90_v15, %v98_v16 }
  0x38   :  { %v1152_v11 = vcombine.high %v72_v7, %v80_v8  ;;  %364 = vmatprep.subr.bf16.mxu0 %v1168_v4  ;;  %v1154_v14 = vcombine.high %v73_v12, %v81_v13  ;;  %405 = vmatprep.subr.bf16.mxu1 %v1170_v9  ;;  %v1151_v18 = vcombine.low %v72_v7, %v80_v8  ;;  %v70_v19 = vld [vmem:[#allocation2] sm:$0x3]  ;;  %v74_v24 = vld [vmem:[#allocation4 + $0x10] sm:$0xff]  ;;  %v92_v33 = vld [vmem:[#allocation4 + $0xa0] sm:$0xff]  ;;  %v108_v4 = vlaneseq }
  0x39   :  { %365 = vmatpush1.bf16.msra.mxu0 %v1167_v6  ;;  %v99_v20 = vld [vmem:[#allocation4 + $0xd8] sm:$0xff]  ;;  %406 = vmatpush1.bf16.msra.mxu1 %v1169_v10  ;;  %v1153_v21 = vcombine.low %v73_v12, %v81_v13  ;;  %v82_v25 = vld [vmem:[#allocation4 + $0x50] sm:$0xff]  ;;  %v1347_v26 = vpack.c.bf16 %v70_v19, %v70_v19  ;;  %v100_v34 = vld [vmem:[#allocation4 + $0xe0] sm:$0xff] }
  0x3a   :  { %366 = vmatprep.subr.bf16.mxu0 %v1152_v11  ;;  %407 = vmatprep.subr.bf16.mxu1 %v1154_v14  ;;  %v1174_v23 = vcombine.high %v91_v17, %v99_v20  ;;  %v75_v27 = vld [vmem:[#allocation4 + $0x18] sm:$0xff]  ;;  %v1173_v30 = vcombine.low %v91_v17, %v99_v20  ;;  %v1156_v31 = vcombine.high %v74_v24, %v82_v25  ;;  %v93_v35 = vld [vmem:[#allocation4 + $0xa8] sm:$0xff]  ;;  %v76_v41 = vld [vmem:[#allocation4 + $0x20] sm:$0xff]  ;;  %v1371_v5 = vshrl.u32 %v108_v4, 7 }
  0x3b   :  { %v83_v28 = vld [vmem:[#allocation4 + $0x58] sm:$0xff]  ;;  %v101_v36 = vld [vmem:[#allocation4 + $0xe8] sm:$0xff]  ;;  %v1155_v37 = vcombine.low %v74_v24, %v82_v25  ;;  %v1176_v39 = vcombine.high %v92_v33, %v100_v34  ;;  %v84_v42 = vld [vmem:[#allocation4 + $0x60] sm:$0xff]  ;;  %v1175_v45 = vcombine.low %v92_v33, %v100_v34 }
  0x3c   :  { %v1158_v32 = vcombine.high %v75_v27, %v83_v28  ;;  %v1157_v38 = vcombine.low %v75_v27, %v83_v28  ;;  %v1178_v40 = vcombine.high %v93_v35, %v101_v36  ;;  %v77_v43 = vld [vmem:[#allocation4 + $0x28] sm:$0xff]  ;;  %v1177_v46 = vcombine.low %v93_v35, %v101_v36  ;;  %v94_v49 = vld [vmem:[#allocation4 + $0xb0] sm:$0xff]  ;;  %v95_v51 = vld [vmem:[#allocation4 + $0xb8] sm:$0xff] }
  0x3d   :  { %367 = vmatpush1.bf16.msra.mxu0 %v1151_v18  ;;  %408 = vmatpush1.bf16.msra.mxu1 %v1153_v21  ;;  %v85_v44 = vld [vmem:[#allocation4 + $0x68] sm:$0xff]  ;;  %v1160_v47 = vcombine.high %v76_v41, %v84_v42  ;;  %v102_v50 = vld [vmem:[#allocation4 + $0xf0] sm:$0xff]  ;;  %v103_v52 = vld [vmem:[#allocation4 + $0xf8] sm:$0xff]  ;;  %v1159_v53 = vcombine.low %v76_v41, %v84_v42  ;;  %v1374_v6 = vsub.s32 0, %v1371_v5  ;;  %v114_v8 = vsub.s32 1, %v1371_v5 }
  0x3e   :  { %446 = vmatprep.subr.bf16.mxu0 %v1172_v22  ;;  %487 = vmatprep.subr.bf16.mxu1 %v1174_v23  ;;  %v1162_v48 = vcombine.high %v77_v43, %v85_v44  ;;  %v1161_v54 = vcombine.low %v77_v43, %v85_v44  ;;  %v1180_v55 = vcombine.high %v94_v49, %v102_v50  ;;  %v78_v57 = vld [vmem:[#allocation4 + $0x30] sm:$0xff]  ;;  %v79_v59 = vld [vmem:[#allocation4 + $0x38] sm:$0xff]  ;;  %v122_v9 = vsub.s32 3, %v1371_v5  ;;  %v1390_v17 = vld [vmem:[%s1610_s2 + $0x8] sm:$0xff] }
  0x3f   :  { %v1182_v56 = vcombine.high %v95_v51, %v103_v52  ;;  %v86_v58 = vld [vmem:[#allocation4 + $0x70] sm:$0xff]  ;;  %v87_v60 = vld [vmem:[#allocation4 + $0x78] sm:$0xff]  ;;  %v1179_v61 = vcombine.low %v94_v49, %v102_v50  ;;  %v1181_v62 = vcombine.low %v95_v51, %v103_v52  ;;  %v126_v10 = vsub.s32 4, %v1371_v5 }
  0x40   :  { %1183 = vmatmul.mubr.msk.bf16.vlgmr.msra.gmra.mxu0 %vm348_vm0, %v1347_v26  ;;  %1184 = vmatmul.mubr.msk.bf16.vlgmr.msra.gmra.mxu1 %vm348_vm0, %v1347_v26  ;;  %v1164_v63 = vcombine.high %v78_v57, %v86_v58  ;;  %v1166_v1 = vcombine.high %v79_v59, %v87_v60  ;;  %v1163_v2 = vcombine.low %v78_v57, %v86_v58  ;;  %v104_v7 = vld [vmem:[%s1610_s2] sm:$0xff]  ;;  %v134_v12 = vsub.s32 6, %v1371_v5 }
  0x41   :  { %447 = vmatpush1.bf16.msra.mxu0 %v1171_v29  ;;  %488 = vmatpush1.bf16.msra.mxu1 %v1173_v30  ;;  %v1165_v3 = vcombine.low %v79_v59, %v87_v60  ;;  %v111_v11 = vrot.slane %v104_v7, %v1374_v6  ;;  %v130_v13 = vsub.s32 5, %v1371_v5  ;;  %v138_v14 = vsub.s32 7, %v1371_v5 }
  0x42   :  { %448 = vmatprep.subr.bf16.mxu0 %v1156_v31  ;;  %489 = vmatprep.subr.bf16.mxu1 %v1158_v32  ;;  %v115_v16 = vrot.slane %v104_v7, %v114_v8  ;;  %v123_v19 = vrot.slane %v104_v7, %v122_v9  ;;  %v1394_v20 = vrot.slane %v104_v7, %v126_v10 }
  0x43   :  { %466 = vmatprep.mubr.bf16.mxu0 %v1301_v0  ;;  %507 = vmatprep.mubr.bf16.mxu1 %v1301_v0  ;;  %v1400_v23 = vrot.slane %v104_v7, %v134_v12  ;;  %v1404_v24 = vrot.slane %v104_v7, %v130_v13  ;;  %v1408_v25 = vrot.slane %v104_v7, %v138_v14 }
  0x44   :  { %v143_v28 = vrot.slane %v1390_v17, %v1374_v6  ;;  %v1418_v30 = vrot.slane %v1390_v17, %v114_v8  ;;  %v1427_v35 = vrot.slane %v1390_v17, %v122_v9 }
  0x45   :  { %449 = vmatpush1.bf16.msra.mxu0 %v1155_v37  ;;  %490 = vmatpush1.bf16.msra.mxu1 %v1157_v38 }
  0x46   :  { %528 = vmatprep.subr.bf16.mxu0 %v1176_v39  ;;  %569 = vmatprep.subr.bf16.mxu1 %v1178_v40 }
  0x48   :  { %1185 = vmatmul.mubr.msk.bf16.vlgmr.msra.gmra.mxu0 %vm348_vm0, %v1347_v26  ;;  %1186 = vmatmul.mubr.msk.bf16.vlgmr.msra.gmra.mxu1 %vm348_vm0, %v1347_v26 }
  0x49   :  { %529 = vmatpush1.bf16.msra.mxu0 %v1175_v45  ;;  %570 = vmatpush1.bf16.msra.mxu1 %v1177_v46 }
  0x4a   :  { %530 = vmatprep.subr.bf16.mxu0 %v1160_v47  ;;  %571 = vmatprep.subr.bf16.mxu1 %v1162_v48 }
  0x4b   :  { %548 = vmatprep.mubr.bf16.mxu0 %v1301_v0  ;;  %589 = vmatprep.mubr.bf16.mxu1 %v1301_v0 }
  0x4d   :  { %531 = vmatpush1.bf16.msra.mxu0 %v1159_v53  ;;  %572 = vmatpush1.bf16.msra.mxu1 %v1161_v54 }
  0x4e   :  { %610 = vmatprep.subr.bf16.mxu0 %v1180_v55  ;;  %651 = vmatprep.subr.bf16.mxu1 %v1182_v56 }
  0x50   :  { %1187 = vmatmul.mubr.msk.bf16.vlgmr.msra.gmra.mxu0 %vm348_vm0, %v1347_v26  ;;  %1188 = vmatmul.mubr.msk.bf16.vlgmr.msra.gmra.mxu1 %vm348_vm0, %v1347_v26 }
  0x51   :  { %611 = vmatpush1.bf16.msra.mxu0 %v1179_v61  ;;  %652 = vmatpush1.bf16.msra.mxu1 %v1181_v62 }
  0x52   :  { %612 = vmatprep.subr.bf16.mxu0 %v1164_v63  ;;  %653 = vmatprep.subr.bf16.mxu1 %v1166_v1 }
  0x53   :  { %630 = vmatprep.mubr.bf16.mxu0 %v1301_v0  ;;  %671 = vmatprep.mubr.bf16.mxu1 %v1301_v0  ;;  %v118_v0 = vsub.s32 2, %v1371_v5 }
  0x55   :  { %613 = vmatpush1.bf16.msra.mxu0 %v1163_v2  ;;  %654 = vmatpush1.bf16.msra.mxu1 %v1165_v3  ;;  %v119_v15 = vrot.slane %v104_v7, %v118_v0  ;;  %v1415_v29 = vrot.slane %v1390_v17, %v118_v0 }
  0x58   :  { %1189 = vmatmul.mubr.msk.bf16.vlgmr.msra.gmra.mxu0 %vm348_vm0, %v1347_v26  ;;  %1190 = vmatmul.mubr.msk.bf16.vlgmr.msra.gmra.mxu1 %vm348_vm0, %v1347_v26 }
 0x100   :  { %v386_v18 = vpop.f32.mrf.mxu0  ;;  %v427_v22 = vpop.f32.mrf.mxu1 }
 0x101   :  { %v1396_v21 = vadd.f32 %v386_v18, %v111_v11  ;;  %v1410_v26 = vadd.f32 %v427_v22, %v119_v15 }
 0x102   :  { %v388_v27 = vpop.f32.mrf.mxu0  ;;  %v429_v34 = vpop.f32.mrf.mxu1 }
 0x103   :  { %v681_v31 = vsel %vm680_vm1, %v1396_v21, 0.0  ;;  %v689_v32 = vmul.f32 %v1396_v21, %v1396_v21  ;;  %v1424_v33 = vadd.f32 %v388_v27, %v115_v16  ;;  %v715_v37 = vsel %vm680_vm1, %v1410_v26, 0.0 }
 0x104   :  { %v682_v36 = vrot.slane %v681_v31, 4  ;;  %v723_v38 = vmul.f32 %v1410_v26, %v1410_v26  ;;  %v1433_v39 = vadd.f32 %v429_v34, %v123_v19  ;;  %v390_v40 = vpop.f32.mrf.mxu0  ;;  %v716_v42 = vrot.slane %v715_v37, 4  ;;  %v431_v45 = vpop.f32.mrf.mxu1 }
 0x105   :  { %v690_v41 = vsel %vm680_vm1, %v689_v32, 0.0  ;;  %v698_v43 = vsel %vm680_vm1, %v1424_v33, 0.0  ;;  %v706_v44 = vmul.f32 %v1424_v33, %v1424_v33 }
 0x106   :  { %v683_v46 = vadd.f32 %v682_v36, %v681_v31  ;;  %v691_v47 = vrot.slane %v690_v41, 4  ;;  %v724_v48 = vsel %vm680_vm1, %v723_v38, 0.0  ;;  %v699_v49 = vrot.slane %v698_v43, 4  ;;  %v391_v50 = vpop.f32.mrf.mxu0  ;;  %v432_v55 = vpop.f32.mrf.mxu1 }
 0x107   :  { %v717_v51 = vadd.f32 %v716_v42, %v715_v37  ;;  %v725_v52 = vrot.slane %v724_v48, 4  ;;  %v707_v53 = vsel %vm680_vm1, %v706_v44, 0.0  ;;  %v732_v54 = vsel %vm680_vm1, %v1433_v39, 0.0 }
 0x108   :  { %v684_v56 = vrot.slane %v683_v46, 2  ;;  %v692_v57 = vadd.f32 %v691_v47, %v690_v41  ;;  %v700_v58 = vadd.f32 %v699_v49, %v698_v43  ;;  %v708_v59 = vrot.slane %v707_v53, 4  ;;  %v468_v60 = vpop.f32.mrf.mxu0  ;;  %v509_v2 = vpop.f32.mrf.mxu1 }
 0x109   :  { %v718_v61 = vrot.slane %v717_v51, 2  ;;  %v726_v62 = vadd.f32 %v725_v52, %v724_v48  ;;  %v733_v63 = vrot.slane %v732_v54, 4  ;;  %v740_v1 = vmul.f32 %v1433_v39, %v1433_v39 }
 0x10a   :  { %v685_v3 = vadd.f32 %v684_v56, %v683_v46  ;;  %v693_v4 = vrot.slane %v692_v57, 2  ;;  %v701_v7 = vrot.slane %v700_v58, 2  ;;  %v709_v0 = vadd.f32 %v708_v59, %v707_v53  ;;  %v470_v8 = vpop.f32.mrf.mxu0  ;;  %v1447_v18 = vpop.f32.mrf.mxu1 }
 0x10b   :  { %v719_v9 = vadd.f32 %v718_v61, %v717_v51  ;;  %v727_v11 = vrot.slane %v726_v62, 2  ;;  %v734_v15 = vadd.f32 %v733_v63, %v732_v54  ;;  %v741_v16 = vsel %vm680_vm1, %v740_v1, 0.0 }
 0x10c   :  { %v686_v19 = vrot.slane %v685_v3, 1  ;;  %v694_v22 = vadd.f32 %v693_v4, %v692_v57  ;;  %v702_v27 = vadd.f32 %v701_v7, %v700_v58  ;;  %v710_v31 = vrot.slane %v709_v0, 2  ;;  %v472_v32 = vpop.f32.mrf.mxu0  ;;  %v513_v40 = vpop.f32.mrf.mxu1 }
 0x10d   :  { %v720_v34 = vrot.slane %v719_v9, 1  ;;  %v728_v36 = vadd.f32 %v727_v11, %v726_v62  ;;  %v735_v37 = vrot.slane %v734_v15, 2  ;;  %v742_v38 = vrot.slane %v741_v16, 4 }
 0x10e   :  { %v687_v41 = vadd.f32 %v686_v19, %v685_v3  ;;  %v695_v42 = vrot.slane %v694_v22, 1  ;;  %v703_v43 = vrot.slane %v702_v27, 1  ;;  %v711_v44 = vadd.f32 %v710_v31, %v709_v0  ;;  %v473_v45 = vpop.f32.mrf.mxu0  ;;  %v514_v50 = vpop.f32.mrf.mxu1 }
 0x10f   :  { %v721_v46 = vadd.f32 %v720_v34, %v719_v9  ;;  %v729_v47 = vrot.slane %v728_v36, 1  ;;  %v736_v48 = vadd.f32 %v735_v37, %v734_v15  ;;  %v743_v49 = vadd.f32 %v742_v38, %v741_v16 }
 0x110   :  { %v696_v51 = vadd.f32 %v695_v42, %v694_v22  ;;  %v704_v52 = vadd.f32 %v703_v43, %v702_v27  ;;  %v712_v53 = vrot.slane %v711_v44, 1  ;;  %v1450_v54 = vadd.f32 %v468_v60, %v1394_v20  ;;  %v1452_v55 = vpop.f32.mrf.mxu0  ;;  %v1457_v61 = vpop.f32.mrf.mxu1 }
 0x111   :  { %v730_v56 = vadd.f32 %v729_v47, %v728_v36  ;;  %v737_v57 = vrot.slane %v736_v48, 1  ;;  %v744_v58 = vrot.slane %v743_v49, 2  ;;  %v1455_v59 = vadd.f32 %v509_v2, %v1400_v23 }
 0x112   :  { %v705_v62 = vadd.f32 %v704_v52, %v687_v41  ;;  %v713_v63 = vadd.f32 %v712_v53, %v711_v44  ;;  %v749_v1 = vsel %vm680_vm1, %v1450_v54, 0.0  ;;  %v757_v3 = vmul.f32 %v1450_v54, %v1450_v54  ;;  %v1463_v20 = vpop.f32.mrf.mxu0  ;;  %v1467_v23 = vpop.f32.mrf.mxu1 }
 0x113   :  { %v738_v60 = vadd.f32 %v737_v57, %v736_v48  ;;  %v745_v4 = vadd.f32 %v744_v58, %v743_v49  ;;  %v750_v7 = vrot.slane %v749_v1, 4  ;;  %v783_v0 = vsel %vm680_vm1, %v1455_v59, 0.0 }
 0x114   :  { %v714_v2 = vadd.f32 %v713_v63, %v696_v51  ;;  %v722_v9 = vadd.f32 %v721_v46, %v705_v62  ;;  %v758_v11 = vsel %vm680_vm1, %v757_v3, 0.0  ;;  %v784_v15 = vrot.slane %v783_v0, 4  ;;  %v554_v16 = vpop.f32.mrf.mxu0  ;;  %v595_v32 = vpop.f32.mrf.mxu1 }
 0x115   :  { %v746_v19 = vrot.slane %v745_v4, 1  ;;  %v751_v22 = vadd.f32 %v750_v7, %v749_v1  ;;  %v759_v27 = vrot.slane %v758_v11, 4  ;;  %v791_v31 = vmul.f32 %v1455_v59, %v1455_v59 }
 0x116   :  { %v731_v34 = vadd.f32 %v730_v56, %v714_v2  ;;  %v785_v36 = vadd.f32 %v784_v15, %v783_v0  ;;  %v1473_v37 = vadd.f32 %v470_v8, %v1404_v24  ;;  %v555_v38 = vpop.f32.mrf.mxu0  ;;  %v1478_v40 = vrot.slane %v1390_v17, %v126_v10  ;;  %v596_v45 = vpop.f32.mrf.mxu1 }
 0x117   :  { %v739_v41 = vadd.f32 %v738_v60, %v722_v9  ;;  %v752_v42 = vrot.slane %v751_v22, 2  ;;  %v760_v43 = vadd.f32 %v759_v27, %v758_v11  ;;  %v792_v44 = vsel %vm680_vm1, %v791_v31, 0.0 }
 0x118   :  { %v786_v46 = vrot.slane %v785_v36, 2  ;;  %v793_v47 = vrot.slane %v792_v44, 4  ;;  %v766_v48 = vsel %vm680_vm1, %v1473_v37, 0.0  ;;  %v774_v24 = vmul.f32 %v1473_v37, %v1473_v37  ;;  %v1485_v8 = vpop.f32.mrf.mxu0  ;;  %v1487_v52 = vpop.f32.mrf.mxu1 }
 0x119   :  { %v747_v49 = vadd.f32 %v746_v19, %v745_v4  ;;  %v753_v50 = vadd.f32 %v752_v42, %v751_v22  ;;  %v761_v10 = vrot.slane %v760_v43, 2  ;;  %v767_v51 = vrot.slane %v766_v48, 4 }
 0x11a   :  { %v787_v53 = vadd.f32 %v786_v46, %v785_v36  ;;  %v794_v56 = vadd.f32 %v793_v47, %v792_v44  ;;  %v775_v57 = vsel %vm680_vm1, %v774_v24, 0.0  ;;  %v1492_v58 = vadd.f32 %v1447_v18, %v1408_v25  ;;  %v1494_v62 = vpop.f32.mrf.mxu0  ;;  %v1496_v4 = vpop.f32.mrf.mxu1 }
 0x11b   :  { %v754_v63 = vrot.slane %v753_v50, 1  ;;  %v762_v1 = vadd.f32 %v761_v10, %v760_v43  ;;  %v768_v3 = vadd.f32 %v767_v51, %v766_v48  ;;  %v776_v60 = vrot.slane %v775_v57, 4 }
 0x11c   :  { %v788_v7 = vrot.slane %v787_v53, 1  ;;  %v795_v0 = vrot.slane %v794_v56, 2  ;;  %v800_v2 = vsel %vm680_vm1, %v1492_v58, 0.0  ;;  %v808_v9 = vmul.f32 %v1492_v58, %v1492_v58  ;;  %v636_v11 = vpop.f32.mrf.mxu0  ;;  %v677_v19 = vpop.f32.mrf.mxu1 }
 0x11d   :  { %v755_v15 = vadd.f32 %v754_v63, %v753_v50  ;;  %v763_v25 = vrot.slane %v762_v1, 1  ;;  %v769_v18 = vrot.slane %v768_v3, 2  ;;  %v777_v16 = vadd.f32 %v776_v60, %v775_v57 }
 0x11e   :  { %v748_v22 = vadd.f32 %v747_v49, %v731_v34  ;;  %v796_v27 = vadd.f32 %v795_v0, %v794_v56  ;;  %v801_v31 = vrot.slane %v800_v2, 4  ;;  %v809_v32 = vsel %vm680_vm1, %v808_v9, 0.0  ;;  %v637_v36 = vpop.f32.mrf.mxu0  ;;  %v678_v45 = vpop.f32.mrf.mxu1 }
 0x11f   :  { %v764_v38 = vadd.f32 %v763_v25, %v762_v1  ;;  %v789_v42 = vadd.f32 %v788_v7, %v787_v53  ;;  %v770_v43 = vadd.f32 %v769_v18, %v768_v3  ;;  %v778_v44 = vrot.slane %v777_v16, 2 }
 0x120   :  { %v756_v46 = vadd.f32 %v755_v15, %v739_v41  ;;  %v802_v47 = vadd.f32 %v801_v31, %v800_v2  ;;  %v810_v48 = vrot.slane %v809_v32, 4  ;;  %v1507_v24 = vadd.f32 %v1452_v55, %v143_v28 }
 0x121   :  { %v797_v34 = vrot.slane %v796_v27, 1  ;;  %v771_v49 = vrot.slane %v770_v43, 1  ;;  %v779_v50 = vadd.f32 %v778_v44, %v777_v16  ;;  %v1511_v10 = vadd.f32 %v1457_v61, %v1415_v29 }
 0x122   :  { %v765_v51 = vadd.f32 %v764_v38, %v748_v22  ;;  %v803_v53 = vrot.slane %v802_v47, 2  ;;  %v811_v56 = vadd.f32 %v810_v48, %v809_v32  ;;  %v817_v41 = vsel %vm680_vm1, %v1507_v24, 0.0 }
 0x123   :  { %v772_v57 = vadd.f32 %v771_v49, %v770_v43  ;;  %v780_v63 = vrot.slane %v779_v50, 1  ;;  %v818_v1 = vrot.slane %v817_v41, 4  ;;  %v825_v28 = vmul.f32 %v1507_v24, %v1507_v24 }
 0x124   :  { %v804_v55 = vadd.f32 %v803_v53, %v802_v47  ;;  %v812_v3 = vrot.slane %v811_v56, 2  ;;  %v851_v60 = vsel %vm680_vm1, %v1511_v10, 0.0  ;;  %v859_v29 = vmul.f32 %v1511_v10, %v1511_v10 }
 0x125   :  { %v773_v61 = vadd.f32 %v772_v57, %v756_v46  ;;  %v781_v7 = vadd.f32 %v780_v63, %v779_v50  ;;  %v819_v0 = vadd.f32 %v818_v1, %v817_v41  ;;  %v826_v2 = vsel %vm680_vm1, %v825_v28, 0.0 }
 0x126   :  { %v805_v9 = vrot.slane %v804_v55, 1  ;;  %v813_v11 = vadd.f32 %v812_v3, %v811_v56  ;;  %v827_v15 = vrot.slane %v826_v2, 4  ;;  %v852_v25 = vrot.slane %v851_v60, 4 }
 0x127   :  { %v782_v18 = vadd.f32 %v781_v7, %v765_v51  ;;  %v820_v16 = vrot.slane %v819_v0, 2  ;;  %v860_v19 = vsel %vm680_vm1, %v859_v29, 0.0  ;;  %v167_v22 = vrot.slane %v1390_v17, %v134_v12 }
 0x128   :  { %v798_v31 = vadd.f32 %v797_v34, %v796_v27  ;;  %v790_v32 = vadd.f32 %v789_v42, %v773_v61  ;;  %v828_v36 = vadd.f32 %v827_v15, %v826_v2  ;;  %v853_v38 = vadd.f32 %v852_v25, %v851_v60 }
 0x129   :  { %v814_v43 = vrot.slane %v813_v11, 1  ;;  %v821_v44 = vadd.f32 %v820_v16, %v819_v0  ;;  %v861_v45 = vrot.slane %v860_v19, 4  ;;  %v1528_v46 = vadd.f32 %v1463_v20, %v1418_v30 }
 0x12a   :  { %v799_v47 = vadd.f32 %v798_v31, %v782_v18  ;;  %v806_v48 = vadd.f32 %v805_v9, %v804_v55  ;;  %v829_v49 = vrot.slane %v828_v36, 2  ;;  %v854_v50 = vrot.slane %v853_v38, 2 }
 0x12b   :  { %v822_v51 = vrot.slane %v821_v44, 1  ;;  %v862_v53 = vadd.f32 %v861_v45, %v860_v19  ;;  %v834_v12 = vsel %vm680_vm1, %v1528_v46, 0.0  ;;  %v842_v27 = vmul.f32 %v1528_v46, %v1528_v46 }
 0x12c   :  { %v807_v42 = vadd.f32 %v806_v48, %v790_v32  ;;  %v830_v34 = vadd.f32 %v829_v49, %v828_v36  ;;  %v855_v56 = vadd.f32 %v854_v50, %v853_v38  ;;  %v835_v41 = vrot.slane %v834_v12, 4 }
 0x12d   :  { %v815_v57 = vadd.f32 %v814_v43, %v813_v11  ;;  %v823_v63 = vadd.f32 %v822_v51, %v821_v44  ;;  %v843_v30 = vsel %vm680_vm1, %v842_v27, 0.0  ;;  %v1537_v20 = vadd.f32 %v1467_v23, %v1427_v35 }
 0x12e   :  { %v831_v1 = vrot.slane %v830_v34, 1  ;;  %v863_v28 = vrot.slane %v862_v53, 2  ;;  %v836_v55 = vadd.f32 %v835_v41, %v834_v12  ;;  %v844_v3 = vrot.slane %v843_v30, 4 }
 0x12f   :  { %v816_v60 = vadd.f32 %v815_v57, %v799_v47  ;;  %v868_v29 = vsel %vm680_vm1, %v1537_v20, 0.0  ;;  %v876_v61 = vmul.f32 %v1537_v20, %v1537_v20  ;;  %v163_v7 = vrot.slane %v1390_v17, %v130_v13 }
 0x130   :  { %v832_v0 = vadd.f32 %v831_v1, %v830_v34  ;;  %v856_v2 = vrot.slane %v855_v56, 1  ;;  %v837_v9 = vrot.slane %v836_v55, 2  ;;  %v845_v35 = vadd.f32 %v844_v3, %v843_v30 }
 0x131   :  { %v824_v23 = vadd.f32 %v823_v63, %v807_v42  ;;  %v869_v11 = vrot.slane %v868_v29, 4  ;;  %v877_v15 = vsel %vm680_vm1, %v876_v61, 0.0  ;;  %v1549_v25 = vadd.f32 %v1485_v8, %v1478_v40 }
 0x132   :  { %v864_v18 = vadd.f32 %v863_v28, %v862_v53  ;;  %v838_v16 = vadd.f32 %v837_v9, %v836_v55  ;;  %v846_v19 = vrot.slane %v845_v35, 2  ;;  %v878_v31 = vrot.slane %v877_v15, 4 }
 0x133   :  { %v833_v32 = vadd.f32 %v832_v0, %v816_v60  ;;  %v870_v36 = vadd.f32 %v869_v11, %v868_v29  ;;  %v885_v13 = vsel %vm680_vm1, %v1549_v25, 0.0  ;;  %v893_v38 = vmul.f32 %v1549_v25, %v1549_v25 }
 0x134   :  { %v839_v43 = vrot.slane %v838_v16, 1  ;;  %v847_v44 = vadd.f32 %v846_v19, %v845_v35  ;;  %v879_v45 = vadd.f32 %v878_v31, %v877_v15  ;;  %v886_v47 = vrot.slane %v885_v13, 4 }
 0x135   :  { %v871_v48 = vrot.slane %v870_v36, 2  ;;  %v894_v40 = vsel %vm680_vm1, %v893_v38, 0.0  ;;  %v1557_v8 = vadd.f32 %v1487_v52, %v167_v22  ;;  %v1560_v49 = vadd.f32 %v1494_v62, %v163_v7 }
 0x136   :  { %v840_v50 = vadd.f32 %v839_v43, %v838_v16  ;;  %v848_v51 = vrot.slane %v847_v44, 1  ;;  %v880_v53 = vrot.slane %v879_v45, 2  ;;  %v887_v12 = vadd.f32 %v886_v47, %v885_v13 }
 0x137   :  { %v872_v27 = vadd.f32 %v871_v48, %v870_v36  ;;  %v895_v42 = vrot.slane %v894_v40, 4  ;;  %v919_v34 = vsel %vm680_vm1, %v1557_v8, 0.0  ;;  %v927_v41 = vmul.f32 %v1557_v8, %v1557_v8 }
 0x138   :  { %v841_v57 = vadd.f32 %v840_v50, %v824_v23  ;;  %v849_v63 = vadd.f32 %v848_v51, %v847_v44  ;;  %v881_v30 = vadd.f32 %v880_v53, %v879_v45  ;;  %v888_v52 = vrot.slane %v887_v12, 2 }
 0x139   :  { %v865_v22 = vrot.slane %v864_v18, 1  ;;  %v896_v1 = vadd.f32 %v895_v42, %v894_v40  ;;  %v920_v62 = vrot.slane %v919_v34, 4  ;;  %v928_v28 = vsel %vm680_vm1, %v927_v41, 0.0 }
 0x13a   :  { %v857_v55 = vadd.f32 %v856_v2, %v855_v56  ;;  %v873_v3 = vrot.slane %v872_v27, 1  ;;  %v889_v60 = vadd.f32 %v888_v52, %v887_v12  ;;  %v171_v29 = vrot.slane %v1390_v17, %v138_v14 }
 0x13b   :  { %v850_v61 = vadd.f32 %v849_v63, %v833_v32  ;;  %v897_v7 = vrot.slane %v896_v1, 2  ;;  %v921_v0 = vadd.f32 %v920_v62, %v919_v34  ;;  %v929_v9 = vrot.slane %v928_v28, 4 }
 0x13c   :  { %v858_v35 = vadd.f32 %v857_v55, %v841_v57  ;;  %v882_v23 = vrot.slane %v881_v30, 1  ;;  %v902_v11 = vsel %vm680_vm1, %v1560_v49, 0.0  ;;  %v866_v15 = vadd.f32 %v865_v22, %v864_v18 }
 0x13d   :  { %v890_v16 = vrot.slane %v889_v60, 1  ;;  %v898_v19 = vadd.f32 %v897_v7, %v896_v1  ;;  %v930_v31 = vadd.f32 %v929_v9, %v928_v28  ;;  %v874_v56 = vadd.f32 %v873_v3, %v872_v27 }
 0x13e   :  { %v922_v2 = vrot.slane %v921_v0, 2  ;;  %v903_v36 = vrot.slane %v902_v11, 4  ;;  %v910_v13 = vmul.f32 %v1560_v49, %v1560_v49  ;;  %v867_v14 = vadd.f32 %v866_v15, %v850_v61 }
 0x13f   :  { %v1575_v17 = vadd.f32 %v1496_v4, %v171_v29  ;;  %v875_v32 = vadd.f32 %v874_v56, %v858_v35  ;;  %v883_v38 = vadd.f32 %v882_v23, %v881_v30  ;;  %v891_v45 = vadd.f32 %v890_v16, %v889_v60 }
 0x140   :  { %v904_v43 = vadd.f32 %v903_v36, %v902_v11  ;;  %v911_v44 = vsel %vm680_vm1, %v910_v13, 0.0  ;;  %v899_v18 = vrot.slane %v898_v19, 1  ;;  %v931_v47 = vrot.slane %v930_v31, 2 }
 0x141   :  { %v912_v48 = vrot.slane %v911_v44, 4  ;;  %v923_v40 = vadd.f32 %v922_v2, %v921_v0  ;;  %v936_v51 = vsel %vm680_vm1, %v1575_v17, 0.0  ;;  %v944_v53 = vmul.f32 %v1575_v17, %v1575_v17 }
 0x142   :  { %v905_v50 = vrot.slane %v904_v43, 2  ;;  %v884_v4 = vadd.f32 %v883_v38, %v867_v14  ;;  %v937_v42 = vrot.slane %v936_v51, 4  ;;  %v900_v41 = vadd.f32 %v899_v18, %v898_v19 }
 0x143   :  { %v913_v12 = vadd.f32 %v912_v48, %v911_v44  ;;  %v945_v34 = vsel %vm680_vm1, %v944_v53, 0.0  ;;  %v932_v57 = vadd.f32 %v931_v47, %v930_v31  ;;  %v892_v52 = vadd.f32 %v891_v45, %v875_v32 }
 0x144   :  { %v906_v27 = vadd.f32 %v905_v50, %v904_v43  ;;  %v946_v30 = vrot.slane %v945_v34, 4  ;;  %v924_v22 = vrot.slane %v923_v40, 1  ;;  %v938_v62 = vadd.f32 %v937_v42, %v936_v51  ;;  %v959_v51 = vld [vmem:[#allocation6] sm:$0x1] }
 0x145   :  { %v914_v63 = vrot.slane %v913_v12, 2  ;;  %v901_v29 = vadd.f32 %v900_v41, %v884_v4  ;;  %v933_v61 = vrot.slane %v932_v57, 1 }
 0x146   :  { %v907_v1 = vrot.slane %v906_v27, 1  ;;  %v947_v55 = vadd.f32 %v946_v30, %v945_v34  ;;  %v939_v60 = vrot.slane %v938_v62, 2  ;;  %v925_v9 = vadd.f32 %v924_v22, %v923_v40 }
 0x147   :  { %v915_v28 = vadd.f32 %v914_v63, %v913_v12  ;;  %v934_v31 = vadd.f32 %v933_v61, %v932_v57  ;;  %v1302_v40 = vmov 1966171168  }
 0x148   :  { %v908_v3 = vadd.f32 %v907_v1, %v906_v27  ;;  %v948_v0 = vrot.slane %v947_v55, 2  ;;  %v940_v23 = vadd.f32 %v939_v60, %v938_v62  ;;  %v1047_v50 = vunpack.c.l.s4 %v1302_v40  ;;  %v963_v27 = vld [vmem:[#allocation7] sm:$0x1] }
 0x149   :  { %v916_v7 = vrot.slane %v915_v28, 1 }
 0x14a   :  { %v909_v35 = vadd.f32 %v908_v3, %v892_v52  ;;  %v949_v15 = vadd.f32 %v948_v0, %v947_v55  ;;  %v941_v19 = vrot.slane %v940_v23, 1  ;;  %v1048_v12 = vunpack.c.0.s8 %v1047_v50 }
 0x14b   :  { %v917_v11 = vadd.f32 %v916_v7, %v915_v28 }
 0x14c   :  { %v926_v16 = vadd.f32 %v925_v9, %v909_v35  ;;  %v950_v2 = vrot.slane %v949_v15, 1  ;;  %v942_v36 = vadd.f32 %v941_v19, %v940_v23  ;;  %v1051_v41 = vsub.s32 %v1048_v12, %v1371_v5 }
 0x14d   :  { %v918_v56 = vadd.f32 %v917_v11, %v901_v29 }
 0x14e   :  { %v951_v14 = vadd.f32 %v950_v2, %v949_v15  ;;  %v943_v32 = vadd.f32 %v942_v36, %v926_v16 }
 0x14f   :  { %v935_v13 = vadd.f32 %v934_v31, %v918_v56 }
 0x150   :  { %v954_v43 = vmul.f32 0.03125, %v943_v32 }
 0x151   :  { %v952_v38 = vadd.f32 %v951_v14, %v935_v13 }
 0x152   :  { %v956_v45 = vmul.f32 %v954_v43, %v954_v43 }
 0x153   :  { %v955_v44 = vmul.f32 0.03125, %v952_v38 }
 0x155   :  { %v957_v18 = vsub.f32 %v955_v44, %v956_v45 }
 0x157   :  { %v958_v47 = vmax.f32 %v957_v18, 0.0 }
 0x159   :  { %v960_v48 = vadd.f32 1e-05, %v958_v47 }
 0x15b   :  { %1207 = vrsqrt.f32 %v960_v48 }
 0x168   :  { %v1208_v53 = vpop.eup %1207 }
 0x169   :  { %v962_v4 = vmul.f32 %v1208_v53, %v959_v51 }
 0x16b   :  { %v964_v42 = vmul.f32 %v962_v4, %v954_v43  ;;  %v970_v34 = vrot.slane %v962_v4, %v1374_v6 }
 0x16d   :  { %v965_v57 = vsub.f32 %v963_v27, %v964_v42  ;;  %v972_v63 = vmul.f32 %v970_v34, %v1396_v21  ;;  %v980_v30 = vmul.f32 %v970_v34, %v1424_v33  ;;  %v982_v52 = vmul.f32 %v970_v34, %v1410_v26 }
 0x16e   :  { %v984_v22 = vmul.f32 %v970_v34, %v1433_v39  ;;  %v986_v1 = vmul.f32 %v970_v34, %v1450_v54  ;;  %v988_v62 = vmul.f32 %v970_v34, %v1473_v37  ;;  %v990_v28 = vmul.f32 %v970_v34, %v1455_v59 }
 0x16f   :  { %v977_v55 = vrot.slane %v965_v57, %v1374_v6  ;;  %v992_v3 = vmul.f32 %v970_v34, %v1492_v58  ;;  %v994_v5 = vmul.f32 %v970_v34, %v1507_v24  ;;  %v996_v21 = vmul.f32 %v970_v34, %v1528_v46 }
 0x170   :  { %v998_v33 = vmul.f32 %v970_v34, %v1511_v10  ;;  %v1000_v26 = vmul.f32 %v970_v34, %v1537_v20  ;;  %v1002_v39 = vmul.f32 %v970_v34, %v1549_v25  ;;  %v1004_v54 = vmul.f32 %v970_v34, %v1560_v49 }
 0x171   :  { %v979_v60 = vadd.f32 %v977_v55, %v972_v63  ;;  %v981_v37 = vadd.f32 %v980_v30, %v977_v55  ;;  %v983_v29 = vadd.f32 %v982_v52, %v977_v55  ;;  %v985_v59 = vadd.f32 %v984_v22, %v977_v55 }
 0x172   :  { %v987_v61 = vadd.f32 %v986_v1, %v977_v55  ;;  %v989_v6 = vadd.f32 %v988_v62, %v977_v55  ;;  %v991_v7 = vadd.f32 %v990_v28, %v977_v55  ;;  %v993_v58 = vadd.f32 %v992_v3, %v977_v55 }
 0x173   :  { %v995_v0 = vadd.f32 %v994_v5, %v977_v55  ;;  %v997_v24 = vadd.f32 %v996_v21, %v977_v55  ;;  %v999_v9 = vadd.f32 %v998_v33, %v977_v55  ;;  %v1001_v46 = vadd.f32 %v1000_v26, %v977_v55 }
 0x174   :  { %v1003_v35 = vadd.f32 %v1002_v39, %v977_v55  ;;  %v1005_v10 = vadd.f32 %v1004_v54, %v977_v55  ;;  %v1006_v20 = vmul.f32 %v970_v34, %v1557_v8  ;;  %v1008_v25 = vmul.f32 %v970_v34, %v1575_v17 }
 0x175   :  { %v1191_v23 = vpack.c.bf16 %v981_v37, %v979_v60  ;;  %v1192_v49 = vpack.c.bf16 %v985_v59, %v983_v29  ;;  %v1193_v11 = vpack.c.bf16 %v989_v6, %v987_v61  ;;  %v1194_v15 = vpack.c.bf16 %v993_v58, %v991_v7 }
 0x176   :  { %v1007_v16 = vadd.f32 %v1006_v20, %v977_v55  ;;  %v1009_v19 = vadd.f32 %v1008_v25, %v977_v55  ;;  %v1195_v31 = vpack.c.bf16 %v997_v24, %v995_v0  ;;  %v1196_v56 = vpack.c.bf16 %v1001_v46, %v999_v9 }
 0x177   :  { %v1052_v2 = vrot.slane %v1191_v23, %v1051_v41  ;;  %v1059_v36 = vrot.slane %v1192_v49, %v1051_v41  ;;  %v1066_v13 = vrot.slane %v1193_v11, %v1051_v41  ;;  %v1073_v14 = vrot.slane %v1194_v15, %v1051_v41 }
 0x178   :  { %v1197_v32 = vpack.c.bf16 %v1005_v10, %v1003_v35  ;;  %v1198_v38 = vpack.c.bf16 %v1009_v19, %v1007_v16  ;;  %v1101_v43 = vrot.slane %v1195_v31, %v1051_v41  ;;  %v1108_v44 = vrot.slane %v1196_v56, %v1051_v41 }
 0x179   :  { %v1074_v45 = vcombine.low %v1052_v2, %v1059_v36  ;;  %v1075_v8 = vcombine.low %v1066_v13, %v1073_v14 }
 0x17a   :  { %v1115_v18 = vrot.slane %v1197_v32, %v1051_v41  ;;  %v1122_v17 = vrot.slane %v1198_v38, %v1051_v41  ;;  %v1123_v47 = vcombine.low %v1101_v43, %v1108_v44 }
 0x17b   :  { %v1082_v48 = vrot.slane %v1074_v45, %v1051_v41  ;;  %v1089_v40 = vrot.slane %v1075_v8, %v1051_v41 }
 0x17c   :  { %v1124_v50 = vcombine.low %v1115_v18, %v1122_v17  ;;  %v1131_v51 = vrot.slane %v1123_v47, %v1051_v41 }
 0x17d   :  { %v1090_v53 = vcombine.low %v1082_v48, %v1089_v40 }
 0x17e   :  { %v1138_v12 = vrot.slane %v1124_v50, %v1051_v41 }
 0x17f   :  { %1142 = vst [vmem:[%s1613_s5] sm:$0xff] %v1090_v53 }
 0x180   :  { %v1139_v4 = vcombine.low %v1131_v51, %v1138_v12 }
 0x182   :  { %1143 = vst [vmem:[%s1613_s5 + $0x8] sm:$0xff] %v1139_v4 }
 0x183   :  { %1148 = vsyncpa [#allocation3], 1 }
 0x184   :  { %1149 = vsyncpa [#allocation5], 1 }
 0x185   :  { %1150 = vsyncpa [#allocation8], 1 }

// kernel: generator_forward.5
= control target key start
LH: loop header
LB: loop body
LE: loop exit
PB: predicated region body
PF: predicated region fallthrough
CT: control target
= control target key end

     0   :  { %11 = vsyncpa [#allocation3], 0  ;;  %s3225_s18 = smov [#allocation2]   ;;  %s3712_s0 = inlined_call_operand.vmem [shape: bf16[2,4,4,128], index: 0, kind: input, shape index: {}]   ;;  %s3713_s1 = inlined_call_operand.hbm [shape: bf16[4,512,128], index: 1, kind: input, shape index: {}]   ;;  %s3714_s2 = inlined_call_operand.vmem [shape: f32[1,128], index: 2, kind: input, shape index: {}, may-alias: {2,3}]   ;;  %s3715_s3 = inlined_call_operand.vmem [shape: f32[1,128], index: 3, kind: input, shape index: {}, may-alias: {2,3}]   ;;  %s3716_s4 = inlined_call_operand.vmem [shape: bf16[2,4,2,4,256], index: 4, kind: output, shape index: {0}]   ;;  %s3717_s5 = inlined_call_operand.vmem [shape: f32[1,2,128], index: 5, kind: output, shape index: {1}]  }
   0x1   :  { %s19_s19 = sshll.u32 %s3225_s18, 4  ;;  %s20_s19 = int_to_ptr.vmem [resolvable:$true] %s19_s19 }
   0x2   :  { %s3211_s20 = scalar_lea.vmem %s20_s19, 16384  ;;  %p3216_p1 = scmp.lt.s32.totalorder %s20_s19, %s20_s19 }
   0x3   :  { %p3212_p0 = scmp.ne.s32.totalorder %s20_s19, %s3211_s20  ;;  %p3217_p2 = scmp.lt.s32.totalorder %s3211_s20, %s3211_s20 }
   0x5   :  { %p3218_p3 = por %p3217_p2, %p3216_p1 }
   0x7   :  { %p3219_p4 = pnand %p3218_p3, %p3212_p0 }
   0x9   :  { %3222 = shalt.err (!%p3219_p4)
}
   0xa   :  { %s3226_s2 = smov 64   ;;  %s3227_s21 = smov 4  }
   0xb   :  { %25 = dma.hbm_to_vmem [thread:$0]  %s3713_s1, 16384, %s20_s19, [#allocation3], %s3226_s2, %s3226_s2, %s3227_s21  }
   0xc   :  { %3223 = dma.done.wait [#allocation3], 16384  }
   0xd   :  { %3224 = vsyncadd [#allocation3], 4294950912  ;;  %v3075_v0 = vld [vmem:[#allocation2 + $0x78] sm:$0xff]   ;;  %v3079_v4 = vld [vmem:[#allocation2 + $0x70] sm:$0xff]   ;;  %vm171_vm0 = vsmask.f32 256  ;;  %v269_v28 = vlaneseq }
   0xe   :  { %v3076_v1 = vld [vmem:[#allocation2 + $0xf8] sm:$0xff]   ;;  %2846 = vmatprep.subr.bf16.mxu0 %v3075_v0  ;;  %v3080_v5 = vld [vmem:[#allocation2 + $0xf0] sm:$0xff]   ;;  %v3083_v8 = vld [vmem:[#allocation2 + $0x68] sm:$0xff]   ;;  %vm182_vm1 = vsmask.f32 2304  ;;  %vm170_vm2 = vcmask 1040384  }
   0xf   :  { %v3077_v2 = vld [vmem:[#allocation2 + $0x38] sm:$0xff]   ;;  %2874 = vmatprep.subr.bf16.mxu1 %v3076_v1  ;;  %v3081_v6 = vld [vmem:[#allocation2 + $0x30] sm:$0xff]   ;;  %v3084_v9 = vld [vmem:[#allocation2 + $0xe8] sm:$0xff]   ;;  %vm181_vm3 = vcmask 1042432   ;;  %v3228_v32 = vmov 0   ;;  %v270_v35 = vshrl.u32 %v269_v28, 7 }
  0x10   :  { %v3078_v3 = vld [vmem:[#allocation2 + $0xb8] sm:$0xff]   ;;  %2847 = vmatpush3.bf16.msra.mxu0 %v3077_v2  ;;  %v3082_v7 = vld [vmem:[#allocation2 + $0xb0] sm:$0xff]   ;;  %v3085_v10 = vld [vmem:[#allocation2 + $0x28] sm:$0xff]   ;;  %v197_v33 = vrot.slane %v3228_v32, 1  ;;  %v3229_v46 = vmov 1983009808  }
  0x11   :  { %2875 = vmatpush3.bf16.msra.mxu1 %v3078_v3  ;;  %2848 = vmatprep.subr.bf16.mxu0 %v3079_v4  ;;  %v3086_v11 = vld [vmem:[#allocation2 + $0xa8] sm:$0xff]   ;;  %v3087_v12 = vld [vmem:[#allocation2 + $0x60] sm:$0xff]   ;;  %v3091_v16 = vld [vmem:[#allocation2 + $0x58] sm:$0xff]   ;;  %v267_v47 = vunpack.c.l.s4 %v3229_v46  ;;  %vm848_vm6 = vsmask.f32 1280 }
  0x12   :  { %2876 = vmatprep.subr.bf16.mxu1 %v3080_v5  ;;  %v3088_v13 = vld [vmem:[#allocation2 + $0xe0] sm:$0xff]   ;;  %v3092_v17 = vld [vmem:[#allocation2 + $0xd8] sm:$0xff]   ;;  %v3095_v20 = vld [vmem:[#allocation2 + $0x50] sm:$0xff]   ;;  %v264_v1 = vcombine.low %v3228_v32, %v197_v33  ;;  %vm849_vm7 = vsmask.f32 3336 }
  0x13   :  { %v3089_v14 = vld [vmem:[#allocation2 + $0x20] sm:$0xff]   ;;  %v3093_v18 = vld [vmem:[#allocation2 + $0x18] sm:$0xff]   ;;  %v3096_v21 = vld [vmem:[#allocation2 + $0xd0] sm:$0xff]   ;;  %v268_v61 = vunpack.c.0.s8 %v267_v47  ;;  %vm851_vm8 = vsmask.f32 5392 }
  0x14   :  { %2849 = vmatpush3.bf16.msra.mxu0 %v3081_v6  ;;  %v3090_v15 = vld [vmem:[#allocation2 + $0xa0] sm:$0xff]   ;;  %v3094_v19 = vld [vmem:[#allocation2 + $0x98] sm:$0xff]   ;;  %v3097_v22 = vld [vmem:[#allocation2 + $0x10] sm:$0xff]   ;;  %vm853_vm9 = vsmask.f32 7448 }
  0x15   :  { %2877 = vmatpush3.bf16.msra.mxu1 %v3082_v7  ;;  %2850 = vmatprep.subr.bf16.mxu0 %v3083_v8  ;;  %v3098_v23 = vld [vmem:[#allocation2 + $0x90] sm:$0xff]   ;;  %v3099_v24 = vld [vmem:[#allocation2 + $0x48] sm:$0xff]   ;;  %v3103_v29 = vld [vmem:[#allocation2 + $0x40] sm:$0xff]  }
  0x16   :  { %2878 = vmatprep.subr.bf16.mxu1 %v3084_v9  ;;  %v3100_v25 = vld [vmem:[#allocation2 + $0xc8] sm:$0xff]   ;;  %v3104_v30 = vld [vmem:[#allocation2 + $0xc0] sm:$0xff]   ;;  %v3107_v48 = vld [vmem:[#allocation2 + $0x178] sm:$0xff]  }
  0x17   :  { %v3101_v26 = vld [vmem:[#allocation2 + $0x8] sm:$0xff]   ;;  %v3105_v31 = vld [vmem:[#allocation2] sm:$0xff]   ;;  %vm3274_vm4 = vmand %vm170_vm2, %vm171_vm0 }
  0x18   :  { %2851 = vmatpush3.bf16.msra.mxu0 %v3085_v10  ;;  %v3102_v27 = vld [vmem:[#allocation2 + $0x88] sm:$0xff]   ;;  %v3106_v34 = vld [vmem:[#allocation2 + $0x80] sm:$0xff]   ;;  %v3108_v52 = vld [vmem:[#allocation2 + $0x1f8] sm:$0xff]  }
  0x19   :  { %2879 = vmatpush3.bf16.msra.mxu1 %v3086_v11  ;;  %2852 = vmatprep.subr.bf16.mxu0 %v3087_v12  ;;  %v2662_v36 = vld.sshfl [vmem:[%s3712_s0] sm:$0x3 pattern:$0x76325410]  ;;  %vm3283_vm5 = vmand %vm181_vm3, %vm182_vm1 }
  0x1a   :  { %2880 = vmatprep.subr.bf16.mxu1 %v3088_v13  ;;  %v2663_v37 = vld.sshfl [vmem:[%s3712_s0 + $0x2] sm:$0x3 pattern:$0x76325410]  ;;  %v107_v38 = vshrl.u32 %v2662_v36, 16  ;;  %v110_v39 = vshll.u32 %v2662_v36, 16  ;;  %v3299_v13 = vsub.s32 %v268_v61, %v270_v35  ;;  %vm3400_vm10 = vmor %vm848_vm6, %vm849_vm7 }
  0x1b   :  { %v2664_v40 = vld.sshfl [vmem:[%s3712_s0 + $0x4] sm:$0x3 pattern:$0x76325410]  ;;  %v114_v41 = vshrl.u32 %v2663_v37, 16  ;;  %v117_v42 = vshll.u32 %v2663_v37, 16  ;;  %vm3446_vm11 = vmor %vm3400_vm10, %vm851_vm8 }
  0x1c   :  { %2853 = vmatpush3.bf16.msra.mxu0 %v3089_v14  ;;  %v109_v43 = vrot.slane %v107_v38, 7  ;;  %v121_v44 = vshrl.u32 %v2664_v40, 16  ;;  %v124_v45 = vshll.u32 %v2664_v40, 16  ;;  %vm3465_vm12 = vmor %vm3446_vm11, %vm853_vm9 }
  0x1d   :  { %2881 = vmatpush3.bf16.msra.mxu1 %v3090_v15  ;;  %2854 = vmatprep.subr.bf16.mxu0 %v3091_v16  ;;  %v116_v49 = vrot.slane %v114_v41, 7  ;;  %v2665_v51 = vld.sshfl [vmem:[%s3712_s0 + $0x6] sm:$0x3 pattern:$0x76325410] }
  0x1e   :  { %2882 = vmatprep.subr.bf16.mxu1 %v3092_v17  ;;  %v112_v53 = vor.u32 %v110_v39, %v109_v43  ;;  %v123_v54 = vrot.slane %v121_v44, 7  ;;  %v128_v56 = vshrl.u32 %v2665_v51, 16  ;;  %v131_v57 = vshll.u32 %v2665_v51, 16 }
  0x1f   :  { %v119_v58 = vor.u32 %v117_v42, %v116_v49  ;;  %v2667_v28 = vld.sshfl [vmem:[%s3712_s0 + $0xa] sm:$0x3 pattern:$0x76325410] }
  0x20   :  { %2855 = vmatpush3.bf16.msra.mxu0 %v3093_v18  ;;  %v126_v59 = vor.u32 %v124_v45, %v123_v54  ;;  %v173_v60 = vsel %vm3274_vm4, 0, %v112_v53  ;;  %v130_v62 = vrot.slane %v128_v56, 7  ;;  %v142_v35 = vshrl.u32 %v2667_v28, 16 }
  0x21   :  { %2883 = vmatpush3.bf16.msra.mxu1 %v3094_v19  ;;  %2856 = vmatprep.subr.bf16.mxu0 %v3095_v20  ;;  %v174_v63 = vsel %vm3274_vm4, 0, %v119_v58  ;;  %v184_v0 = vsel %vm3283_vm5, %v173_v60, 0  ;;  %v145_v45 = vshll.u32 %v2667_v28, 16  ;;  %v3111_v60 = vld [vmem:[#allocation2 + $0x170] sm:$0xff]  }
  0x22   :  { %2884 = vmatprep.subr.bf16.mxu1 %v3096_v21  ;;  %v175_v2 = vsel %vm3274_vm4, 0, %v126_v59  ;;  %v185_v3 = vsel %vm3283_vm5, %v174_v63, 0  ;;  %v200_v4 = vshrl.u32 %v184_v0, 16  ;;  %v202_v5 = vshll.u32 %v184_v0, 16  ;;  %v3109_v59 = vld [vmem:[#allocation2 + $0x138] sm:$0xff]  }
  0x23   :  { %v186_v6 = vsel %vm3283_vm5, %v175_v2, 0  ;;  %v207_v7 = vshrl.u32 %v185_v3, 16  ;;  %v209_v8 = vshll.u32 %v185_v3, 16  ;;  %v133_v9 = vor.u32 %v131_v57, %v130_v62 }
  0x24   :  { %2857 = vmatpush3.bf16.msra.mxu0 %v3097_v22  ;;  %v204_v10 = vrot.slane %v202_v5, 1  ;;  %v214_v11 = vshrl.u32 %v186_v6, 16  ;;  %v216_v12 = vshll.u32 %v186_v6, 16  ;;  %v144_v47 = vrot.slane %v142_v35, 7  ;;  %v3110_v5 = vld [vmem:[#allocation2 + $0x1b8] sm:$0xff]  }
  0x25   :  { %2885 = vmatpush3.bf16.msra.mxu1 %v3098_v23  ;;  %2858 = vmatprep.subr.bf16.mxu0 %v3099_v24  ;;  %v211_v14 = vrot.slane %v209_v8, 1  ;;  %v176_v15 = vsel %vm3274_vm4, 0, %v133_v9  ;;  %v3306_v24 = vrot.slane %v264_v1, %v3299_v13  ;;  %v2669_v1 = vld.sshfl [vmem:[%s3712_s0 + $0xe] sm:$0x3 pattern:$0x76325410] }
  0x26   :  { %2886 = vmatprep.subr.bf16.mxu1 %v3100_v25  ;;  %v205_v16 = vor.u32 %v204_v10, %v200_v4  ;;  %v218_v17 = vrot.slane %v216_v12, 1  ;;  %v187_v18 = vsel %vm3283_vm5, %v176_v15, 0  ;;  %v2666_v25 = vld.sshfl [vmem:[%s3712_s0 + $0x8] sm:$0x3 pattern:$0x76325410]  ;;  %v147_v9 = vor.u32 %v145_v45, %v144_v47 }
  0x27   :  { %v212_v19 = vor.u32 %v211_v14, %v207_v7  ;;  %v242_v20 = vshrl.u32 %v187_v18, 16  ;;  %v244_v21 = vshll.u32 %v187_v18, 16  ;;  %v138_v39 = vshll.u32 %v2666_v25, 16  ;;  %v3112_v7 = vld [vmem:[#allocation2 + $0x1f0] sm:$0xff]   ;;  %v3119_v45 = vld [vmem:[#allocation2 + $0x160] sm:$0xff]  }
  0x28   :  { %2859 = vmatpush3.bf16.msra.mxu0 %v3101_v26  ;;  %v219_v22 = vor.u32 %v218_v17, %v214_v11  ;;  %v265_v23 = vcombine.low %v184_v0, %v205_v16  ;;  %v3113_v8 = vld [vmem:[#allocation2 + $0x130] sm:$0xff]  }
  0x29   :  { %2887 = vmatpush3.bf16.msra.mxu1 %v3102_v27  ;;  %2860 = vmatprep.subr.bf16.mxu0 %v3103_v29  ;;  %v281_v26 = vcombine.low %v185_v3, %v212_v19  ;;  %v246_v27 = vrot.slane %v244_v21, 1  ;;  %v135_v29 = vshrl.u32 %v2666_v25, 16  ;;  %v178_v19 = vsel %vm3274_vm4, 0, %v147_v9  ;;  %v3115_v21 = vld [vmem:[#allocation2 + $0x168] sm:$0xff]  }
  0x2a   :  { %2888 = vmatprep.subr.bf16.mxu1 %v3104_v30  ;;  %v3315_v30 = vrot.slane %v265_v23, %v3299_v13  ;;  %v189_v23 = vsel %vm3283_vm5, %v178_v19, 0 }
  0x2b   :  { %v3318_v32 = vrot.slane %v281_v26, %v3299_v13  ;;  %v247_v33 = vor.u32 %v246_v27, %v242_v20  ;;  %v137_v38 = vrot.slane %v135_v29, 7  ;;  %v156_v27 = vshrl.u32 %v2669_v1, 16 }
  0x2c   :  { %2861 = vmatpush3.bf16.msra.mxu0 %v3105_v31  ;;  %v290_v31 = vcombine.low %v186_v6, %v219_v22  ;;  %v3325_v36 = vcombine.low %v3306_v24, %v3315_v30  ;;  %v3114_v22 = vld [vmem:[#allocation2 + $0x1b0] sm:$0xff]  }
  0x2d   :  { %2889 = vmatpush3.bf16.msra.mxu1 %v3106_v34  ;;  %2902 = vmatprep.subr.bf16.mxu0 %v3107_v48  ;;  %v2668_v34 = vld.sshfl [vmem:[%s3712_s0 + $0xc] sm:$0x3 pattern:$0x76325410]  ;;  %v289_v40 = vcombine.low %v3315_v30, %v3318_v32  ;;  %v299_v41 = vcombine.low %v187_v18, %v247_v33  ;;  %v230_v33 = vshll.u32 %v189_v23, 16  ;;  %v841_v19 = vcombine.high %v3315_v30, %v3318_v32 }
  0x2e   :  { %2930 = vmatprep.subr.bf16.mxu1 %v3108_v52  ;;  %v3328_v37 = vrot.slane %v290_v31, %v3299_v13  ;;  %v418_v43 = vrot.slane %v3325_v36, %v3299_v13  ;;  %v856_v44 = vshrl.u32 %v3325_v36, 16  ;;  %v149_v48 = vshrl.u32 %v2668_v34, 16 }
  0x2f   :  { %v3340_v46 = vrot.slane %v299_v41, %v3299_v13  ;;  %v859_v51 = vshll.u32 %v3325_v36, 16  ;;  %v140_v52 = vor.u32 %v138_v39, %v137_v38  ;;  %v152_v53 = vshll.u32 %v2668_v34, 16  ;;  %v3116_v34 = vld [vmem:[#allocation2 + $0x1e8] sm:$0xff]  }
  0x30   :  { %v3334_v42 = vcombine.low %v3318_v32, %v3328_v37  ;;  %v425_v56 = vrot.slane %v289_v40, %v3299_v13  ;;  %v870_v57 = vshrl.u32 %v289_v40, 16  ;;  %v873_v58 = vshll.u32 %v289_v40, 16 }
  0x31   :  { %v307_v54 = vcombine.low %v3328_v37, %v3340_v46  ;;  %v3351_v62 = vrot.slane %v856_v44, 6  ;;  %v151_v10 = vrot.slane %v149_v48, 7  ;;  %v177_v11 = vsel %vm3274_vm4, 0, %v140_v52  ;;  %v3117_v44 = vld [vmem:[#allocation2 + $0x128] sm:$0xff]  }
  0x32   :  { %v3344_v49 = vrot.slane %v3334_v42, %v3299_v13  ;;  %v884_v63 = vshrl.u32 %v3334_v42, 16  ;;  %v887_v2 = vshll.u32 %v3334_v42, 16  ;;  %v872_v14 = vrot.slane %v870_v57, 6 }
  0x33   :  { %v439_v3 = vrot.slane %v307_v54, %v3299_v13  ;;  %v898_v4 = vshrl.u32 %v307_v54, 16  ;;  %v901_v6 = vshll.u32 %v307_v54, 16  ;;  %v875_v15 = vrot.slane %v873_v58, 7  ;;  %v3120_v58 = vld [vmem:[#allocation2 + $0x1e0] sm:$0xff]  }
  0x34   :  { %v441_v61 = vcombine.high %v418_v43, %v3344_v49  ;;  %v440_v0 = vcombine.low %v418_v43, %v3344_v49  ;;  %v154_v18 = vor.u32 %v152_v53, %v151_v10  ;;  %v188_v20 = vsel %vm3283_vm5, %v177_v11, 0  ;;  %v3118_v53 = vld [vmem:[#allocation2 + $0x1a8] sm:$0xff]  }
  0x35   :  { %v3362_v12 = vcombine.high %v425_v56, %v439_v3  ;;  %v3364_v16 = vcombine.low %v425_v56, %v439_v3  ;;  %v3366_v17 = vrot.slane %v898_v4, 6  ;;  %v221_v25 = vshrl.u32 %v188_v20, 16 }
  0x36   :  { %712 = vmatprep.mubr.bf16.mxu0 %v441_v61  ;;  %v223_v26 = vshll.u32 %v188_v20, 16  ;;  %v903_v28 = vrot.slane %v901_v6, 7  ;;  %v179_v29 = vsel %vm3274_vm4, 0, %v154_v18  ;;  %v228_v31 = vshrl.u32 %v189_v23, 16 }
  0x37   :  { %713 = vmatmul.mubr.bf16.vlgmr.msra.gmra.mxu0 %v440_v0  ;;  %761 = vmatprep.mubr.bf16.mxu1 %v3362_v12  ;;  %v190_v35 = vsel %vm3283_vm5, %v179_v29, 0  ;;  %v158_v38 = vrot.slane %v156_v27, 7  ;;  %v159_v39 = vshll.u32 %v2669_v1, 16  ;;  %v3380_v40 = vrot.slane %v859_v51, 7 }
  0x38   :  { %2903 = vmatpush3.bf16.msra.mxu0 %v3109_v59  ;;  %762 = vmatmul.mubr.bf16.vlgmr.msra.gmra.mxu1 %v3364_v16  ;;  %v225_v36 = vrot.slane %v223_v26, 1  ;;  %v232_v41 = vrot.slane %v230_v33, 1  ;;  %v235_v42 = vshrl.u32 %v190_v35, 16  ;;  %v237_v43 = vshll.u32 %v190_v35, 16 }
  0x39   :  { %2904 = vmatprep.subr.bf16.mxu0 %v3111_v60  ;;  %2931 = vmatpush3.bf16.msra.mxu1 %v3110_v5  ;;  %v876_v47 = vor.u32 %v875_v15, %v872_v14  ;;  %v161_v52 = vor.u32 %v159_v39, %v158_v38  ;;  %v3382_v54 = vrot.slane %v884_v63, 6  ;;  %v3384_v51 = vrot.slane %v887_v2, 7  ;;  %v3121_v63 = vld [vmem:[#allocation2 + $0x120] sm:$0xff]  }
  0x3a   :  { %2932 = vmatprep.subr.bf16.mxu1 %v3112_v7  ;;  %v226_v48 = vor.u32 %v225_v36, %v221_v25  ;;  %v233_v56 = vor.u32 %v232_v41, %v228_v31  ;;  %v239_v57 = vrot.slane %v237_v43, 1  ;;  %v904_v59 = vor.u32 %v903_v28, %v3366_v17  ;;  %v3122_v7 = vld [vmem:[#allocation2 + $0x1a0] sm:$0xff]   ;;  %v3124_v17 = vld [vmem:[#allocation2 + $0x1d8] sm:$0xff]   ;;  %v3128_v36 = vld [vmem:[#allocation2 + $0x1d0] sm:$0xff]  }
  0x3b   :  { %v180_v61 = vsel %vm3274_vm4, 0, %v161_v52  ;;  %v1963_v2 = vcombine.high %v3340_v46, %v3306_v24  ;;  %v3393_v4 = vrot.slane %v876_v47, 2  ;;  %v862_v9 = vor.u32 %v3380_v40, %v3351_v62  ;;  %v3126_v28 = vld [vmem:[#allocation2 + $0x198] sm:$0xff]  }
  0x3c   :  { %2905 = vmatpush3.bf16.msra.mxu0 %v3113_v8  ;;  %v308_v60 = vcombine.low %v188_v20, %v226_v48  ;;  %v240_v0 = vor.u32 %v239_v57, %v235_v42  ;;  %v317_v1 = vcombine.low %v189_v23, %v233_v56  ;;  %v191_v3 = vsel %vm3283_vm5, %v180_v61, 0  ;;  %v3123_v8 = vld [vmem:[#allocation2 + $0x158] sm:$0xff]   ;;  %v3130_v57 = vld [vmem:[#allocation2 + $0x190] sm:$0xff]   ;;  %v3132_v61 = vld [vmem:[#allocation2 + $0x1c8] sm:$0xff]  }
  0x3d   :  { %2906 = vmatprep.subr.bf16.mxu0 %v3115_v21  ;;  %2933 = vmatpush3.bf16.msra.mxu1 %v3114_v22  ;;  %v249_v6 = vshrl.u32 %v191_v3, 16  ;;  %v251_v50 = vshll.u32 %v191_v3, 16  ;;  %v840_v18 = vcombine.high %v3306_v24, %v3315_v30  ;;  %v3415_v20 = vrot.slane %v904_v59, 2  ;;  %v3125_v22 = vld [vmem:[#allocation2 + $0x118] sm:$0xff]   ;;  %v3127_v30 = vld [vmem:[#allocation2 + $0x150] sm:$0xff]  }
  0x3e   :  { %2934 = vmatprep.subr.bf16.mxu1 %v3116_v34  ;;  %v3396_v5 = vrot.slane %v308_v60, %v3299_v13  ;;  %v3407_v10 = vrot.slane %v317_v1, %v3299_v13  ;;  %v326_v11 = vcombine.low %v190_v35, %v240_v0  ;;  %v842_v23 = vcombine.high %v3318_v32, %v3328_v37  ;;  %v3174_v0 = vld [vmem:[#allocation2 + $0x3b8] sm:$0xff]  }
  0x3f   :  { %v253_v15 = vrot.slane %v251_v50, 1  ;;  %v843_v29 = vcombine.high %v3328_v37, %v3340_v46  ;;  %v863_v39 = vrot.slane %v862_v9, 2  ;;  %v890_v40 = vor.u32 %v3384_v51, %v3382_v54 }
  0x40   :  { %2907 = vmatpush3.bf16.msra.mxu0 %v3117_v44  ;;  %v316_v14 = vcombine.low %v3306_v24, %v3396_v5  ;;  %v3418_v62 = vrot.slane %v326_v11, %v3299_v13  ;;  %v325_v21 = vcombine.low %v3396_v5, %v3407_v10  ;;  %v3129_v44 = vld [vmem:[#allocation2 + $0x110] sm:$0xff]   ;;  %v844_v52 = vcombine.high %v3306_v24, %v3396_v5 }
  0x41   :  { %2908 = vmatprep.subr.bf16.mxu0 %v3119_v45  ;;  %2935 = vmatpush3.bf16.msra.mxu1 %v3118_v53  ;;  %v254_v27 = vor.u32 %v253_v15, %v249_v6  ;;  %v845_v53 = vcombine.high %v3396_v5, %v3407_v10  ;;  %v865_v51 = vshll.u32 %v840_v18, 16  ;;  %v879_v59 = vshll.u32 %v841_v19, 16  ;;  %v3133_v6 = vld [vmem:[#allocation2 + $0x108] sm:$0xff]   ;;  %v3135_v18 = vld [vmem:[#allocation2 + $0x140] sm:$0xff]  }
  0x42   :  { %2936 = vmatprep.subr.bf16.mxu1 %v3120_v58  ;;  %v912_v25 = vshrl.u32 %v316_v14, 16  ;;  %v915_v26 = vshll.u32 %v316_v14, 16  ;;  %v3428_v31 = vcombine.low %v3407_v10, %v3418_v62  ;;  %v454_v33 = vrot.slane %v316_v14, %v3299_v13  ;;  %v3131_v58 = vld [vmem:[#allocation2 + $0x148] sm:$0xff]  }
  0x43   :  { %v926_v34 = vshrl.u32 %v325_v21, 16  ;;  %v929_v35 = vshll.u32 %v325_v21, 16  ;;  %v335_v32 = vcombine.low %v191_v3, %v254_v27  ;;  %v461_v48 = vrot.slane %v325_v21, %v3299_v13  ;;  %v3134_v15 = vld [vmem:[#allocation2 + $0x188] sm:$0xff]  }
  0x44   :  { %2909 = vmatpush3.bf16.msra.mxu0 %v3121_v63  ;;  %v3431_v38 = vrot.slane %v912_v25, 6  ;;  %v3437_v37 = vrot.slane %v3428_v31, %v3299_v13  ;;  %v917_v41 = vrot.slane %v915_v26, 7  ;;  %v891_v1 = vrot.slane %v890_v40, 2 }
  0x45   :  { %2910 = vmatprep.subr.bf16.mxu0 %v3123_v8  ;;  %2937 = vmatpush3.bf16.msra.mxu1 %v3122_v7  ;;  %v3439_v42 = vrot.slane %v926_v34, 6  ;;  %v3441_v43 = vrot.slane %v929_v35, 7  ;;  %v3451_v47 = vrot.slane %v335_v32, %v3299_v13  ;;  %v893_v3 = vshll.u32 %v842_v23, 16  ;;  %v3137_v35 = vld [vmem:[#allocation2 + $0x100] sm:$0xff]  }
  0x46   :  { %2938 = vmatprep.subr.bf16.mxu1 %v3124_v17  ;;  %v477_v54 = vcombine.high %v454_v33, %v3437_v37  ;;  %v476_v56 = vcombine.low %v454_v33, %v3437_v37  ;;  %v907_v63 = vshll.u32 %v843_v29, 16  ;;  %v867_v50 = vrot.slane %v865_v51, 7 }
  0x47   :  { %v343_v60 = vcombine.low %v3418_v62, %v3451_v47  ;;  %v881_v7 = vrot.slane %v879_v59, 7  ;;  %v846_v8 = vcombine.high %v3407_v10, %v3418_v62  ;;  %v918_v55 = vor.u32 %v917_v41, %v3431_v38  ;;  %v3142_v10 = vld [vmem:[#allocation2 + $0x2b8] sm:$0xff]  }
  0x48   :  { %2911 = vmatpush3.bf16.msra.mxu0 %v3125_v22  ;;  %720 = vmatprep.mubr.bf16.mxu0 %v477_v54  ;;  %v895_v17 = vrot.slane %v893_v3, 7  ;;  %v868_v19 = vsel %vm3465_vm12, %v863_v39, %v867_v50  ;;  %v909_v22 = vrot.slane %v907_v63, 7  ;;  %v932_v23 = vor.u32 %v3441_v43, %v3439_v42  ;;  %v3140_v54 = vld [vmem:[#allocation2 + $0x2f8] sm:$0xff]  }
  0x49   :  { %2912 = vmatprep.subr.bf16.mxu0 %v3127_v30  ;;  %2939 = vmatpush3.bf16.msra.mxu1 %v3126_v28  ;;  %v475_v9 = vrot.slane %v343_v60, %v3299_v13  ;;  %v954_v11 = vshrl.u32 %v343_v60, 16  ;;  %v957_v14 = vshll.u32 %v343_v60, 16  ;;  %v3478_v21 = vsel %vm3465_vm12, %v3393_v4, %v881_v7  ;;  %v3136_v30 = vld [vmem:[#allocation2 + $0x1c0] sm:$0xff]   ;;  %v3141_v3 = vld [vmem:[#allocation2 + $0x238] sm:$0xff]  }
  0x4a   :  { %2940 = vmatprep.subr.bf16.mxu1 %v3128_v36  ;;  %721 = vmatmul.mubr.bf16.gmra.mxu0 %v476_v56  ;;  %v3488_v29 = vsel %vm3465_vm12, %v891_v1, %v895_v17  ;;  %v3493_v4 = vsel %vm3465_vm12, %v3415_v20, %v909_v22  ;;  %v1032_v33 = vcombine.low %v868_v19, %v3478_v21  ;;  %v919_v39 = vrot.slane %v918_v55, 2  ;;  %v3138_v20 = vld [vmem:[#allocation2 + $0x180] sm:$0xff]  }
  0x4b   :  { %v3482_v25 = vcombine.high %v461_v48, %v475_v9  ;;  %v956_v26 = vrot.slane %v954_v11, 6  ;;  %v959_v27 = vrot.slane %v957_v14, 7  ;;  %v3484_v28 = vcombine.low %v461_v48, %v475_v9  ;;  %v3139_v48 = vld [vmem:[#allocation2 + $0x278] sm:$0xff]   ;;  %v3145_v14 = vld [vmem:[#allocation2 + $0x230] sm:$0xff]  }
  0x4c   :  { %2913 = vmatpush3.bf16.msra.mxu0 %v3129_v44  ;;  %v1033_v34 = vcombine.high %v868_v19, %v3478_v21  ;;  %v1034_v36 = vcombine.low %v3488_v29, %v3493_v4  ;;  %v1035_v38 = vcombine.high %v3488_v29, %v3493_v4  ;;  %v847_v32 = vcombine.high %v3418_v62, %v3451_v47  ;;  %v3146_v19 = vld [vmem:[#allocation2 + $0x2b0] sm:$0xff]  }
  0x4d   :  { %2941 = vmatpush3.bf16.msra.mxu1 %v3130_v57  ;;  %2914 = vmatprep.subr.bf16.mxu0 %v3131_v58  ;;  %v1042_v40 = vrot.slane %v1032_v33, %v3299_v13  ;;  %v921_v42 = vshll.u32 %v844_v52, 16  ;;  %v960_v43 = vor.u32 %v959_v27, %v956_v26  ;;  %v933_v62 = vrot.slane %v932_v23, 2  ;;  %v3147_v27 = vld [vmem:[#allocation2 + $0x268] sm:$0xff]  }
  0x4e   :  { %2942 = vmatprep.subr.bf16.mxu1 %v3132_v61  ;;  %769 = vmatprep.mubr.bf16.mxu1 %v3482_v25  ;;  %v1049_v41 = vrot.slane %v1033_v34, %v3299_v13  ;;  %v1056_v44 = vrot.slane %v1034_v36, %v3299_v13  ;;  %v1063_v45 = vrot.slane %v1035_v38, %v3299_v13  ;;  %v935_v56 = vshll.u32 %v845_v53, 16  ;;  %v3143_v53 = vld [vmem:[#allocation2 + $0x270] sm:$0xff]  }
  0x4f   :  { %770 = vmatmul.mubr.bf16.gmra.mxu1 %v3484_v28  ;;  %v923_v57 = vrot.slane %v921_v42, 7  ;;  %v940_v58 = vshrl.u32 %v3428_v31, 16  ;;  %v943_v52 = vshll.u32 %v3428_v31, 16  ;;  %v949_v51 = vshll.u32 %v846_v8, 16  ;;  %v3144_v31 = vld [vmem:[#allocation2 + $0x2f0] sm:$0xff]   ;;  %v3150_v42 = vld [vmem:[#allocation2 + $0x2a8] sm:$0xff]  }
  0x50   :  { %2915 = vmatpush3.bf16.msra.mxu0 %v3133_v6  ;;  %v1064_v59 = vcombine.low %v1042_v40, %v1056_v44  ;;  %v1065_v60 = vcombine.high %v1042_v40, %v1056_v44  ;;  %v1066_v61 = vcombine.low %v1049_v41, %v1063_v45  ;;  %v1067_v1 = vcombine.high %v1049_v41, %v1063_v45  ;;  %v3152_v45 = vld [vmem:[#allocation2 + $0x2e0] sm:$0xff]  }
  0x51   :  { %2943 = vmatpush3.bf16.msra.mxu1 %v3134_v15  ;;  %2916 = vmatprep.subr.bf16.mxu0 %v3135_v18  ;;  %v924_v63 = vsel %vm3465_vm12, %v919_v39, %v923_v57  ;;  %v937_v6 = vrot.slane %v935_v56, 7  ;;  %v942_v50 = vrot.slane %v940_v58, 6  ;;  %v945_v5 = vrot.slane %v943_v52, 7 }
  0x52   :  { %2944 = vmatprep.subr.bf16.mxu1 %v3136_v30  ;;  %1336 = vmatprep.mubr.bf16.mxu0 %v1065_v60  ;;  %v961_v7 = vrot.slane %v960_v43, 2  ;;  %v963_v55 = vshll.u32 %v847_v32, 16  ;;  %v951_v11 = vrot.slane %v949_v51, 7  ;;  %v1964_v23 = vcombine.high %v3451_v47, %v3306_v24  ;;  %v3151_v43 = vld [vmem:[#allocation2 + $0x260] sm:$0xff]  }
  0x53   :  { %1385 = vmatprep.mubr.bf16.mxu1 %v1067_v1  ;;  %v3518_v8 = vsel %vm3465_vm12, %v933_v62, %v937_v6  ;;  %v946_v9 = vor.u32 %v945_v5, %v942_v50  ;;  %v3530_v30 = vcombine.low %v3451_v47, %v3306_v24  ;;  %v1464_v36 = vcombine.low %v3340_v46, %v3306_v24  ;;  %v3153_v51 = vld [vmem:[#allocation2 + $0x220] sm:$0xff]   ;;  %v3156_v50 = vld [vmem:[#allocation2 + $0x2d8] sm:$0xff]  }
  0x54   :  { %2917 = vmatpush3.bf16.msra.mxu0 %v3137_v35  ;;  %v965_v15 = vrot.slane %v963_v55, 7  ;;  %v1068_v17 = vcombine.low %v924_v63, %v3518_v8  ;;  %v1069_v18 = vcombine.high %v924_v63, %v3518_v8  ;;  %v3148_v35 = vld [vmem:[#allocation2 + $0x2e8] sm:$0xff]   ;;  %v3154_v1 = vld [vmem:[#allocation2 + $0x2a0] sm:$0xff]   ;;  %v1989_v5 = vshll.u32 %v1964_v23, 16  ;;  %v3172_v46 = vld [vmem:[#allocation2 + $0x3f8] sm:$0xff]  }
  0x55   :  { %2945 = vmatpush3.bf16.msra.mxu1 %v3138_v20  ;;  %2958 = vmatprep.subr.bf16.mxu0 %v3139_v48  ;;  %v947_v22 = vrot.slane %v946_v9, 2  ;;  %v1980_v39 = vshrl.u32 %v3530_v30, 16  ;;  %v3149_v20 = vld [vmem:[#allocation2 + $0x228] sm:$0xff]   ;;  %v1966_v44 = vshrl.u32 %v1464_v36, 16  ;;  %v3548_v48 = vrot.slane %v1464_v36, %v3299_v13 }
  0x56   :  { %2986 = vmatprep.subr.bf16.mxu1 %v3140_v54  ;;  %v3526_v26 = vsel %vm3465_vm12, %v961_v7, %v965_v15  ;;  %v1078_v34 = vrot.slane %v1068_v17, %v3299_v13  ;;  %v1085_v47 = vrot.slane %v1069_v18, %v3299_v13  ;;  %v1983_v62 = vshll.u32 %v3530_v30, 16  ;;  %v3159_v7 = vld [vmem:[#allocation2 + $0x250] sm:$0xff]   ;;  %v3163_v17 = vld [vmem:[#allocation2 + $0x248] sm:$0xff]  }
  0x57   :  { %1337 = vmatmul.mubr.bf16.vlgmr.msra.gmra.mxu0 %v1064_v59  ;;  %v3534_v33 = vsel %vm3465_vm12, %v947_v22, %v951_v11  ;;  %v1982_v54 = vrot.slane %v1980_v39, 6  ;;  %v1969_v59 = vshll.u32 %v1464_v36, 16  ;;  %v1968_v63 = vrot.slane %v1966_v44, 6  ;;  %v3160_v11 = vld [vmem:[#allocation2 + $0x2d0] sm:$0xff]   ;;  %v3164_v22 = vld [vmem:[#allocation2 + $0x2c8] sm:$0xff]   ;;  %v3170_v39 = vld [vmem:[#allocation2 + $0x280] sm:$0xff]  }
  0x58   :  { %1386 = vmatmul.mubr.bf16.vlgmr.msra.gmra.mxu1 %v1066_v61  ;;  %2959 = vmatpush3.bf16.msra.mxu0 %v3141_v3  ;;  %v1070_v38 = vcombine.low %v3534_v33, %v3526_v26  ;;  %v1071_v32 = vcombine.high %v3534_v33, %v3526_v26  ;;  %v1985_v60 = vrot.slane %v1983_v62, 7  ;;  %v3155_v61 = vld [vmem:[#allocation2 + $0x258] sm:$0xff]   ;;  %v1566_v3 = vcombine.high %v3344_v49, %v3548_v48  ;;  %v3165_v23 = vld [vmem:[#allocation2 + $0x208] sm:$0xff]   ;;  %v3176_v44 = vld [vmem:[#allocation2 + $0x3f0] sm:$0xff]  }
  0x59   :  { %2987 = vmatpush3.bf16.msra.mxu1 %v3142_v10  ;;  %2960 = vmatprep.subr.bf16.mxu0 %v3143_v53  ;;  %v3157_v10 = vld [vmem:[#allocation2 + $0x218] sm:$0xff]   ;;  %v1971_v53 = vrot.slane %v1969_v59, 7  ;;  %v1991_v9 = vrot.slane %v1989_v5, 7  ;;  %v3177_v62 = vld [vmem:[#allocation2 + $0x330] sm:$0xff]   ;;  %v3184_v59 = vld [vmem:[#allocation2 + $0x3e0] sm:$0xff]  }
  0x5a   :  { %2988 = vmatprep.subr.bf16.mxu1 %v3144_v31  ;;  %v1092_v40 = vrot.slane %v1070_v38, %v3299_v13  ;;  %v1099_v41 = vrot.slane %v1071_v32, %v3299_v13  ;;  %v1986_v6 = vor.u32 %v1985_v60, %v1982_v54  ;;  %v3158_v31 = vld [vmem:[#allocation2 + $0x298] sm:$0xff]   ;;  %v3168_v38 = vld [vmem:[#allocation2 + $0x2c0] sm:$0xff]   ;;  %v3193_v5 = vld [vmem:[#allocation2 + $0x310] sm:$0xff]  }
  0x5b   :  { %v1972_v18 = vor.u32 %v1971_v53, %v1968_v63  ;;  %v3169_v32 = vld [vmem:[#allocation2 + $0x200] sm:$0xff]   ;;  %v3188_v63 = vld [vmem:[#allocation2 + $0x3d8] sm:$0xff]   ;;  %v3194_v53 = vld [vmem:[#allocation2 + $0x390] sm:$0xff]  }
  0x5c   :  { %2961 = vmatpush3.bf16.msra.mxu0 %v3145_v14  ;;  %v1101_v56 = vcombine.high %v1078_v34, %v1092_v40  ;;  %v1103_v57 = vcombine.high %v1085_v47, %v1099_v41  ;;  %v1100_v58 = vcombine.low %v1078_v34, %v1092_v40  ;;  %v1102_v52 = vcombine.low %v1085_v47, %v1099_v41  ;;  %v3161_v14 = vld [vmem:[#allocation2 + $0x210] sm:$0xff]   ;;  %v3171_v47 = vld [vmem:[#allocation2 + $0x378] sm:$0xff]  }
  0x5d   :  { %2989 = vmatpush3.bf16.msra.mxu1 %v3146_v19  ;;  %2962 = vmatprep.subr.bf16.mxu0 %v3147_v27  ;;  %v1987_v55 = vrot.slane %v1986_v6, 2  ;;  %v3162_v19 = vld [vmem:[#allocation2 + $0x290] sm:$0xff]   ;;  %v3167_v27 = vld [vmem:[#allocation2 + $0x240] sm:$0xff]   ;;  %v1973_v34 = vrot.slane %v1972_v18, 2  ;;  %v2058_v41 = vcombine.low %v3478_v21, %v3488_v29  ;;  %v3190_v6 = vld [vmem:[#allocation2 + $0x398] sm:$0xff]  }
  0x5e   :  { %2990 = vmatprep.subr.bf16.mxu1 %v3148_v35  ;;  %1344 = vmatprep.mubr.bf16.mxu0 %v1101_v56  ;;  %v3166_v35 = vld [vmem:[#allocation2 + $0x288] sm:$0xff]   ;;  %v3175_v40 = vld [vmem:[#allocation2 + $0x370] sm:$0xff]  }
  0x5f   :  { %1393 = vmatprep.mubr.bf16.mxu1 %v1103_v57  ;;  %1345 = vmatmul.mubr.bf16.gmra.mxu0 %v1100_v58  ;;  %v3556_v15 = vsel %vm3465_vm12, %v1987_v55, %v1991_v9  ;;  %v3179_v56 = vld [vmem:[#allocation2 + $0x368] sm:$0xff]   ;;  %v3183_v57 = vld [vmem:[#allocation2 + $0x360] sm:$0xff]  }
  0x60   :  { %2963 = vmatpush3.bf16.msra.mxu0 %v3149_v20  ;;  %1394 = vmatmul.mubr.bf16.gmra.mxu1 %v1102_v52  ;;  %v3173_v20 = vld [vmem:[#allocation2 + $0x338] sm:$0xff]   ;;  %v3197_v55 = vld [vmem:[#allocation2 + $0x308] sm:$0xff]   ;;  %v2096_v9 = vcombine.low %v3526_v26, %v3556_v15  ;;  %v2097_v18 = vcombine.high %v3526_v26, %v3556_v15 }
  0x61   :  { %2991 = vmatpush3.bf16.msra.mxu1 %v3150_v42  ;;  %2964 = vmatprep.subr.bf16.mxu0 %v3151_v43  ;;  %v1565_v43 = vcombine.low %v3344_v49, %v3548_v48  ;;  %v3577_v49 = vrot.slane %v2058_v41, %v3299_v13  ;;  %v3178_v48 = vld [vmem:[#allocation2 + $0x3b0] sm:$0xff]  }
  0x62   :  { %2992 = vmatprep.subr.bf16.mxu1 %v3152_v45  ;;  %1835 = vmatprep.mubr.bf16.mxu0 %v3362_v12  ;;  %v1975_v12 = vshll.u32 %v1963_v2, 16  ;;  %v1598_v2 = vrot.slane %v3530_v30, %v3299_v13  ;;  %v2059_v45 = vcombine.high %v3478_v21, %v3488_v29  ;;  %v3180_v21 = vld [vmem:[#allocation2 + $0x3e8] sm:$0xff]  }
  0x63   :  { %1884 = vmatprep.mubr.bf16.mxu1 %v1566_v3  ;;  %v3186_v3 = vld [vmem:[#allocation2 + $0x3a0] sm:$0xff]  }
  0x64   :  { %2965 = vmatpush3.bf16.msra.mxu0 %v3153_v51  ;;  %v1977_v36 = vrot.slane %v1975_v12, 7  ;;  %v1602_v30 = vcombine.high %v3437_v37, %v1598_v2  ;;  %v3583_v29 = vrot.slane %v2059_v45, %v3299_v13  ;;  %v1601_v52 = vcombine.low %v3437_v37, %v1598_v2  ;;  %v3182_v51 = vld [vmem:[#allocation2 + $0x3a8] sm:$0xff]   ;;  %v3189_v37 = vld [vmem:[#allocation2 + $0x318] sm:$0xff]   ;;  %v3201_v12 = vld [vmem:[#allocation2 + $0x300] sm:$0xff]  }
  0x65   :  { %2966 = vmatprep.subr.bf16.mxu0 %v3155_v61  ;;  %2993 = vmatpush3.bf16.msra.mxu1 %v3154_v1  ;;  %v3185_v61 = vld [vmem:[#allocation2 + $0x320] sm:$0xff]   ;;  %v3187_v1 = vld [vmem:[#allocation2 + $0x358] sm:$0xff]  }
  0x66   :  { %2994 = vmatprep.subr.bf16.mxu1 %v3156_v50  ;;  %v1978_v24 = vsel %vm3465_vm12, %v1973_v34, %v1977_v36  ;;  %v3192_v50 = vld [vmem:[#allocation2 + $0x3d0] sm:$0xff]  }
  0x67   :  { %v2060_v42 = vcombine.low %v3493_v4, %v1978_v24  ;;  %v2061_v54 = vcombine.high %v3493_v4, %v1978_v24 }
  0x68   :  { %2967 = vmatpush3.bf16.msra.mxu0 %v3157_v10  ;;  %v3195_v10 = vld [vmem:[#allocation2 + $0x348] sm:$0xff]  }
  0x69   :  { %2968 = vmatprep.subr.bf16.mxu0 %v3159_v7  ;;  %2995 = vmatpush3.bf16.msra.mxu1 %v3158_v31  ;;  %v3586_v4 = vrot.slane %v2061_v54, %v3299_v13  ;;  %v3196_v7 = vld [vmem:[#allocation2 + $0x3c8] sm:$0xff]   ;;  %v2094_v31 = vcombine.low %v3518_v8, %v3534_v33 }
  0x6a   :  { %2996 = vmatprep.subr.bf16.mxu1 %v3160_v11  ;;  %v3199_v11 = vld [vmem:[#allocation2 + $0x340] sm:$0xff]  }
  0x6b   :  { %v2093_v60 = vcombine.high %v3583_v29, %v3586_v4 }
  0x6c   :  { %2969 = vmatpush3.bf16.msra.mxu0 %v3161_v14  ;;  %v3198_v14 = vld [vmem:[#allocation2 + $0x388] sm:$0xff]  }
  0x6d   :  { %2970 = vmatprep.subr.bf16.mxu0 %v3163_v17  ;;  %2997 = vmatpush3.bf16.msra.mxu1 %v3162_v19  ;;  %v2095_v17 = vcombine.high %v3518_v8, %v3534_v33  ;;  %v3200_v19 = vld [vmem:[#allocation2 + $0x3c0] sm:$0xff]   ;;  %v2125_v8 = vrot.slane %v2097_v18, %v3299_v13  ;;  %v2092_v33 = vcombine.low %v3583_v29, %v3586_v4 }
  0x6e   :  { %2998 = vmatprep.subr.bf16.mxu1 %v3164_v22  ;;  %v2104_v22 = vrot.slane %v2094_v31, %v3299_v13 }
  0x70   :  { %2971 = vmatpush3.bf16.msra.mxu0 %v3165_v23  ;;  %v2118_v23 = vrot.slane %v2096_v9, %v3299_v13 }
  0x71   :  { %2972 = vmatprep.subr.bf16.mxu0 %v3167_v27  ;;  %2999 = vmatpush3.bf16.msra.mxu1 %v3166_v35  ;;  %v3202_v27 = vld [vmem:[#allocation2 + $0x380] sm:$0xff]   ;;  %v2111_v35 = vrot.slane %v2095_v17, %v3299_v13 }
  0x72   :  { %3000 = vmatprep.subr.bf16.mxu1 %v3168_v38  ;;  %v2127_v26 = vcombine.high %v2104_v22, %v2118_v23  ;;  %v2126_v36 = vcombine.low %v2104_v22, %v2118_v23 }
  0x73   :  { %v2129_v15 = vcombine.high %v2111_v35, %v2125_v8  ;;  %v2128_v38 = vcombine.low %v2111_v35, %v2125_v8 }
  0x74   :  { %2973 = vmatpush3.bf16.msra.mxu0 %v3169_v32 }
  0x75   :  { %3014 = vmatprep.subr.bf16.mxu0 %v3171_v47  ;;  %3001 = vmatpush3.bf16.msra.mxu1 %v3170_v39 }
  0x76   :  { %3042 = vmatprep.subr.bf16.mxu1 %v3172_v46 }
  0x77   :  { %1836 = vmatmul.mubr.bf16.vlgmr.msra.gmra.mxu0 %v3364_v16  ;;  %v3580_v16 = vrot.slane %v2060_v42, %v3299_v13 }
  0x78   :  { %3015 = vmatpush3.bf16.msra.mxu0 %v3173_v20  ;;  %1843 = vmatprep.mubr.bf16.mxu0 %v3482_v25  ;;  %v3181_v25 = vld [vmem:[#allocation2 + $0x328] sm:$0xff]  }
  0x79   :  { %3016 = vmatprep.subr.bf16.mxu0 %v3175_v40  ;;  %1885 = vmatmul.mubr.bf16.vlgmr.msra.gmra.mxu1 %v1565_v43  ;;  %v2091_v58 = vcombine.high %v3577_v49, %v3580_v16  ;;  %v2090_v34 = vcombine.low %v3577_v49, %v3580_v16 }
  0x7a   :  { %3043 = vmatpush3.bf16.msra.mxu1 %v3174_v0  ;;  %1892 = vmatprep.mubr.bf16.mxu1 %v1602_v30 }
  0x7b   :  { %3044 = vmatprep.subr.bf16.mxu1 %v3176_v44 }
  0x7c   :  { %3017 = vmatpush3.bf16.msra.mxu0 %v3177_v62 }
  0x7d   :  { %3018 = vmatprep.subr.bf16.mxu0 %v3179_v56 }
  0x7e   :  { %3045 = vmatpush3.bf16.msra.mxu1 %v3178_v48 }
  0x7f   :  { %1844 = vmatmul.mubr.bf16.gmra.mxu0 %v3484_v28  ;;  %3046 = vmatprep.subr.bf16.mxu1 %v3180_v21  ;;  %v3191_v28 = vld [vmem:[#allocation2 + $0x350] sm:$0xff]  }
  0x80   :  { %3019 = vmatpush3.bf16.msra.mxu0 %v3181_v25  ;;  %2362 = vmatprep.mubr.bf16.mxu0 %v2091_v58 }
  0x81   :  { %3020 = vmatprep.subr.bf16.mxu0 %v3183_v57  ;;  %1893 = vmatmul.mubr.bf16.gmra.mxu1 %v1601_v52 }
  0x82   :  { %3047 = vmatpush3.bf16.msra.mxu1 %v3182_v51  ;;  %2411 = vmatprep.mubr.bf16.mxu1 %v2093_v60 }
  0x83   :  { %3048 = vmatprep.subr.bf16.mxu1 %v3184_v59 }
  0x84   :  { %3021 = vmatpush3.bf16.msra.mxu0 %v3185_v61 }
  0x85   :  { %3022 = vmatprep.subr.bf16.mxu0 %v3187_v1 }
  0x86   :  { %3049 = vmatpush3.bf16.msra.mxu1 %v3186_v3 }
  0x87   :  { %3050 = vmatprep.subr.bf16.mxu1 %v3188_v63 }
  0x88   :  { %3023 = vmatpush3.bf16.msra.mxu0 %v3189_v37 }
  0x89   :  { %3024 = vmatprep.subr.bf16.mxu0 %v3191_v28 }
  0x8a   :  { %3051 = vmatpush3.bf16.msra.mxu1 %v3190_v6 }
  0x8b   :  { %3052 = vmatprep.subr.bf16.mxu1 %v3192_v50 }
  0x8c   :  { %3025 = vmatpush3.bf16.msra.mxu0 %v3193_v5 }
  0x8d   :  { %3026 = vmatprep.subr.bf16.mxu0 %v3195_v10 }
  0x8e   :  { %3053 = vmatpush3.bf16.msra.mxu1 %v3194_v53 }
  0x8f   :  { %3054 = vmatprep.subr.bf16.mxu1 %v3196_v7 }
  0x90   :  { %3027 = vmatpush3.bf16.msra.mxu0 %v3197_v55 }
  0x91   :  { %3028 = vmatprep.subr.bf16.mxu0 %v3199_v11 }
  0x92   :  { %3055 = vmatpush3.bf16.msra.mxu1 %v3198_v14 }
  0x93   :  { %3056 = vmatprep.subr.bf16.mxu1 %v3200_v19 }
  0x94   :  { %3029 = vmatpush3.bf16.msra.mxu0 %v3201_v12 }
  0x96   :  { %3057 = vmatpush3.bf16.msra.mxu1 %v3202_v27 }
  0x97   :  { %2363 = vmatmul.mubr.bf16.vlgmr.msra.gmra.mxu0 %v2090_v34 }
  0x98   :  { %2370 = vmatprep.mubr.bf16.mxu0 %v2127_v26 }
  0x99   :  { %2412 = vmatmul.mubr.bf16.vlgmr.msra.gmra.mxu1 %v2092_v33 }
  0x9a   :  { %2419 = vmatprep.mubr.bf16.mxu1 %v2129_v15 }
  0x9f   :  { %2371 = vmatmul.mubr.bf16.gmra.mxu0 %v2126_v36 }
  0xa1   :  { %2420 = vmatmul.mubr.bf16.gmra.mxu1 %v2128_v38 }
  0xf7   :  { %v2862_v32 = vpop.f32.mrf.mxu0 }
  0xf8   :  { %v2890_v39 = vpop.f32.mrf.mxu1 }
  0xf9   :  { %v2863_v47 = vpop.f32.mrf.mxu0 }
  0xfa   :  { %v2891_v46 = vpop.f32.mrf.mxu1  ;;  %v2864_v2 = vadd.f32 %v2863_v47, %v2862_v32 }
  0xfb   :  { %v2865_v24 = vpop.f32.mrf.mxu0  ;;  %v2892_v20 = vadd.f32 %v2891_v46, %v2890_v39 }
  0xfc   :  { %v2893_v41 = vpop.f32.mrf.mxu1 }
  0xfd   :  { %v2866_v40 = vpop.f32.mrf.mxu0  ;;  %v764_v0 = vadd.f32 %v2892_v20, %v2864_v2 }
  0xfe   :  { %v2867_v42 = vadd.f32 %v2866_v40, %v2865_v24  ;;  %v2894_v43 = vpop.f32.mrf.mxu1 }
  0xff   :  { %v2895_v44 = vadd.f32 %v2894_v43, %v2893_v41  ;;  %v788_v45 = vmul.f32 %v764_v0, %v764_v0 }
 0x101   :  { %v767_v30 = vadd.f32 %v2895_v44, %v2867_v42 }
 0x103   :  { %v789_v54 = vmul.f32 %v767_v30, %v767_v30  ;;  %v778_v62 = vadd.f32 %v767_v30, %v764_v0  ;;  %v802_v19 = vpack.c.bf16 %v767_v30, %v764_v0  ;;  %v2710_v12 = vpack.c.bf16 %v767_v30, %v767_v30 }
 0x105   :  { %v792_v56 = vadd.f32 %v789_v54, %v788_v45  ;;  %v813_v47 = vrot.slane %v802_v19, %v3299_v13  ;;  %v820_v39 = vrot.slane %v2710_v12, %v3299_v13 }
 0x10a   :  { %v2868_v49 = vpop.f32.mrf.mxu0 }
 0x10c   :  { %v2869_v16 = vpop.f32.mrf.mxu0 }
 0x10d   :  { %v2870_v29 = vadd.f32 %v2869_v16, %v2868_v49 }
 0x10e   :  { %v2871_v48 = vpop.f32.mrf.mxu0 }
 0x10f   :  { %v2896_v21 = vpop.f32.mrf.mxu1 }
 0x110   :  { %v2872_v25 = vpop.f32.mrf.mxu0 }
 0x111   :  { %v2897_v4 = vpop.f32.mrf.mxu1  ;;  %v2873_v51 = vadd.f32 %v2872_v25, %v2871_v48 }
 0x112   :  { %v2898_v57 = vadd.f32 %v2897_v4, %v2896_v21 }
 0x113   :  { %v2899_v58 = vpop.f32.mrf.mxu1 }
 0x114   :  { %v3610_v52 = vadd.f32 %v2898_v57, %v2870_v29 }
 0x115   :  { %v2900_v59 = vpop.f32.mrf.mxu1 }
 0x116   :  { %v2901_v60 = vadd.f32 %v2900_v59, %v2899_v58  ;;  %v779_v3 = vadd.f32 %v778_v62, %v3610_v52  ;;  %v790_v5 = vmul.f32 %v3610_v52, %v3610_v52 }
 0x117   :  { %v2918_v61 = vpop.f32.mrf.mxu0 }
 0x118   :  { %v2946_v1 = vpop.f32.mrf.mxu1  ;;  %v3613_v63 = vadd.f32 %v2901_v60, %v2873_v51  ;;  %v793_v17 = vadd.f32 %v792_v56, %v790_v5 }
 0x119   :  { %v2919_v37 = vpop.f32.mrf.mxu0 }
 0x11a   :  { %v2947_v28 = vpop.f32.mrf.mxu1  ;;  %v780_v6 = vadd.f32 %v779_v3, %v3613_v63  ;;  %v2920_v10 = vadd.f32 %v2919_v37, %v2918_v61  ;;  %v791_v31 = vmul.f32 %v3613_v63, %v3613_v63  ;;  %v803_v29 = vpack.c.bf16 %v3613_v63, %v3610_v52 }
 0x11b   :  { %v2921_v50 = vpop.f32.mrf.mxu0  ;;  %v2948_v53 = vadd.f32 %v2947_v28, %v2946_v1  ;;  %v2711_v51 = vpack.c.bf16 %v3613_v63, %v3613_v63 }
 0x11c   :  { %v2949_v7 = vpop.f32.mrf.mxu1  ;;  %v794_v23 = vadd.f32 %v793_v17, %v791_v31  ;;  %v781_v26 = vrot.slane %v780_v6, 4  ;;  %v830_v37 = vrot.slane %v803_v29, %v3299_v13 }
 0x11d   :  { %v2922_v55 = vpop.f32.mrf.mxu0  ;;  %v1388_v18 = vadd.f32 %v2948_v53, %v2920_v10  ;;  %v837_v53 = vrot.slane %v2711_v51, %v3299_v13 }
 0x11e   :  { %v2923_v9 = vadd.f32 %v2922_v55, %v2921_v50  ;;  %v2950_v11 = vpop.f32.mrf.mxu1  ;;  %v795_v2 = vrot.slane %v794_v23, 4  ;;  %v782_v30 = vadd.f32 %v781_v26, %v780_v6 }
 0x11f   :  { %v2951_v14 = vadd.f32 %v2950_v11, %v2949_v7  ;;  %v2924_v27 = vpop.f32.mrf.mxu0  ;;  %v1412_v33 = vmul.f32 %v1388_v18, %v1388_v18 }
 0x120   :  { %v2952_v34 = vpop.f32.mrf.mxu1  ;;  %v796_v21 = vadd.f32 %v795_v2, %v794_v23  ;;  %v783_v58 = vrot.slane %v782_v30, 2 }
 0x121   :  { %v1391_v22 = vadd.f32 %v2951_v14, %v2923_v9  ;;  %v2925_v36 = vpop.f32.mrf.mxu0 }
 0x122   :  { %v2953_v38 = vpop.f32.mrf.mxu1  ;;  %v2926_v46 = vadd.f32 %v2925_v36, %v2924_v27  ;;  %v797_v3 = vrot.slane %v796_v21, 2  ;;  %v784_v10 = vadd.f32 %v783_v58, %v782_v30 }
 0x123   :  { %v1413_v35 = vmul.f32 %v1391_v22, %v1391_v22  ;;  %v1426_v8 = vpack.c.bf16 %v1391_v22, %v1388_v18  ;;  %v2744_v15 = vpack.c.bf16 %v1391_v22, %v1391_v22  ;;  %v1402_v32 = vadd.f32 %v1391_v22, %v1388_v18  ;;  %v2927_v42 = vpop.f32.mrf.mxu0 }
 0x124   :  { %v2954_v40 = vadd.f32 %v2953_v38, %v2952_v34  ;;  %v2955_v43 = vpop.f32.mrf.mxu1  ;;  %v798_v14 = vadd.f32 %v797_v3, %v796_v21  ;;  %v785_v19 = vrot.slane %v784_v10, 1 }
 0x125   :  { %v1437_v24 = vrot.slane %v1426_v8, %v3299_v13  ;;  %v1444_v20 = vrot.slane %v2744_v15, %v3299_v13  ;;  %v1416_v41 = vadd.f32 %v1413_v35, %v1412_v33  ;;  %v2928_v56 = vpop.f32.mrf.mxu0 }
 0x126   :  { %v1396_v62 = vadd.f32 %v2954_v40, %v2926_v46  ;;  %v2956_v49 = vpop.f32.mrf.mxu1  ;;  %v2929_v16 = vadd.f32 %v2928_v56, %v2927_v42  ;;  %v799_v23 = vrot.slane %v798_v14, 1  ;;  %v786_v8 = vadd.f32 %v785_v19, %v784_v10 }
 0x127   :  { %v2490_v0 = vcombine.low %v813_v47, %v1437_v24  ;;  %v2822_v44 = vcombine.high %v813_v47, %v1437_v24  ;;  %v2522_v45 = vcombine.low %v820_v39, %v1444_v20  ;;  %v2824_v54 = vcombine.high %v820_v39, %v1444_v20 }
 0x128   :  { %v2957_v48 = vadd.f32 %v2956_v49, %v2955_v43  ;;  %v1414_v4 = vmul.f32 %v1396_v62, %v1396_v62  ;;  %v1403_v25 = vadd.f32 %v1402_v32, %v1396_v62  ;;  %v800_v38 = vadd.f32 %v799_v23, %v798_v14 }
 0x129   :  { %2830 = vst.sshfl [vmem:[%s3716_s4] sm:$0x33 pattern:$0x76325410] %v2490_v0 }
 0x12a   :  { %2832 = vst.sshfl [vmem:[%s3716_s4 + $0x8] sm:$0x33 pattern:$0x76325410] %v2822_v44  ;;  %v1399_v57 = vadd.f32 %v2957_v48, %v2929_v16  ;;  %v1417_v59 = vadd.f32 %v1416_v41, %v1414_v4 }
 0x12b   :  { %2834 = vst.sshfl [vmem:[%s3716_s4 + $0x10] sm:$0x33 pattern:$0x76325410] %v2522_v45 }
 0x12c   :  { %2836 = vst.sshfl [vmem:[%s3716_s4 + $0x18] sm:$0x33 pattern:$0x76325410] %v2824_v54  ;;  %v1404_v60 = vadd.f32 %v1403_v25, %v1399_v57  ;;  %v1415_v61 = vmul.f32 %v1399_v57, %v1399_v57  ;;  %v1427_v1 = vpack.c.bf16 %v1399_v57, %v1396_v62  ;;  %v2745_v52 = vpack.c.bf16 %v1399_v57, %v1399_v57 }
 0x12e   :  { %v1405_v28 = vrot.slane %v1404_v60, 4  ;;  %v1418_v6 = vadd.f32 %v1417_v59, %v1415_v61  ;;  %v1454_v50 = vrot.slane %v1427_v1, %v3299_v13  ;;  %v1461_v5 = vrot.slane %v2745_v52, %v3299_v13 }
 0x130   :  { %v1406_v7 = vadd.f32 %v1405_v28, %v1404_v60  ;;  %v1419_v55 = vrot.slane %v1418_v6, 4  ;;  %v2554_v63 = vcombine.low %v830_v37, %v1454_v50  ;;  %v2826_v31 = vcombine.high %v830_v37, %v1454_v50 }
 0x131   :  { %v2586_v9 = vcombine.low %v837_v53, %v1461_v5  ;;  %v2828_v11 = vcombine.high %v837_v53, %v1461_v5 }
 0x132   :  { %v1407_v17 = vrot.slane %v1406_v7, 2  ;;  %v1420_v18 = vadd.f32 %v1419_v55, %v1418_v6  ;;  %2838 = vst.sshfl [vmem:[%s3716_s4 + $0x20] sm:$0x33 pattern:$0x76325410] %v2554_v63 }
 0x133   :  { %2840 = vst.sshfl [vmem:[%s3716_s4 + $0x28] sm:$0x33 pattern:$0x76325410] %v2826_v31 }
 0x134   :  { %2842 = vst.sshfl [vmem:[%s3716_s4 + $0x30] sm:$0x33 pattern:$0x76325410] %v2586_v9  ;;  %v1408_v12 = vadd.f32 %v1407_v17, %v1406_v7  ;;  %v1421_v22 = vrot.slane %v1420_v18, 2 }
 0x135   :  { %2844 = vst.sshfl [vmem:[%s3716_s4 + $0x38] sm:$0x33 pattern:$0x76325410] %v2828_v11 }
 0x136   :  { %v1409_v27 = vrot.slane %v1408_v12, 1  ;;  %v1422_v34 = vadd.f32 %v1421_v22, %v1420_v18 }
 0x137   :  { %v2974_v35 = vpop.f32.mrf.mxu0 }
 0x138   :  { %v1410_v26 = vadd.f32 %v1409_v27, %v1408_v12  ;;  %v1423_v33 = vrot.slane %v1422_v34, 1 }
 0x139   :  { %v2975_v15 = vpop.f32.mrf.mxu0  ;;  %v3002_v36 = vpop.f32.mrf.mxu1 }
 0x13a   :  { %v3656_v32 = vadd.f32 %v1410_v26, %v786_v8  ;;  %v1424_v47 = vadd.f32 %v1423_v33, %v1422_v34  ;;  %v2976_v49 = vadd.f32 %v2975_v15, %v2974_v35 }
 0x13b   :  { %v2977_v39 = vpop.f32.mrf.mxu0  ;;  %v3003_v24 = vpop.f32.mrf.mxu1 }
 0x13c   :  { %v3658_v46 = vadd.f32 %v1424_v47, %v800_v38  ;;  %v3004_v16 = vadd.f32 %v3003_v24, %v3002_v36 }
 0x13d   :  { %v3005_v2 = vpop.f32.mrf.mxu1  ;;  %v2978_v20 = vpop.f32.mrf.mxu0 }
 0x13e   :  { %v2979_v45 = vadd.f32 %v2978_v20, %v2977_v39  ;;  %v1887_v57 = vadd.f32 %v3004_v16, %v2976_v49 }
 0x13f   :  { %v3006_v40 = vpop.f32.mrf.mxu1  ;;  %v2980_v41 = vpop.f32.mrf.mxu0 }
 0x140   :  { %v3007_v54 = vadd.f32 %v3006_v40, %v3005_v2  ;;  %v1911_v61 = vmul.f32 %v1887_v57, %v1887_v57 }
 0x141   :  { %v3008_v42 = vpop.f32.mrf.mxu1  ;;  %v2981_v43 = vpop.f32.mrf.mxu0 }
 0x142   :  { %v2982_v48 = vadd.f32 %v2981_v43, %v2980_v41  ;;  %v1890_v29 = vadd.f32 %v3007_v54, %v2979_v45 }
 0x143   :  { %v3009_v0 = vpop.f32.mrf.mxu1  ;;  %v2983_v44 = vpop.f32.mrf.mxu0 }
 0x144   :  { %v3010_v21 = vadd.f32 %v3009_v0, %v3008_v42  ;;  %v1912_v51 = vmul.f32 %v1890_v29, %v1890_v29  ;;  %v1901_v3 = vadd.f32 %v1890_v29, %v1887_v57  ;;  %v1925_v22 = vpack.c.bf16 %v1890_v29, %v1887_v57 }
 0x145   :  { %v3011_v30 = vpop.f32.mrf.mxu1  ;;  %v2984_v62 = vpop.f32.mrf.mxu0  ;;  %v2786_v23 = vpack.c.bf16 %v1890_v29, %v1890_v29 }
 0x146   :  { %v2985_v4 = vadd.f32 %v2984_v62, %v2983_v44  ;;  %v3660_v58 = vadd.f32 %v3010_v21, %v2982_v48  ;;  %v1915_v37 = vadd.f32 %v1912_v51, %v1911_v61  ;;  %v1936_v2 = vrot.slane %v1925_v22, %v3299_v13 }
 0x147   :  { %v3012_v56 = vpop.f32.mrf.mxu1  ;;  %v1943_v20 = vrot.slane %v2786_v23, %v3299_v13 }
 0x148   :  { %v3013_v25 = vadd.f32 %v3012_v56, %v3011_v30  ;;  %v1913_v1 = vmul.f32 %v3660_v58, %v3660_v58  ;;  %v1902_v5 = vadd.f32 %v1901_v3, %v3660_v58 }
 0x14a   :  { %v3662_v59 = vadd.f32 %v3013_v25, %v2985_v4  ;;  %v1916_v10 = vadd.f32 %v1915_v37, %v1913_v1 }
 0x14c   :  { %v1914_v28 = vmul.f32 %v3662_v59, %v3662_v59  ;;  %v1903_v55 = vadd.f32 %v1902_v5, %v3662_v59  ;;  %v1926_v51 = vpack.c.bf16 %v3662_v59, %v3660_v58  ;;  %v2787_v58 = vpack.c.bf16 %v3662_v59, %v3662_v59 }
 0x14e   :  { %v1917_v63 = vadd.f32 %v1916_v10, %v1914_v28  ;;  %v1904_v27 = vrot.slane %v1903_v55, 4  ;;  %v1953_v10 = vrot.slane %v1926_v51, %v3299_v13 }
 0x150   :  { %v1918_v34 = vrot.slane %v1917_v63, 4  ;;  %v1905_v40 = vadd.f32 %v1904_v27, %v1903_v55 }
 0x152   :  { %v1919_v41 = vadd.f32 %v1918_v34, %v1917_v63  ;;  %v1906_v25 = vrot.slane %v1905_v40, 2 }
 0x154   :  { %v1920_v57 = vrot.slane %v1919_v41, 2 }
 0x156   :  { %v1921_v5 = vadd.f32 %v1920_v57, %v1919_v41 }
 0x157   :  { %v3030_v60 = vpop.f32.mrf.mxu0 }
 0x159   :  { %v3031_v52 = vpop.f32.mrf.mxu0  ;;  %v3058_v6 = vpop.f32.mrf.mxu1 }
 0x15a   :  { %v3032_v9 = vadd.f32 %v3031_v52, %v3030_v60 }
 0x15b   :  { %v3033_v50 = vpop.f32.mrf.mxu0  ;;  %v3059_v53 = vpop.f32.mrf.mxu1 }
 0x15c   :  { %v3060_v11 = vadd.f32 %v3059_v53, %v3058_v6 }
 0x15d   :  { %v3034_v7 = vpop.f32.mrf.mxu0  ;;  %v3061_v31 = vpop.f32.mrf.mxu1 }
 0x15e   :  { %v3035_v14 = vadd.f32 %v3034_v7, %v3033_v50  ;;  %v2414_v8 = vadd.f32 %v3060_v11, %v3032_v9  ;;  %v1907_v50 = vadd.f32 %v1906_v25, %v1905_v40 }
 0x15f   :  { %v3036_v17 = vpop.f32.mrf.mxu0  ;;  %v3062_v18 = vpop.f32.mrf.mxu1 }
 0x160   :  { %v3063_v19 = vadd.f32 %v3062_v18, %v3061_v31  ;;  %v2438_v45 = vmul.f32 %v2414_v8, %v2414_v8  ;;  %v1960_v31 = vrot.slane %v2787_v58, %v3299_v13 }
 0x161   :  { %v3037_v12 = vpop.f32.mrf.mxu0  ;;  %v3064_v35 = vpop.f32.mrf.mxu1 }
 0x162   :  { %v2417_v26 = vadd.f32 %v3063_v19, %v3035_v14  ;;  %v3038_v33 = vadd.f32 %v3037_v12, %v3036_v17  ;;  %v1908_v19 = vrot.slane %v1907_v50, 1  ;;  %v1922_v12 = vrot.slane %v1921_v5, 1 }
 0x163   :  { %v3039_v15 = vpop.f32.mrf.mxu0  ;;  %v3065_v36 = vpop.f32.mrf.mxu1 }
 0x164   :  { %v2452_v38 = vpack.c.bf16 %v2417_v26, %v2414_v8  ;;  %v2820_v47 = vpack.c.bf16 %v2417_v26, %v2417_v26  ;;  %v3066_v39 = vadd.f32 %v3065_v36, %v3064_v35  ;;  %v2439_v43 = vmul.f32 %v2417_v26, %v2417_v26 }
 0x165   :  { %v3040_v24 = vpop.f32.mrf.mxu0  ;;  %v3067_v42 = vpop.f32.mrf.mxu1  ;;  %v2428_v21 = vadd.f32 %v2417_v26, %v2414_v8  ;;  %v1909_v34 = vadd.f32 %v1908_v19, %v1907_v50  ;;  %v1923_v35 = vadd.f32 %v1922_v12, %v1921_v5 }
 0x166   :  { %v2463_v0 = vrot.slane %v2452_v38, %v3299_v13  ;;  %v2470_v44 = vrot.slane %v2820_v47, %v3299_v13  ;;  %v2422_v30 = vadd.f32 %v3066_v39, %v3038_v33  ;;  %v3041_v54 = vadd.f32 %v3040_v24, %v3039_v15 }
 0x167   :  { %v3068_v62 = vpop.f32.mrf.mxu1  ;;  %v2442_v60 = vadd.f32 %v2439_v43, %v2438_v45  ;;  %v1910_v36 = vadd.f32 %v1909_v34, %v3656_v32  ;;  %v1924_v38 = vadd.f32 %v1923_v35, %v3658_v46 }
 0x168   :  { %v2498_v56 = vcombine.low %v1936_v2, %v2463_v0  ;;  %v2823_v49 = vcombine.high %v1936_v2, %v2463_v0  ;;  %v2530_v16 = vcombine.low %v1943_v20, %v2470_v44  ;;  %v2825_v48 = vcombine.high %v1943_v20, %v2470_v44 }
 0x169   :  { %v2440_v29 = vmul.f32 %v2422_v30, %v2422_v30  ;;  %v3069_v4 = vadd.f32 %v3068_v62, %v3067_v42  ;;  %v2429_v61 = vadd.f32 %v2428_v21, %v2422_v30 }
 0x16a   :  { %2831 = vst.sshfl [vmem:[%s3716_s4 + $0x4] sm:$0x33 pattern:$0x76325410] %v2498_v56 }
 0x16b   :  { %2833 = vst.sshfl [vmem:[%s3716_s4 + $0xc] sm:$0x33 pattern:$0x76325410] %v2823_v49  ;;  %v2425_v1 = vadd.f32 %v3069_v4, %v3041_v54  ;;  %v2443_v52 = vadd.f32 %v2442_v60, %v2440_v29 }
 0x16c   :  { %2835 = vst.sshfl [vmem:[%s3716_s4 + $0x14] sm:$0x33 pattern:$0x76325410] %v2530_v16 }
 0x16d   :  { %2837 = vst.sshfl [vmem:[%s3716_s4 + $0x1c] sm:$0x33 pattern:$0x76325410] %v2825_v48  ;;  %v2430_v3 = vadd.f32 %v2429_v61, %v2425_v1  ;;  %v2441_v37 = vmul.f32 %v2425_v1, %v2425_v1  ;;  %v2453_v28 = vpack.c.bf16 %v2425_v1, %v2422_v30  ;;  %v2821_v6 = vpack.c.bf16 %v2425_v1, %v2425_v1 }
 0x16f   :  { %v2431_v53 = vrot.slane %v2430_v3, 4  ;;  %v2444_v7 = vadd.f32 %v2443_v52, %v2441_v37  ;;  %v2480_v55 = vrot.slane %v2453_v28, %v3299_v13  ;;  %v2487_v63 = vrot.slane %v2821_v6, %v3299_v13 }
 0x171   :  { %v2432_v9 = vadd.f32 %v2431_v53, %v2430_v3  ;;  %v2445_v11 = vrot.slane %v2444_v7, 4  ;;  %v2562_v59 = vcombine.low %v1953_v10, %v2480_v55  ;;  %v2827_v14 = vcombine.high %v1953_v10, %v2480_v55 }
 0x172   :  { %v2594_v17 = vcombine.low %v1960_v31, %v2487_v63  ;;  %v2829_v18 = vcombine.high %v1960_v31, %v2487_v63 }
 0x173   :  { %v2433_v22 = vrot.slane %v2432_v9, 2  ;;  %v2446_v23 = vadd.f32 %v2445_v11, %v2444_v7  ;;  %2839 = vst.sshfl [vmem:[%s3716_s4 + $0x24] sm:$0x33 pattern:$0x76325410] %v2562_v59 }
 0x174   :  { %2841 = vst.sshfl [vmem:[%s3716_s4 + $0x2c] sm:$0x33 pattern:$0x76325410] %v2827_v14 }
 0x175   :  { %2843 = vst.sshfl [vmem:[%s3716_s4 + $0x34] sm:$0x33 pattern:$0x76325410] %v2594_v17  ;;  %v2434_v13 = vadd.f32 %v2433_v22, %v2432_v9  ;;  %v2447_v27 = vrot.slane %v2446_v23, 2 }
 0x176   :  { %2845 = vst.sshfl [vmem:[%s3716_s4 + $0x3c] sm:$0x33 pattern:$0x76325410] %v2829_v18 }
 0x177   :  { %v2435_v8 = vrot.slane %v2434_v13, 1  ;;  %v2448_v26 = vadd.f32 %v2447_v27, %v2446_v23 }
 0x179   :  { %v2436_v33 = vadd.f32 %v2435_v8, %v2434_v13  ;;  %v2449_v15 = vrot.slane %v2448_v26, 1 }
 0x17b   :  { %v2450_v47 = vadd.f32 %v2449_v15, %v2448_v26  ;;  %v2437_v39 = vadd.f32 %v2436_v33, %v1910_v36 }
 0x17d   :  { %v2451_v24 = vadd.f32 %v2450_v47, %v1924_v38 }
 0x17f   :  { %v2651_v2 = vsel %vm170_vm2, %v2437_v39, %v2451_v24 }
 0x180   :  { %2652 = vst [vmem:[%s3717_s5] sm:$0x3] %v2651_v2 }
 0x181   :  { %2661 = vsyncpa [#allocation3], 1 }

// kernel: generator_forward.7
= control target key start
LH: loop header
LB: loop body
LE: loop exit
PB: predicated region body
PF: predicated region fallthrough
CT: control target
= control target key end

     0   :  { %s3375_s18 = smov 0   ;;  %s4708_s0 = inlined_call_operand.vmem [shape: bf16[2,16,16,128], index: 0, kind: input, shape index: {}]   ;;  %s4709_s1 = inlined_call_operand.vmem [shape: bf16[1152,128], index: 1, kind: input, shape index: {}]   ;;  %s4710_s2 = inlined_call_operand.vmem [shape: f32[1,128], index: 2, kind: input, shape index: {}]   ;;  %s4711_s3 = inlined_call_operand.vmem [shape: f32[1,128], index: 3, kind: input, shape index: {}]   ;;  %s4712_s4 = inlined_call_operand.vmem [shape: f32[1,128], index: 4, kind: input, shape index: {}]   ;;  %s4713_s5 = inlined_call_operand.vmem [shape: f32[2,16,16,3], index: 5, kind: output, shape index: {}]  }
   0x1 LB: > { %s2486_s19 = sadd.s32 4294967295, %s3342_s18   ;;  %p2490_p0 = scmp.ge.s32.totalorder %s3342_s18, 1  ;;  %s3342_s18 = sphi %s3375_s18, %s15_s18  }
   0x2   : > { %p187_p1 = scmp.lt.s32.totalorder %s3342_s18, 3 }
   0x4   : > { %p188_p2 = pnand %p2490_p0, %p187_p1 }
   0x6   : > { %191 = sbr.rel (%p188_p2) target bundleno = 555 (0x22b), region = 40 }
   0xb   : > { %v3198_v0 = vld [vmem:[%s4709_s1 + $0x78] sm:$0xff]   ;;  %v3344_v2 = vmov 0   ;;  %v3200_v4 = vld [vmem:[%s4709_s1 + $0x70] sm:$0xff]   ;;  %p215_p3 = scmp.lt.s32.totalorder %s2486_s19, 1  ;;  %v3202_v6 = vld [vmem:[%s4709_s1 + $0x68] sm:$0xff]   ;;  %vm624_vm0 = vcmask 1040384  }
   0xc   : > { %v3199_v1 = vld [vmem:[%s4709_s1 + $0x38] sm:$0xff]   ;;  %v3390_v3 = vrot.slane %v3344_v2, 1  ;;  %2653 = vmatprep.subr.bf16.mxu0 %v3198_v0  ;;  %3173 = vmatprep.subr.bf16.mxu1 %v3198_v0  ;;  %v3201_v5 = vld [vmem:[%s4709_s1 + $0x30] sm:$0xff]   ;;  %v3203_v7 = vld [vmem:[%s4709_s1 + $0x28] sm:$0xff]   ;;  %vm625_vm3 = vsmask.f32 256 }
   0xd   : > { %2654 = vmatpush3.bf16.msra.mxu0 %v3199_v1  ;;  %3181 = vmatpush3.bf16.msra.mxu1 %v3199_v1  ;;  %s4737_s19 = smov (!%p215_p3, %s2486_s19), 1  ;;  %v3204_v8 = vld [vmem:[%s4709_s1 + $0x60] sm:$0xff]   ;;  %v3206_v10 = vld [vmem:[%s4709_s1 + $0x58] sm:$0xff]   ;;  %v3208_v12 = vld [vmem:[%s4709_s1 + $0x50] sm:$0xff]   ;;  %vm659_vm9 = vsmask.f32 7424 }
   0xe   : > { %2655 = vmatprep.subr.bf16.mxu0 %v3200_v4  ;;  %3174 = vmatprep.subr.bf16.mxu1 %v3200_v4  ;;  %s2572_s9 = sshll.u32 %s4737_s19, 7  ;;  %v3205_v9 = vld [vmem:[%s4709_s1 + $0x20] sm:$0xff]   ;;  %v3207_v11 = vld [vmem:[%s4709_s1 + $0x18] sm:$0xff]   ;;  %v3209_v18 = vld [vmem:[%s4709_s1 + $0x10] sm:$0xff]   ;;  %s2573_s22 = sshll.u32 %s4737_s19, 8 }
   0xf   : > { %1593 = vmatprep.mubr.bf16.mxu0 %v3390_v3  ;;  %s3420_s16 = scalar_lea.vmem %s4708_s0, %s2572_s9  ;;  %v3432_v14 = vld [vmem:[%s4710_s2] ss:$0 sm:$0xff]  ;;  %v3210_v21 = vld [vmem:[%s4709_s1 + $0x48] sm:$0xff]   ;;  %vm3461_vm4 = vmand %vm624_vm0, %vm625_vm3  ;;  %s4583_s19 = scalar_lea.vmem %s4713_s5, %s2573_s22 }
  0x10   : > { %v2648_v13 = vld [vmem:[%s3420_s16 + $0x58] sm:$0xff]   ;;  %v3437_v17 = vld [vmem:[%s4711_s3] ss:$0 sm:$0xff]  ;;  %v3211_v22 = vld [vmem:[%s4709_s1 + $0x8] sm:$0xff]  }
  0x11   : > { %2656 = vmatpush3.bf16.msra.mxu0 %v3201_v5  ;;  %3182 = vmatpush3.bf16.msra.mxu1 %v3201_v5  ;;  %v2620_v15 = vunpack.c.l.bf16 %v2648_v13  ;;  %v2621_v16 = vunpack.c.h.bf16 %v2648_v13  ;;  %v3212_v25 = vld [vmem:[%s4709_s1 + $0x40] sm:$0xff]   ;;  %v3214_v41 = vld [vmem:[%s4709_s1 + $0xf8] sm:$0xff]   ;;  %v2638_v47 = vld [vmem:[%s3420_s16 + $0x8] sm:$0xff]  }
  0x12   : > { %2657 = vmatprep.subr.bf16.mxu0 %v3202_v6  ;;  %3175 = vmatprep.subr.bf16.mxu1 %v3202_v6  ;;  %v2575_v30 = vld [vmem:[%s3420_s16] sm:$0xff]   ;;  %v3217_v42 = vld [vmem:[%s4709_s1 + $0x178] sm:$0xff]   ;;  %v2580_v51 = vunpack.c.l.bf16 %v2638_v47  ;;  %v2650_v52 = vld [vmem:[%s3420_s16 + $0x68] sm:$0xff]   ;;  %v2581_v56 = vunpack.c.h.bf16 %v2638_v47 }
  0x13   : > { %v319_v19 = vmul.f32 %v2620_v15, %v3432_v14  ;;  %v320_v20 = vmul.f32 %v2621_v16, %v3432_v14  ;;  %v2649_v31 = vld [vmem:[%s3420_s16 + $0x60] sm:$0xff]   ;;  %v2576_v34 = vunpack.c.l.bf16 %v2575_v30  ;;  %v2577_v35 = vunpack.c.h.bf16 %v2575_v30  ;;  %v3219_v53 = vld [vmem:[%s4709_s1 + $0x138] sm:$0xff]   ;;  %v3225_v60 = vld [vmem:[%s4709_s1 + $0x170] sm:$0xff]  }
  0x14   : > { %v3213_v32 = vld [vmem:[%s4709_s1] sm:$0xff]   ;;  %v2624_v36 = vunpack.c.l.bf16 %v2649_v31  ;;  %v2625_v38 = vunpack.c.h.bf16 %v2649_v31  ;;  %v2628_v57 = vunpack.c.l.bf16 %v2650_v52  ;;  %v3227_v13 = vld [vmem:[%s4709_s1 + $0x130] sm:$0xff]  }
  0x15   : > { %2658 = vmatpush3.bf16.msra.mxu0 %v3203_v7  ;;  %3183 = vmatpush3.bf16.msra.mxu1 %v3203_v7  ;;  %v358_v23 = vadd.f32 %v3437_v17, %v319_v19  ;;  %v359_v24 = vadd.f32 %v3437_v17, %v320_v20  ;;  %v297_v43 = vmul.f32 %v2576_v34, %v3432_v14 }
  0x16   : > { %2659 = vmatprep.subr.bf16.mxu0 %v3204_v8  ;;  %3176 = vmatprep.subr.bf16.mxu1 %v3204_v8  ;;  %v298_v44 = vmul.f32 %v2577_v35, %v3432_v14  ;;  %v321_v45 = vmul.f32 %v2624_v36, %v3432_v14  ;;  %v322_v46 = vmul.f32 %v2625_v38, %v3432_v14  ;;  %v3218_v36 = vld [vmem:[%s4709_s1 + $0xb0] sm:$0xff]  }
  0x17   : > { %vm390_vm1 = vcmp.ge.f32.partialorder %v358_v23, 0.0  ;;  %vm391_vm2 = vcmp.ge.f32.partialorder %v359_v24, 0.0  ;;  %v422_v26 = vmul.f32 0.2, %v358_v23  ;;  %v423_v27 = vmul.f32 0.2, %v359_v24 }
  0x18   : > { %v336_v49 = vadd.f32 %v3437_v17, %v297_v43  ;;  %v337_v50 = vadd.f32 %v3437_v17, %v298_v44  ;;  %v360_v54 = vadd.f32 %v3437_v17, %v321_v45  ;;  %v361_v55 = vadd.f32 %v3437_v17, %v322_v46  ;;  %v3220_v45 = vld [vmem:[%s4709_s1 + $0xe8] sm:$0xff]  }
  0x19   : > { %2660 = vmatpush3.bf16.msra.mxu0 %v3205_v9  ;;  %3184 = vmatpush3.bf16.msra.mxu1 %v3205_v9  ;;  %v454_v28 = vsel %vm390_vm1, %v358_v23, %v422_v26  ;;  %v455_v29 = vsel %vm391_vm2, %v359_v24, %v423_v27  ;;  %v300_v19 = vmul.f32 %v2581_v56, %v3432_v14  ;;  %v3215_v24 = vld [vmem:[%s4709_s1 + $0xb8] sm:$0xff]  }
  0x1a   : > { %2661 = vmatprep.subr.bf16.mxu0 %v3206_v10  ;;  %3177 = vmatprep.subr.bf16.mxu1 %v3206_v10  ;;  %v475_v33 = vpack.c.bf16 %v455_v29, %v454_v28  ;;  %vm368_vm5 = vcmp.ge.f32.partialorder %v336_v49, 0.0  ;;  %vm369_vm6 = vcmp.ge.f32.partialorder %v337_v50, 0.0  ;;  %v400_v62 = vmul.f32 0.2, %v336_v49 }
  0x1b   : > { %v401_v63 = vmul.f32 0.2, %v337_v50  ;;  %vm392_vm7 = vcmp.ge.f32.partialorder %v360_v54, 0.0  ;;  %vm393_vm8 = vcmp.ge.f32.partialorder %v361_v55, 0.0  ;;  %v424_v1 = vmul.f32 0.2, %v360_v54 }
  0x1c   : > { %v558_v39 = vshrl.u32 %v475_v33, 16  ;;  %v561_v40 = vshll.u32 %v475_v33, 16  ;;  %v425_v4 = vmul.f32 0.2, %v361_v55  ;;  %v432_v8 = vsel %vm368_vm5, %v336_v49, %v400_v62 }
  0x1d   : > { %2662 = vmatpush3.bf16.msra.mxu0 %v3207_v11  ;;  %3185 = vmatpush3.bf16.msra.mxu1 %v3207_v11  ;;  %v433_v9 = vsel %vm369_vm6, %v337_v50, %v401_v63  ;;  %v456_v10 = vsel %vm392_vm7, %v360_v54, %v424_v1  ;;  %v339_v30 = vadd.f32 %v3437_v17, %v300_v19  ;;  %v2639_v50 = vld [vmem:[%s3420_s16 + $0x10] sm:$0xff]   ;;  %v3222_v1 = vld [vmem:[%s4709_s1 + $0xe0] sm:$0xff]   ;;  %v3235_v19 = vld [vmem:[%s4709_s1 + $0x128] sm:$0xff]  }
  0x1e   : > { %2663 = vmatprep.subr.bf16.mxu0 %v3208_v12  ;;  %3178 = vmatprep.subr.bf16.mxu1 %v3208_v12  ;;  %v560_v48 = vrot.slane %v558_v39, 7  ;;  %v457_v11 = vsel %vm393_vm8, %v361_v55, %v425_v4  ;;  %v299_v12 = vmul.f32 %v2580_v51, %v3432_v14  ;;  %v464_v16 = vpack.c.bf16 %v433_v9, %v432_v8  ;;  %v3233_v51 = vld [vmem:[%s4709_s1 + $0x168] sm:$0xff]   ;;  %v3552_v55 = vld [vmem:[%s3420_s16 + $0x70] sm:$0xff]  }
  0x1f   : > { %vm371_vm11 = vcmp.ge.f32.partialorder %v339_v30, 0.0  ;;  %v403_v38 = vmul.f32 0.2, %v339_v30 }
  0x20   : > { %v563_v58 = vor.u32 %v561_v40, %v560_v48  ;;  %v3486_v59 = vsel %vm3461_vm4, %v560_v48, 0  ;;  %v338_v20 = vadd.f32 %v3437_v17, %v299_v12  ;;  %v481_v26 = vshrl.u32 %v464_v16, 16 }
  0x21   : > { %2664 = vmatpush3.bf16.msra.mxu0 %v3209_v18  ;;  %3186 = vmatpush3.bf16.msra.mxu1 %v3209_v18  ;;  %v808_v61 = vshll.u32 %v3486_v59, 16  ;;  %v476_v18 = vpack.c.bf16 %v457_v11, %v456_v10  ;;  %v484_v27 = vshll.u32 %v464_v16, 16  ;;  %v435_v48 = vsel %vm371_vm11, %v339_v30, %v403_v38  ;;  %v2640_v30 = vld [vmem:[%s3420_s16 + $0x18] sm:$0xff]  }
  0x22   : > { %2665 = vmatprep.subr.bf16.mxu0 %v3210_v21  ;;  %3179 = vmatprep.subr.bf16.mxu1 %v3210_v21  ;;  %v3494_v0 = vsel %vm3461_vm4, 0, %v563_v58  ;;  %v2629_v21 = vunpack.c.h.bf16 %v2650_v52  ;;  %vm370_vm10 = vcmp.ge.f32.partialorder %v338_v20, 0.0  ;;  %v402_v31 = vmul.f32 0.2, %v338_v20 }
  0x23   : > { %v801_v5 = vshrl.u32 %v3494_v0, 16  ;;  %v803_v6 = vshll.u32 %v3494_v0, 16  ;;  %v810_v7 = vrot.slane %v808_v61, 1  ;;  %v565_v28 = vshrl.u32 %v476_v18, 16  ;;  %v3221_v61 = vld [vmem:[%s4709_s1 + $0xa8] sm:$0xff]  }
  0x24   : > { %v568_v29 = vshll.u32 %v476_v18, 16  ;;  %v483_v33 = vrot.slane %v481_v26, 7  ;;  %v324_v35 = vmul.f32 %v2629_v21, %v3432_v14  ;;  %v434_v39 = vsel %vm370_vm10, %v338_v20, %v402_v31  ;;  %v3223_v21 = vld [vmem:[%s4709_s1 + $0xa0] sm:$0xff]  }
  0x25   : > { %2666 = vmatpush3.bf16.msra.mxu0 %v3211_v22  ;;  %3187 = vmatpush3.bf16.msra.mxu1 %v3211_v22  ;;  %v805_v15 = vrot.slane %v803_v6, 1  ;;  %v323_v22 = vmul.f32 %v2628_v57, %v3432_v14  ;;  %v567_v34 = vrot.slane %v565_v28, 7  ;;  %v465_v54 = vpack.c.bf16 %v435_v48, %v434_v39 }
  0x26   : > { %2667 = vmatprep.subr.bf16.mxu0 %v3212_v25  ;;  %3180 = vmatprep.subr.bf16.mxu1 %v3212_v25  ;;  %v3216_v25 = vld [vmem:[%s4709_s1 + $0xf0] sm:$0xff]   ;;  %v363_v49 = vadd.f32 %v3437_v17, %v324_v35  ;;  %v2584_v11 = vunpack.c.l.bf16 %v2639_v50  ;;  %v2585_v12 = vunpack.c.h.bf16 %v2639_v50  ;;  %v2632_v18 = vunpack.c.l.bf16 %v3552_v55 }
  0x27   : > { %v806_v23 = vor.u32 %v805_v15, %v801_v5  ;;  %v362_v40 = vadd.f32 %v3437_v17, %v323_v22  ;;  %v570_v43 = vor.u32 %v568_v29, %v567_v34  ;;  %v3531_v44 = vsel %vm3461_vm4, %v567_v34, 0 }
  0x28   : > { %v820_v47 = vshll.u32 %v3531_v44, 16  ;;  %v488_v4 = vshrl.u32 %v465_v54, 16  ;;  %v491_v5 = vshll.u32 %v465_v54, 16  ;;  %vm395_vm13 = vcmp.ge.f32.partialorder %v363_v49, 0.0 }
  0x29   : > { %2668 = vmatpush3.bf16.msra.mxu0 %v3213_v32  ;;  %3188 = vmatpush3.bf16.msra.mxu1 %v3213_v32  ;;  %v3516_v32 = vsel %vm659_vm9, %v806_v23, %v810_v7  ;;  %vm394_vm12 = vcmp.ge.f32.partialorder %v362_v40, 0.0  ;;  %v426_v7 = vmul.f32 0.2, %v362_v40  ;;  %v427_v8 = vmul.f32 0.2, %v363_v49 }
  0x2a   : > { %2765 = vmatprep.subr.bf16.mxu1 %v3214_v41  ;;  %2877 = vmatprep.subr.bf16.mxu0 %v3217_v42  ;;  %v486_v41 = vor.u32 %v484_v27, %v483_v33  ;;  %v3527_v42 = vsel %vm3461_vm4, %v483_v33, 0  ;;  %v822_v63 = vrot.slane %v820_v47, 1  ;;  %v490_v10 = vrot.slane %v488_v4, 7  ;;  %v3224_v27 = vld [vmem:[%s4709_s1 + $0xd8] sm:$0xff]   ;;  %v3228_v47 = vld [vmem:[%s4709_s1 + $0xd0] sm:$0xff]  }
  0x2b   : > { %1689 = vmatprep.mubr.bf16.mxu1 %v3516_v32  ;;  %v676_v46 = vshll.u32 %v3527_v42, 16  ;;  %v458_v15 = vsel %vm394_vm12, %v362_v40, %v426_v7  ;;  %v459_v16 = vsel %vm395_vm13, %v363_v49, %v427_v8  ;;  %v301_v28 = vmul.f32 %v2584_v11, %v3432_v14  ;;  %v3230_v7 = vld [vmem:[%s4709_s1 + $0xc8] sm:$0xff]  }
  0x2c   : > { %1594 = vmatmul.mubr.bf16.vlgmr.msra.gmra.mxu0 %v3344_v2  ;;  %1690 = vmatmul.mubr.bf16.vlgmr.msra.gmra.mxu1 %v3494_v0  ;;  %v3545_v52 = vsel %vm3461_vm4, 0, %v486_v41  ;;  %v493_v22 = vor.u32 %v491_v5, %v490_v10  ;;  %v3574_v23 = vsel %vm3461_vm4, %v490_v10, 0  ;;  %v302_v29 = vmul.f32 %v2585_v12, %v3432_v14  ;;  %v3226_v41 = vld [vmem:[%s4709_s1 + $0x98] sm:$0xff]  }
  0x2d   : > { %2878 = vmatpush3.bf16.msra.mxu0 %v3219_v53  ;;  %2766 = vmatpush3.bf16.msra.mxu1 %v3215_v24  ;;  %v3549_v53 = vsel %vm3461_vm4, 0, %v570_v43  ;;  %v669_v56 = vshrl.u32 %v3545_v52, 16  ;;  %v671_v57 = vshll.u32 %v3545_v52, 16  ;;  %v678_v58 = vrot.slane %v676_v46, 1 }
  0x2e   : > { %2879 = vmatprep.subr.bf16.mxu0 %v3225_v60  ;;  %2767 = vmatprep.subr.bf16.mxu1 %v3216_v25  ;;  %v813_v60 = vshrl.u32 %v3549_v53, 16  ;;  %v815_v62 = vshll.u32 %v3549_v53, 16  ;;  %v477_v24 = vpack.c.bf16 %v459_v16, %v458_v15  ;;  %v688_v26 = vshll.u32 %v3574_v23, 16  ;;  %v3242_v15 = vld [vmem:[%s4709_s1 + $0x158] sm:$0xff]  }
  0x2f   : > { %v673_v6 = vrot.slane %v671_v57, 1  ;;  %v3592_v33 = vsel %vm3461_vm4, 0, %v493_v22  ;;  %v340_v43 = vadd.f32 %v3437_v17, %v301_v28  ;;  %v341_v48 = vadd.f32 %v3437_v17, %v302_v29 }
  0x30   : > { %v817_v9 = vrot.slane %v815_v62, 1  ;;  %v572_v34 = vshrl.u32 %v477_v24, 16  ;;  %v575_v35 = vshll.u32 %v477_v24, 16  ;;  %v681_v38 = vshrl.u32 %v3592_v33, 16  ;;  %v3229_v62 = vld [vmem:[%s4709_s1 + $0x90] sm:$0xff]  }
  0x31   : > { %2880 = vmatpush3.bf16.msra.mxu0 %v3227_v13  ;;  %2768 = vmatpush3.bf16.msra.mxu1 %v3218_v36  ;;  %v674_v13 = vor.u32 %v673_v6, %v669_v56  ;;  %v3238_v36 = vld [vmem:[%s4709_s1 + $0x160] sm:$0xff]   ;;  %v683_v39 = vshll.u32 %v3592_v33, 16  ;;  %v690_v40 = vrot.slane %v688_v26, 1  ;;  %v2633_v49 = vunpack.c.h.bf16 %v3552_v55 }
  0x32   : > { %2881 = vmatprep.subr.bf16.mxu0 %v3233_v51  ;;  %2769 = vmatprep.subr.bf16.mxu1 %v3220_v45  ;;  %v818_v20 = vor.u32 %v817_v9, %v813_v60  ;;  %v3239_v45 = vld [vmem:[%s4709_s1 + $0x120] sm:$0xff]   ;;  %v574_v46 = vrot.slane %v572_v34, 7  ;;  %v325_v50 = vmul.f32 %v2632_v18, %v3432_v14  ;;  %vm372_vm14 = vcmp.ge.f32.partialorder %v340_v43, 0.0 }
  0x33   : > { %v3577_v25 = vsel %vm659_vm9, %v674_v13, %v678_v58  ;;  %v685_v51 = vrot.slane %v683_v39, 1  ;;  %v404_v54 = vmul.f32 0.2, %v340_v43  ;;  %v2588_v56 = vunpack.c.l.bf16 %v2640_v30  ;;  %v2641_v9 = vld [vmem:[%s3420_s16 + $0x20] sm:$0xff]  }
  0x34   : > { %1601 = vmatprep.mubr.bf16.mxu0 %v3577_v25  ;;  %v3588_v31 = vsel %vm659_vm9, %v818_v20, %v822_v63  ;;  %v577_v57 = vor.u32 %v575_v35, %v574_v46  ;;  %v3617_v58 = vsel %vm3461_vm4, %v574_v46, 0  ;;  %vm373_vm15 = vcmp.ge.f32.partialorder %v341_v48, 0.0  ;;  %v3243_v20 = vld [vmem:[%s4709_s1 + $0x118] sm:$0xff]  }
  0x35   : > { %2770 = vmatpush3.bf16.msra.mxu1 %v3221_v61  ;;  %2882 = vmatpush3.bf16.msra.mxu0 %v3235_v19  ;;  %v405_v60 = vmul.f32 0.2, %v341_v48  ;;  %v686_v61 = vor.u32 %v685_v51, %v681_v38  ;;  %v832_v55 = vshll.u32 %v3617_v58, 16  ;;  %v436_v63 = vsel %vm372_vm14, %v340_v43, %v404_v54  ;;  %v3234_v54 = vld [vmem:[%s4709_s1 + $0x80] sm:$0xff]  }
  0x36   : > { %2771 = vmatprep.subr.bf16.mxu1 %v3222_v1  ;;  %1697 = vmatprep.mubr.bf16.mxu1 %v3588_v31  ;;  %v326_v1 = vmul.f32 %v2633_v49, %v3432_v14  ;;  %v3626_v4 = vsel %vm3461_vm4, 0, %v577_v57  ;;  %v364_v6 = vadd.f32 %v3437_v17, %v325_v50  ;;  %v2589_v8 = vunpack.c.h.bf16 %v2640_v30  ;;  %v3244_v30 = vld [vmem:[%s4709_s1 + $0x150] sm:$0xff]  }
  0x37   : > { %1602 = vmatmul.mubr.bf16.gmra.mxu0 %v3545_v52  ;;  %1698 = vmatmul.mubr.bf16.gmra.mxu1 %v3549_v53  ;;  %v437_v5 = vsel %vm373_vm15, %v341_v48, %v405_v60  ;;  %v3634_v10 = vsel %vm659_vm9, %v686_v61, %v690_v40  ;;  %v825_v11 = vshrl.u32 %v3626_v4, 16  ;;  %v827_v12 = vshll.u32 %v3626_v4, 16  ;;  %v3232_v48 = vld [vmem:[%s4709_s1 + $0xc0] sm:$0xff]   ;;  %v3246_v49 = vld [vmem:[%s4709_s1 + $0x110] sm:$0xff]  }
  0x38   : > { %2883 = vmatprep.subr.bf16.mxu0 %v3238_v36  ;;  %v834_v13 = vrot.slane %v832_v55, 1  ;;  %1609 = vmatprep.mubr.bf16.mxu0 %v3634_v10  ;;  %v466_v16 = vpack.c.bf16 %v437_v5, %v436_v63  ;;  %v365_v18 = vadd.f32 %v3437_v17, %v326_v1  ;;  %vm396_vm0 = vcmp.ge.f32.partialorder %v364_v6, 0.0  ;;  %v3248_v63 = vld [vmem:[%s4709_s1 + $0x148] sm:$0xff]  }
  0x39   : > { %2772 = vmatpush3.bf16.msra.mxu1 %v3223_v21  ;;  %2884 = vmatpush3.bf16.msra.mxu0 %v3239_v45  ;;  %v428_v19 = vmul.f32 0.2, %v364_v6  ;;  %v829_v21 = vrot.slane %v827_v12, 1  ;;  %v303_v22 = vmul.f32 %v2588_v56, %v3432_v14  ;;  %v304_v24 = vmul.f32 %v2589_v8, %v3432_v14  ;;  %v3249_v8 = vld [vmem:[%s4709_s1 + $0x108] sm:$0xff]  }
  0x3a   : > { %2773 = vmatprep.subr.bf16.mxu1 %v3224_v27  ;;  %v2592_v26 = vunpack.c.l.bf16 %v2641_v9  ;;  %2885 = vmatprep.subr.bf16.mxu0 %v3242_v15  ;;  %v495_v27 = vshrl.u32 %v466_v16, 16  ;;  %v498_v28 = vshll.u32 %v466_v16, 16  ;;  %vm397_vm1 = vcmp.ge.f32.partialorder %v365_v18, 0.0 }
  0x3b   : > { %v429_v29 = vmul.f32 0.2, %v365_v18  ;;  %v830_v34 = vor.u32 %v829_v21, %v825_v11  ;;  %v460_v35 = vsel %vm396_vm0, %v364_v6, %v428_v19  ;;  %v342_v36 = vadd.f32 %v3437_v17, %v303_v22 }
  0x3c   : > { %v343_v38 = vadd.f32 %v3437_v17, %v304_v24  ;;  %v497_v39 = vrot.slane %v495_v27, 7  ;;  %v2593_v43 = vunpack.c.h.bf16 %v2641_v9  ;;  %v305_v45 = vmul.f32 %v2592_v26, %v3432_v14  ;;  %v2642_v24 = vld [vmem:[%s3420_s16 + $0x28] sm:$0xff]  }
  0x3d   : > { %2774 = vmatpush3.bf16.msra.mxu1 %v3226_v41  ;;  %2886 = vmatpush3.bf16.msra.mxu0 %v3243_v20  ;;  %v461_v40 = vsel %vm397_vm1, %v365_v18, %v429_v29  ;;  %v3231_v41 = vld [vmem:[%s4709_s1 + $0x88] sm:$0xff]   ;;  %v3660_v46 = vsel %vm659_vm9, %v830_v34, %v834_v13  ;;  %vm374_vm2 = vcmp.ge.f32.partialorder %v342_v36, 0.0  ;;  %v406_v56 = vmul.f32 0.2, %v342_v36  ;;  %v3236_v13 = vld [vmem:[%s4709_s1 + $0x1f8] sm:$0xff]  }
  0x3e   : > { %2775 = vmatprep.subr.bf16.mxu1 %v3228_v47  ;;  %2887 = vmatprep.subr.bf16.mxu0 %v3244_v30  ;;  %v478_v47 = vpack.c.bf16 %v461_v40, %v460_v35  ;;  %vm375_vm3 = vcmp.ge.f32.partialorder %v343_v38, 0.0  ;;  %v500_v50 = vor.u32 %v498_v28, %v497_v39  ;;  %v3671_v51 = vsel %vm3461_vm4, %v497_v39, 0 }
  0x3f   : > { %1610 = vmatmul.mubr.bf16.gmra.mxu0 %v3592_v33  ;;  %1705 = vmatprep.mubr.bf16.mxu1 %v3660_v46  ;;  %v407_v57 = vmul.f32 0.2, %v343_v38  ;;  %v700_v60 = vshll.u32 %v3671_v51, 16  ;;  %v438_v5 = vsel %vm374_vm2, %v342_v36, %v406_v56  ;;  %v3253_v56 = vld [vmem:[%s4709_s1 + $0x100] sm:$0xff]   ;;  %vm895_vm10 = vcmask 1046528  }
  0x40   : > { %1706 = vmatmul.mubr.bf16.gmra.mxu1 %v3626_v4  ;;  %v579_v61 = vshrl.u32 %v478_v47, 16  ;;  %v582_v55 = vshll.u32 %v478_v47, 16  ;;  %v3684_v1 = vsel %vm3461_vm4, 0, %v500_v50 }
  0x41   : > { %2776 = vmatpush3.bf16.msra.mxu1 %v3229_v62  ;;  %v306_v62 = vmul.f32 %v2593_v43, %v3432_v14  ;;  %2888 = vmatpush3.bf16.msra.mxu0 %v3246_v49  ;;  %v439_v6 = vsel %vm375_vm3, %v343_v38, %v407_v57  ;;  %v693_v9 = vshrl.u32 %v3684_v1, 16  ;;  %v695_v11 = vshll.u32 %v3684_v1, 16 }
  0x42   : > { %2777 = vmatprep.subr.bf16.mxu1 %v3230_v7  ;;  %v344_v7 = vadd.f32 %v3437_v17, %v305_v45  ;;  %v581_v12 = vrot.slane %v579_v61, 7  ;;  %2889 = vmatprep.subr.bf16.mxu0 %v3248_v63  ;;  %v467_v15 = vpack.c.bf16 %v439_v6, %v438_v5  ;;  %v702_v20 = vrot.slane %v700_v60, 1  ;;  %v2643_v6 = vld [vmem:[%s3420_s16 + $0x30] sm:$0xff]  }
  0x43   : > { %v345_v16 = vadd.f32 %v3437_v17, %v306_v62  ;;  %v697_v19 = vrot.slane %v695_v11, 1  ;;  %v2596_v45 = vunpack.c.l.bf16 %v2642_v24  ;;  %v2597_v60 = vunpack.c.h.bf16 %v2642_v24  ;;  %v3739_v11 = vld [vmem:[%s4709_s1 + $0x238] sm:$0xff]  }
  0x44   : > { %vm376_vm5 = vcmp.ge.f32.partialorder %v344_v7, 0.0  ;;  %v408_v18 = vmul.f32 0.2, %v344_v7  ;;  %v584_v21 = vor.u32 %v582_v55, %v581_v12  ;;  %v3700_v22 = vsel %vm3461_vm4, %v581_v12, 0 }
  0x45   : > { %2778 = vmatpush3.bf16.msra.mxu1 %v3231_v41  ;;  %2890 = vmatpush3.bf16.msra.mxu0 %v3249_v8  ;;  %v844_v26 = vshll.u32 %v3700_v22, 16  ;;  %v502_v27 = vshrl.u32 %v467_v15, 16  ;;  %v505_v28 = vshll.u32 %v467_v15, 16  ;;  %vm377_vm6 = vcmp.ge.f32.partialorder %v345_v16, 0.0 }
  0x46   : > { %2779 = vmatprep.subr.bf16.mxu1 %v3232_v48  ;;  %v698_v29 = vor.u32 %v697_v19, %v693_v9  ;;  %v3706_v30 = vsel %vm3461_vm4, 0, %v584_v21  ;;  %v409_v34 = vmul.f32 0.2, %v345_v16  ;;  %v440_v35 = vsel %vm376_vm5, %v344_v7, %v408_v18 }
  0x47   : > { %v837_v36 = vshrl.u32 %v3706_v30, 16  ;;  %v839_v38 = vshll.u32 %v3706_v30, 16  ;;  %v504_v39 = vrot.slane %v502_v27, 7  ;;  %v846_v41 = vrot.slane %v844_v26, 1 }
  0x48   : > { %v3712_v40 = vsel %vm659_vm9, %v698_v29, %v702_v20  ;;  %v441_v43 = vsel %vm377_vm6, %v345_v16, %v409_v34  ;;  %v307_v61 = vmul.f32 %v2596_v45, %v3432_v14  ;;  %v308_v9 = vmul.f32 %v2597_v60, %v3432_v14 }
  0x49   : > { %2780 = vmatpush3.bf16.msra.mxu1 %v3234_v54  ;;  %1617 = vmatprep.mubr.bf16.mxu0 %v3712_v40  ;;  %v841_v47 = vrot.slane %v839_v38, 1  ;;  %v507_v48 = vor.u32 %v505_v28, %v504_v39  ;;  %v3717_v49 = vsel %vm3461_vm4, %v504_v39, 0  ;;  %v468_v50 = vpack.c.bf16 %v441_v43, %v440_v35  ;;  %v3252_v54 = vld [vmem:[%s4709_s1 + $0x140] sm:$0xff]   ;;  %v2644_v38 = vld [vmem:[%s3420_s16 + $0x38] sm:$0xff]  }
  0x4a   : > { %2989 = vmatprep.subr.bf16.mxu1 %v3236_v13  ;;  %1618 = vmatmul.mubr.bf16.gmra.mxu0 %v3684_v1  ;;  %v712_v57 = vshll.u32 %v3717_v49, 16  ;;  %v346_v15 = vadd.f32 %v3437_v17, %v307_v61  ;;  %v347_v19 = vadd.f32 %v3437_v17, %v308_v9  ;;  %v2600_v20 = vunpack.c.l.bf16 %v2643_v6 }
  0x4b   : > { %v842_v55 = vor.u32 %v841_v47, %v837_v36  ;;  %v3730_v62 = vsel %vm3461_vm4, 0, %v507_v48  ;;  %v509_v63 = vshrl.u32 %v468_v50, 16  ;;  %v512_v5 = vshll.u32 %v468_v50, 16  ;;  %2891 = vmatprep.subr.bf16.mxu0 %v3252_v54  ;;  %v3240_v50 = vld [vmem:[%s4709_s1 + $0x1f0] sm:$0xff]  }
  0x4c   : > { %v705_v7 = vshrl.u32 %v3730_v62, 16  ;;  %v707_v8 = vshll.u32 %v3730_v62, 16  ;;  %2892 = vmatpush3.bf16.msra.mxu0 %v3253_v56  ;;  %v714_v18 = vrot.slane %v712_v57, 1  ;;  %vm378_vm7 = vcmp.ge.f32.partialorder %v346_v15, 0.0 }
  0x4d   : > { %v3742_v12 = vsel %vm659_vm9, %v842_v55, %v846_v41  ;;  %v511_v13 = vrot.slane %v509_v63, 7  ;;  %3125 = vmatprep.subr.bf16.mxu0 %v3739_v11  ;;  %v410_v26 = vmul.f32 0.2, %v346_v15  ;;  %vm379_vm8 = vcmp.ge.f32.partialorder %v347_v19, 0.0  ;;  %v3237_v41 = vld [vmem:[%s4709_s1 + $0x1b8] sm:$0xff]  }
  0x4e   : > { %1713 = vmatprep.mubr.bf16.mxu1 %v3742_v12  ;;  %v709_v16 = vrot.slane %v707_v8, 1  ;;  %v411_v29 = vmul.f32 0.2, %v347_v19  ;;  %v2601_v36 = vunpack.c.h.bf16 %v2643_v6  ;;  %v898_v47 = vrot.slane %v3545_v52, 1 }
  0x4f   : > { %1714 = vmatmul.mubr.bf16.gmra.mxu1 %v3706_v30  ;;  %v514_v21 = vor.u32 %v512_v5, %v511_v13  ;;  %v3751_v24 = vsel %vm3461_vm4, %v511_v13, 0  ;;  %v442_v35 = vsel %vm378_vm7, %v346_v15, %v410_v26  ;;  %v309_v54 = vmul.f32 %v2600_v20, %v3432_v14 }
  0x50   : > { %v710_v27 = vor.u32 %v709_v16, %v705_v7  ;;  %1754 = vmatprep.mubr.bf16.mxu1 %v3545_v52  ;;  %v724_v28 = vshll.u32 %v3751_v24, 16  ;;  %v443_v48 = vsel %vm379_vm8, %v347_v19, %v411_v29  ;;  %v310_v56 = vmul.f32 %v2601_v36, %v3432_v14  ;;  %v2645_v7 = vld [vmem:[%s3420_s16 + $0x40] sm:$0xff]   ;;  %v3241_v19 = vld [vmem:[%s4709_s1 + $0x1b0] sm:$0xff]   ;;  %v3245_v29 = vld [vmem:[%s4709_s1 + $0x1e8] sm:$0xff]  }
  0x51   : > { %v3757_v34 = vsel %vm3461_vm4, 0, %v514_v21  ;;  %v469_v61 = vpack.c.bf16 %v443_v48, %v442_v35  ;;  %v2604_v55 = vunpack.c.l.bf16 %v2644_v38  ;;  %v899_v63 = vrot.slane %v3527_v42, 1 }
  0x52   : > { %v3761_v39 = vsel %vm659_vm9, %v710_v27, %v714_v18  ;;  %v717_v43 = vshrl.u32 %v3757_v34, 16  ;;  %v719_v45 = vshll.u32 %v3757_v34, 16  ;;  %v726_v60 = vrot.slane %v724_v28, 1 }
  0x53   : > { %1625 = vmatprep.mubr.bf16.mxu0 %v3761_v39  ;;  %v348_v5 = vadd.f32 %v3437_v17, %v309_v54  ;;  %v349_v52 = vadd.f32 %v3437_v17, %v310_v56  ;;  %v2605_v6 = vunpack.c.h.bf16 %v2644_v38  ;;  %v516_v9 = vshrl.u32 %v469_v61, 16  ;;  %v3250_v54 = vld [vmem:[%s4709_s1 + $0x1e0] sm:$0xff]  }
  0x54   : > { %1626 = vmatmul.mubr.bf16.gmra.mxu0 %v3730_v62  ;;  %v721_v57 = vrot.slane %v719_v45, 1  ;;  %v519_v13 = vshll.u32 %v469_v61, 16  ;;  %v311_v20 = vmul.f32 %v2604_v55, %v3432_v14  ;;  %v3792_v26 = vsel %vm895_vm10, %v898_v47, %v899_v63 }
  0x55   : > { %vm380_vm11 = vcmp.ge.f32.partialorder %v348_v5, 0.0  ;;  %vm381_vm12 = vcmp.ge.f32.partialorder %v349_v52, 0.0  ;;  %v412_v15 = vmul.f32 0.2, %v348_v5  ;;  %v413_v16 = vmul.f32 0.2, %v349_v52 }
  0x56   : > { %v722_v8 = vor.u32 %v721_v57, %v717_v43  ;;  %v518_v42 = vrot.slane %v516_v9, 7  ;;  %v312_v21 = vmul.f32 %v2605_v6, %v3432_v14  ;;  %v2608_v35 = vunpack.c.l.bf16 %v2645_v7  ;;  %v3247_v43 = vld [vmem:[%s4709_s1 + $0x1a8] sm:$0xff]   ;;  %v3822_v6 = vld [vmem:[%s4710_s2] ss:$0 sm:$0xff] }
  0x57   : > { %1755 = vmatmul.mubr.bf16.vlgmr.msra.gmra.mxu1 %v3390_v3  ;;  %v444_v27 = vsel %vm380_vm11, %v348_v5, %v412_v15  ;;  %v445_v28 = vsel %vm381_vm12, %v349_v52, %v413_v16  ;;  %v350_v14 = vadd.f32 %v3437_v17, %v311_v20  ;;  %v901_v47 = vrot.slane %v3592_v33, 1  ;;  %v3251_v20 = vld [vmem:[%s4709_s1 + $0x1a0] sm:$0xff]  }
  0x58   : > { %2990 = vmatpush3.bf16.msra.mxu1 %v3237_v41  ;;  %v3782_v18 = vsel %vm659_vm9, %v722_v8, %v726_v60  ;;  %1762 = vmatprep.mubr.bf16.mxu1 %v3592_v33  ;;  %v521_v36 = vor.u32 %v519_v13, %v518_v42  ;;  %v3799_v38 = vsel %vm3461_vm4, %v518_v42, 0  ;;  %v470_v41 = vpack.c.bf16 %v445_v28, %v444_v27  ;;  %v2646_v13 = vld [vmem:[%s3420_s16 + $0x48] sm:$0xff]  }
  0x59   : > { %1633 = vmatprep.mubr.bf16.mxu0 %v3782_v18  ;;  %2991 = vmatprep.subr.bf16.mxu1 %v3240_v50  ;;  %v736_v45 = vshll.u32 %v3799_v38, 16  ;;  %v351_v48 = vadd.f32 %v3437_v17, %v312_v21  ;;  %v2609_v50 = vunpack.c.h.bf16 %v2645_v7  ;;  %v902_v57 = vrot.slane %v3574_v23, 1 }
  0x5a   : > { %v3814_v56 = vsel %vm3461_vm4, 0, %v521_v36  ;;  %v523_v60 = vshrl.u32 %v470_v41, 16  ;;  %v526_v61 = vshll.u32 %v470_v41, 16  ;;  %vm382_vm13 = vcmp.ge.f32.partialorder %v350_v14, 0.0  ;;  %v3254_v36 = vld [vmem:[%s4709_s1 + $0x1d8] sm:$0xff]  }
  0x5b   : > { %v729_v55 = vshrl.u32 %v3814_v56, 16  ;;  %v731_v17 = vshll.u32 %v3814_v56, 16  ;;  %vm383_vm14 = vcmp.ge.f32.partialorder %v351_v48, 0.0  ;;  %v414_v5 = vmul.f32 0.2, %v350_v14 }
  0x5c   : > { %1634 = vmatmul.mubr.bf16.gmra.mxu0 %v3757_v34  ;;  %2992 = vmatpush3.bf16.msra.mxu1 %v3241_v19  ;;  %v525_v63 = vrot.slane %v523_v60, 7  ;;  %v415_v52 = vmul.f32 0.2, %v351_v48  ;;  %v313_v23 = vmul.f32 %v3822_v6, %v2608_v35  ;;  %v738_v8 = vrot.slane %v736_v45, 1 }
  0x5d   : > { %2993 = vmatprep.subr.bf16.mxu1 %v3245_v29  ;;  %v733_v7 = vrot.slane %v731_v17, 1  ;;  %v314_v9 = vmul.f32 %v3822_v6, %v2609_v50  ;;  %v446_v42 = vsel %vm382_vm13, %v350_v14, %v414_v5  ;;  %v3842_v29 = vld [vmem:[%s4711_s3] ss:$0 sm:$0xff]  ;;  %v3849_v41 = vsel %vm895_vm10, %v901_v47, %v902_v57  ;;  %v3255_v57 = vld [vmem:[%s4709_s1 + $0x198] sm:$0xff]  }
  0x5e   : > { %v528_v15 = vor.u32 %v526_v61, %v525_v63  ;;  %v3831_v16 = vsel %vm3461_vm4, %v525_v63, 0  ;;  %v447_v19 = vsel %vm383_vm14, %v351_v48, %v415_v52  ;;  %v352_v35 = vadd.f32 %v3842_v29, %v313_v23  ;;  %v3257_v52 = vld [vmem:[%s4709_s1 + $0x1d0] sm:$0xff]  }
  0x5f   : > { %1763 = vmatmul.mubr.bf16.gmra.mxu1 %v3792_v26  ;;  %v734_v21 = vor.u32 %v733_v7, %v729_v55  ;;  %v748_v27 = vshll.u32 %v3831_v16, 16  ;;  %v471_v28 = vpack.c.bf16 %v447_v19, %v446_v42  ;;  %v2612_v45 = vunpack.c.l.bf16 %v2646_v13 }
  0x60   : > { %1770 = vmatprep.mubr.bf16.mxu1 %v3684_v1  ;;  %2994 = vmatpush3.bf16.msra.mxu1 %v3247_v43  ;;  %v3853_v14 = vsel %vm3461_vm4, 0, %v528_v15  ;;  %v353_v43 = vadd.f32 %v3842_v29, %v314_v9  ;;  %vm384_vm15 = vcmp.ge.f32.partialorder %v352_v35, 0.0  ;;  %v416_v17 = vmul.f32 0.2, %v352_v35 }
  0x61   : > { %2995 = vmatprep.subr.bf16.mxu1 %v3250_v54  ;;  %v3857_v48 = vsel %vm659_vm9, %v734_v21, %v738_v8  ;;  %v741_v50 = vshrl.u32 %v3853_v14, 16  ;;  %v743_v54 = vshll.u32 %v3853_v14, 16  ;;  %v750_v60 = vrot.slane %v748_v27, 1 }
  0x62   : > { %1641 = vmatprep.mubr.bf16.mxu0 %v3857_v48  ;;  %v530_v61 = vshrl.u32 %v471_v28, 16  ;;  %v533_v47 = vshll.u32 %v471_v28, 16  ;;  %vm385_vm0 = vcmp.ge.f32.partialorder %v353_v43, 0.0  ;;  %v417_v63 = vmul.f32 0.2, %v353_v43  ;;  %v3258_v28 = vld [vmem:[%s4709_s1 + $0x190] sm:$0xff]  }
  0x63   : > { %v745_v55 = vrot.slane %v743_v54, 1  ;;  %v2613_v5 = vunpack.c.h.bf16 %v2646_v13  ;;  %v904_v23 = vrot.slane %v3684_v1, 1  ;;  %v905_v7 = vrot.slane %v3671_v51, 1  ;;  %v3260_v54 = vld [vmem:[%s4709_s1 + $0x1c8] sm:$0xff]  }
  0x64   : > { %2996 = vmatpush3.bf16.msra.mxu1 %v3251_v20  ;;  %1642 = vmatmul.mubr.bf16.gmra.mxu0 %v3814_v56  ;;  %v532_v8 = vrot.slane %v530_v61, 7  ;;  %v315_v9 = vmul.f32 %v3822_v6, %v2612_v45  ;;  %v448_v42 = vsel %vm384_vm15, %v352_v35, %v416_v17  ;;  %v449_v13 = vsel %vm385_vm0, %v353_v43, %v417_v63 }
  0x65   : > { %2997 = vmatprep.subr.bf16.mxu1 %v3254_v36  ;;  %v746_v15 = vor.u32 %v745_v55, %v741_v50  ;;  %v316_v19 = vmul.f32 %v3822_v6, %v2613_v5  ;;  %v472_v51 = vpack.c.bf16 %v449_v13, %v448_v42  ;;  %v907_v43 = vrot.slane %v3730_v62, 1  ;;  %v2647_v50 = vld [vmem:[%s3420_s16 + $0x50] sm:$0xff]   ;;  %v3263_v13 = vld [vmem:[%s4709_s1 + $0x1c0] sm:$0xff]  }
  0x66   : > { %v535_v20 = vor.u32 %v533_v47, %v532_v8  ;;  %v3879_v21 = vsel %vm3461_vm4, %v532_v8, 0  ;;  %v354_v27 = vadd.f32 %v3842_v29, %v315_v9  ;;  %v3897_v61 = vsel %vm895_vm10, %v904_v23, %v905_v7  ;;  %v3261_v23 = vld [vmem:[%s4709_s1 + $0x188] sm:$0xff]  }
  0x67   : > { %1771 = vmatmul.mubr.bf16.gmra.mxu1 %v3849_v41  ;;  %v3886_v35 = vsel %vm659_vm9, %v746_v15, %v750_v60  ;;  %v760_v36 = vshll.u32 %v3879_v21, 16  ;;  %v355_v45 = vadd.f32 %v3842_v29, %v316_v19  ;;  %v537_v47 = vshrl.u32 %v472_v51, 16 }
  0x68   : > { %1778 = vmatprep.mubr.bf16.mxu1 %v3730_v62  ;;  %2998 = vmatpush3.bf16.msra.mxu1 %v3255_v57  ;;  %v3901_v60 = vsel %vm3461_vm4, 0, %v535_v20  ;;  %v540_v57 = vshll.u32 %v472_v51, 16  ;;  %vm386_vm1 = vcmp.ge.f32.partialorder %v354_v27, 0.0  ;;  %v418_v5 = vmul.f32 0.2, %v354_v27 }
  0x69   : > { %2999 = vmatprep.subr.bf16.mxu1 %v3257_v52  ;;  %1649 = vmatprep.mubr.bf16.mxu0 %v3886_v35  ;;  %v753_v55 = vshrl.u32 %v3901_v60, 16  ;;  %v755_v17 = vshll.u32 %v3901_v60, 16  ;;  %vm387_vm2 = vcmp.ge.f32.partialorder %v355_v45, 0.0  ;;  %v539_v63 = vrot.slane %v537_v47, 7 }
  0x6a   : > { %v419_v52 = vmul.f32 0.2, %v355_v45  ;;  %v2616_v8 = vunpack.c.l.bf16 %v2647_v50  ;;  %v762_v9 = vrot.slane %v760_v36, 1  ;;  %v908_v15 = vrot.slane %v3717_v49, 1 }
  0x6b   : > { %v757_v7 = vrot.slane %v755_v17, 1  ;;  %v2617_v42 = vunpack.c.h.bf16 %v2647_v50  ;;  %v542_v19 = vor.u32 %v540_v57, %v539_v63  ;;  %v3915_v20 = vsel %vm3461_vm4, %v539_v63, 0 }
  0x6c   : > { %3000 = vmatpush3.bf16.msra.mxu1 %v3258_v28  ;;  %1650 = vmatmul.mubr.bf16.gmra.mxu0 %v3853_v14  ;;  %v450_v51 = vsel %vm386_vm1, %v354_v27, %v418_v5  ;;  %v451_v28 = vsel %vm387_vm2, %v355_v45, %v419_v52  ;;  %v772_v49 = vshll.u32 %v3915_v20, 16  ;;  %v3264_v27 = vld [vmem:[%s4709_s1 + $0x180] sm:$0xff]  }
  0x6d   : > { %3001 = vmatprep.subr.bf16.mxu1 %v3260_v54  ;;  %v758_v36 = vor.u32 %v757_v7, %v753_v55  ;;  %v473_v50 = vpack.c.bf16 %v451_v28, %v450_v51  ;;  %v317_v54 = vmul.f32 %v3822_v6, %v2616_v8  ;;  %v3925_v47 = vsel %vm3461_vm4, 0, %v542_v19 }
  0x6e   : > { %v318_v57 = vmul.f32 %v3822_v6, %v2617_v42  ;;  %v765_v55 = vshrl.u32 %v3925_v47, 16  ;;  %v767_v17 = vshll.u32 %v3925_v47, 16  ;;  %v774_v42 = vrot.slane %v772_v49, 1 }
  0x6f   : > { %1779 = vmatmul.mubr.bf16.gmra.mxu1 %v3897_v61  ;;  %v3932_v45 = vsel %vm659_vm9, %v758_v36, %v762_v9  ;;  %v544_v63 = vshrl.u32 %v473_v50, 16  ;;  %v547_v5 = vshll.u32 %v473_v50, 16  ;;  %v356_v52 = vadd.f32 %v3842_v29, %v317_v54 }
  0x70   : > { %1786 = vmatprep.mubr.bf16.mxu1 %v3757_v34  ;;  %3002 = vmatpush3.bf16.msra.mxu1 %v3261_v23  ;;  %v357_v8 = vadd.f32 %v3842_v29, %v318_v57  ;;  %v3940_v23 = vsel %vm895_vm10, %v907_v43, %v908_v15  ;;  %v769_v7 = vrot.slane %v767_v17, 1  ;;  %v910_v54 = vrot.slane %v3757_v34, 1 }
  0x71   : > { %3003 = vmatprep.subr.bf16.mxu1 %v3263_v13  ;;  %1657 = vmatprep.mubr.bf16.mxu0 %v3932_v45  ;;  %v546_v9 = vrot.slane %v544_v63, 7  ;;  %vm388_vm3 = vcmp.ge.f32.partialorder %v356_v52, 0.0  ;;  %v420_v19 = vmul.f32 0.2, %v356_v52  ;;  %v911_v57 = vrot.slane %v3751_v24, 1 }
  0x72   : > { %vm389_vm5 = vcmp.ge.f32.partialorder %v357_v8, 0.0  ;;  %v770_v13 = vor.u32 %v769_v7, %v765_v55  ;;  %v421_v51 = vmul.f32 0.2, %v357_v8 }
  0x73   : > { %v549_v28 = vor.u32 %v547_v5, %v546_v9  ;;  %v3945_v36 = vsel %vm3461_vm4, %v546_v9, 0  ;;  %v452_v50 = vsel %vm388_vm3, %v356_v52, %v420_v19 }
  0x74   : > { %3004 = vmatpush3.bf16.msra.mxu1 %v3264_v27  ;;  %1658 = vmatmul.mubr.bf16.gmra.mxu0 %v3901_v60  ;;  %v3949_v43 = vsel %vm659_vm9, %v770_v13, %v774_v42  ;;  %v784_v15 = vshll.u32 %v3945_v36, 16  ;;  %v453_v49 = vsel %vm389_vm5, %v357_v8, %v421_v51  ;;  %v3963_v42 = vsel %vm895_vm10, %v910_v54, %v911_v57 }
  0x75   : > { %1665 = vmatprep.mubr.bf16.mxu0 %v3949_v43  ;;  %v3958_v27 = vsel %vm3461_vm4, 0, %v549_v28  ;;  %v474_v55 = vpack.c.bf16 %v453_v49, %v452_v50  ;;  %v913_v50 = vrot.slane %v3814_v56, 1 }
  0x76   : > { %v777_v17 = vshrl.u32 %v3958_v27, 16  ;;  %v779_v63 = vshll.u32 %v3958_v27, 16  ;;  %v786_v7 = vrot.slane %v784_v15, 1  ;;  %v914_v15 = vrot.slane %v3799_v38, 1 }
  0x77   : > { %1787 = vmatmul.mubr.bf16.gmra.mxu1 %v3940_v23  ;;  %v551_v5 = vshrl.u32 %v474_v55, 16  ;;  %v554_v52 = vshll.u32 %v474_v55, 16 }
  0x78   : > { %1794 = vmatprep.mubr.bf16.mxu1 %v3814_v56  ;;  %v781_v8 = vrot.slane %v779_v63, 1  ;;  %v3986_v63 = vsel %vm895_vm10, %v913_v50, %v914_v15  ;;  %v2652_v50 = vld [vmem:[%s3420_s16 + $0x78] sm:$0xff]   ;;  %v925_v15 = vrot.slane %v3958_v27, 1 }
  0x79   : > { %v553_v9 = vrot.slane %v551_v5, 7 }
  0x7a   : > { %v782_v24 = vor.u32 %v781_v8, %v777_v17  ;;  %v917_v8 = vrot.slane %v3831_v16, 1 }
  0x7b   : > { %v556_v19 = vor.u32 %v554_v52, %v553_v9  ;;  %v3968_v13 = vsel %vm3461_vm4, %v553_v9, 0  ;;  %v916_v52 = vrot.slane %v3853_v14, 1  ;;  %v919_v9 = vrot.slane %v3901_v60, 1 }
  0x7c   : > { %1666 = vmatmul.mubr.bf16.gmra.mxu0 %v3925_v47  ;;  %v3972_v51 = vsel %vm659_vm9, %v782_v24, %v786_v7  ;;  %v796_v28 = vshll.u32 %v3968_v13, 16  ;;  %v920_v24 = vrot.slane %v3879_v21, 1  ;;  %v922_v21 = vrot.slane %v3925_v47, 1 }
  0x7d   : > { %1673 = vmatprep.mubr.bf16.mxu0 %v3972_v51  ;;  %v3981_v49 = vsel %vm3461_vm4, 0, %v556_v19  ;;  %v3998_v7 = vsel %vm895_vm10, %v916_v52, %v917_v8  ;;  %v3259_v19 = vld [vmem:[%s4709_s1 + $0x230] sm:$0xff]  }
  0x7e   : > { %v789_v54 = vshrl.u32 %v3981_v49, 16  ;;  %v791_v57 = vshll.u32 %v3981_v49, 16  ;;  %v798_v17 = vrot.slane %v796_v28, 1  ;;  %v4010_v16 = vsel %vm895_vm10, %v919_v9, %v920_v24 }
  0x7f   : > { %1795 = vmatmul.mubr.bf16.gmra.mxu1 %v3963_v42  ;;  %v923_v28 = vrot.slane %v3915_v20, 1  ;;  %v3266_v20 = vld [vmem:[%s4709_s1 + $0x218] sm:$0xff]   ;;  %v928_v9 = vrot.slane %v3981_v49, 1  ;;  %v929_v24 = vrot.slane %v3968_v13, 1  ;;  %v932_v13 = vrot.slane %v3486_v59, 1 }
  0x80   : > { %1802 = vmatprep.mubr.bf16.mxu1 %v3853_v14  ;;  %v793_v55 = vrot.slane %v791_v57, 1  ;;  %v2636_v57 = vunpack.c.l.bf16 %v2652_v50 }
  0x82   : > { %v794_v5 = vor.u32 %v793_v55, %v789_v54  ;;  %v926_v54 = vrot.slane %v3945_v36, 1  ;;  %v2637_v55 = vunpack.c.h.bf16 %v2652_v50  ;;  %v327_v52 = vmul.f32 %v3822_v6, %v2636_v57  ;;  %v3268_v36 = vld [vmem:[%s4709_s1 + $0x208] sm:$0xff]  }
  0x83   : > { %v934_v57 = vrot.slane %v3549_v53, 1 }
  0x84   : > { %1674 = vmatmul.mubr.bf16.gmra.mxu0 %v3958_v27  ;;  %v3991_v38 = vsel %vm659_vm9, %v794_v5, %v798_v17  ;;  %v3267_v17 = vld [vmem:[%s4709_s1 + $0x210] sm:$0xff]   ;;  %v4042_v5 = vsel %vm895_vm10, %v925_v15, %v926_v54  ;;  %v328_v8 = vmul.f32 %v3822_v6, %v2637_v55  ;;  %v3269_v6 = vld [vmem:[%s4709_s1 + $0x200] sm:$0xff]   ;;  %v935_v55 = vrot.slane %v3531_v44, 1 }
  0x85   : > { %1681 = vmatprep.mubr.bf16.mxu0 %v3991_v38 }
  0x87   : > { %1803 = vmatmul.mubr.bf16.gmra.mxu1 %v3986_v63 }
  0x88   : > { %1810 = vmatprep.mubr.bf16.mxu1 %v3901_v60 }
  0x8c   : > { %1682 = vmatmul.mubr.bf16.gmra.mxu0 %v3981_v49 }
  0x8d   : > { %1915 = vmatprep.mubr.bf16.mxu0 %v3792_v26  ;;  %v3262_v26 = vld [vmem:[%s4709_s1 + $0x228] sm:$0xff]  }
  0x8f   : > { %1811 = vmatmul.mubr.bf16.gmra.mxu1 %v3998_v7 }
  0x90   : > { %1818 = vmatprep.mubr.bf16.mxu1 %v3925_v47 }
  0x94   : > { %1916 = vmatmul.mubr.bf16.vlgmr.msra.gmra.mxu0 %v3577_v25  ;;  %v3265_v25 = vld [vmem:[%s4709_s1 + $0x220] sm:$0xff]  }
  0x95   : > { %3126 = vmatpush3.bf16.msra.mxu0 %v3739_v11  ;;  %1923 = vmatprep.mubr.bf16.mxu0 %v3849_v41  ;;  %v4026_v11 = vsel %vm895_vm10, %v922_v21, %v923_v28  ;;  %v4061_v21 = vsel %vm895_vm10, %v928_v9, %v929_v24  ;;  %v938_v9 = vrot.slane %v3617_v58, 1  ;;  %v941_v58 = vrot.slane %v3700_v22, 1 }
  0x96   : > { %3127 = vmatprep.subr.bf16.mxu0 %v3259_v19 }
  0x97   : > { %1819 = vmatmul.mubr.bf16.gmra.mxu1 %v4010_v16 }
  0x98   : > { %1826 = vmatprep.mubr.bf16.mxu1 %v3958_v27 }
  0x99   : > { %3128 = vmatpush3.bf16.msra.mxu0 %v3259_v19  ;;  %v366_v19 = vadd.f32 %v3842_v29, %v327_v52 }
  0x9a   : > { %3129 = vmatprep.subr.bf16.mxu0 %v3262_v26 }
  0x9b   : > { %v430_v28 = vmul.f32 0.2, %v366_v19  ;;  %vm398_vm6 = vcmp.ge.f32.partialorder %v366_v19, 0.0 }
  0x9c   : > { %1924 = vmatmul.mubr.bf16.gmra.mxu0 %v3634_v10 }
  0x9d   : > { %1931 = vmatprep.mubr.bf16.mxu0 %v3897_v61  ;;  %3130 = vmatpush3.bf16.msra.mxu0 %v3262_v26  ;;  %v367_v26 = vadd.f32 %v3842_v29, %v328_v8  ;;  %v931_v29 = vrot.slane %v3494_v0, 1  ;;  %v462_v50 = vsel %vm398_vm6, %v366_v19, %v430_v28 }
  0x9e   : > { %3131 = vmatprep.subr.bf16.mxu0 %v3265_v25 }
  0x9f   : > { %1827 = vmatmul.mubr.bf16.gmra.mxu1 %v4026_v11  ;;  %vm399_vm7 = vcmp.ge.f32.partialorder %v367_v26, 0.0  ;;  %v4070_v15 = vsel %vm895_vm10, %v931_v29, %v932_v13 }
  0xa0   : > { %1834 = vmatprep.mubr.bf16.mxu1 %v3981_v49 }
  0xa1   : > { %3132 = vmatpush3.bf16.msra.mxu0 %v3265_v25  ;;  %v431_v25 = vmul.f32 0.2, %v367_v26 }
  0xa2   : > { %3133 = vmatprep.subr.bf16.mxu0 %v3266_v20 }
  0xa4   : > { %1932 = vmatmul.mubr.bf16.gmra.mxu0 %v3712_v40 }
  0xa5   : > { %1939 = vmatprep.mubr.bf16.mxu0 %v3940_v23  ;;  %3134 = vmatpush3.bf16.msra.mxu0 %v3266_v20  ;;  %v463_v20 = vsel %vm399_vm7, %v367_v26, %v431_v25  ;;  %v940_v26 = vrot.slane %v3706_v30, 1 }
  0xa6   : > { %3135 = vmatprep.subr.bf16.mxu0 %v3267_v17  ;;  %v479_v54 = vpack.c.bf16 %v463_v20, %v462_v50 }
  0xa7   : > { %1835 = vmatmul.mubr.bf16.gmra.mxu1 %v4042_v5 }
  0xa8   : > { %1842 = vmatprep.mubr.bf16.mxu1 %v3494_v0  ;;  %v586_v59 = vshrl.u32 %v479_v54, 16  ;;  %v589_v8 = vshll.u32 %v479_v54, 16 }
  0xa9   : > { %3136 = vmatpush3.bf16.msra.mxu0 %v3267_v17  ;;  %v4079_v17 = vsel %vm895_vm10, %v934_v57, %v935_v55 }
  0xaa   : > { %3137 = vmatprep.subr.bf16.mxu0 %v3268_v36  ;;  %v4082_v52 = vrot.slane %v586_v59, 7 }
  0xac   : > { %1940 = vmatmul.mubr.bf16.gmra.mxu0 %v3761_v39  ;;  %v591_v44 = vor.u32 %v589_v8, %v4082_v52 }
  0xad   : > { %1947 = vmatprep.mubr.bf16.mxu0 %v3963_v42  ;;  %3138 = vmatpush3.bf16.msra.mxu0 %v3268_v36  ;;  %v937_v36 = vrot.slane %v3626_v4, 1 }
  0xae   : > { %3139 = vmatprep.subr.bf16.mxu0 %v3269_v6  ;;  %v4096_v19 = vsel %vm3461_vm4, 0, %v591_v44 }
  0xaf   : > { %1843 = vmatmul.mubr.bf16.gmra.mxu1 %v4061_v21  ;;  %v4091_v24 = vsel %vm895_vm10, %v937_v36, %v938_v9 }
  0xb0   : > { %1850 = vmatprep.mubr.bf16.mxu1 %v3549_v53 }
  0xb1   : > { %3140 = vmatpush3.bf16.msra.mxu0 %v3269_v6  ;;  %v4104_v6 = vsel %vm895_vm10, %v940_v26, %v941_v58 }
  0xb4   : > { %1948 = vmatmul.mubr.bf16.gmra.mxu0 %v3782_v18 }
  0xb5   : > { %1955 = vmatprep.mubr.bf16.mxu0 %v3986_v63 }
  0xb7   : > { %1851 = vmatmul.mubr.bf16.gmra.mxu1 %v4070_v15 }
  0xb8   : > { %1858 = vmatprep.mubr.bf16.mxu1 %v3626_v4 }
  0xbc   : > { %1956 = vmatmul.mubr.bf16.gmra.mxu0 %v3857_v48 }
  0xbd   : > { %1963 = vmatprep.mubr.bf16.mxu0 %v3998_v7 }
  0xbf   : > { %1859 = vmatmul.mubr.bf16.gmra.mxu1 %v4079_v17 }
  0xc0   : > { %1866 = vmatprep.mubr.bf16.mxu1 %v3706_v30 }
  0xc4   : > { %1964 = vmatmul.mubr.bf16.gmra.mxu0 %v3886_v35 }
  0xc5   : > { %1971 = vmatprep.mubr.bf16.mxu0 %v4010_v16 }
  0xc7   : > { %1867 = vmatmul.mubr.bf16.gmra.mxu1 %v4091_v24 }
  0xc8   : > { %1874 = vmatprep.mubr.bf16.mxu1 %v4096_v19 }
  0xcc   : > { %1972 = vmatmul.mubr.bf16.gmra.mxu0 %v3932_v45 }
  0xcd   : > { %1979 = vmatprep.mubr.bf16.mxu0 %v4026_v11 }
  0xcf   : > { %1875 = vmatmul.mubr.bf16.gmra.mxu1 %v4104_v6 }
  0xd0   : > { %2076 = vmatprep.mubr.bf16.mxu1 %v3634_v10 }
  0xd4   : > { %1980 = vmatmul.mubr.bf16.gmra.mxu0 %v3949_v43 }
  0xd5   : > { %1987 = vmatprep.mubr.bf16.mxu0 %v4042_v5 }
  0xd7   : > { %2077 = vmatmul.mubr.bf16.vlgmr.msra.gmra.mxu1 %v3592_v33 }
  0xd8   : > { %2084 = vmatprep.mubr.bf16.mxu1 %v3712_v40 }
  0xdc   : > { %1988 = vmatmul.mubr.bf16.gmra.mxu0 %v3972_v51 }
  0xdd   : > { %1995 = vmatprep.mubr.bf16.mxu0 %v4061_v21 }
  0xdf   : > { %2085 = vmatmul.mubr.bf16.gmra.mxu1 %v3684_v1 }
  0xe0   : > { %2092 = vmatprep.mubr.bf16.mxu1 %v3761_v39 }
  0xe4   : > { %1996 = vmatmul.mubr.bf16.gmra.mxu0 %v3991_v38 }
  0xe5   : > { %2003 = vmatprep.mubr.bf16.mxu0 %v4070_v15 }
  0xe7   : > { %2093 = vmatmul.mubr.bf16.gmra.mxu1 %v3730_v62 }
  0xe8   : > { %2100 = vmatprep.mubr.bf16.mxu1 %v3782_v18 }
  0xec   : > { %v2669_v22 = vpop.f32.mrf.mxu0  ;;  %v2741_v33 = vpop.f32.mrf.mxu1  ;;  %2004 = vmatmul.mubr.bf16.gmra.mxu0 %v3516_v32 }
  0xed   : > { %2011 = vmatprep.mubr.bf16.mxu0 %v4079_v17 }
  0xee   : > { %v2670_v28 = vpop.f32.mrf.mxu0  ;;  %v2742_v40 = vpop.f32.mrf.mxu1 }
  0xef   : > { %v4118_v25 = vadd.f32 %v2670_v28, %v2669_v22  ;;  %v4126_v1 = vadd.f32 %v2742_v40, %v2741_v33  ;;  %2101 = vmatmul.mubr.bf16.gmra.mxu1 %v3757_v34  ;;  %v658_v22 = vsel %vm3461_vm4, %v4082_v52, 0  ;;  %vm2398_vm4 = vcmask 23552  }
  0xf0   : > { %v2672_v10 = vpop.f32.mrf.mxu0  ;;  %v2744_v39 = vpop.f32.mrf.mxu1  ;;  %2108 = vmatprep.mubr.bf16.mxu1 %v3857_v48 }
  0xf2   : > { %v2673_v29 = vpop.f32.mrf.mxu0  ;;  %v2745_v50 = vpop.f32.mrf.mxu1 }
  0xf3   : > { %v4121_v13 = vadd.f32 %v2673_v29, %v2672_v10  ;;  %v4130_v20 = vadd.f32 %v2745_v50, %v2744_v39  ;;  %v974_v10 = vrot.slane %v4096_v19, 1  ;;  %v975_v29 = vrot.slane %v658_v22, 1 }
  0xf4   : > { %2012 = vmatmul.mubr.bf16.gmra.mxu0 %v3588_v31  ;;  %v960_v39 = vshrl.u32 %v4096_v19, 16 }
  0xf5   : > { %2019 = vmatprep.mubr.bf16.mxu0 %v4091_v24 }
  0xf7   : > { %v2675_v54 = vpop.f32.mrf.mxu0  ;;  %v2747_v62 = vpop.f32.mrf.mxu1  ;;  %2109 = vmatmul.mubr.bf16.gmra.mxu1 %v3814_v56 }
  0xf8   : > { %2116 = vmatprep.mubr.bf16.mxu1 %v3886_v35  ;;  %v962_v35 = vshll.u32 %v4096_v19, 16 }
  0xf9   : > { %v2676_v57 = vpop.f32.mrf.mxu0  ;;  %v2748_v55 = vpop.f32.mrf.mxu1 }
  0xfa   : > { %v4135_v18 = vadd.f32 %v2676_v57, %v2675_v54  ;;  %v4138_v59 = vadd.f32 %v2748_v55, %v2747_v62  ;;  %v964_v50 = vrot.slane %v962_v35, 1  ;;  %v967_v54 = vshll.u32 %v658_v22, 16 }
  0xfb   : > { %v2678_v8 = vpop.f32.mrf.mxu0  ;;  %v2750_v36 = vpop.f32.mrf.mxu1  ;;  %v4163_v57 = vsel %vm895_vm10, %v974_v10, %v975_v29 }
  0xfc   : > { %2020 = vmatmul.mubr.bf16.gmra.mxu0 %v3660_v46 }
  0xfd   : > { %v2679_v34 = vpop.f32.mrf.mxu0  ;;  %v2751_v9 = vpop.f32.mrf.mxu1  ;;  %2027 = vmatprep.mubr.bf16.mxu0 %v4104_v6 }
  0xfe   : > { %v4142_v48 = vadd.f32 %v2679_v34, %v2678_v8  ;;  %v4144_v44 = vadd.f32 %v2751_v9, %v2750_v36  ;;  %v969_v8 = vrot.slane %v967_v54, 1 }
  0xff   : > { %v2681_v26 = vpop.f32.mrf.mxu0  ;;  %2117 = vmatmul.mubr.bf16.gmra.mxu1 %v3853_v14 }
 0x100   : > { %2124 = vmatprep.mubr.bf16.mxu1 %v3932_v45  ;;  %v2753_v33 = vpop.f32.mrf.mxu1  ;;  %v965_v45 = vor.u32 %v964_v50, %v960_v39  ;;  %v4195_v50 = vld [vmem:[%s4712_s4] ss:$0 sm:$0xff] }
 0x101   : > { %v2682_v58 = vpop.f32.mrf.mxu0 }
 0x102   : > { %v4150_v28 = vadd.f32 %v2682_v58, %v2681_v26  ;;  %v2754_v52 = vpop.f32.mrf.mxu1  ;;  %v4172_v9 = vsel %vm659_vm9, %v965_v45, %v969_v8 }
 0x103   : > { %v2684_v56 = vpop.f32.mrf.mxu0  ;;  %v4160_v62 = vadd.f32 %v2754_v52, %v2753_v33 }
 0x104   : > { %v2756_v14 = vpop.f32.mrf.mxu1  ;;  %2028 = vmatmul.mubr.bf16.gmra.mxu0 %v3742_v12 }
 0x105   : > { %v2685_v40 = vpop.f32.mrf.mxu0  ;;  %2035 = vmatprep.mubr.bf16.mxu0 %v4163_v57 }
 0x106   : > { %v4157_v37 = vadd.f32 %v2685_v40, %v2684_v56  ;;  %v2757_v55 = vpop.f32.mrf.mxu1 }
 0x107   : > { %2125 = vmatmul.mubr.bf16.gmra.mxu1 %v3901_v60  ;;  %v4168_v36 = vadd.f32 %v2757_v55, %v2756_v14 }
 0x108   : > { %2132 = vmatprep.mubr.bf16.mxu1 %v3949_v43 }
 0x10a   : > { %v2687_v34 = vpop.f32.mrf.mxu0 }
 0x10c   : > { %v2688_v26 = vpop.f32.mrf.mxu0  ;;  %2036 = vmatmul.mubr.bf16.gmra.mxu0 %v4172_v9 }
 0x10d   : > { %v4175_v58 = vadd.f32 %v2688_v26, %v2687_v34  ;;  %3141 = vmatprep.mubr.bf16.mxu0 %v3849_v41 }
 0x10e   : > { %v2690_v22 = vpop.f32.mrf.mxu0 }
 0x10f   : > { %v2759_v56 = vpop.f32.mrf.mxu1  ;;  %2133 = vmatmul.mubr.bf16.gmra.mxu1 %v3925_v47 }
 0x110   : > { %v2691_v60 = vpop.f32.mrf.mxu0  ;;  %2140 = vmatprep.mubr.bf16.mxu1 %v3972_v51 }
 0x111   : > { %v2760_v35 = vpop.f32.mrf.mxu1  ;;  %v4180_v43 = vadd.f32 %v2691_v60, %v2690_v22 }
 0x112   : > { %v4182_v10 = vadd.f32 %v2760_v35, %v2759_v56 }
 0x113   : > { %v2762_v29 = vpop.f32.mrf.mxu1 }
 0x114   : > { %v2693_v33 = vpop.f32.mrf.mxu0  ;;  %3142 = vmatmul.mubr.bf16.vlgmr.msra.gmra.mxu0 %v3897_v61  ;;  %v1596_v61 = vadd.f32 %v4118_v25, %v4195_v50 }
 0x115   : > { %v2763_v40 = vpop.f32.mrf.mxu1  ;;  %3145 = vmatprep.mubr.bf16.mxu0 %v3940_v23 }
 0x116   : > { %v4185_v52 = vadd.f32 %v2763_v40, %v2762_v29  ;;  %v2694_v39 = vpop.f32.mrf.mxu0 }
 0x117   : > { %v2781_v41 = vpop.f32.mrf.mxu1  ;;  %2141 = vmatmul.mubr.bf16.gmra.mxu1 %v3958_v27  ;;  %v4189_v47 = vadd.f32 %v2694_v39, %v2693_v33 }
 0x118   : > { %v2696_v51 = vpop.f32.mrf.mxu0  ;;  %2148 = vmatprep.mubr.bf16.mxu1 %v3991_v38  ;;  %v1599_v38 = vadd.f32 %v4121_v13, %v4195_v50 }
 0x119   : > { %v2782_v54 = vpop.f32.mrf.mxu1 }
 0x11a   : > { %v2783_v14 = vadd.f32 %v2782_v54, %v2781_v41  ;;  %v2697_v55 = vpop.f32.mrf.mxu0 }
 0x11b   : > { %v2784_v23 = vpop.f32.mrf.mxu1  ;;  %v4199_v45 = vadd.f32 %v2697_v55, %v2696_v51  ;;  %v1607_v51 = vadd.f32 %v4142_v48, %v4195_v50 }
 0x11c   : > { %v4201_v27 = vadd.f32 %v2783_v14, %v1596_v61  ;;  %v2699_v8 = vpop.f32.mrf.mxu0  ;;  %3146 = vmatmul.mubr.bf16.gmra.mxu0 %v3963_v42  ;;  %v1604_v42 = vadd.f32 %v4135_v18, %v4195_v50 }
 0x11d   : > { %v2785_v34 = vpop.f32.mrf.mxu1  ;;  %3149 = vmatprep.mubr.bf16.mxu0 %v3986_v63 }
 0x11e   : > { %v2786_v26 = vadd.f32 %v2785_v34, %v2784_v23  ;;  %v2700_v22 = vpop.f32.mrf.mxu0 }
 0x11f   : > { %v2787_v56 = vpop.f32.mrf.mxu1  ;;  %2149 = vmatmul.mubr.bf16.gmra.mxu1 %v3981_v49  ;;  %v4208_v25 = vadd.f32 %v2700_v22, %v2699_v8  ;;  %v1615_v22 = vadd.f32 %v4157_v37, %v4195_v50 }
 0x120   : > { %v4210_v60 = vadd.f32 %v2786_v26, %v1599_v38  ;;  %v2702_v35 = vpop.f32.mrf.mxu0  ;;  %2156 = vmatprep.mubr.bf16.mxu1 %v3516_v32 }
 0x121   : > { %v2788_v29 = vpop.f32.mrf.mxu1 }
 0x122   : > { %v2789_v33 = vadd.f32 %v2788_v29, %v2787_v56  ;;  %v2703_v13 = vpop.f32.mrf.mxu0 }
 0x123   : > { %v2790_v40 = vpop.f32.mrf.mxu1  ;;  %v4215_v39 = vadd.f32 %v2703_v13, %v2702_v35 }
 0x124   : > { %v4217_v63 = vadd.f32 %v2789_v33, %v1604_v42  ;;  %v2705_v49 = vpop.f32.mrf.mxu0  ;;  %3150 = vmatmul.mubr.bf16.gmra.mxu0 %v3998_v7  ;;  %v1612_v7 = vadd.f32 %v4150_v28, %v4195_v50 }
 0x125   : > { %v2791_v41 = vpop.f32.mrf.mxu1  ;;  %3153 = vmatprep.mubr.bf16.mxu0 %v4010_v16 }
 0x126   : > { %v2792_v54 = vadd.f32 %v2791_v41, %v2790_v40  ;;  %v2706_v18 = vpop.f32.mrf.mxu0 }
 0x127   : > { %v2793_v32 = vpop.f32.mrf.mxu1  ;;  %2157 = vmatmul.mubr.bf16.gmra.mxu1 %v3494_v0  ;;  %v4226_v14 = vadd.f32 %v2706_v18, %v2705_v49 }
 0x128   : > { %v4224_v61 = vadd.f32 %v2792_v54, %v1607_v51  ;;  %2164 = vmatprep.mubr.bf16.mxu1 %v3588_v31  ;;  %v2708_v23 = vpop.f32.mrf.mxu0  ;;  %v1623_v51 = vadd.f32 %v4180_v43, %v4195_v50 }
 0x129   : > { %v2794_v55 = vpop.f32.mrf.mxu1 }
 0x12a   : > { %v2795_v8 = vadd.f32 %v2794_v55, %v2793_v32  ;;  %v2709_v34 = vpop.f32.mrf.mxu0 }
 0x12b   : > { %v2796_v48 = vpop.f32.mrf.mxu1  ;;  %v4233_v16 = vadd.f32 %v2709_v34, %v2708_v23 }
 0x12c   : > { %v4231_v38 = vadd.f32 %v2795_v8, %v1612_v7  ;;  %v2711_v26 = vpop.f32.mrf.mxu0  ;;  %3154 = vmatmul.mubr.bf16.gmra.mxu0 %v4026_v11  ;;  %v1620_v11 = vadd.f32 %v4175_v58, %v4195_v50 }
 0x12d   : > { %v2797_v0 = vpop.f32.mrf.mxu1  ;;  %3157 = vmatprep.mubr.bf16.mxu0 %v4042_v5 }
 0x12e   : > { %v2798_v31 = vadd.f32 %v2797_v0, %v2796_v48  ;;  %v2712_v28 = vpop.f32.mrf.mxu0  ;;  %v1631_v0 = vadd.f32 %v4199_v45, %v4195_v50 }
 0x12f   : > { %v2799_v56 = vpop.f32.mrf.mxu1  ;;  %2165 = vmatmul.mubr.bf16.gmra.mxu1 %v3549_v53  ;;  %v4242_v29 = vadd.f32 %v2712_v28, %v2711_v26 }
 0x130   : > { %v4240_v35 = vadd.f32 %v2798_v31, %v1615_v22  ;;  %2172 = vmatprep.mubr.bf16.mxu1 %v3660_v46  ;;  %v2714_v33 = vpop.f32.mrf.mxu0 }
 0x131   : > { %v2800_v42 = vpop.f32.mrf.mxu1 }
 0x132   : > { %v2801_v13 = vadd.f32 %v2800_v42, %v2799_v56  ;;  %v2715_v40 = vpop.f32.mrf.mxu0 }
 0x133   : > { %v2802_v37 = vpop.f32.mrf.mxu1  ;;  %v4249_v5 = vadd.f32 %v2715_v40, %v2714_v33 }
 0x134   : > { %v4247_v41 = vadd.f32 %v2801_v13, %v1620_v11  ;;  %v2717_v49 = vpop.f32.mrf.mxu0  ;;  %3158 = vmatmul.mubr.bf16.gmra.mxu0 %v4061_v21  ;;  %v1628_v21 = vadd.f32 %v4189_v47, %v4195_v50 }
 0x135   : > { %v2803_v53 = vpop.f32.mrf.mxu1  ;;  %3161 = vmatprep.mubr.bf16.mxu0 %v4070_v15 }
 0x136   : > { %v2804_v46 = vadd.f32 %v2803_v53, %v2802_v37  ;;  %v2718_v58 = vpop.f32.mrf.mxu0  ;;  %v1639_v37 = vadd.f32 %v4215_v39, %v4195_v50 }
 0x137   : > { %v2805_v54 = vpop.f32.mrf.mxu1  ;;  %2173 = vmatmul.mubr.bf16.gmra.mxu1 %v3626_v4  ;;  %v4258_v18 = vadd.f32 %v2718_v58, %v2717_v49 }
 0x138   : > { %v4256_v32 = vadd.f32 %v2804_v46, %v1623_v51  ;;  %2180 = vmatprep.mubr.bf16.mxu1 %v3742_v12  ;;  %v2720_v23 = vpop.f32.mrf.mxu0 }
 0x139   : > { %v2806_v55 = vpop.f32.mrf.mxu1 }
 0x13a   : > { %v2807_v7 = vadd.f32 %v2806_v55, %v2805_v54  ;;  %v2721_v8 = vpop.f32.mrf.mxu0 }
 0x13b   : > { %v2808_v43 = vpop.f32.mrf.mxu1  ;;  %v4265_v15 = vadd.f32 %v2721_v8, %v2720_v23 }
 0x13c   : > { %v4263_v48 = vadd.f32 %v2807_v7, %v1628_v21  ;;  %v2723_v34 = vpop.f32.mrf.mxu0  ;;  %3162 = vmatmul.mubr.bf16.gmra.mxu0 %v4079_v17  ;;  %v1636_v17 = vadd.f32 %v4208_v25, %v4195_v50  ;;  %v1647_v21 = vadd.f32 %v4233_v16, %v4195_v50 }
 0x13d   : > { %v2809_v4 = vpop.f32.mrf.mxu1  ;;  %3165 = vmatprep.mubr.bf16.mxu0 %v4091_v24 }
 0x13e   : > { %v2810_v12 = vadd.f32 %v2809_v4, %v2808_v43  ;;  %v2724_v47 = vpop.f32.mrf.mxu0 }
 0x13f   : > { %v2811_v26 = vpop.f32.mrf.mxu1  ;;  %2181 = vmatmul.mubr.bf16.gmra.mxu1 %v3706_v30  ;;  %v4274_v31 = vadd.f32 %v2724_v47, %v2723_v34 }
 0x140   : > { %v4272_v22 = vadd.f32 %v2810_v12, %v1631_v0  ;;  %2188 = vmatprep.mubr.bf16.mxu1 %v4172_v9  ;;  %v2726_v28 = vpop.f32.mrf.mxu0  ;;  %v1652_v12 = vadd.f32 %v4242_v29, %v4195_v50 }
 0x141   : > { %v2812_v56 = vpop.f32.mrf.mxu1 }
 0x142   : > { %v2813_v42 = vadd.f32 %v2812_v56, %v2811_v26  ;;  %v2727_v33 = vpop.f32.mrf.mxu0 }
 0x143   : > { %v2814_v45 = vpop.f32.mrf.mxu1  ;;  %v4281_v24 = vadd.f32 %v2727_v33, %v2726_v28 }
 0x144   : > { %v4279_v11 = vadd.f32 %v2813_v42, %v1636_v17  ;;  %v2729_v13 = vpop.f32.mrf.mxu0  ;;  %3166 = vmatmul.mubr.bf16.gmra.mxu0 %v4104_v6  ;;  %v1644_v6 = vadd.f32 %v4226_v14, %v4195_v50 }
 0x145   : > { %v2815_v30 = vpop.f32.mrf.mxu1  ;;  %3169 = vmatprep.mubr.bf16.mxu0 %v4163_v57 }
 0x146   : > { %v2816_v9 = vadd.f32 %v2815_v30, %v2814_v45  ;;  %v2730_v25 = vpop.f32.mrf.mxu0 }
 0x147   : > { %v2817_v40 = vpop.f32.mrf.mxu1  ;;  %2189 = vmatmul.mubr.bf16.gmra.mxu1 %v4096_v19  ;;  %v4290_v49 = vadd.f32 %v2730_v25, %v2729_v13 }
 0x148   : > { %v4288_v53 = vadd.f32 %v2816_v9, %v1639_v37  ;;  %2196 = vmatprep.mubr.bf16.mxu1 %v3390_v3  ;;  %v2732_v46 = vpop.f32.mrf.mxu0  ;;  %v1660_v9 = vadd.f32 %v4258_v18, %v4195_v50 }
 0x149   : > { %v2818_v51 = vpop.f32.mrf.mxu1 }
 0x14a   : > { %v2819_v54 = vadd.f32 %v2818_v51, %v2817_v40  ;;  %v2733_v58 = vpop.f32.mrf.mxu0 }
 0x14b   : > { %v2820_v39 = vpop.f32.mrf.mxu1  ;;  %v4297_v57 = vadd.f32 %v2733_v58, %v2732_v46  ;;  %v1663_v58 = vadd.f32 %v4265_v15, %v4195_v50 }
 0x14c   : > { %v4295_v55 = vadd.f32 %v2819_v54, %v1644_v6  ;;  %v2735_v23 = vpop.f32.mrf.mxu0  ;;  %3170 = vmatmul.mubr.bf16.gmra.mxu0 %v3390_v3 }
 0x14d   : > { %v2821_v19 = vpop.f32.mrf.mxu1 }
 0x14e   : > { %v2822_v7 = vadd.f32 %v2821_v19, %v2820_v39  ;;  %v2736_v8 = vpop.f32.mrf.mxu0 }
 0x14f   : > { %v2823_v43 = vpop.f32.mrf.mxu1  ;;  %2197 = vmatmul.mubr.bf16.gmra.mxu1 %v3344_v2  ;;  %v4305_v4 = vadd.f32 %v2736_v8, %v2735_v23  ;;  %v1655_v2 = vadd.f32 %v4249_v5, %v4195_v50 }
 0x150   : > { %v4303_v14 = vadd.f32 %v2822_v7, %v1647_v21  ;;  %v2738_v0 = vpop.f32.mrf.mxu0 }
 0x151   : > { %v2824_v34 = vpop.f32.mrf.mxu1 }
 0x152   : > { %v2825_v26 = vadd.f32 %v2824_v34, %v2823_v43  ;;  %v2739_v3 = vpop.f32.mrf.mxu0  ;;  %v1668_v34 = vadd.f32 %v4274_v31, %v4195_v50 }
 0x153   : > { %v2826_v47 = vpop.f32.mrf.mxu1  ;;  %v4311_v16 = vadd.f32 %v2739_v3, %v2738_v0 }
 0x154   : > { %v4309_v56 = vadd.f32 %v2825_v26, %v1652_v12  ;;  %v2893_v17 = vpop.f32.mrf.mxu0 }
 0x155   : > { %v2827_v28 = vpop.f32.mrf.mxu1 }
 0x156   : > { %v2828_v42 = vadd.f32 %v2827_v28, %v2826_v47  ;;  %v2894_v33 = vpop.f32.mrf.mxu0 }
 0x157   : > { %v2829_v45 = vpop.f32.mrf.mxu1  ;;  %v2895_v13 = vadd.f32 %v2894_v33, %v2893_v17  ;;  %v1671_v17 = vadd.f32 %v4281_v24, %v4195_v50 }
 0x158   : > { %v4315_v30 = vadd.f32 %v2828_v42, %v1655_v2  ;;  %v2896_v29 = vpop.f32.mrf.mxu0 }
 0x159   : > { %v2830_v37 = vpop.f32.mrf.mxu1  ;;  %v4320_v25 = vadd.f32 %v2895_v13, %v4201_v27 }
 0x15a   : > { %v2831_v40 = vadd.f32 %v2830_v37, %v2829_v45  ;;  %v2897_v46 = vpop.f32.mrf.mxu0 }
 0x15b   : > { %v2832_v51 = vpop.f32.mrf.mxu1  ;;  %v2898_v5 = vadd.f32 %v2897_v46, %v2896_v29  ;;  %v1676_v29 = vadd.f32 %v4290_v49, %v4195_v50 }
 0x15c   : > { %v4322_v6 = vadd.f32 %v2831_v40, %v1660_v9  ;;  %v2899_v39 = vpop.f32.mrf.mxu0 }
 0x15d   : > { %v2833_v54 = vpop.f32.mrf.mxu1  ;;  %v4327_v23 = vadd.f32 %v2898_v5, %v4210_v60 }
 0x15e   : > { %v2834_v19 = vadd.f32 %v2833_v54, %v2832_v51  ;;  %v2900_v18 = vpop.f32.mrf.mxu0 }
 0x15f   : > { %v2835_v21 = vpop.f32.mrf.mxu1  ;;  %v2901_v27 = vadd.f32 %v2900_v18, %v2899_v39  ;;  %v1679_v39 = vadd.f32 %v4297_v57, %v4195_v50 }
 0x160   : > { %v4329_v7 = vadd.f32 %v2834_v19, %v1663_v58  ;;  %v2902_v8 = vpop.f32.mrf.mxu0 }
 0x161   : > { %v2836_v43 = vpop.f32.mrf.mxu1  ;;  %v4334_v12 = vadd.f32 %v2901_v27, %v4217_v63 }
 0x162   : > { %v2837_v0 = vadd.f32 %v2836_v43, %v2835_v21  ;;  %v2903_v15 = vpop.f32.mrf.mxu0 }
 0x163   : > { %v2838_v26 = vpop.f32.mrf.mxu1  ;;  %v2904_v60 = vadd.f32 %v2903_v15, %v2902_v8  ;;  %v1684_v8 = vadd.f32 %v4305_v4, %v4195_v50 }
 0x164   : > { %v4336_v47 = vadd.f32 %v2837_v0, %v1668_v34  ;;  %v2905_v28 = vpop.f32.mrf.mxu0 }
 0x165   : > { %v2839_v3 = vpop.f32.mrf.mxu1  ;;  %v4341_v42 = vadd.f32 %v2904_v60, %v4224_v61 }
 0x166   : > { %v2840_v2 = vadd.f32 %v2839_v3, %v2838_v26  ;;  %v2906_v31 = vpop.f32.mrf.mxu0 }
 0x167   : > { %v2841_v45 = vpop.f32.mrf.mxu1  ;;  %v2907_v63 = vadd.f32 %v2906_v31, %v2905_v28  ;;  %v1687_v28 = vadd.f32 %v4311_v16, %v4195_v50 }
 0x168   : > { %v4343_v33 = vadd.f32 %v2840_v2, %v1671_v17  ;;  %v2908_v37 = vpop.f32.mrf.mxu0 }
 0x169   : > { %v2842_v13 = vpop.f32.mrf.mxu1  ;;  %v4348_v40 = vadd.f32 %v2907_v63, %v4231_v38 }
 0x16a   : > { %v2843_v9 = vadd.f32 %v2842_v13, %v2841_v45  ;;  %v2909_v24 = vpop.f32.mrf.mxu0 }
 0x16b   : > { %v2844_v51 = vpop.f32.mrf.mxu1  ;;  %v2910_v61 = vadd.f32 %v2909_v24, %v2908_v37  ;;  %v1692_v37 = vadd.f32 %v4126_v1, %v4195_v50 }
 0x16c   : > { %v4350_v46 = vadd.f32 %v2843_v9, %v1676_v29  ;;  %v2911_v54 = vpop.f32.mrf.mxu0 }
 0x16d   : > { %v2845_v5 = vpop.f32.mrf.mxu1  ;;  %v4355_v19 = vadd.f32 %v2910_v61, %v4240_v35 }
 0x16e   : > { %v2846_v58 = vadd.f32 %v2845_v5, %v2844_v51  ;;  %v2912_v49 = vpop.f32.mrf.mxu0 }
 0x16f   : > { %v2847_v21 = vpop.f32.mrf.mxu1  ;;  %v2913_v38 = vadd.f32 %v2912_v49, %v2911_v54  ;;  %v1695_v54 = vadd.f32 %v4130_v20, %v4195_v50 }
 0x170   : > { %v4357_v18 = vadd.f32 %v2846_v58, %v1679_v39  ;;  %v2914_v43 = vpop.f32.mrf.mxu0 }
 0x171   : > { %v2848_v27 = vpop.f32.mrf.mxu1  ;;  %v4362_v0 = vadd.f32 %v2913_v38, %v4247_v41 }
 0x172   : > { %v2849_v34 = vadd.f32 %v2848_v27, %v2847_v21  ;;  %v2915_v57 = vpop.f32.mrf.mxu0 }
 0x173   : > { %v2850_v26 = vpop.f32.mrf.mxu1  ;;  %v2916_v35 = vadd.f32 %v2915_v57, %v2914_v43  ;;  %v1700_v43 = vadd.f32 %v4138_v59, %v4195_v50 }
 0x174   : > { %v4364_v15 = vadd.f32 %v2849_v34, %v1684_v8  ;;  %v2917_v3 = vpop.f32.mrf.mxu0 }
 0x175   : > { %v2851_v60 = vpop.f32.mrf.mxu1  ;;  %v4369_v2 = vadd.f32 %v2916_v35, %v4256_v32 }
 0x176   : > { %v2852_v17 = vadd.f32 %v2851_v60, %v2850_v26  ;;  %v2918_v4 = vpop.f32.mrf.mxu0 }
 0x177   : > { %v2853_v45 = vpop.f32.mrf.mxu1  ;;  %v2919_v41 = vadd.f32 %v2918_v4, %v2917_v3  ;;  %v1703_v3 = vadd.f32 %v4144_v44, %v4195_v50 }
 0x178   : > { %v4371_v31 = vadd.f32 %v2852_v17, %v1687_v28  ;;  %v2920_v13 = vpop.f32.mrf.mxu0 }
 0x179   : > { %v2854_v63 = vpop.f32.mrf.mxu1  ;;  %v4376_v9 = vadd.f32 %v2919_v41, %v4263_v48 }
 0x17a   : > { %v2855_v29 = vadd.f32 %v2854_v63, %v2853_v45  ;;  %v2921_v16 = vpop.f32.mrf.mxu0 }
 0x17b   : > { %v2856_v51 = vpop.f32.mrf.mxu1  ;;  %v2922_v32 = vadd.f32 %v2921_v16, %v2920_v13  ;;  %v1708_v13 = vadd.f32 %v4160_v62, %v4195_v50 }
 0x17c   : > { %v4378_v24 = vadd.f32 %v2855_v29, %v1692_v37  ;;  %v2923_v5 = vpop.f32.mrf.mxu0 }
 0x17d   : > { %v2857_v61 = vpop.f32.mrf.mxu1  ;;  %v4383_v58 = vadd.f32 %v2922_v32, %v4272_v22 }
 0x17e   : > { %v2858_v39 = vadd.f32 %v2857_v61, %v2856_v51  ;;  %v2924_v1 = vpop.f32.mrf.mxu0 }
 0x17f   : > { %v2859_v21 = vpop.f32.mrf.mxu1  ;;  %v2925_v48 = vadd.f32 %v2924_v1, %v2923_v5  ;;  %v1711_v5 = vadd.f32 %v4168_v36, %v4195_v50 }
 0x180   : > { %v4385_v49 = vadd.f32 %v2858_v39, %v1695_v54  ;;  %v2926_v27 = vpop.f32.mrf.mxu0 }
 0x181   : > { %v2860_v38 = vpop.f32.mrf.mxu1  ;;  %v4390_v34 = vadd.f32 %v2925_v48, %v4279_v11 }
 0x182   : > { %v2861_v8 = vadd.f32 %v2860_v38, %v2859_v21  ;;  %v2927_v20 = vpop.f32.mrf.mxu0 }
 0x183   : > { %v2862_v26 = vpop.f32.mrf.mxu1  ;;  %v2928_v22 = vadd.f32 %v2927_v20, %v2926_v27  ;;  %v1716_v27 = vadd.f32 %v4182_v10, %v4195_v50 }
 0x184   : > { %v4392_v57 = vadd.f32 %v2861_v8, %v1700_v43  ;;  %v2929_v60 = vpop.f32.mrf.mxu0 }
 0x185   : > { %v2863_v35 = vpop.f32.mrf.mxu1  ;;  %v4397_v17 = vadd.f32 %v2928_v22, %v4288_v53 }
 0x186   : > { %v2864_v28 = vadd.f32 %v2863_v35, %v2862_v26  ;;  %v2930_v59 = vpop.f32.mrf.mxu0 }
 0x187   : > { %v2865_v45 = vpop.f32.mrf.mxu1  ;;  %v2931_v11 = vadd.f32 %v2930_v59, %v2929_v60  ;;  %v1719_v60 = vadd.f32 %v4185_v52, %v4195_v50 }
 0x188   : > { %v4399_v4 = vadd.f32 %v2864_v28, %v1703_v3  ;;  %v2932_v63 = vpop.f32.mrf.mxu0 }
 0x189   : > { %v2866_v41 = vpop.f32.mrf.mxu1  ;;  %v4404_v29 = vadd.f32 %v2931_v11, %v4295_v55 }
 0x18a   : > { %v2867_v37 = vadd.f32 %v2866_v41, %v2865_v45  ;;  %v2933_v44 = vpop.f32.mrf.mxu0 }
 0x18b   : > { %v2868_v51 = vpop.f32.mrf.mxu1  ;;  %v2934_v53 = vadd.f32 %v2933_v44, %v2932_v63 }
 0x18c   : > { %v4406_v16 = vadd.f32 %v2867_v37, %v1708_v13  ;;  %v2935_v61 = vpop.f32.mrf.mxu0 }
 0x18d   : > { %v2869_v32 = vpop.f32.mrf.mxu1  ;;  %v4411_v39 = vadd.f32 %v2934_v53, %v4303_v14 }
 0x18e   : > { %v2870_v54 = vadd.f32 %v2869_v32, %v2868_v51  ;;  %v2936_v62 = vpop.f32.mrf.mxu0 }
 0x18f   : > { %v2871_v21 = vpop.f32.mrf.mxu1  ;;  %v2937_v55 = vadd.f32 %v2936_v62, %v2935_v61 }
 0x190   : > { %v4413_v1 = vadd.f32 %v2870_v54, %v1711_v5  ;;  %v2938_v38 = vpop.f32.mrf.mxu0 }
 0x191   : > { %v2872_v48 = vpop.f32.mrf.mxu1  ;;  %v4418_v8 = vadd.f32 %v2937_v55, %v4309_v56 }
 0x192   : > { %v2873_v43 = vadd.f32 %v2872_v48, %v2871_v21  ;;  %v2939_v36 = vpop.f32.mrf.mxu0 }
 0x193   : > { %v2874_v26 = vpop.f32.mrf.mxu1  ;;  %v2940_v14 = vadd.f32 %v2939_v36, %v2938_v38 }
 0x194   : > { %v4420_v20 = vadd.f32 %v2873_v43, %v1716_v27  ;;  %v2941_v35 = vpop.f32.mrf.mxu0 }
 0x195   : > { %v2875_v22 = vpop.f32.mrf.mxu1  ;;  %v4425_v28 = vadd.f32 %v2940_v14, %v4315_v30 }
 0x196   : > { %v2876_v3 = vadd.f32 %v2875_v22, %v2874_v26  ;;  %v2942_v10 = vpop.f32.mrf.mxu0 }
 0x197   : > { %v4427_v45 = vpop.f32.mrf.mxu1  ;;  %v2943_v56 = vadd.f32 %v2942_v10, %v2941_v35 }
 0x198   : > { %v4429_v59 = vadd.f32 %v2876_v3, %v1719_v60  ;;  %v2944_v41 = vpop.f32.mrf.mxu0 }
 0x199   : > { %v4431_v11 = vpop.f32.mrf.mxu1  ;;  %v4434_v63 = vadd.f32 %v2943_v56, %v4322_v6 }
 0x19a   : > { %v2945_v37 = vpop.f32.mrf.mxu0 }
 0x19b   : > { %v4436_v13 = vpop.f32.mrf.mxu1  ;;  %v2946_v52 = vadd.f32 %v2945_v37, %v2944_v41 }
 0x19c   : > { %v2947_v30 = vpop.f32.mrf.mxu0 }
 0x19d   : > { %v4438_v50 = vpop.f32.mrf.mxu1  ;;  %v4441_v51 = vadd.f32 %v2946_v52, %v4329_v7 }
 0x19e   : > { %v2948_v53 = vpop.f32.mrf.mxu0 }
 0x19f   : > { %v4443_v44 = vpop.f32.mrf.mxu1  ;;  %v2949_v32 = vadd.f32 %v2948_v53, %v2947_v30 }
 0x1a0   : > { %v2950_v5 = vpop.f32.mrf.mxu0 }
 0x1a1   : > { %v4445_v61 = vpop.f32.mrf.mxu1  ;;  %v4448_v6 = vadd.f32 %v2949_v32, %v4336_v47 }
 0x1a2   : > { %v2951_v21 = vpop.f32.mrf.mxu0 }
 0x1a3   : > { %v4450_v54 = vpop.f32.mrf.mxu1  ;;  %v2952_v62 = vadd.f32 %v2951_v21, %v2950_v5 }
 0x1a4   : > { %v2953_v48 = vpop.f32.mrf.mxu0 }
 0x1a5   : > { %v4452_v55 = vpop.f32.mrf.mxu1  ;;  %v4455_v7 = vadd.f32 %v2952_v62, %v4343_v33 }
 0x1a6   : > { %v2954_v27 = vpop.f32.mrf.mxu0 }
 0x1a7   : > { %v4457_v38 = vpop.f32.mrf.mxu1  ;;  %v2955_v43 = vadd.f32 %v2954_v27, %v2953_v48 }
 0x1a8   : > { %v2956_v36 = vpop.f32.mrf.mxu0 }
 0x1a9   : > { %v4459_v26 = vpop.f32.mrf.mxu1  ;;  %v4462_v47 = vadd.f32 %v2955_v43, %v4350_v46 }
 0x1aa   : > { %v2957_v22 = vpop.f32.mrf.mxu0 }
 0x1ab   : > { %4716 = vst [vmem:[#allocation2_spill] sm:$0xff] %v4462_v47  ;;  %v4464_v14 = vpop.f32.mrf.mxu1  ;;  %v2958_v35 = vadd.f32 %v2957_v22, %v2956_v36 }
 0x1ac   : > { %v2959_v3 = vpop.f32.mrf.mxu0 }
 0x1ad   : > { %v4466_v60 = vpop.f32.mrf.mxu1  ;;  %v4469_v33 = vadd.f32 %v2958_v35, %v4357_v18 }
 0x1ae   : > { %v2960_v56 = vpop.f32.mrf.mxu0 }
 0x1af   : > { %4717 = vst [vmem:[#allocation3_spill] sm:$0xff] %v4469_v33  ;;  %v4471_v10 = vpop.f32.mrf.mxu1  ;;  %v2961_v41 = vadd.f32 %v2960_v56, %v2959_v3 }
 0x1b0   : > { %v2962_v52 = vpop.f32.mrf.mxu0 }
 0x1b1   : > { %v4473_v37 = vpop.f32.mrf.mxu1  ;;  %v4476_v46 = vadd.f32 %v2961_v41, %v4364_v15 }
 0x1b2   : > { %v2963_v53 = vpop.f32.mrf.mxu0 }
 0x1b3   : > { %4718 = vst [vmem:[#allocation4_spill] sm:$0xff] %v4476_v46  ;;  %v4478_v30 = vpop.f32.mrf.mxu1  ;;  %v2964_v32 = vadd.f32 %v2963_v53, %v2962_v52 }
 0x1b4   : > { %v2965_v21 = vpop.f32.mrf.mxu0 }
 0x1b5   : > { %v4480_v5 = vpop.f32.mrf.mxu1  ;;  %v4483_v18 = vadd.f32 %v2964_v32, %v4371_v31 }
 0x1b6   : > { %v2966_v48 = vpop.f32.mrf.mxu0 }
 0x1b7   : > { %4719 = vst [vmem:[#allocation5_spill] sm:$0xff] %v4483_v18  ;;  %v4485_v62 = vpop.f32.mrf.mxu1  ;;  %v2967_v27 = vadd.f32 %v2966_v48, %v2965_v21 }
 0x1b8   : > { %v2968_v36 = vpop.f32.mrf.mxu0 }
 0x1b9   : > { %v4487_v43 = vpop.f32.mrf.mxu1  ;;  %v4490_v15 = vadd.f32 %v2967_v27, %v4378_v24 }
 0x1ba   : > { %v2969_v35 = vpop.f32.mrf.mxu0 }
 0x1bb   : > { %4720 = vst [vmem:[#allocation6_spill] sm:$0xff] %v4490_v15  ;;  %v4492_v22 = vpop.f32.mrf.mxu1  ;;  %v2970_v3 = vadd.f32 %v2969_v35, %v2968_v36 }
 0x1bc   : > { %v2971_v41 = vpop.f32.mrf.mxu0 }
 0x1bd   : > { %v4494_v56 = vpop.f32.mrf.mxu1  ;;  %v4497_v31 = vadd.f32 %v2970_v3, %v4385_v49 }
 0x1be   : > { %v2972_v53 = vpop.f32.mrf.mxu0 }
 0x1bf   : > { %4721 = vst [vmem:[#allocation7_spill] sm:$0xff] %v4497_v31  ;;  %v4499_v52 = vpop.f32.mrf.mxu1  ;;  %v2973_v32 = vadd.f32 %v2972_v53, %v2971_v41 }
 0x1c0   : > { %v2974_v48 = vpop.f32.mrf.mxu0 }
 0x1c1   : > { %v4501_v21 = vpop.f32.mrf.mxu1  ;;  %v4504_v24 = vadd.f32 %v2973_v32, %v4392_v57 }
 0x1c2   : > { %v2975_v15 = vpop.f32.mrf.mxu0 }
 0x1c3   : > { %4722 = vst [vmem:[#allocation8_spill] sm:$0xff] %v4504_v24  ;;  %v4506_v27 = vpop.f32.mrf.mxu1  ;;  %v2976_v36 = vadd.f32 %v2975_v15, %v2974_v48 }
 0x1c4   : > { %v2977_v33 = vpop.f32.mrf.mxu0 }
 0x1c5   : > { %v4508_v35 = vpop.f32.mrf.mxu1  ;;  %v4511_v49 = vadd.f32 %v2976_v36, %v4399_v4 }
 0x1c6   : > { %v2978_v31 = vpop.f32.mrf.mxu0 }
 0x1c7   : > { %4723 = vst [vmem:[#allocation9_spill] sm:$0xff] %v4511_v49  ;;  %v4513_v3 = vpop.f32.mrf.mxu1  ;;  %v2979_v41 = vadd.f32 %v2978_v31, %v2977_v33  ;;  %v3013_v33 = vadd.f32 %v4445_v61, %v4443_v44 }
 0x1c8   : > { %v2980_v18 = vpop.f32.mrf.mxu0 }
 0x1c9   : > { %v4515_v53 = vpop.f32.mrf.mxu1  ;;  %v4518_v57 = vadd.f32 %v2979_v41, %v4406_v16  ;;  %v3007_v41 = vadd.f32 %v4431_v11, %v4427_v45 }
 0x1ca   : > { %v2981_v24 = vpop.f32.mrf.mxu0 }
 0x1cb   : > { %4724 = vst [vmem:[#allocation10_spill] sm:$0xff] %v4518_v57  ;;  %v4520_v32 = vpop.f32.mrf.mxu1  ;;  %v2982_v15 = vadd.f32 %v2981_v24, %v2980_v18  ;;  %v2087_v57 = vadd.f32 %v3013_v33, %v4334_v12  ;;  %v2079_v11 = vadd.f32 %v3007_v41, %v4320_v25 }
 0x1cc   : > { %v2983_v47 = vpop.f32.mrf.mxu0 }
 0x1cd   : > { %v4522_v48 = vpop.f32.mrf.mxu1  ;;  %v4525_v4 = vadd.f32 %v2982_v15, %v4413_v1  ;;  %v3016_v15 = vadd.f32 %v4452_v55, %v4450_v54  ;;  %v3025_v54 = vadd.f32 %v4473_v37, %v4471_v10  ;;  %v3028_v10 = vadd.f32 %v4480_v5, %v4478_v30 }
 0x1ce   : > { %v2984_v49 = vpop.f32.mrf.mxu0  ;;  %v3037_v30 = vadd.f32 %v4501_v21, %v4499_v52 }
 0x1cf   : > { %4725 = vst [vmem:[#allocation11_spill] sm:$0xff] %v4525_v4  ;;  %v4527_v36 = vpop.f32.mrf.mxu1  ;;  %v2985_v31 = vadd.f32 %v2984_v49, %v2983_v47  ;;  %v3010_v47 = vadd.f32 %v4438_v50, %v4436_v13  ;;  %v2090_v55 = vadd.f32 %v3016_v15, %v4341_v42  ;;  %v2103_v42 = vadd.f32 %v3025_v54, %v4362_v0 }
 0x1d0   : > { %v2986_v16 = vpop.f32.mrf.mxu0  ;;  %v2106_v0 = vadd.f32 %v3028_v10, %v4369_v2  ;;  %v3040_v2 = vadd.f32 %v4508_v35, %v4506_v27 }
 0x1d1   : > { %v4531_v46 = vpop.f32.mrf.mxu1  ;;  %v4536_v18 = vadd.f32 %v2985_v31, %v4420_v20  ;;  %v2082_v25 = vadd.f32 %v3010_v47, %v4327_v23 }
 0x1d2   : > { %v2987_v1 = vpop.f32.mrf.mxu0 }
 0x1d3   : > { %v4538_v24 = vpop.f32.mrf.mxu1  ;;  %v2988_v4 = vadd.f32 %v2987_v1, %v2986_v16 }
 0x1d4   : > { %v3143_v61 = vpop.f32.mrf.mxu0 }
 0x1d5   : > { %v4543_v44 = vpop.f32.mrf.mxu1  ;;  %v4548_v45 = vadd.f32 %v2988_v4, %v4429_v59  ;;  %v2248_v20 = vadd.f32 %v3143_v61, %v2087_v57  ;;  %v3019_v59 = vadd.f32 %v4459_v26, %v4457_v38  ;;  %v3022_v38 = vadd.f32 %v4466_v60, %v4464_v14 }
 0x1d6   : > { %v2239_v31 = vpop.f32.mrf.mxu0  ;;  %v3031_v14 = vadd.f32 %v4487_v43, %v4485_v62  ;;  %v2119_v43 = vadd.f32 %v3037_v30, %v4390_v34  ;;  %v3049_v34 = vadd.f32 %v4531_v46, %v4527_v36 }
 0x1d7   : > { %v4551_v49 = vpop.f32.mrf.mxu1  ;;  %3270 = vtanh.f32 %v2248_v20  ;;  %v2240_v12 = vadd.f32 %v2239_v31, %v2079_v11  ;;  %v2095_v23 = vadd.f32 %v3019_v59, %v4348_v40  ;;  %v2098_v40 = vadd.f32 %v3022_v38, %v4355_v19 }
 0x1d8   : > { %v3144_v16 = vpop.f32.mrf.mxu0  ;;  %v3034_v31 = vadd.f32 %v4494_v56, %v4492_v22  ;;  %v2122_v22 = vadd.f32 %v3040_v2, %v4397_v17  ;;  %v3052_v17 = vadd.f32 %v4543_v44, %v4538_v24 }
 0x1d9   : > { %v4556_v33 = vpop.f32.mrf.mxu1  ;;  %3272 = vtanh.f32 %v2240_v12  ;;  %v2251_v13 = vadd.f32 %v3144_v16, %v2090_v55  ;;  %v2111_v12 = vadd.f32 %v3031_v14, %v4376_v9  ;;  %v3043_v9 = vadd.f32 %v4515_v53, %v4513_v3 }
 0x1da   : > { %v2242_v57 = vpop.f32.mrf.mxu0  ;;  %v2114_v46 = vadd.f32 %v3034_v31, %v4383_v58  ;;  %v2135_v3 = vadd.f32 %v3049_v34, %v4418_v8  ;;  %v3046_v58 = vadd.f32 %v4522_v48, %v4520_v32  ;;  %v2138_v30 = vadd.f32 %v3052_v17, %v4425_v28 }
 0x1db   : > { %v4561_v50 = vpop.f32.mrf.mxu1  ;;  %3274 = vtanh.f32 %v2251_v13  ;;  %v2243_v37 = vadd.f32 %v2242_v57, %v2082_v25  ;;  %v2127_v24 = vadd.f32 %v3043_v9, %v4404_v29 }
 0x1dc   : > { %v3147_v41 = vpop.f32.mrf.mxu0 }
 0x1dd   : > { %v4566_v4 = vpop.f32.mrf.mxu1  ;;  %3276 = vtanh.f32 %v2243_v37  ;;  %v2264_v26 = vadd.f32 %v3147_v41, %v2103_v42 }
 0x1de   : > { %v2255_v15 = vpop.f32.mrf.mxu0  ;;  %v3058_v2 = vadd.f32 %v4566_v4, %v4561_v50 }
 0x1df   : > { %v4571_v1 = vpop.f32.mrf.mxu1  ;;  %3278 = vtanh.f32 %v2264_v26  ;;  %v2256_v5 = vadd.f32 %v2255_v15, %v2095_v23 }
 0x1e0   : > { %v3148_v47 = vpop.f32.mrf.mxu0 }
 0x1e1   : > { %v3060_v61 = vpop.f32.mrf.mxu1  ;;  %3280 = vtanh.f32 %v2256_v5  ;;  %v2267_v60 = vadd.f32 %v3148_v47, %v2106_v0  ;;  %v3055_v0 = vadd.f32 %v4556_v33, %v4551_v49 }
 0x1e2   : > { %v2258_v21 = vpop.f32.mrf.mxu0  ;;  %v3061_v15 = vadd.f32 %v3060_v61, %v4571_v1  ;;  %v2130_v1 = vadd.f32 %v3046_v58, %v4411_v39 }
 0x1e3   : > { %v4585_v52 = vpop.f32.mrf.mxu1  ;;  %3282 = vtanh.f32 %v2267_v60  ;;  %v2259_v62 = vadd.f32 %v2258_v21, %v2098_v40 }
 0x1e4   : > { %v3271_v20 = vpop.eup %3270  ;;  %v3151_v11 = vpop.f32.mrf.mxu0  ;;  %v2151_v40 = vadd.f32 %v3061_v15, %v4448_v6 }
 0x1e5   : > { %v3063_v19 = vpop.f32.mrf.mxu1  ;;  %2401 = vst.msk [vmem:[%s4583_s19 + $0x10] sm:$0xff] %vm2398_vm4, %v3271_v20  ;;  %3284 = vtanh.f32 %v2259_v62  ;;  %v2280_v54 = vadd.f32 %v3151_v11, %v2119_v43 }
 0x1e6   : > { %v3273_v55 = vpop.eup %3272  ;;  %v2271_v35 = vpop.f32.mrf.mxu0  ;;  %v3064_v60 = vadd.f32 %v3063_v19, %v4585_v52  ;;  %v2143_v52 = vadd.f32 %v3055_v0, %v4434_v63 }
 0x1e7   : > { %v4595_v27 = vpop.f32.mrf.mxu1  ;;  %2399 = vst.msk [vmem:[%s4583_s19] sm:$0xff] %vm2398_vm4, %v3273_v55  ;;  %3286 = vtanh.f32 %v2280_v54  ;;  %v2272_v16 = vadd.f32 %v2271_v35, %v2111_v12  ;;  %v2146_v12 = vadd.f32 %v3058_v2, %v4441_v51 }
 0x1e8   : > { %v3275_v56 = vpop.eup %3274  ;;  %v3152_v13 = vpop.f32.mrf.mxu0  ;;  %v2154_v11 = vadd.f32 %v3064_v60, %v4455_v7 }
 0x1e9   : > { %v4602_v59 = vpop.f32.mrf.mxu1  ;;  %2402 = vst.msk [vmem:[%s4583_s19 + $0x18] sm:$0xff] %vm2398_vm4, %v3275_v56  ;;  %3288 = vtanh.f32 %v2272_v16  ;;  %v2283_v25 = vadd.f32 %v3152_v13, %v2122_v22  ;;  %v4726_v22 = vld [vmem:[#allocation4_spill] sm:$0xff] }
 0x1ea   : > { %v3277_v36 = vpop.eup %3276  ;;  %v2274_v10 = vpop.f32.mrf.mxu0  ;;  %v3067_v54 = vadd.f32 %v4602_v59, %v4595_v27 }
 0x1eb   : > { %v4609_v57 = vpop.f32.mrf.mxu1  ;;  %2400 = vst.msk [vmem:[%s4583_s19 + $0x8] sm:$0xff] %vm2398_vm4, %v3277_v36  ;;  %3290 = vtanh.f32 %v2283_v25  ;;  %v2275_v37 = vadd.f32 %v2274_v10, %v2114_v46  ;;  %v4727_v25 = vld [vmem:[#allocation2_spill] sm:$0xff] }
 0x1ec   : > { %v3279_v53 = vpop.eup %3278  ;;  %v3155_v41 = vpop.f32.mrf.mxu0  ;;  %v2159_v46 = vadd.f32 %v3067_v54, %v4727_v25 }
 0x1ed   : > { %v4616_v42 = vpop.f32.mrf.mxu1  ;;  %2405 = vst.msk [vmem:[%s4583_s19 + $0x30] sm:$0xff] %vm2398_vm4, %v3279_v53  ;;  %3292 = vtanh.f32 %v2275_v37  ;;  %v2296_v38 = vadd.f32 %v3155_v41, %v2135_v3  ;;  %v4728_v3 = vld [vmem:[#allocation5_spill] sm:$0xff] }
 0x1ee   : > { %v3281_v44 = vpop.eup %3280  ;;  %v2287_v23 = vpop.f32.mrf.mxu0  ;;  %v3070_v9 = vadd.f32 %v4616_v42, %v4609_v57 }
 0x1ef   : > { %v3071_v26 = vpop.f32.mrf.mxu1  ;;  %2403 = vst.msk [vmem:[%s4583_s19 + $0x20] sm:$0xff] %vm2398_vm4, %v3281_v44  ;;  %3294 = vtanh.f32 %v2296_v38  ;;  %v2288_v8 = vadd.f32 %v2287_v23, %v2127_v24  ;;  %v4729_v44 = vld [vmem:[#allocation3_spill] sm:$0xff] }
 0x1f0   : > { %v3283_v32 = vpop.eup %3282  ;;  %v3156_v5 = vpop.f32.mrf.mxu0 }
 0x1f1   : > { %v3072_v48 = vpop.f32.mrf.mxu1  ;;  %2406 = vst.msk [vmem:[%s4583_s19 + $0x38] sm:$0xff] %vm2398_vm4, %v3283_v32  ;;  %3296 = vtanh.f32 %v2288_v8  ;;  %v2299_v29 = vadd.f32 %v3156_v5, %v2138_v30  ;;  %v4730_v32 = vld [vmem:[#allocation8_spill] sm:$0xff] }
 0x1f2   : > { %v3285_v61 = vpop.eup %3284  ;;  %v2290_v14 = vpop.f32.mrf.mxu0  ;;  %v3073_v6 = vadd.f32 %v3072_v48, %v3071_v26  ;;  %v2162_v26 = vadd.f32 %v3070_v9, %v4729_v44 }
 0x1f3   : > { %v3074_v47 = vpop.f32.mrf.mxu1  ;;  %2404 = vst.msk [vmem:[%s4583_s19 + $0x28] sm:$0xff] %vm2398_vm4, %v3285_v61  ;;  %3298 = vtanh.f32 %v2299_v29  ;;  %v2291_v28 = vadd.f32 %v2290_v14, %v2130_v1  ;;  %v4731_v1 = vld [vmem:[#allocation6_spill] sm:$0xff] }
 0x1f4   : > { %v3287_v49 = vpop.eup %3286  ;;  %v3159_v21 = vpop.f32.mrf.mxu0  ;;  %v2167_v56 = vadd.f32 %v3073_v6, %v4726_v22  ;;  %v4733_v6 = vld [vmem:[#allocation7_spill] sm:$0xff] }
 0x1f5   : > { %v3075_v33 = vpop.f32.mrf.mxu1  ;;  %2409 = vst.msk [vmem:[%s4583_s19 + $0x50] sm:$0xff] %vm2398_vm4, %v3287_v49  ;;  %3300 = vtanh.f32 %v2291_v28  ;;  %v2312_v39 = vadd.f32 %v3159_v21, %v2151_v40  ;;  %v4732_v21 = vld [vmem:[#allocation9_spill] sm:$0xff] }
 0x1f6   : > { %v3289_v62 = vpop.eup %3288  ;;  %v2303_v20 = vpop.f32.mrf.mxu0  ;;  %v3076_v7 = vadd.f32 %v3075_v33, %v3074_v47 }
 0x1f7   : > { %v3077_v43 = vpop.f32.mrf.mxu1  ;;  %2407 = vst.msk [vmem:[%s4583_s19 + $0x40] sm:$0xff] %vm2398_vm4, %v3289_v62  ;;  %3302 = vtanh.f32 %v2312_v39  ;;  %v2304_v19 = vadd.f32 %v2303_v20, %v2143_v52 }
 0x1f8   : > { %v3291_v31 = vpop.eup %3290  ;;  %v3160_v4 = vpop.f32.mrf.mxu0  ;;  %v2170_v53 = vadd.f32 %v3076_v7, %v4728_v3 }
 0x1f9   : > { %v3078_v50 = vpop.f32.mrf.mxu1  ;;  %2410 = vst.msk [vmem:[%s4583_s19 + $0x58] sm:$0xff] %vm2398_vm4, %v3291_v31  ;;  %3304 = vtanh.f32 %v2304_v19  ;;  %v2315_v63 = vadd.f32 %v3160_v4, %v2154_v11 }
 0x1fa   : > { %v3293_v55 = vpop.eup %3292  ;;  %v2306_v34 = vpop.f32.mrf.mxu0  ;;  %v3079_v58 = vadd.f32 %v3078_v50, %v3077_v43 }
 0x1fb   : > { %v3080_v35 = vpop.f32.mrf.mxu1  ;;  %2408 = vst.msk [vmem:[%s4583_s19 + $0x48] sm:$0xff] %vm2398_vm4, %v3293_v55  ;;  %3306 = vtanh.f32 %v2315_v63  ;;  %v2307_v16 = vadd.f32 %v2306_v34, %v2146_v12 }
 0x1fc   : > { %v3295_v13 = vpop.eup %3294  ;;  %v3163_v59 = vpop.f32.mrf.mxu0  ;;  %v2175_v61 = vadd.f32 %v3079_v58, %v4731_v1 }
 0x1fd   : > { %v3081_v27 = vpop.f32.mrf.mxu1  ;;  %2413 = vst.msk [vmem:[%s4583_s19 + $0x70] sm:$0xff] %vm2398_vm4, %v3295_v13  ;;  %3308 = vtanh.f32 %v2307_v16  ;;  %v2328_v51 = vadd.f32 %v3163_v59, %v2167_v56 }
 0x1fe   : > { %v3297_v36 = vpop.eup %3296  ;;  %v2319_v17 = vpop.f32.mrf.mxu0  ;;  %v3082_v47 = vadd.f32 %v3081_v27, %v3080_v35  ;;  %v4734_v35 = vld [vmem:[#allocation10_spill] sm:$0xff] }
 0x1ff   : > { %v3083_v10 = vpop.f32.mrf.mxu1  ;;  %2411 = vst.msk [vmem:[%s4583_s19 + $0x60] sm:$0xff] %vm2398_vm4, %v3297_v36  ;;  %3310 = vtanh.f32 %v2328_v51  ;;  %v2320_v37 = vadd.f32 %v2319_v17, %v2159_v46  ;;  %v4735_v51 = vld [vmem:[#allocation11_spill] sm:$0xff] }
 0x200   : > { %v3299_v41 = vpop.eup %3298  ;;  %v3164_v42 = vpop.f32.mrf.mxu0  ;;  %v2178_v19 = vadd.f32 %v3082_v47, %v4733_v6 }
 0x201   : > { %v3084_v57 = vpop.f32.mrf.mxu1  ;;  %2414 = vst.msk [vmem:[%s4583_s19 + $0x78] sm:$0xff] %vm2398_vm4, %v3299_v41  ;;  %3312 = vtanh.f32 %v2320_v37  ;;  %v2331_v24 = vadd.f32 %v3164_v42, %v2170_v53 }
 0x202   : > { %v3085_v38 = vadd.f32 %v3084_v57, %v3083_v10  ;;  %v3301_v23 = vpop.eup %3300  ;;  %v2322_v8 = vpop.f32.mrf.mxu0 }
 0x203   : > { %v3086_v15 = vpop.f32.mrf.mxu1  ;;  %2412 = vst.msk [vmem:[%s4583_s19 + $0x68] sm:$0xff] %vm2398_vm4, %v3301_v23  ;;  %3314 = vtanh.f32 %v2331_v24  ;;  %v2323_v30 = vadd.f32 %v2322_v8, %v2162_v26 }
 0x204   : > { %v2183_v48 = vadd.f32 %v3085_v38, %v4730_v32  ;;  %v3303_v5 = vpop.eup %3302  ;;  %v3167_v29 = vpop.f32.mrf.mxu0 }
 0x205   : > { %v3087_v0 = vpop.f32.mrf.mxu1  ;;  %2417 = vst.msk [vmem:[%s4583_s19 + $0x90] sm:$0xff] %vm2398_vm4, %v3303_v5  ;;  %3316 = vtanh.f32 %v2323_v30 }
 0x206   : > { %v3088_v14 = vadd.f32 %v3087_v0, %v3086_v15  ;;  %v2344_v60 = vadd.f32 %v3167_v29, %v2183_v48  ;;  %v3305_v28 = vpop.eup %3304  ;;  %v2335_v49 = vpop.f32.mrf.mxu0 }
 0x207   : > { %v3089_v40 = vpop.f32.mrf.mxu1  ;;  %2415 = vst.msk [vmem:[%s4583_s19 + $0x80] sm:$0xff] %vm2398_vm4, %v3305_v28  ;;  %v2336_v33 = vadd.f32 %v2335_v49, %v2175_v61 }
 0x208   : > { %3318 = vtanh.f32 %v2344_v60  ;;  %v2186_v2 = vadd.f32 %v3088_v14, %v4732_v21  ;;  %v3307_v39 = vpop.eup %3306  ;;  %v3168_v62 = vpop.f32.mrf.mxu0 }
 0x209   : > { %v3090_v52 = vpop.f32.mrf.mxu1  ;;  %2418 = vst.msk [vmem:[%s4583_s19 + $0x98] sm:$0xff] %vm2398_vm4, %v3307_v39  ;;  %3320 = vtanh.f32 %v2336_v33 }
 0x20a   : > { %v3091_v43 = vadd.f32 %v3090_v52, %v3089_v40  ;;  %v2347_v20 = vadd.f32 %v3168_v62, %v2186_v2  ;;  %v3309_v11 = vpop.eup %3308  ;;  %v2338_v50 = vpop.f32.mrf.mxu0 }
 0x20b   : > { %v3092_v31 = vpop.f32.mrf.mxu1  ;;  %2416 = vst.msk [vmem:[%s4583_s19 + $0x88] sm:$0xff] %vm2398_vm4, %v3309_v11  ;;  %v2339_v4 = vadd.f32 %v2338_v50, %v2178_v19 }
 0x20c   : > { %3322 = vtanh.f32 %v2347_v20  ;;  %v3311_v54 = vpop.eup %3310  ;;  %v3171_v12 = vpop.f32.mrf.mxu0  ;;  %v2191_v34 = vadd.f32 %v3091_v43, %v4734_v35 }
 0x20d   : > { %v3093_v63 = vpop.f32.mrf.mxu1  ;;  %2421 = vst.msk [vmem:[%s4583_s19 + $0xb0] sm:$0xff] %vm2398_vm4, %v3311_v54  ;;  %3324 = vtanh.f32 %v2339_v4 }
 0x20e   : > { %v3094_v55 = vadd.f32 %v3093_v63, %v3092_v31  ;;  %v3313_v7 = vpop.eup %3312  ;;  %v2351_v22 = vpop.f32.mrf.mxu0 }
 0x20f   : > { %v3095_v16 = vpop.f32.mrf.mxu1  ;;  %2419 = vst.msk [vmem:[%s4583_s19 + $0xa0] sm:$0xff] %vm2398_vm4, %v3313_v7  ;;  %v2352_v56 = vadd.f32 %v2351_v22, %v2191_v34 }
 0x210   : > { %v3315_v13 = vpop.eup %3314  ;;  %v3172_v59 = vpop.f32.mrf.mxu0  ;;  %v2194_v25 = vadd.f32 %v3094_v55, %v4735_v51 }
 0x211   : > { %v3096_v27 = vpop.f32.mrf.mxu1  ;;  %2422 = vst.msk [vmem:[%s4583_s19 + $0xb8] sm:$0xff] %vm2398_vm4, %v3315_v13  ;;  %3326 = vtanh.f32 %v2352_v56 }
 0x212   : > { %v3097_v9 = vadd.f32 %v3096_v27, %v3095_v16  ;;  %v3317_v46 = vpop.eup %3316  ;;  %v2354_v10 = vpop.f32.mrf.mxu0 }
 0x213   : > { %v3098_v36 = vpop.f32.mrf.mxu1  ;;  %2420 = vst.msk [vmem:[%s4583_s19 + $0xa8] sm:$0xff] %vm2398_vm4, %v3317_v46  ;;  %v2355_v37 = vadd.f32 %v2354_v10, %v2194_v25 }
 0x214   : > { %v2199_v17 = vadd.f32 %v3097_v9, %v4536_v18 }
 0x215   : > { %v3319_v3 = vpop.eup %3318  ;;  %v3099_v53 = vpop.f32.mrf.mxu1  ;;  %3328 = vtanh.f32 %v2355_v37 }
 0x216   : > { %2425 = vst.msk [vmem:[%s4583_s19 + $0xd0] sm:$0xff] %vm2398_vm4, %v3319_v3  ;;  %v2360_v41 = vadd.f32 %v3171_v12, %v2199_v17  ;;  %v3100_v58 = vadd.f32 %v3099_v53, %v3098_v36  ;;  %v3321_v57 = vpop.eup %3320 }
 0x217   : > { %2423 = vst.msk [vmem:[%s4583_s19 + $0xc0] sm:$0xff] %vm2398_vm4, %v3321_v57 }
 0x218   : > { %3330 = vtanh.f32 %v2360_v41  ;;  %v2202_v42 = vadd.f32 %v3100_v58, %v4548_v45 }
 0x219   : > { %v3323_v18 = vpop.eup %3322 }
 0x21a   : > { %2426 = vst.msk [vmem:[%s4583_s19 + $0xd8] sm:$0xff] %vm2398_vm4, %v3323_v18  ;;  %v2363_v38 = vadd.f32 %v3172_v59, %v2202_v42  ;;  %v3325_v24 = vpop.eup %3324 }
 0x21b   : > { %2424 = vst.msk [vmem:[%s4583_s19 + $0xc8] sm:$0xff] %vm2398_vm4, %v3325_v24 }
 0x21c   : > { %3332 = vtanh.f32 %v2363_v38 }
 0x21e   : > { %v3327_v44 = vpop.eup %3326 }
 0x21f   : > { %2427 = vst.msk [vmem:[%s4583_s19 + $0xe0] sm:$0xff] %vm2398_vm4, %v3327_v44 }
 0x222   : > { %v3329_v26 = vpop.eup %3328 }
 0x223   : > { %2428 = vst.msk [vmem:[%s4583_s19 + $0xe8] sm:$0xff] %vm2398_vm4, %v3329_v26 }
 0x225   : > { %v3331_v23 = vpop.eup %3330 }
 0x226   : > { %2429 = vst.msk [vmem:[%s4583_s19 + $0xf0] sm:$0xff] %vm2398_vm4, %v3331_v23 }
 0x229   : > { %v3333_v15 = vpop.eup %3332 }
 0x22a   : > { %2430 = vst.msk [vmem:[%s4583_s19 + $0xf8] sm:$0xff] %vm2398_vm4, %v3333_v15 }
 0x22b PF: > { %s15_s18 = sadd.s32 1, %s3342_s18  }
 0x22c   : > { %p12_p4 = scmp.ge.s32.totalorder %s15_s18, 4  }
 0x22e   :  { %14 = sbr.rel (!%p12_p4) target bundleno = 1 (0x1), region = 70 }

// kernel: generator_forward.6
= control target key start
LH: loop header
LB: loop body
LE: loop exit
PB: predicated region body
PF: predicated region fallthrough
CT: control target
= control target key end

     0   :  { %v5934_v23 = vmov 0   ;;  %vm290_vm0 = vcmask 1040384   ;;  %vm291_vm1 = vsmask.f32 256  ;;  %vm309_vm2 = vcmask 1044480   ;;  %s5928_s1 = inlined_call_operand.vmem [shape: bf16[4,512,128], index: 1, kind: input, shape index: {}]   ;;  %s5929_s0 = inlined_call_operand.vmem [shape: bf16[2,8,8,128], index: 0, kind: input, shape index: {}]   ;;  %s5930_s2 = inlined_call_operand.vmem [shape: f32[1,128], index: 2, kind: input, shape index: {}]   ;;  %s5931_s3 = inlined_call_operand.vmem [shape: f32[1,128], index: 3, kind: input, shape index: {}]   ;;  %s5932_s4 = inlined_call_operand.vmem [shape: bf16[2,8,2,8,256], index: 4, kind: output, shape index: {0}]   ;;  %s5933_s5 = inlined_call_operand.vmem [shape: f32[1,2,128], index: 5, kind: output, shape index: {1}]  }
   0x1   :  { %v4307_v0 = vld [vmem:[%s5928_s1 + $0x78] sm:$0xff]   ;;  %v4311_v4 = vld [vmem:[%s5928_s1 + $0x70] sm:$0xff]   ;;  %v4315_v8 = vld [vmem:[%s5928_s1 + $0x68] sm:$0xff]   ;;  %v4536_v24 = vrot.slane %v5934_v23, 1  ;;  %vm310_vm3 = vsmask.f32 4352 }
   0x2   :  { %v4308_v1 = vld [vmem:[%s5928_s1 + $0xf8] sm:$0xff]   ;;  %3794 = vmatprep.subr.bf16.mxu0 %v4307_v0  ;;  %v4312_v5 = vld [vmem:[%s5928_s1 + $0xf0] sm:$0xff]   ;;  %v4316_v9 = vld [vmem:[%s5928_s1 + $0xe8] sm:$0xff]   ;;  %vm1172_vm6 = vsmask.f32 3328 }
   0x3   :  { %v4309_v2 = vld [vmem:[%s5928_s1 + $0x38] sm:$0xff]   ;;  %3858 = vmatprep.subr.bf16.mxu1 %v4308_v1  ;;  %v4313_v6 = vld [vmem:[%s5928_s1 + $0x30] sm:$0xff]   ;;  %v4317_v10 = vld [vmem:[%s5928_s1 + $0x28] sm:$0xff]   ;;  %5957 = vst [vmem:[#allocation2_spill] sm:$0xff] %v4536_v24  ;;  %v3329_v27 = vcombine.low %v5934_v23, %v4536_v24  ;;  %v3331_v36 = vcombine.high %v5934_v23, %v4536_v24  ;;  %vm1173_vm7 = vsmask.f32 7440 }
   0x4   :  { %v4310_v3 = vld [vmem:[%s5928_s1 + $0xb8] sm:$0xff]   ;;  %3795 = vmatpush3.bf16.msra.mxu0 %v4309_v2  ;;  %v4314_v7 = vld [vmem:[%s5928_s1 + $0xb0] sm:$0xff]   ;;  %v4318_v11 = vld [vmem:[%s5928_s1 + $0xa8] sm:$0xff]  }
   0x5   :  { %3859 = vmatpush3.bf16.msra.mxu1 %v4310_v3  ;;  %3796 = vmatprep.subr.bf16.mxu0 %v4311_v4  ;;  %v4319_v12 = vld [vmem:[%s5928_s1 + $0x60] sm:$0xff]   ;;  %v4323_v16 = vld [vmem:[%s5928_s1 + $0x58] sm:$0xff]   ;;  %v4327_v20 = vld [vmem:[%s5928_s1 + $0x50] sm:$0xff]   ;;  %v1176_v32 = vshrl.u32 %v3329_v27, 16  ;;  %v1179_v34 = vshll.u32 %v3329_v27, 16  ;;  %v1185_v46 = vshll.u32 %v3331_v36, 16 }
   0x6   :  { %3860 = vmatprep.subr.bf16.mxu1 %v4312_v5  ;;  %v4320_v13 = vld [vmem:[%s5928_s1 + $0xe0] sm:$0xff]   ;;  %v4324_v17 = vld [vmem:[%s5928_s1 + $0xd8] sm:$0xff]   ;;  %v4328_v21 = vld [vmem:[%s5928_s1 + $0xd0] sm:$0xff]  }
   0x7   :  { %v4321_v14 = vld [vmem:[%s5928_s1 + $0x20] sm:$0xff]   ;;  %v4325_v18 = vld [vmem:[%s5928_s1 + $0x18] sm:$0xff]   ;;  %v4329_v22 = vld [vmem:[%s5928_s1 + $0x10] sm:$0xff]   ;;  %v1178_v42 = vrot.slane %v1176_v32, 4  ;;  %v1181_v43 = vrot.slane %v1179_v34, 5  ;;  %v1187_v56 = vrot.slane %v1185_v46, 5 }
   0x8   :  { %3797 = vmatpush3.bf16.msra.mxu0 %v4313_v6  ;;  %v4322_v15 = vld [vmem:[%s5928_s1 + $0xa0] sm:$0xff]   ;;  %v4326_v19 = vld [vmem:[%s5928_s1 + $0x98] sm:$0xff]   ;;  %v4330_v25 = vld [vmem:[%s5928_s1 + $0x90] sm:$0xff]  }
   0x9   :  { %3861 = vmatpush3.bf16.msra.mxu1 %v4314_v7  ;;  %3798 = vmatprep.subr.bf16.mxu0 %v4315_v8  ;;  %v4331_v26 = vld [vmem:[%s5928_s1 + $0x48] sm:$0xff]   ;;  %v4335_v31 = vld [vmem:[%s5928_s1 + $0x40] sm:$0xff]   ;;  %v4339_v45 = vld [vmem:[%s5928_s1 + $0x178] sm:$0xff]   ;;  %v1182_v55 = vor.u32 %v1181_v43, %v1178_v42 }
   0xa   :  { %3862 = vmatprep.subr.bf16.mxu1 %v4316_v9  ;;  %v4332_v28 = vld [vmem:[%s5928_s1 + $0xc8] sm:$0xff]   ;;  %v4336_v33 = vld [vmem:[%s5928_s1 + $0xc0] sm:$0xff]   ;;  %v4340_v49 = vld [vmem:[%s5928_s1 + $0x1f8] sm:$0xff]  }
   0xb   :  { %v4333_v29 = vld [vmem:[%s5928_s1 + $0x8] sm:$0xff]   ;;  %v4337_v35 = vld [vmem:[%s5928_s1] sm:$0xff]   ;;  %v3788_v3 = vld [vmem:[%s5929_s0 + $0x10] sm:$0xff]   ;;  %v1183_v4 = vrot.slane %v1182_v55, 4 }
   0xc   :  { %3799 = vmatpush3.bf16.msra.mxu0 %v4317_v10  ;;  %v4334_v30 = vld [vmem:[%s5928_s1 + $0x88] sm:$0xff]   ;;  %v4338_v37 = vld [vmem:[%s5928_s1 + $0x80] sm:$0xff]   ;;  %vm4604_vm10 = vmor %vm1172_vm6, %vm1173_vm7 }
   0xd   :  { %3863 = vmatpush3.bf16.msra.mxu1 %v4318_v11  ;;  %3800 = vmatprep.subr.bf16.mxu0 %v4319_v12  ;;  %v3756_v38 = vld [vmem:[%s5929_s0] sm:$0xff]   ;;  %v3787_v52 = vld [vmem:[%s5929_s0 + $0x8] sm:$0xff]   ;;  %vm4610_vm11 = vmand %vm290_vm0, %vm291_vm1 }
   0xe   :  { %3864 = vmatprep.subr.bf16.mxu1 %v4320_v13  ;;  %v4575_v39 = vld [vmem:[%s5930_s2] ss:$0 sm:$0xff]  ;;  %v3757_v40 = vunpack.c.l.bf16 %v3756_v38  ;;  %v3758_v41 = vunpack.c.h.bf16 %v3756_v38  ;;  %v3761_v53 = vunpack.c.l.bf16 %v3787_v52  ;;  %v3762_v54 = vunpack.c.h.bf16 %v3787_v52  ;;  %vm4616_vm12 = vmand %vm309_vm2, %vm310_vm3 }
   0xf   :  { %v4580_v44 = vld [vmem:[%s5931_s3] ss:$0 sm:$0xff]  ;;  %v3765_v13 = vunpack.c.l.bf16 %v3788_v3 }
  0x10   :  { %3801 = vmatpush3.bf16.msra.mxu0 %v4321_v14  ;;  %v59_v47 = vmul.f32 %v3757_v40, %v4575_v39  ;;  %v60_v48 = vmul.f32 %v3758_v41, %v4575_v39  ;;  %v61_v59 = vmul.f32 %v3761_v53, %v4575_v39  ;;  %v62_v60 = vmul.f32 %v3762_v54, %v4575_v39 }
  0x11   :  { %3865 = vmatpush3.bf16.msra.mxu1 %v4322_v15  ;;  %3802 = vmatprep.subr.bf16.mxu0 %v4323_v16  ;;  %v3766_v14 = vunpack.c.h.bf16 %v3788_v3 }
  0x12   :  { %3866 = vmatprep.subr.bf16.mxu1 %v4324_v17  ;;  %v82_v50 = vadd.f32 %v4580_v44, %v59_v47  ;;  %v83_v51 = vadd.f32 %v4580_v44, %v60_v48  ;;  %v84_v1 = vadd.f32 %v4580_v44, %v61_v59  ;;  %v85_v2 = vadd.f32 %v4580_v44, %v62_v60  ;;  %v4342_v59 = vld [vmem:[%s5928_s1 + $0x1b8] sm:$0xff]  }
  0x13   :  { %v64_v27 = vmul.f32 %v3766_v14, %v4575_v39  ;;  %v4345_v14 = vld [vmem:[%s5928_s1 + $0x130] sm:$0xff]  }
  0x14   :  { %3803 = vmatpush3.bf16.msra.mxu0 %v4325_v18  ;;  %vm98_vm4 = vcmp.ge.f32.partialorder %v82_v50, 0.0  ;;  %v114_v57 = vmul.f32 0.2, %v82_v50  ;;  %vm99_vm5 = vcmp.ge.f32.partialorder %v83_v51, 0.0  ;;  %v115_v58 = vmul.f32 0.2, %v83_v51 }
  0x15   :  { %3867 = vmatpush3.bf16.msra.mxu1 %v4326_v19  ;;  %3804 = vmatprep.subr.bf16.mxu0 %v4327_v20  ;;  %vm100_vm8 = vcmp.ge.f32.partialorder %v84_v1, 0.0  ;;  %v116_v9 = vmul.f32 0.2, %v84_v1  ;;  %vm101_vm9 = vcmp.ge.f32.partialorder %v85_v2, 0.0  ;;  %v117_v10 = vmul.f32 0.2, %v85_v2 }
  0x16   :  { %3868 = vmatprep.subr.bf16.mxu1 %v4328_v21  ;;  %v130_v61 = vsel %vm98_vm4, %v82_v50, %v114_v57  ;;  %v131_v62 = vsel %vm99_vm5, %v83_v51, %v115_v58  ;;  %v87_v51 = vadd.f32 %v4580_v44, %v64_v27  ;;  %v4341_v58 = vld [vmem:[%s5928_s1 + $0x138] sm:$0xff]  }
  0x17   :  { %v146_v63 = vpack.c.bf16 %v130_v61, %v130_v61  ;;  %v147_v0 = vpack.c.bf16 %v131_v62, %v131_v62  ;;  %v132_v17 = vsel %vm100_vm8, %v84_v1, %v116_v9  ;;  %v133_v18 = vsel %vm101_vm9, %v85_v2, %v117_v10  ;;  %v4700_v10 = vld [vmem:[%s5929_s0 + $0x20] sm:$0xff]  }
  0x18   :  { %3805 = vmatpush3.bf16.msra.mxu0 %v4329_v22  ;;  %v148_v22 = vpack.c.bf16 %v132_v17, %v132_v17  ;;  %vm103_vm14 = vcmp.ge.f32.partialorder %v87_v51, 0.0 }
  0x19   :  { %3869 = vmatpush3.bf16.msra.mxu1 %v4330_v25  ;;  %3806 = vmatprep.subr.bf16.mxu0 %v4331_v26  ;;  %v163_v5 = vshrl.u32 %v146_v63, 16  ;;  %v166_v6 = vshll.u32 %v146_v63, 16  ;;  %v170_v7 = vshrl.u32 %v147_v0, 16  ;;  %v173_v8 = vshll.u32 %v147_v0, 16  ;;  %v4343_v63 = vld [vmem:[%s5928_s1 + $0x170] sm:$0xff]  }
  0x1a   :  { %3870 = vmatprep.subr.bf16.mxu1 %v4332_v28  ;;  %v149_v25 = vpack.c.bf16 %v133_v18, %v133_v18  ;;  %v63_v26 = vmul.f32 %v3765_v13, %v4575_v39  ;;  %v4624_v28 = vsel %vm4604_vm10, %v1183_v4, %v1187_v56  ;;  %v180_v32 = vshll.u32 %v148_v22, 16 }
  0x1b   :  { %v165_v11 = vrot.slane %v163_v5, 7  ;;  %v172_v12 = vrot.slane %v170_v7, 7  ;;  %v119_v0 = vmul.f32 0.2, %v87_v51  ;;  %v4344_v5 = vld [vmem:[%s5928_s1 + $0x1f0] sm:$0xff]  }
  0x1c   :  { %3807 = vmatpush3.bf16.msra.mxu0 %v4333_v29  ;;  %v184_v36 = vshrl.u32 %v149_v25, 16  ;;  %v86_v50 = vadd.f32 %v4580_v44, %v63_v26 }
  0x1d   :  { %3871 = vmatpush3.bf16.msra.mxu1 %v4334_v30  ;;  %3808 = vmatprep.subr.bf16.mxu0 %v4335_v31  ;;  %v168_v19 = vor.u32 %v166_v6, %v165_v11  ;;  %v175_v21 = vor.u32 %v173_v8, %v172_v12  ;;  %v177_v31 = vshrl.u32 %v148_v22, 16  ;;  %v135_v22 = vsel %vm103_vm14, %v87_v51, %v119_v0 }
  0x1e   :  { %3872 = vmatprep.subr.bf16.mxu1 %v4336_v33  ;;  %v3789_v33 = vld [vmem:[%s5929_s0 + $0x18] sm:$0xff]   ;;  %v186_v47 = vrot.slane %v184_v36, 7  ;;  %vm102_vm13 = vcmp.ge.f32.partialorder %v86_v50, 0.0  ;;  %v118_v60 = vmul.f32 0.2, %v86_v50  ;;  %v151_v27 = vpack.c.bf16 %v135_v22, %v135_v22 }
  0x1f   :  { %v293_v29 = vsel %vm4610_vm11, 0, %v168_v19  ;;  %v294_v30 = vsel %vm4610_vm11, 0, %v175_v21  ;;  %v179_v46 = vrot.slane %v177_v31, 7  ;;  %v3769_v54 = vunpack.c.l.bf16 %v3789_v33  ;;  %v4346_v19 = vld [vmem:[%s5928_s1 + $0x1b0] sm:$0xff]  }
  0x20   :  { %3809 = vmatpush3.bf16.msra.mxu0 %v4337_v35  ;;  %v4635_v34 = vsel %vm4616_vm12, %v293_v29, 0  ;;  %v4639_v35 = vsel %vm4616_vm12, %v294_v30, 0  ;;  %v3770_v55 = vunpack.c.h.bf16 %v3789_v33  ;;  %v134_v17 = vsel %vm102_vm13, %v86_v50, %v118_v60  ;;  %v4347_v29 = vld [vmem:[%s5928_s1 + $0x168] sm:$0xff]   ;;  %v4352_v60 = vld [vmem:[%s5928_s1 + $0x1e0] sm:$0xff]  }
  0x21   :  { %3873 = vmatpush3.bf16.msra.mxu1 %v4338_v37  ;;  %3922 = vmatprep.subr.bf16.mxu0 %v4339_v45  ;;  %v187_v37 = vshll.u32 %v149_v25, 16  ;;  %v336_v38 = vshrl.u32 %v4635_v34, 16  ;;  %v338_v40 = vshll.u32 %v4635_v34, 16  ;;  %v343_v41 = vshrl.u32 %v4639_v35, 16 }
  0x22   :  { %3986 = vmatprep.subr.bf16.mxu1 %v4340_v49  ;;  %v345_v42 = vshll.u32 %v4639_v35, 16  ;;  %v3265_v43 = vcombine.low %v5934_v23, %v4635_v34  ;;  %v4649_v45 = vcombine.low %v4635_v34, %v4639_v35  ;;  %v182_v52 = vor.u32 %v180_v32, %v179_v46  ;;  %v4349_v46 = vld [vmem:[%s5928_s1 + $0x128] sm:$0xff]  }
  0x23   :  { %v340_v48 = vrot.slane %v338_v40, 1  ;;  %v189_v53 = vor.u32 %v187_v37, %v186_v47  ;;  %v150_v21 = vpack.c.bf16 %v134_v17, %v134_v17  ;;  %v65_v25 = vmul.f32 %v3769_v54, %v4575_v39  ;;  %v4348_v37 = vld [vmem:[%s5928_s1 + $0x1e8] sm:$0xff]   ;;  %v4355_v17 = vld [vmem:[%s5928_s1 + $0x158] sm:$0xff]  }
  0x24   :  { %v347_v49 = vrot.slane %v345_v42, 1  ;;  %v295_v61 = vsel %vm4610_vm11, 0, %v182_v52  ;;  %v66_v30 = vmul.f32 %v3770_v55, %v4575_v39  ;;  %v3773_v31 = vunpack.c.l.bf16 %v4700_v10  ;;  %v4733_v40 = vld [vmem:[%s5929_s0 + $0x28] sm:$0xff]  }
  0x25   :  { %v4653_v56 = vor.u32 %v340_v48, %v336_v38  ;;  %v296_v62 = vsel %vm4610_vm11, 0, %v189_v53  ;;  %v4682_v4 = vsel %vm4616_vm12, %v295_v61, 0  ;;  %v191_v33 = vshrl.u32 %v150_v21, 16  ;;  %v4350_v47 = vld [vmem:[%s5928_s1 + $0x1a8] sm:$0xff]  }
  0x26   :  { %v4655_v57 = vor.u32 %v347_v49, %v343_v41  ;;  %v350_v6 = vshrl.u32 %v4682_v4, 16  ;;  %v352_v7 = vshll.u32 %v4682_v4, 16  ;;  %v4691_v8 = vsel %vm4616_vm12, %v296_v62, 0 }
  0x27   :  { %v3266_v1 = vcombine.low %v4536_v24, %v4653_v56  ;;  %v4674_v2 = vcombine.low %v4635_v34, %v4653_v56  ;;  %v4695_v9 = vcombine.low %v4639_v35, %v4682_v4  ;;  %v357_v11 = vshrl.u32 %v4691_v8, 16 }
  0x28   :  { %v4678_v3 = vcombine.low %v4653_v56, %v4655_v57  ;;  %v359_v12 = vshll.u32 %v4691_v8, 16  ;;  %v4707_v13 = vcombine.low %v4682_v4, %v4691_v8  ;;  %v354_v18 = vrot.slane %v352_v7, 1 }
  0x29   :  { %850 = vmatprep.mubr.bf16.mxu0 %v3266_v1  ;;  %v194_v36 = vshll.u32 %v150_v21, 16  ;;  %v88_v38 = vadd.f32 %v4580_v44, %v65_v25  ;;  %v198_v42 = vshrl.u32 %v151_v27, 16  ;;  %v89_v48 = vadd.f32 %v4580_v44, %v66_v30  ;;  %v4356_v30 = vld [vmem:[%s5928_s1 + $0x1d8] sm:$0xff]  }
  0x2a   :  { %947 = vmatprep.mubr.bf16.mxu1 %v4678_v3  ;;  %851 = vmatmul.mubr.bf16.vlgmr.msra.gmra.mxu0 %v3265_v43  ;;  %v361_v26 = vrot.slane %v359_v12, 1  ;;  %v4724_v32 = vor.u32 %v354_v18, %v350_v6  ;;  %v201_v43 = vshll.u32 %v151_v27, 16  ;;  %v193_v50 = vrot.slane %v191_v33, 7  ;;  %v4354_v6 = vld [vmem:[%s5928_s1 + $0x1a0] sm:$0xff]  }
  0x2b   :  { %948 = vmatmul.mubr.bf16.vlgmr.msra.gmra.mxu1 %v4649_v45  ;;  %3923 = vmatpush3.bf16.msra.mxu0 %v4341_v58  ;;  %vm104_vm15 = vcmp.ge.f32.partialorder %v88_v38, 0.0  ;;  %v120_v51 = vmul.f32 0.2, %v88_v38  ;;  %v200_v53 = vrot.slane %v198_v42, 7  ;;  %vm105_vm1 = vcmp.ge.f32.partialorder %v89_v48, 0.0 }
  0x2c   :  { %3987 = vmatpush3.bf16.msra.mxu1 %v4342_v59  ;;  %3924 = vmatprep.subr.bf16.mxu0 %v4343_v63  ;;  %v4735_v41 = vor.u32 %v361_v26, %v357_v11  ;;  %v4746_v49 = vcombine.low %v4655_v57, %v4724_v32  ;;  %v121_v54 = vmul.f32 0.2, %v89_v48  ;;  %v196_v55 = vor.u32 %v194_v36, %v193_v50  ;;  %v4351_v59 = vld [vmem:[%s5928_s1 + $0x160] sm:$0xff]  }
  0x2d   :  { %3988 = vmatprep.subr.bf16.mxu1 %v4344_v5  ;;  %v136_v58 = vsel %vm104_vm15, %v88_v38, %v120_v51  ;;  %v67_v61 = vmul.f32 %v3773_v31, %v4575_v39  ;;  %v3774_v62 = vunpack.c.h.bf16 %v4700_v10  ;;  %v203_v63 = vor.u32 %v201_v43, %v200_v53  ;;  %v4353_v5 = vld [vmem:[%s5928_s1 + $0x120] sm:$0xff]  }
  0x2e   :  { %v4750_v52 = vcombine.low %v4724_v32, %v4735_v41  ;;  %858 = vmatprep.mubr.bf16.mxu0 %v4746_v49  ;;  %v152_v0 = vpack.c.bf16 %v136_v58, %v136_v58  ;;  %v137_v1 = vsel %vm105_vm1, %v89_v48, %v121_v54  ;;  %v3777_v7 = vunpack.c.l.bf16 %v4733_v40  ;;  %v4359_v54 = vld [vmem:[%s5928_s1 + $0x150] sm:$0xff]  }
  0x2f   :  { %3925 = vmatpush3.bf16.msra.mxu0 %v4345_v14  ;;  %v297_v10 = vsel %vm4610_vm11, 0, %v196_v55  ;;  %v153_v11 = vpack.c.bf16 %v137_v1, %v137_v1  ;;  %v90_v12 = vadd.f32 %v4580_v44, %v67_v61  ;;  %v68_v14 = vmul.f32 %v3774_v62, %v4575_v39  ;;  %v4360_v61 = vld [vmem:[%s5928_s1 + $0x1d0] sm:$0xff]  }
  0x30   :  { %3989 = vmatpush3.bf16.msra.mxu1 %v4346_v19  ;;  %3926 = vmatprep.subr.bf16.mxu0 %v4347_v29  ;;  %v4780_v18 = vsel %vm4616_vm12, %v297_v10, 0  ;;  %v298_v19 = vsel %vm4610_vm11, 0, %v203_v63  ;;  %v205_v21 = vshrl.u32 %v152_v0, 16  ;;  %v208_v22 = vshll.u32 %v152_v0, 16  ;;  %v4361_v1 = vld [vmem:[%s5928_s1 + $0x110] sm:$0xff]  }
  0x31   :  { %955 = vmatprep.mubr.bf16.mxu1 %v4750_v52  ;;  %3990 = vmatprep.subr.bf16.mxu1 %v4348_v37  ;;  %v364_v25 = vshrl.u32 %v4780_v18, 16  ;;  %v366_v26 = vshll.u32 %v4780_v18, 16  ;;  %v4788_v27 = vsel %vm4616_vm12, %v298_v19, 0  ;;  %v4792_v29 = vcombine.low %v4691_v8, %v4780_v18 }
  0x32   :  { %859 = vmatmul.mubr.bf16.gmra.mxu0 %v4695_v9  ;;  %v371_v31 = vshrl.u32 %v4788_v27, 16  ;;  %v373_v33 = vshll.u32 %v4788_v27, 16  ;;  %v4801_v36 = vcombine.low %v4780_v18, %v4788_v27  ;;  %v207_v37 = vrot.slane %v205_v21, 7 }
  0x33   :  { %956 = vmatmul.mubr.bf16.gmra.mxu1 %v4707_v13  ;;  %3927 = vmatpush3.bf16.msra.mxu0 %v4349_v46  ;;  %v368_v38 = vrot.slane %v366_v26, 1  ;;  %v212_v42 = vshrl.u32 %v153_v11, 16  ;;  %v215_v43 = vshll.u32 %v153_v11, 16  ;;  %vm106_vm2 = vcmp.ge.f32.partialorder %v90_v12, 0.0  ;;  %v4357_v46 = vld [vmem:[%s5928_s1 + $0x118] sm:$0xff]   ;;  %v4363_v11 = vld [vmem:[%s5928_s1 + $0x148] sm:$0xff]  }
  0x34   :  { %3991 = vmatpush3.bf16.msra.mxu1 %v4350_v47  ;;  %3928 = vmatprep.subr.bf16.mxu0 %v4351_v59  ;;  %v4358_v47 = vld [vmem:[%s5928_s1 + $0x198] sm:$0xff]   ;;  %v375_v48 = vrot.slane %v373_v33, 1  ;;  %v210_v50 = vor.u32 %v208_v22, %v207_v37  ;;  %v122_v51 = vmul.f32 0.2, %v90_v12  ;;  %v91_v53 = vadd.f32 %v4580_v44, %v68_v14 }
  0x35   :  { %3992 = vmatprep.subr.bf16.mxu1 %v4352_v60  ;;  %v4813_v55 = vor.u32 %v368_v38, %v364_v25  ;;  %v214_v58 = vrot.slane %v212_v42, 7  ;;  %v69_v59 = vmul.f32 %v3777_v7, %v4575_v39  ;;  %v3778_v60 = vunpack.c.h.bf16 %v4733_v40  ;;  %v4362_v40 = vld [vmem:[%s5928_s1 + $0x190] sm:$0xff]  }
  0x36   :  { %v4820_v62 = vor.u32 %v375_v48, %v371_v31  ;;  %v299_v63 = vsel %vm4610_vm11, 0, %v210_v50  ;;  %v138_v0 = vsel %vm106_vm2, %v90_v12, %v122_v51  ;;  %vm107_vm3 = vcmp.ge.f32.partialorder %v91_v53, 0.0  ;;  %v4364_v31 = vld [vmem:[%s5928_s1 + $0x1c8] sm:$0xff]  }
  0x37   :  { %3929 = vmatpush3.bf16.msra.mxu0 %v4353_v5  ;;  %v4833_v5 = vcombine.low %v4735_v41, %v4813_v55  ;;  %v217_v7 = vor.u32 %v215_v43, %v214_v58  ;;  %v154_v10 = vpack.c.bf16 %v138_v0, %v138_v0  ;;  %v123_v26 = vmul.f32 0.2, %v91_v53  ;;  %v4365_v43 = vld [vmem:[%s5928_s1 + $0x108] sm:$0xff]  }
  0x38   :  { %3993 = vmatpush3.bf16.msra.mxu1 %v4354_v6  ;;  %3930 = vmatprep.subr.bf16.mxu0 %v4355_v17  ;;  %v4837_v6 = vsel %vm4616_vm12, %v299_v63, 0  ;;  %v4844_v12 = vcombine.low %v4813_v55, %v4820_v62  ;;  %v92_v38 = vadd.f32 %v4580_v44, %v69_v59  ;;  %v70_v42 = vmul.f32 %v3778_v60, %v4575_v39  ;;  %v4366_v51 = vld [vmem:[%s5928_s1 + $0x188] sm:$0xff]   ;;  %v4367_v60 = vld [vmem:[%s5928_s1 + $0x140] sm:$0xff]  }
  0x39   :  { %3994 = vmatprep.subr.bf16.mxu1 %v4356_v30  ;;  %v378_v14 = vshrl.u32 %v4837_v6, 16  ;;  %v380_v17 = vshll.u32 %v4837_v6, 16  ;;  %v4850_v19 = vcombine.low %v4788_v27, %v4837_v6  ;;  %866 = vmatprep.mubr.bf16.mxu0 %v4833_v5  ;;  %v300_v21 = vsel %vm4610_vm11, 0, %v217_v7  ;;  %v4858_v30 = vld [vmem:[%s5929_s0 + $0x30] sm:$0xff]  }
  0x3a   :  { %v219_v22 = vshrl.u32 %v154_v10, 16  ;;  %v222_v25 = vshll.u32 %v154_v10, 16  ;;  %963 = vmatprep.mubr.bf16.mxu1 %v4844_v12  ;;  %867 = vmatmul.mubr.bf16.gmra.mxu0 %v4792_v29  ;;  %v4867_v37 = vsel %vm4616_vm12, %v300_v21, 0  ;;  %v139_v58 = vsel %vm107_vm3, %v91_v53, %v123_v26  ;;  %v4368_v10 = vld [vmem:[%s5928_s1 + $0x1c0] sm:$0xff]   ;;  %v4910_v26 = vld [vmem:[%s5929_s0 + $0x38] sm:$0xff]  }
  0x3b   :  { %5964 = vst [vmem:[#allocation3_spill] sm:$0xff] %v4850_v19  ;;  %3931 = vmatpush3.bf16.msra.mxu0 %v4357_v46  ;;  %v382_v33 = vrot.slane %v380_v17, 1  ;;  %964 = vmatmul.mubr.bf16.gmra.mxu1 %v4801_v36  ;;  %v434_v46 = vshrl.u32 %v4867_v37, 16  ;;  %v4879_v48 = vcombine.low %v4837_v6, %v4867_v37  ;;  %vm108_vm4 = vcmp.ge.f32.partialorder %v92_v38, 0.0  ;;  %v4369_v17 = vld [vmem:[%s5928_s1 + $0x100] sm:$0xff]  }
  0x3c   :  { %3995 = vmatpush3.bf16.msra.mxu1 %v4358_v47  ;;  %3932 = vmatprep.subr.bf16.mxu0 %v4359_v54  ;;  %v436_v47 = vshll.u32 %v4867_v37, 16  ;;  %v221_v50 = vrot.slane %v219_v22, 7  ;;  %v124_v59 = vmul.f32 0.2, %v92_v38  ;;  %v155_v7 = vpack.c.bf16 %v139_v58, %v139_v58  ;;  %v4371_v58 = vld [vmem:[%s5928_s1 + $0x278] sm:$0xff]  }
  0x3d   :  { %5965 = vst [vmem:[#allocation4_spill] sm:$0xff] %v4879_v48  ;;  %3996 = vmatprep.subr.bf16.mxu1 %v4360_v61  ;;  %v4884_v54 = vor.u32 %v382_v33, %v378_v14  ;;  %v93_v61 = vadd.f32 %v4580_v44, %v70_v42  ;;  %v3782_v14 = vunpack.c.h.bf16 %v4858_v30 }
  0x3e   :  { %v438_v63 = vrot.slane %v436_v47, 1  ;;  %v224_v0 = vor.u32 %v222_v25, %v221_v50  ;;  %v226_v22 = vshrl.u32 %v155_v7, 16  ;;  %v229_v25 = vshll.u32 %v155_v7, 16  ;;  %v4372_v7 = vld [vmem:[%s5928_s1 + $0x2f8] sm:$0xff]  }
  0x3f   :  { %3933 = vmatpush3.bf16.msra.mxu0 %v4361_v1  ;;  %v4896_v53 = vcombine.low %v4820_v62, %v4884_v54  ;;  %v140_v1 = vsel %vm108_vm4, %v92_v38, %v124_v59  ;;  %vm109_vm5 = vcmp.ge.f32.partialorder %v93_v61, 0.0  ;;  %v125_v38 = vmul.f32 0.2, %v93_v61 }
  0x40   :  { %3997 = vmatpush3.bf16.msra.mxu1 %v4362_v40  ;;  %3934 = vmatprep.subr.bf16.mxu0 %v4363_v11  ;;  %v3781_v40 = vunpack.c.l.bf16 %v4858_v30  ;;  %v4903_v21 = vor.u32 %v438_v63, %v434_v46  ;;  %v301_v11 = vsel %vm4610_vm11, 0, %v224_v0  ;;  %v4370_v30 = vld [vmem:[%s5928_s1 + $0x180] sm:$0xff]   ;;  %v156_v33 = vpack.c.bf16 %v140_v1, %v140_v1 }
  0x41   :  { %3998 = vmatprep.subr.bf16.mxu1 %v4364_v31  ;;  %874 = vmatprep.mubr.bf16.mxu0 %v4896_v53  ;;  %v4918_v31 = vsel %vm4616_vm12, %v301_v11, 0  ;;  %v228_v50 = vrot.slane %v226_v22, 7  ;;  %v141_v0 = vsel %vm109_vm5, %v93_v61, %v125_v38  ;;  %v3786_v61 = vunpack.c.h.bf16 %v4910_v26 }
  0x42   :  { %v4922_v42 = vcombine.low %v4884_v54, %v4903_v21  ;;  %v385_v46 = vshrl.u32 %v4918_v31, 16  ;;  %v387_v47 = vshll.u32 %v4918_v31, 16  ;;  %875 = vmatmul.mubr.bf16.gmra.mxu0 %v4850_v19  ;;  %v233_v59 = vshrl.u32 %v156_v33, 16 }
  0x43   :  { %3935 = vmatpush3.bf16.msra.mxu0 %v4365_v43  ;;  %v3281_v43 = vcombine.low %v5934_v23, %v4918_v31  ;;  %v236_v63 = vshll.u32 %v156_v33, 16  ;;  %v157_v1 = vpack.c.bf16 %v141_v0, %v141_v0  ;;  %v71_v11 = vmul.f32 %v3781_v40, %v4575_v39 }
  0x44   :  { %5966 = vst [vmem:[#allocation5_spill] sm:$0xff] %v4922_v42  ;;  %3999 = vmatpush3.bf16.msra.mxu1 %v4366_v51  ;;  %3936 = vmatprep.subr.bf16.mxu0 %v4367_v60  ;;  %v389_v51 = vrot.slane %v387_v47, 1  ;;  %v231_v60 = vor.u32 %v229_v25, %v228_v50  ;;  %v235_v22 = vrot.slane %v233_v59, 7  ;;  %v72_v23 = vmul.f32 %v3782_v14, %v4575_v39 }
  0x45   :  { %4000 = vmatprep.subr.bf16.mxu1 %v4368_v10  ;;  %971 = vmatprep.mubr.bf16.mxu1 %v4922_v42  ;;  %v3785_v33 = vunpack.c.l.bf16 %v4910_v26  ;;  %v240_v47 = vshrl.u32 %v157_v1, 16  ;;  %v243_v25 = vshll.u32 %v157_v1, 16  ;;  %v94_v14 = vadd.f32 %v4580_v44, %v71_v11 }
  0x46   :  { %972 = vmatmul.mubr.bf16.gmra.mxu1 %v4879_v48  ;;  %v4941_v10 = vor.u32 %v389_v51, %v385_v46  ;;  %v302_v38 = vsel %vm4610_vm11, 0, %v231_v60  ;;  %v238_v50 = vor.u32 %v236_v63, %v235_v22  ;;  %v95_v59 = vadd.f32 %v4580_v44, %v72_v23 }
  0x47   :  { %3937 = vmatpush3.bf16.msra.mxu0 %v4369_v17  ;;  %v4947_v40 = vsel %vm4616_vm12, %v302_v38, 0  ;;  %v242_v63 = vrot.slane %v240_v47, 7  ;;  %vm110_vm6 = vcmp.ge.f32.partialorder %v94_v14, 0.0  ;;  %v126_v0 = vmul.f32 0.2, %v94_v14 }
  0x48   :  { %4001 = vmatpush3.bf16.msra.mxu1 %v4370_v30  ;;  %4050 = vmatprep.subr.bf16.mxu0 %v4371_v58  ;;  %v3282_v17 = vcombine.low %v4536_v24, %v4941_v10  ;;  %v392_v26 = vshrl.u32 %v4947_v40, 16  ;;  %v394_v46 = vshll.u32 %v4947_v40, 16  ;;  %v4957_v30 = vcombine.low %v4918_v31, %v4947_v40 }
  0x49   :  { %4114 = vmatprep.subr.bf16.mxu1 %v4372_v7  ;;  %v303_v58 = vsel %vm4610_vm11, 0, %v238_v50  ;;  %vm111_vm7 = vcmp.ge.f32.partialorder %v95_v59, 0.0  ;;  %v127_v51 = vmul.f32 0.2, %v95_v59  ;;  %v245_v11 = vor.u32 %v243_v25, %v242_v63 }
  0x4a   :  { %5967 = vst [vmem:[#allocation6_spill] sm:$0xff] %v4957_v30  ;;  %882 = vmatprep.mubr.bf16.mxu0 %v3282_v17  ;;  %v396_v23 = vrot.slane %v394_v46, 1  ;;  %v4963_v7 = vsel %vm4616_vm12, %v303_v58, 0  ;;  %v142_v47 = vsel %vm110_vm6, %v94_v14, %v126_v0  ;;  %v73_v17 = vmul.f32 %v3785_v33, %v4575_v39 }
  0x4b   :  { %883 = vmatmul.mubr.bf16.gmra.mxu0 %v3281_v43  ;;  %v399_v60 = vshrl.u32 %v4963_v7, 16  ;;  %v401_v1 = vshll.u32 %v4963_v7, 16  ;;  %v4969_v22 = vcombine.low %v4947_v40, %v4963_v7  ;;  %v143_v50 = vsel %vm111_vm7, %v95_v59, %v127_v51 }
  0x4c   :  { %v4971_v38 = vor.u32 %v396_v23, %v392_v26  ;;  %v304_v58 = vsel %vm4610_vm11, 0, %v245_v11  ;;  %v158_v43 = vpack.c.bf16 %v142_v47, %v142_v47  ;;  %v159_v48 = vpack.c.bf16 %v143_v50, %v143_v50 }
  0x4d   :  { %5968 = vst [vmem:[#allocation7_spill] sm:$0xff] %v4969_v22  ;;  %v403_v46 = vrot.slane %v401_v1, 1  ;;  %v4982_v25 = vsel %vm4616_vm12, %v304_v58, 0  ;;  %v96_v26 = vadd.f32 %v4580_v44, %v73_v17  ;;  %v74_v14 = vmul.f32 %v3786_v61, %v4575_v39 }
  0x4e   :  { %v4978_v19 = vcombine.low %v4941_v10, %v4971_v38  ;;  %v406_v33 = vshrl.u32 %v4982_v25, 16  ;;  %v408_v63 = vshll.u32 %v4982_v25, 16  ;;  %v4992_v0 = vcombine.low %v4963_v7, %v4982_v25 }
  0x4f   :  { %v4986_v59 = vor.u32 %v403_v46, %v399_v60  ;;  %v247_v23 = vshrl.u32 %v158_v43, 16  ;;  %v250_v51 = vshll.u32 %v158_v43, 16  ;;  %v254_v1 = vshrl.u32 %v159_v48, 16 }
  0x50   :  { %5969 = vst [vmem:[#allocation8_spill] sm:$0xff] %v4978_v19  ;;  %5970 = vst [vmem:[#allocation9_spill] sm:$0xff] %v4992_v0  ;;  %979 = vmatprep.mubr.bf16.mxu1 %v4978_v19  ;;  %v257_v11 = vshll.u32 %v159_v48, 16  ;;  %v410_v61 = vrot.slane %v408_v63, 1  ;;  %vm112_vm8 = vcmp.ge.f32.partialorder %v96_v26, 0.0  ;;  %v97_v17 = vadd.f32 %v4580_v44, %v74_v14 }
  0x51   :  { %980 = vmatmul.mubr.bf16.gmra.mxu1 %v4957_v30  ;;  %v4998_v39 = vcombine.low %v4971_v38, %v4986_v59  ;;  %v128_v60 = vmul.f32 0.2, %v96_v26  ;;  %v249_v47 = vrot.slane %v247_v23, 7  ;;  %v256_v50 = vrot.slane %v254_v1, 7 }
  0x52   :  { %v3332_v46 = vcombine.high %v4635_v34, %v4653_v56  ;;  %v5004_v58 = vor.u32 %v410_v61, %v406_v33  ;;  %v1190_v43 = vshrl.u32 %v4674_v2, 16  ;;  %v1193_v30 = vshll.u32 %v4674_v2, 16 }
  0x53   :  { %5971 = vst [vmem:[#allocation10_spill] sm:$0xff] %v4998_v39  ;;  %890 = vmatprep.mubr.bf16.mxu0 %v4998_v39  ;;  %v144_v48 = vsel %vm112_vm8, %v96_v26, %v128_v60  ;;  %v252_v63 = vor.u32 %v250_v51, %v249_v47  ;;  %v259_v19 = vor.u32 %v257_v11, %v256_v50  ;;  %vm113_vm9 = vcmp.ge.f32.partialorder %v97_v17, 0.0 }
  0x54   :  { %891 = vmatmul.mubr.bf16.gmra.mxu0 %v4969_v22  ;;  %v160_v23 = vpack.c.bf16 %v144_v48, %v144_v48  ;;  %v5011_v44 = vcombine.low %v4986_v59, %v5004_v58  ;;  %v129_v34 = vmul.f32 0.2, %v97_v17  ;;  %v1192_v56 = vrot.slane %v1190_v43, 4 }
  0x55   :  { %v1195_v14 = vrot.slane %v1193_v30, 5  ;;  %v305_v26 = vsel %vm4610_vm11, 0, %v252_v63  ;;  %v306_v33 = vsel %vm4610_vm11, 0, %v259_v19  ;;  %v3334_v24 = vcombine.high %v4639_v35, %v4655_v57 }
  0x56   :  { %5972 = vst [vmem:[#allocation11_spill] sm:$0xff] %v5011_v44  ;;  %v261_v2 = vshrl.u32 %v160_v23, 16  ;;  %v264_v1 = vshll.u32 %v160_v23, 16  ;;  %987 = vmatprep.mubr.bf16.mxu1 %v5011_v44  ;;  %v5020_v51 = vsel %vm4616_vm12, %v305_v26, 0  ;;  %v5024_v11 = vsel %vm4616_vm12, %v306_v33, 0 }
  0x57   :  { %v145_v61 = vsel %vm113_vm9, %v97_v17, %v129_v34  ;;  %v1196_v30 = vor.u32 %v1195_v14, %v1192_v56  ;;  %v413_v60 = vshrl.u32 %v5020_v51, 16  ;;  %v415_v47 = vshll.u32 %v5020_v51, 16 }
  0x58   :  { %v420_v19 = vshrl.u32 %v5024_v11, 16  ;;  %v422_v50 = vshll.u32 %v5024_v11, 16  ;;  %v5033_v48 = vcombine.low %v4982_v25, %v5020_v51  ;;  %v5037_v43 = vcombine.low %v5020_v51, %v5024_v11 }
  0x59   :  { %988 = vmatmul.mubr.bf16.gmra.mxu1 %v4992_v0  ;;  %v263_v17 = vrot.slane %v261_v2, 7  ;;  %v161_v63 = vpack.c.bf16 %v145_v61, %v145_v61  ;;  %v417_v23 = vrot.slane %v415_v47, 1  ;;  %v1197_v56 = vrot.slane %v1196_v30, 4 }
  0x5a   :  { %5973 = vst [vmem:[#allocation12_spill] sm:$0xff] %v5033_v48  ;;  %5974 = vst [vmem:[#allocation13_spill] sm:$0xff] %v5037_v43  ;;  %v424_v34 = vrot.slane %v422_v50, 1  ;;  %v1199_v14 = vshll.u32 %v3332_v46, 16  ;;  %v3333_v0 = vcombine.low %v4639_v35, %v4655_v57 }
  0x5b   :  { %v266_v26 = vor.u32 %v264_v1, %v263_v17  ;;  %v268_v33 = vshrl.u32 %v161_v63, 16  ;;  %v271_v22 = vshll.u32 %v161_v63, 16  ;;  %v5041_v44 = vor.u32 %v417_v23, %v413_v60 }
  0x5c   :  { %v5043_v39 = vor.u32 %v424_v34, %v420_v19  ;;  %v1201_v42 = vrot.slane %v1199_v14, 5  ;;  %v1204_v30 = vshrl.u32 %v3333_v0, 16  ;;  %v1207_v46 = vshll.u32 %v3333_v0, 16 }
  0x5d   :  { %v307_v2 = vsel %vm4610_vm11, 0, %v266_v26  ;;  %v270_v61 = vrot.slane %v268_v33, 7  ;;  %v5051_v1 = vcombine.low %v5004_v58, %v5041_v44  ;;  %v3335_v14 = vcombine.low %v4682_v4, %v4724_v32 }
  0x5e   :  { %v5055_v60 = vcombine.low %v5041_v44, %v5043_v39  ;;  %v5059_v47 = vsel %vm4616_vm12, %v307_v2, 0  ;;  %v5063_v35 = vsel %vm4604_vm10, %v1197_v56, %v1201_v42  ;;  %v1206_v63 = vrot.slane %v1204_v30, 4 }
  0x5f   :  { %v427_v57 = vshrl.u32 %v5059_v47, 16  ;;  %v429_v0 = vshll.u32 %v5059_v47, 16  ;;  %v273_v19 = vor.u32 %v271_v22, %v270_v61  ;;  %v5069_v50 = vcombine.low %v5024_v11, %v5059_v47  ;;  %898 = vmatprep.mubr.bf16.mxu0 %v5051_v1 }
  0x60   :  { %995 = vmatprep.mubr.bf16.mxu1 %v5055_v60  ;;  %v3428_v17 = vcombine.high %v4624_v28, %v5063_v35  ;;  %v1209_v23 = vrot.slane %v1207_v46, 5  ;;  %v1213_v42 = vshll.u32 %v3334_v24, 16  ;;  %899 = vmatmul.mubr.bf16.gmra.mxu0 %v5033_v48  ;;  %v3336_v2 = vcombine.high %v4682_v4, %v4724_v32 }
  0x61   :  { %5975 = vst [vmem:[#allocation14_spill] sm:$0xff] %v5069_v50  ;;  %996 = vmatmul.mubr.bf16.gmra.mxu1 %v5037_v43  ;;  %v431_v34 = vrot.slane %v429_v0, 1  ;;  %v308_v22 = vsel %vm4610_vm11, 0, %v273_v19  ;;  %v1218_v19 = vshrl.u32 %v3335_v14, 16  ;;  %v1221_v20 = vshll.u32 %v3335_v14, 16 }
  0x62   :  { %v5085_v26 = vsel %vm4616_vm12, %v308_v22, 0  ;;  %v1210_v33 = vor.u32 %v1209_v23, %v1206_v63  ;;  %v1215_v24 = vrot.slane %v1213_v42, 5  ;;  %v1227_v22 = vshll.u32 %v3336_v2, 16 }
  0x63   :  { %v5089_v61 = vor.u32 %v431_v34, %v427_v57  ;;  %v441_v16 = vshrl.u32 %v5085_v26, 16  ;;  %v443_v30 = vshll.u32 %v5085_v26, 16  ;;  %v5095_v46 = vcombine.low %v5059_v47, %v5085_v26 }
  0x64   :  { %v1211_v0 = vrot.slane %v1210_v33, 4  ;;  %v3337_v4 = vcombine.low %v4691_v8, %v4735_v41  ;;  %v3338_v32 = vcombine.high %v4691_v8, %v4735_v41  ;;  %v1220_v42 = vrot.slane %v1218_v19, 4 }
  0x65   :  { %5976 = vst [vmem:[#allocation15_spill] sm:$0xff] %v5095_v46  ;;  %v5099_v63 = vcombine.low %v5043_v39, %v5089_v61  ;;  %v445_v23 = vrot.slane %v443_v30, 1  ;;  %v1223_v34 = vrot.slane %v1221_v20, 5  ;;  %v1229_v33 = vrot.slane %v1227_v22, 5 }
  0x66   :  { %v1216_v57 = vsel %vm4604_vm10, %v1211_v0, %v1215_v24  ;;  %v1232_v56 = vshrl.u32 %v3337_v4, 16  ;;  %v1235_v48 = vshll.u32 %v3337_v4, 16  ;;  %v1241_v8 = vshll.u32 %v3338_v32, 16 }
  0x67   :  { %906 = vmatprep.mubr.bf16.mxu0 %v5099_v63  ;;  %v5108_v14 = vor.u32 %v445_v23, %v441_v16  ;;  %v5111_v2 = vcombine.high %v5063_v35, %v1216_v57  ;;  %v5114_v30 = vcombine.low %v5063_v35, %v1216_v57  ;;  %v1224_v43 = vor.u32 %v1223_v34, %v1220_v42 }
  0x68   :  { %v3339_v41 = vcombine.low %v4780_v18, %v4813_v55  ;;  %907 = vmatmul.mubr.bf16.gmra.mxu0 %v5069_v50  ;;  %v1234_v16 = vrot.slane %v1232_v56, 4  ;;  %v3340_v0 = vcombine.high %v4780_v18, %v4813_v55  ;;  %v3341_v19 = vcombine.low %v4788_v27, %v4820_v62 }
  0x69   :  { %5977 = vst [vmem:[#allocation16_spill] sm:$0xff] %v5111_v2  ;;  %v5120_v24 = vcombine.low %v5089_v61, %v5108_v14  ;;  %1800 = vmatprep.mubr.bf16.mxu0 %v3428_v17  ;;  %v1225_v20 = vrot.slane %v1224_v43, 4  ;;  %v1237_v22 = vrot.slane %v1235_v48, 5  ;;  %v1243_v23 = vrot.slane %v1241_v8, 5 }
  0x6a   :  { %v1246_v4 = vshrl.u32 %v3339_v41, 16  ;;  %v1249_v32 = vshll.u32 %v3339_v41, 16  ;;  %v1255_v42 = vshll.u32 %v3340_v0, 16  ;;  %v3342_v34 = vcombine.high %v4788_v27, %v4820_v62  ;;  %v4373_v27 = vld [vmem:[%s5928_s1 + $0x238] sm:$0xff]  }
  0x6b   :  { %1003 = vmatprep.mubr.bf16.mxu1 %v5120_v24  ;;  %v1260_v50 = vshrl.u32 %v3341_v19, 16  ;;  %v1230_v18 = vsel %vm4604_vm10, %v1225_v20, %v1229_v33  ;;  %v1238_v55 = vor.u32 %v1237_v22, %v1234_v16  ;;  %v1263_v17 = vshll.u32 %v3341_v19, 16  ;;  %v4375_v33 = vld [vmem:[%s5928_s1 + $0x270] sm:$0xff]  }
  0x6c   :  { %1004 = vmatmul.mubr.bf16.gmra.mxu1 %v5095_v46  ;;  %v1248_v56 = vrot.slane %v1246_v4, 4  ;;  %v5134_v48 = vcombine.high %v1216_v57, %v1230_v18  ;;  %v5136_v43 = vcombine.low %v1216_v57, %v1230_v18  ;;  %v1251_v8 = vrot.slane %v1249_v32, 5  ;;  %v4374_v32 = vld [vmem:[%s5928_s1 + $0x2b8] sm:$0xff]  }
  0x6d   :  { %1897 = vmatprep.mubr.bf16.mxu1 %v5111_v2  ;;  %v1257_v41 = vrot.slane %v1255_v42, 5  ;;  %v1239_v62 = vrot.slane %v1238_v55, 4  ;;  %v1262_v16 = vrot.slane %v1260_v50, 4  ;;  %v1265_v0 = vrot.slane %v1263_v17, 5  ;;  %v4377_v17 = vld [vmem:[%s5928_s1 + $0x230] sm:$0xff]  }
  0x6e   :  { %v1269_v19 = vshll.u32 %v3342_v34, 16  ;;  %v1252_v20 = vor.u32 %v1251_v8, %v1248_v56  ;;  %v3343_v22 = vcombine.low %v4837_v6, %v4884_v54  ;;  %v3344_v57 = vcombine.high %v4837_v6, %v4884_v54 }
  0x6f   :  { %v3345_v4 = vcombine.low %v4867_v37, %v4903_v21  ;;  %v5155_v42 = vsel %vm4604_vm10, %v1239_v62, %v1243_v23  ;;  %v1266_v50 = vor.u32 %v1265_v0, %v1262_v16  ;;  %v3346_v55 = vcombine.high %v4867_v37, %v4903_v21  ;;  %v4376_v23 = vld [vmem:[%s5928_s1 + $0x2f0] sm:$0xff]  }
  0x70   :  { %v1271_v34 = vrot.slane %v1269_v19, 5  ;;  %v5978_v56 = vcombine.low %v4624_v28, %v5063_v35  ;;  %v5163_v6 = vcombine.high %v1230_v18, %v5155_v42  ;;  %v5166_v54 = vcombine.low %v1230_v18, %v5155_v42  ;;  %v4378_v18 = vld [vmem:[%s5928_s1 + $0x2b0] sm:$0xff]  }
  0x71   :  { %v1253_v8 = vrot.slane %v1252_v20, 4  ;;  %v1274_v62 = vshrl.u32 %v3343_v22, 16  ;;  %v1267_v35 = vrot.slane %v1266_v50, 4  ;;  %v1277_v16 = vshll.u32 %v3343_v22, 16  ;;  %v4379_v20 = vld [vmem:[%s5928_s1 + $0x268] sm:$0xff]  }
  0x72   :  { %1801 = vmatmul.mubr.bf16.vlgmr.msra.gmra.mxu0 %v5978_v56  ;;  %5979 = vst [vmem:[#allocation17_spill] sm:$0xff] %v5163_v6  ;;  %5980 = vst [vmem:[#allocation18_spill] sm:$0xff] %v5166_v54  ;;  %v1283_v0 = vshll.u32 %v3344_v57, 16  ;;  %v1288_v19 = vshrl.u32 %v3345_v4, 16  ;;  %v5183_v46 = vshll.u32 %v3346_v55, 16  ;;  %v4380_v22 = vld [vmem:[%s5928_s1 + $0x2e8] sm:$0xff]  }
  0x73   :  { %4051 = vmatpush3.bf16.msra.mxu0 %v4373_v27  ;;  %1808 = vmatprep.mubr.bf16.mxu0 %v5134_v48  ;;  %v1258_v56 = vsel %vm4604_vm10, %v1253_v8, %v1257_v41  ;;  %v1276_v2 = vrot.slane %v1274_v62, 4  ;;  %v1291_v27 = vshll.u32 %v3345_v4, 16  ;;  %v1279_v57 = vrot.slane %v1277_v16, 5  ;;  %v4381_v4 = vld [vmem:[%s5928_s1 + $0x228] sm:$0xff]  }
  0x74   :  { %4052 = vmatprep.subr.bf16.mxu0 %v4375_v33  ;;  %1898 = vmatmul.mubr.bf16.vlgmr.msra.gmra.mxu1 %v5114_v30  ;;  %v1272_v33 = vsel %vm4604_vm10, %v1267_v35, %v1271_v34  ;;  %v5193_v41 = vcombine.high %v5155_v42, %v1258_v56  ;;  %v1290_v55 = vrot.slane %v1288_v19, 4  ;;  %v1285_v8 = vrot.slane %v1283_v0, 5  ;;  %v4382_v35 = vld [vmem:[%s5928_s1 + $0x2a8] sm:$0xff]   ;;  %v4383_v19 = vld [vmem:[%s5928_s1 + $0x260] sm:$0xff]  }
  0x75   :  { %4115 = vmatpush3.bf16.msra.mxu1 %v4374_v32  ;;  %1905 = vmatprep.mubr.bf16.mxu1 %v5163_v6  ;;  %v5195_v50 = vcombine.high %v1258_v56, %v1272_v33  ;;  %v1280_v34 = vor.u32 %v1279_v57, %v1276_v2  ;;  %v1293_v62 = vrot.slane %v1291_v27, 5  ;;  %v3347_v32 = vcombine.low %v4918_v31, %v4941_v10 }
  0x76   :  { %5981 = vst [vmem:[#allocation19_spill] sm:$0xff] %v5193_v41  ;;  %4116 = vmatprep.subr.bf16.mxu1 %v4376_v23  ;;  %v1299_v16 = vrot.slane %v5183_v46, 5  ;;  %v3348_v6 = vcombine.high %v4918_v31, %v4941_v10  ;;  %v3349_v23 = vcombine.low %v4947_v40, %v4971_v38  ;;  %v3350_v2 = vcombine.high %v4947_v40, %v4971_v38  ;;  %v4384_v31 = vld [vmem:[%s5928_s1 + $0x2e0] sm:$0xff]  }
  0x77   :  { %4053 = vmatpush3.bf16.msra.mxu0 %v4377_v17  ;;  %v1281_v17 = vrot.slane %v1280_v34, 4  ;;  %v1294_v0 = vor.u32 %v1293_v62, %v1290_v55  ;;  %v1305_v27 = vshll.u32 %v3347_v32, 16  ;;  %v3351_v40 = vcombine.low %v4963_v7, %v4986_v59 }
  0x78   :  { %4054 = vmatprep.subr.bf16.mxu0 %v4379_v20  ;;  %v1302_v20 = vshrl.u32 %v3347_v32, 16  ;;  %v1311_v10 = vshll.u32 %v3348_v6, 16  ;;  %v1316_v46 = vshrl.u32 %v3349_v23, 16  ;;  %v1319_v57 = vshll.u32 %v3349_v23, 16 }
  0x79   :  { %4117 = vmatpush3.bf16.msra.mxu1 %v4378_v18  ;;  %v5224_v38 = vsel %vm4604_vm10, %v1281_v17, %v1285_v8  ;;  %v1295_v55 = vrot.slane %v1294_v0, 4  ;;  %v4385_v18 = vld [vmem:[%s5928_s1 + $0x220] sm:$0xff]   ;;  %v1307_v62 = vrot.slane %v1305_v27, 5  ;;  %v1325_v23 = vshll.u32 %v3350_v2, 16  ;;  %v4387_v17 = vld [vmem:[%s5928_s1 + $0x258] sm:$0xff]  }
  0x7a   :  { %1809 = vmatmul.mubr.bf16.gmra.mxu0 %v5136_v43  ;;  %4118 = vmatprep.subr.bf16.mxu1 %v4380_v22  ;;  %v1304_v34 = vrot.slane %v1302_v20, 4  ;;  %v5230_v6 = vcombine.high %v1272_v33, %v5224_v38  ;;  %v5233_v32 = vcombine.low %v1272_v33, %v5224_v38  ;;  %v4386_v22 = vld [vmem:[%s5928_s1 + $0x2a0] sm:$0xff]   ;;  %v1318_v8 = vrot.slane %v1316_v46, 4  ;;  %v4388_v27 = vld [vmem:[%s5928_s1 + $0x2d8] sm:$0xff]  }
  0x7b   :  { %1816 = vmatprep.mubr.bf16.mxu0 %v5193_v41  ;;  %4055 = vmatpush3.bf16.msra.mxu0 %v4381_v4  ;;  %v5243_v4 = vcombine.low %v5155_v42, %v1258_v56  ;;  %v1321_v20 = vrot.slane %v1319_v57, 5  ;;  %v5249_v46 = vcombine.low %v1258_v56, %v1272_v33  ;;  %v1313_v2 = vrot.slane %v1311_v10, 5  ;;  %v4389_v57 = vld [vmem:[%s5928_s1 + $0x218] sm:$0xff]  }
  0x7c   :  { %1906 = vmatmul.mubr.bf16.gmra.mxu1 %v5166_v54  ;;  %4056 = vmatprep.subr.bf16.mxu0 %v4383_v19  ;;  %v1308_v0 = vor.u32 %v1307_v62, %v1304_v34  ;;  %v3352_v41 = vcombine.high %v4963_v7, %v4986_v59  ;;  %v1330_v54 = vshrl.u32 %v3351_v40, 16  ;;  %v5255_v42 = vsel %vm4604_vm10, %v1295_v55, %v1299_v16  ;;  %v4390_v7 = vld [vmem:[%s5928_s1 + $0x298] sm:$0xff]  }
  0x7d   :  { %1913 = vmatprep.mubr.bf16.mxu1 %v5195_v50  ;;  %4119 = vmatpush3.bf16.msra.mxu1 %v4382_v35  ;;  %v1322_v19 = vor.u32 %v1321_v20, %v1318_v8  ;;  %v1333_v34 = vshll.u32 %v3351_v40, 16  ;;  %v3353_v56 = vcombine.low %v4982_v25, %v5004_v58  ;;  %v1327_v35 = vrot.slane %v1325_v23, 5 }
  0x7e   :  { %4120 = vmatprep.subr.bf16.mxu1 %v4384_v31  ;;  %v1309_v33 = vrot.slane %v1308_v0, 4  ;;  %v1332_v59 = vrot.slane %v1330_v54, 4  ;;  %v3354_v16 = vcombine.high %v4982_v25, %v5004_v58  ;;  %v4391_v31 = vld [vmem:[%s5928_s1 + $0x250] sm:$0xff]   ;;  %v3355_v62 = vcombine.low %v5020_v51, %v5041_v44 }
  0x7f   :  { %4057 = vmatpush3.bf16.msra.mxu0 %v4385_v18  ;;  %v1323_v10 = vrot.slane %v1322_v19, 4  ;;  %v1335_v40 = vrot.slane %v1333_v34, 5  ;;  %v1344_v55 = vshrl.u32 %v3353_v56, 16  ;;  %v4392_v18 = vld [vmem:[%s5928_s1 + $0x2d0] sm:$0xff]   ;;  %v5278_v25 = vcombine.high %v5224_v38, %v5255_v42  ;;  %v4395_v34 = vld [vmem:[%s5928_s1 + $0x248] sm:$0xff]  }
  0x80   :  { %4058 = vmatprep.subr.bf16.mxu0 %v4387_v17  ;;  %v1339_v58 = vshll.u32 %v3352_v41, 16  ;;  %v1347_v54 = vshll.u32 %v3353_v56, 16  ;;  %v5281_v17 = vshll.u32 %v3354_v16, 16  ;;  %v5285_v0 = vsel %vm4604_vm10, %v1309_v33, %v1313_v2  ;;  %v4393_v19 = vld [vmem:[%s5928_s1 + $0x210] sm:$0xff]   ;;  %v4396_v56 = vld [vmem:[%s5928_s1 + $0x2c8] sm:$0xff]  }
  0x81   :  { %4121 = vmatpush3.bf16.msra.mxu1 %v4386_v22  ;;  %v1336_v8 = vor.u32 %v1335_v40, %v1332_v59  ;;  %v1346_v23 = vrot.slane %v1344_v55, 4  ;;  %v5293_v41 = vsel %vm4604_vm10, %v1323_v10, %v1327_v35  ;;  %v4394_v22 = vld [vmem:[%s5928_s1 + $0x290] sm:$0xff]   ;;  %v1358_v2 = vshrl.u32 %v3355_v62, 16 }
  0x82   :  { %1817 = vmatmul.mubr.bf16.gmra.mxu0 %v5243_v4  ;;  %4122 = vmatprep.subr.bf16.mxu1 %v4388_v27  ;;  %v1349_v20 = vrot.slane %v1347_v54, 5  ;;  %v3356_v27 = vcombine.high %v5020_v51, %v5041_v44  ;;  %v1341_v33 = vrot.slane %v1339_v58, 5  ;;  %v3357_v59 = vcombine.low %v5024_v11, %v5043_v39  ;;  %v4397_v44 = vld [vmem:[%s5928_s1 + $0x208] sm:$0xff]  }
  0x83   :  { %1824 = vmatprep.mubr.bf16.mxu0 %v5230_v6  ;;  %4059 = vmatpush3.bf16.msra.mxu0 %v4389_v57  ;;  %v1361_v57 = vshll.u32 %v3355_v62, 16  ;;  %v3444_v51 = vcombine.high %v4624_v28, %v5285_v0  ;;  %v1337_v16 = vrot.slane %v1336_v8, 4  ;;  %v3359_v10 = vcombine.low %v5059_v47, %v5089_v61  ;;  %v4398_v58 = vld [vmem:[%s5928_s1 + $0x288] sm:$0xff]  }
  0x84   :  { %1914 = vmatmul.mubr.bf16.gmra.mxu1 %v5249_v46  ;;  %4060 = vmatprep.subr.bf16.mxu0 %v4391_v31  ;;  %v1350_v35 = vor.u32 %v1349_v20, %v1346_v23  ;;  %v1355_v31 = vrot.slane %v5281_v17, 5  ;;  %v5323_v40 = vcombine.high %v5285_v0, %v5293_v41  ;;  %v1360_v55 = vrot.slane %v1358_v2, 4 }
  0x85   :  { %1921 = vmatprep.mubr.bf16.mxu1 %v5278_v25  ;;  %4123 = vmatpush3.bf16.msra.mxu1 %v4390_v7  ;;  %v5319_v7 = vcombine.low %v5224_v38, %v5255_v42  ;;  %v1363_v62 = vrot.slane %v1361_v57, 5  ;;  %v1367_v54 = vshll.u32 %v3356_v27, 16  ;;  %v1372_v8 = vshrl.u32 %v3357_v59, 16  ;;  %v4399_v38 = vld [vmem:[%s5928_s1 + $0x240] sm:$0xff]  }
  0x86   :  { %4124 = vmatprep.subr.bf16.mxu1 %v4392_v18  ;;  %5983 = vst [vmem:[#allocation21_spill] sm:$0xff] %v5323_v40  ;;  %v3358_v18 = vcombine.high %v5024_v11, %v5043_v39  ;;  %v1375_v23 = vshll.u32 %v3357_v59, 16  ;;  %v1351_v17 = vrot.slane %v1350_v35, 4  ;;  %v3360_v20 = vcombine.high %v5059_v47, %v5089_v61  ;;  %v4400_v39 = vld [vmem:[%s5928_s1 + $0x2c0] sm:$0xff]  }
  0x87   :  { %5982 = vst [vmem:[#allocation20_spill] sm:$0xff] %v5319_v7  ;;  %4061 = vmatpush3.bf16.msra.mxu0 %v4393_v19  ;;  %v1386_v19 = vshrl.u32 %v3359_v10, 16  ;;  %v1389_v2 = vshll.u32 %v3359_v10, 16  ;;  %v1342_v11 = vsel %vm4604_vm10, %v1337_v16, %v1341_v33  ;;  %v1374_v27 = vrot.slane %v1372_v8, 4  ;;  %v4401_v57 = vld [vmem:[%s5928_s1 + $0x200] sm:$0xff]  }
  0x88   :  { %4062 = vmatprep.subr.bf16.mxu0 %v4395_v34  ;;  %v1377_v34 = vrot.slane %v1375_v23, 5  ;;  %v4402_v35 = vld [vmem:[%s5928_s1 + $0x280] sm:$0xff]   ;;  %v3443_v33 = vcombine.low %v4624_v28, %v5285_v0  ;;  %v1395_v59 = vshll.u32 %v3360_v20, 16  ;;  %v5359_v16 = vcombine.high %v5293_v41, %v1342_v11 }
  0x89   :  { %4125 = vmatpush3.bf16.msra.mxu1 %v4394_v22  ;;  %v1364_v22 = vor.u32 %v1363_v62, %v1360_v55  ;;  %v1388_v47 = vrot.slane %v1386_v19, 4  ;;  %v1391_v61 = vrot.slane %v1389_v2, 5  ;;  %v1356_v10 = vsel %vm4604_vm10, %v1351_v17, %v1355_v31 }
  0x8a   :  { %1825 = vmatmul.mubr.bf16.gmra.mxu0 %v5233_v32  ;;  %4126 = vmatprep.subr.bf16.mxu1 %v4396_v56  ;;  %v3361_v56 = vcombine.low %v5085_v26, %v5108_v14  ;;  %v1369_v55 = vrot.slane %v1367_v54, 5  ;;  %v1381_v62 = vshll.u32 %v3358_v18, 16  ;;  %v1378_v8 = vor.u32 %v1377_v34, %v1374_v27 }
  0x8b   :  { %1832 = vmatprep.mubr.bf16.mxu0 %v3444_v51  ;;  %4063 = vmatpush3.bf16.msra.mxu0 %v4397_v44  ;;  %v3362_v51 = vcombine.high %v5085_v26, %v5108_v14  ;;  %v4403_v44 = vld [vmem:[%s5928_s1 + $0x378] sm:$0xff]   ;;  %v1392_v23 = vor.u32 %v1391_v61, %v1388_v47  ;;  %v5368_v2 = vcombine.low %v5285_v0, %v5293_v41  ;;  %v1397_v54 = vrot.slane %v1395_v59, 5 }
  0x8c   :  { %1922 = vmatmul.mubr.bf16.gmra.mxu1 %v5319_v7  ;;  %4064 = vmatprep.subr.bf16.mxu0 %v4399_v38  ;;  %v1400_v20 = vshrl.u32 %v3361_v56, 16  ;;  %v1403_v19 = vshll.u32 %v3361_v56, 16  ;;  %v4404_v38 = vld [vmem:[%s5928_s1 + $0x3f8] sm:$0xff]   ;;  %v5370_v17 = vcombine.high %v1342_v11, %v1356_v10  ;;  %v1383_v27 = vrot.slane %v1381_v62, 5 }
  0x8d   :  { %1929 = vmatprep.mubr.bf16.mxu1 %v5323_v40  ;;  %4127 = vmatpush3.bf16.msra.mxu1 %v4398_v58  ;;  %v1365_v40 = vrot.slane %v1364_v22, 4  ;;  %v1409_v7 = vshll.u32 %v3362_v51, 16  ;;  %v1393_v31 = vrot.slane %v1392_v23, 4  ;;  %v5380_v61 = vcombine.low %v5293_v41, %v1342_v11  ;;  %v4406_v62 = vld [vmem:[%s5928_s1 + $0x3b8] sm:$0xff]   ;;  %v4413_v23 = vld [vmem:[%s5928_s1 + $0x328] sm:$0xff]  }
  0x8e   :  { %4128 = vmatprep.subr.bf16.mxu1 %v4400_v39  ;;  %v1402_v18 = vrot.slane %v1400_v20, 4  ;;  %v1405_v58 = vrot.slane %v1403_v19, 5  ;;  %v1379_v39 = vrot.slane %v1378_v8, 4  ;;  %v5396_v56 = vcombine.low %v1342_v11, %v1356_v10  ;;  %v4412_v8 = vld [vmem:[%s5928_s1 + $0x3e8] sm:$0xff]   ;;  %v4416_v20 = vld [vmem:[%s5928_s1 + $0x3e0] sm:$0xff]  }
  0x8f   :  { %4065 = vmatpush3.bf16.msra.mxu0 %v4401_v57  ;;  %v1411_v47 = vrot.slane %v1409_v7, 5  ;;  %v1370_v0 = vsel %vm4604_vm10, %v1365_v40, %v1369_v55  ;;  %v1398_v57 = vsel %vm4604_vm10, %v1393_v31, %v1397_v54  ;;  %v4407_v55 = vld [vmem:[%s5928_s1 + $0x370] sm:$0xff]   ;;  %v4417_v19 = vld [vmem:[%s5928_s1 + $0x320] sm:$0xff]  }
  0x90   :  { %4178 = vmatprep.subr.bf16.mxu0 %v4403_v44  ;;  %v1406_v34 = vor.u32 %v1405_v58, %v1402_v18  ;;  %v1384_v7 = vsel %vm4604_vm10, %v1379_v39, %v1383_v27  ;;  %v5404_v15 = vcombine.low %v1356_v10, %v1370_v0  ;;  %v5984_v31 = vld [vmem:[#allocation2_spill] sm:$0xff]  ;;  %v4422_v18 = vld [vmem:[%s5928_s1 + $0x398] sm:$0xff]   ;;  %v4424_v39 = vld [vmem:[%s5928_s1 + $0x3d0] sm:$0xff]  }
  0x91   :  { %4129 = vmatpush3.bf16.msra.mxu1 %v4402_v35  ;;  %v5382_v35 = vcombine.high %v1356_v10, %v1370_v0  ;;  %v5399_v41 = vcombine.high %v1370_v0, %v1384_v7  ;;  %v5406_v51 = vcombine.high %v1384_v7, %v1398_v57  ;;  %v5408_v44 = vcombine.low %v1370_v0, %v1384_v7  ;;  %v4405_v10 = vld [vmem:[%s5928_s1 + $0x338] sm:$0xff]   ;;  %v5986_v27 = vld [vmem:[#allocation3_spill] sm:$0xff] }
  0x92   :  { %1833 = vmatmul.mubr.bf16.gmra.mxu0 %v3443_v33  ;;  %4242 = vmatprep.subr.bf16.mxu1 %v4404_v38  ;;  %v1407_v22 = vrot.slane %v1406_v34, 4  ;;  %v5414_v11 = vcombine.low %v1384_v7, %v1398_v57  ;;  %v4420_v38 = vld [vmem:[%s5928_s1 + $0x3d8] sm:$0xff]   ;;  %v3556_v54 = vcombine.low %v4903_v21, %v5984_v31  ;;  %v4427_v21 = vld [vmem:[%s5928_s1 + $0x348] sm:$0xff]   ;;  %v4426_v34 = vld [vmem:[%s5928_s1 + $0x390] sm:$0xff]  }
  0x93   :  { %1840 = vmatprep.mubr.bf16.mxu0 %v5359_v16  ;;  %v5985_v58 = vld [vmem:[#allocation5_spill] sm:$0xff]  ;;  %v4429_v0 = vld [vmem:[%s5928_s1 + $0x308] sm:$0xff]   ;;  %v4431_v7 = vld [vmem:[%s5928_s1 + $0x340] sm:$0xff]  }
  0x94   :  { %1930 = vmatmul.mubr.bf16.gmra.mxu1 %v5368_v2  ;;  %v5388_v40 = vsel %vm4604_vm10, %v1407_v22, %v1411_v47  ;;  %v4428_v47 = vld [vmem:[%s5928_s1 + $0x3c8] sm:$0xff]  }
  0x95   :  { %1937 = vmatprep.mubr.bf16.mxu1 %v5370_v17  ;;  %v5391_v33 = vcombine.high %v1398_v57, %v5388_v40  ;;  %v5394_v59 = vcombine.low %v1398_v57, %v5388_v40  ;;  %v5987_v57 = vmov 0  }
  0x96   :  { %v3555_v22 = vcombine.low %v4867_v37, %v5987_v57  ;;  %v4433_v37 = vld [vmem:[%s5928_s1 + $0x300] sm:$0xff]  }
  0x9a   :  { %1841 = vmatmul.mubr.bf16.gmra.mxu0 %v5380_v61 }
  0x9b   :  { %1848 = vmatprep.mubr.bf16.mxu0 %v5382_v35 }
  0x9c   :  { %1938 = vmatmul.mubr.bf16.gmra.mxu1 %v5396_v56 }
  0x9d   :  { %1945 = vmatprep.mubr.bf16.mxu1 %v5399_v41 }
  0xa2   :  { %1849 = vmatmul.mubr.bf16.gmra.mxu0 %v5404_v15 }
  0xa3   :  { %1856 = vmatprep.mubr.bf16.mxu0 %v5406_v51 }
  0xa4   :  { %1946 = vmatmul.mubr.bf16.gmra.mxu1 %v5408_v44 }
  0xa5   :  { %1953 = vmatprep.mubr.bf16.mxu1 %v5391_v33 }
  0xaa   :  { %1857 = vmatmul.mubr.bf16.gmra.mxu0 %v5414_v11 }
  0xab   :  { %2351 = vmatprep.mubr.bf16.mxu0 %v4678_v3  ;;  %v4408_v3 = vld [vmem:[%s5928_s1 + $0x3f0] sm:$0xff]  }
  0xac   :  { %1954 = vmatmul.mubr.bf16.gmra.mxu1 %v5394_v59 }
  0xad   :  { %2448 = vmatprep.mubr.bf16.mxu1 %v4746_v49  ;;  %v4409_v49 = vld [vmem:[%s5928_s1 + $0x330] sm:$0xff]  }
  0xb2   :  { %2352 = vmatmul.mubr.bf16.vlgmr.msra.gmra.mxu0 %v4649_v45  ;;  %v4411_v45 = vld [vmem:[%s5928_s1 + $0x368] sm:$0xff]  }
  0xb3   :  { %4179 = vmatpush3.bf16.msra.mxu0 %v4405_v10  ;;  %2359 = vmatprep.mubr.bf16.mxu0 %v4750_v52  ;;  %v4410_v52 = vld [vmem:[%s5928_s1 + $0x3b0] sm:$0xff]  }
  0xb4   :  { %4180 = vmatprep.subr.bf16.mxu0 %v4407_v55  ;;  %2449 = vmatmul.mubr.bf16.vlgmr.msra.gmra.mxu1 %v4695_v9  ;;  %v4415_v9 = vld [vmem:[%s5928_s1 + $0x360] sm:$0xff]   ;;  %v5988_v10 = vld [vmem:[#allocation4_spill] sm:$0xff]  ;;  %v4430_v55 = vld [vmem:[%s5928_s1 + $0x388] sm:$0xff]  }
  0xb5   :  { %4243 = vmatpush3.bf16.msra.mxu1 %v4406_v62  ;;  %2456 = vmatprep.mubr.bf16.mxu1 %v4833_v5  ;;  %v4414_v5 = vld [vmem:[%s5928_s1 + $0x3a8] sm:$0xff]   ;;  %v5989_v62 = vld [vmem:[#allocation8_spill] sm:$0xff] }
  0xb6   :  { %4244 = vmatprep.subr.bf16.mxu1 %v4408_v3  ;;  %v4432_v3 = vld [vmem:[%s5928_s1 + $0x3c0] sm:$0xff]  }
  0xb7   :  { %4181 = vmatpush3.bf16.msra.mxu0 %v4409_v49  ;;  %v5990_v49 = vld [vmem:[#allocation10_spill] sm:$0xff] }
  0xb8   :  { %4182 = vmatprep.subr.bf16.mxu0 %v4411_v45  ;;  %v4434_v45 = vld [vmem:[%s5928_s1 + $0x380] sm:$0xff]  }
  0xb9   :  { %4245 = vmatpush3.bf16.msra.mxu1 %v4410_v52  ;;  %v5991_v52 = vld [vmem:[#allocation6_spill] sm:$0xff] }
  0xba   :  { %2360 = vmatmul.mubr.bf16.gmra.mxu0 %v4707_v13  ;;  %4246 = vmatprep.subr.bf16.mxu1 %v4412_v8  ;;  %v4419_v13 = vld [vmem:[%s5928_s1 + $0x358] sm:$0xff]   ;;  %v5992_v8 = vld [vmem:[#allocation11_spill] sm:$0xff] }
  0xbb   :  { %2367 = vmatprep.mubr.bf16.mxu0 %v4844_v12  ;;  %4183 = vmatpush3.bf16.msra.mxu0 %v4413_v23  ;;  %v4418_v12 = vld [vmem:[%s5928_s1 + $0x3a0] sm:$0xff]   ;;  %v5993_v23 = vld [vmem:[#allocation7_spill] sm:$0xff] }
  0xbc   :  { %2457 = vmatmul.mubr.bf16.gmra.mxu1 %v4792_v29  ;;  %4184 = vmatprep.subr.bf16.mxu0 %v4415_v9  ;;  %v4421_v29 = vld [vmem:[%s5928_s1 + $0x318] sm:$0xff]  }
  0xbd   :  { %2464 = vmatprep.mubr.bf16.mxu1 %v4896_v53  ;;  %4247 = vmatpush3.bf16.msra.mxu1 %v4414_v5  ;;  %v4423_v53 = vld [vmem:[%s5928_s1 + $0x350] sm:$0xff]   ;;  %v5994_v9 = vld [vmem:[#allocation9_spill] sm:$0xff] }
  0xbe   :  { %4248 = vmatprep.subr.bf16.mxu1 %v4416_v20  ;;  %v5995_v5 = vld [vmem:[#allocation12_spill] sm:$0xff]  ;;  %v5996_v20 = vld [vmem:[#allocation13_spill] sm:$0xff] }
  0xbf   :  { %4185 = vmatpush3.bf16.msra.mxu0 %v4417_v19  ;;  %v3558_v19 = vcombine.low %v5108_v14, %v5984_v31 }
  0xc0   :  { %4186 = vmatprep.subr.bf16.mxu0 %v4419_v13  ;;  %v5997_v13 = vld [vmem:[#allocation14_spill] sm:$0xff] }
  0xc1   :  { %4249 = vmatpush3.bf16.msra.mxu1 %v4418_v12 }
  0xc2   :  { %2368 = vmatmul.mubr.bf16.gmra.mxu0 %v4801_v36  ;;  %4250 = vmatprep.subr.bf16.mxu1 %v4420_v38  ;;  %v4425_v36 = vld [vmem:[%s5928_s1 + $0x310] sm:$0xff]  }
  0xc3   :  { %2375 = vmatprep.mubr.bf16.mxu0 %v5985_v58  ;;  %4187 = vmatpush3.bf16.msra.mxu0 %v4421_v29  ;;  %v5999_v29 = vld [vmem:[#allocation16_spill] sm:$0xff] }
  0xc4   :  { %2465 = vmatmul.mubr.bf16.gmra.mxu1 %v5986_v27  ;;  %4188 = vmatprep.subr.bf16.mxu0 %v4423_v53 }
  0xc5   :  { %2472 = vmatprep.mubr.bf16.mxu1 %v3556_v54  ;;  %4251 = vmatpush3.bf16.msra.mxu1 %v4422_v18 }
  0xc6   :  { %4252 = vmatprep.subr.bf16.mxu1 %v4424_v39 }
  0xc7   :  { %4189 = vmatpush3.bf16.msra.mxu0 %v4425_v36 }
  0xc8   :  { %4190 = vmatprep.subr.bf16.mxu0 %v4427_v21 }
  0xc9   :  { %4253 = vmatpush3.bf16.msra.mxu1 %v4426_v34 }
  0xca   :  { %2376 = vmatmul.mubr.bf16.gmra.mxu0 %v5988_v10  ;;  %4254 = vmatprep.subr.bf16.mxu1 %v4428_v47  ;;  %v6000_v47 = vld [vmem:[#allocation17_spill] sm:$0xff] }
  0xcb   :  { %2383 = vmatprep.mubr.bf16.mxu0 %v5989_v62  ;;  %4191 = vmatpush3.bf16.msra.mxu0 %v4429_v0 }
  0xcc   :  { %2473 = vmatmul.mubr.bf16.gmra.mxu1 %v3555_v22  ;;  %4192 = vmatprep.subr.bf16.mxu0 %v4431_v7 }
  0xcd   :  { %2480 = vmatprep.mubr.bf16.mxu1 %v5990_v49  ;;  %4255 = vmatpush3.bf16.msra.mxu1 %v4430_v55  ;;  %v6001_v55 = vld [vmem:[#allocation19_spill] sm:$0xff] }
  0xce   :  { %4256 = vmatprep.subr.bf16.mxu1 %v4432_v3 }
  0xcf   :  { %4193 = vmatpush3.bf16.msra.mxu0 %v4433_v37 }
  0xd1   :  { %4257 = vmatpush3.bf16.msra.mxu1 %v4434_v45  ;;  %v6002_v45 = vld [vmem:[#allocation18_spill] sm:$0xff] }
  0xd2   :  { %2384 = vmatmul.mubr.bf16.gmra.mxu0 %v5991_v52 }
  0xd3   :  { %2391 = vmatprep.mubr.bf16.mxu0 %v5992_v8 }
  0xd4   :  { %2481 = vmatmul.mubr.bf16.gmra.mxu1 %v5993_v23 }
  0xd5   :  { %2488 = vmatprep.mubr.bf16.mxu1 %v5051_v1  ;;  %v3557_v1 = vcombine.low %v5085_v26, %v5987_v57 }
  0xda   :  { %2392 = vmatmul.mubr.bf16.gmra.mxu0 %v5994_v9 }
  0xdb   :  { %2399 = vmatprep.mubr.bf16.mxu0 %v5055_v60  ;;  %v5998_v60 = vld [vmem:[#allocation15_spill] sm:$0xff] }
  0xdc   :  { %2489 = vmatmul.mubr.bf16.gmra.mxu1 %v5995_v5 }
  0xdd   :  { %2496 = vmatprep.mubr.bf16.mxu1 %v5099_v63 }
  0xe2   :  { %2400 = vmatmul.mubr.bf16.gmra.mxu0 %v5996_v20 }
  0xe3   :  { %2407 = vmatprep.mubr.bf16.mxu0 %v5120_v24 }
  0xe4   :  { %2497 = vmatmul.mubr.bf16.gmra.mxu1 %v5997_v13 }
  0xe5   :  { %2504 = vmatprep.mubr.bf16.mxu1 %v3558_v19 }
  0xea   :  { %v3810_v12 = vpop.f32.mrf.mxu0  ;;  %2408 = vmatmul.mubr.bf16.gmra.mxu0 %v5998_v60 }
  0xeb   :  { %v3874_v38 = vpop.f32.mrf.mxu1  ;;  %2902 = vmatprep.mubr.bf16.mxu0 %v5999_v29 }
  0xec   :  { %v3811_v63 = vpop.f32.mrf.mxu0  ;;  %2505 = vmatmul.mubr.bf16.gmra.mxu1 %v3557_v1 }
  0xed   :  { %v3875_v53 = vpop.f32.mrf.mxu1  ;;  %v3812_v54 = vadd.f32 %v3811_v63, %v3810_v12  ;;  %2999 = vmatprep.mubr.bf16.mxu1 %v5134_v48 }
  0xee   :  { %v3876_v18 = vadd.f32 %v3875_v53, %v3874_v38  ;;  %v3813_v14 = vpop.f32.mrf.mxu0 }
  0xef   :  { %v3877_v31 = vpop.f32.mrf.mxu1 }
  0xf0   :  { %v5546_v24 = vadd.f32 %v3876_v18, %v3812_v54  ;;  %v3814_v58 = vpop.f32.mrf.mxu0 }
  0xf1   :  { %v3878_v39 = vpop.f32.mrf.mxu1  ;;  %v3815_v26 = vadd.f32 %v3814_v58, %v3813_v14  ;;  %v3655_v14 = vcombine.low %v5255_v42, %v4624_v28  ;;  %v6003_v58 = vld [vmem:[#allocation20_spill] sm:$0xff] }
  0xf2   :  { %v3879_v36 = vadd.f32 %v3878_v39, %v3877_v31  ;;  %v3816_v27 = vpop.f32.mrf.mxu0  ;;  %2903 = vmatmul.mubr.bf16.vlgmr.msra.gmra.mxu0 %v5114_v30 }
  0xf3   :  { %v3880_v21 = vpop.f32.mrf.mxu1  ;;  %2910 = vmatprep.mubr.bf16.mxu0 %v6000_v47 }
  0xf4   :  { %v5549_v34 = vadd.f32 %v3879_v36, %v3815_v26  ;;  %v3817_v0 = vpop.f32.mrf.mxu0  ;;  %3000 = vmatmul.mubr.bf16.vlgmr.msra.gmra.mxu1 %v5136_v43 }
  0xf5   :  { %v3881_v57 = vpop.f32.mrf.mxu1  ;;  %v3818_v22 = vadd.f32 %v3817_v0, %v3816_v27  ;;  %3007 = vmatprep.mubr.bf16.mxu1 %v6001_v55 }
  0xf6   :  { %v3882_v7 = vadd.f32 %v3881_v57, %v3880_v21  ;;  %v3819_v48 = vpop.f32.mrf.mxu0 }
  0xf7   :  { %v3883_v10 = vpop.f32.mrf.mxu1 }
  0xf8   :  { %v5554_v62 = vadd.f32 %v3882_v7, %v3818_v22  ;;  %v3820_v3 = vpop.f32.mrf.mxu0 }
  0xf9   :  { %v3884_v37 = vpop.f32.mrf.mxu1  ;;  %v3821_v49 = vadd.f32 %v3820_v3, %v3819_v48 }
  0xfa   :  { %v3885_v30 = vadd.f32 %v3884_v37, %v3883_v10  ;;  %2911 = vmatmul.mubr.bf16.gmra.mxu0 %v6002_v45  ;;  %v3822_v8 = vpop.f32.mrf.mxu0 }
  0xfb   :  { %2918 = vmatprep.mubr.bf16.mxu0 %v5195_v50  ;;  %v3886_v43 = vpop.f32.mrf.mxu1  ;;  %v3656_v50 = vcombine.high %v5255_v42, %v4624_v28 }
  0xfc   :  { %v5557_v52 = vadd.f32 %v3885_v30, %v3821_v49  ;;  %3008 = vmatmul.mubr.bf16.gmra.mxu1 %v5243_v4  ;;  %v3823_v23 = vpop.f32.mrf.mxu0 }
  0xfd   :  { %3015 = vmatprep.mubr.bf16.mxu1 %v5230_v6  ;;  %v3824_v9 = vadd.f32 %v3823_v23, %v3822_v8  ;;  %v3887_v5 = vpop.f32.mrf.mxu1 }
  0xfe   :  { %v3888_v20 = vadd.f32 %v3887_v5, %v3886_v43  ;;  %v3825_v19 = vpop.f32.mrf.mxu0  ;;  %v1012_v5 = vadd.f32 %v5549_v34, %v5546_v24 }
  0xff   :  { %v3889_v13 = vpop.f32.mrf.mxu1 }
 0x100   :  { %v5563_v1 = vadd.f32 %v3888_v20, %v3824_v9  ;;  %v3826_v12 = vpop.f32.mrf.mxu0  ;;  %v1036_v20 = vmul.f32 %v5554_v62, %v5554_v62 }
 0x101   :  { %v3827_v38 = vadd.f32 %v3826_v12, %v3825_v19  ;;  %v3890_v60 = vpop.f32.mrf.mxu1 }
 0x102   :  { %2919 = vmatmul.mubr.bf16.gmra.mxu0 %v5249_v46  ;;  %v3891_v4 = vadd.f32 %v3890_v60, %v3889_v13  ;;  %v3828_v6 = vpop.f32.mrf.mxu0 }
 0x103   :  { %2926 = vmatprep.mubr.bf16.mxu0 %v5278_v25 }
 0x104   :  { %3016 = vmatmul.mubr.bf16.gmra.mxu1 %v5233_v32  ;;  %v5569_v29 = vadd.f32 %v3891_v4, %v3827_v38  ;;  %v3829_v53 = vpop.f32.mrf.mxu0  ;;  %v6004_v32 = vld [vmem:[#allocation21_spill] sm:$0xff] }
 0x105   :  { %3023 = vmatprep.mubr.bf16.mxu1 %v3656_v50  ;;  %v3830_v46 = vadd.f32 %v3829_v53, %v3828_v6  ;;  %v1013_v50 = vadd.f32 %v1012_v5, %v5554_v62 }
 0x106   :  { %v3892_v63 = vpop.f32.mrf.mxu1  ;;  %v3831_v18 = vpop.f32.mrf.mxu0 }
 0x107   :  { %v1014_v6 = vadd.f32 %v1013_v50, %v5557_v52 }
 0x108   :  { %v3893_v54 = vpop.f32.mrf.mxu1  ;;  %v3832_v25 = vpop.f32.mrf.mxu0 }
 0x109   :  { %v3894_v31 = vadd.f32 %v3893_v54, %v3892_v63  ;;  %v3833_v36 = vadd.f32 %v3832_v25, %v3831_v18  ;;  %v1038_v63 = vmul.f32 %v5563_v1, %v5563_v1  ;;  %v1015_v54 = vadd.f32 %v1014_v6, %v5563_v1 }
 0x10a   :  { %2927 = vmatmul.mubr.bf16.gmra.mxu0 %v6003_v58  ;;  %v3895_v39 = vpop.f32.mrf.mxu1  ;;  %v1039_v18 = vmul.f32 %v5569_v29, %v5569_v29 }
 0x10b   :  { %v5574_v26 = vadd.f32 %v3894_v31, %v3830_v46  ;;  %2934 = vmatprep.mubr.bf16.mxu0 %v6004_v32  ;;  %v3834_v21 = vpop.f32.mrf.mxu0  ;;  %v1016_v25 = vadd.f32 %v1015_v54, %v5569_v29 }
 0x10c   :  { %v3896_v27 = vpop.f32.mrf.mxu1  ;;  %3024 = vmatmul.mubr.bf16.gmra.mxu1 %v3655_v14 }
 0x10d   :  { %v3897_v47 = vadd.f32 %v3896_v27, %v3895_v39  ;;  %3031 = vmatprep.mubr.bf16.mxu1 %v5359_v16  ;;  %v3835_v0 = vpop.f32.mrf.mxu0 }
 0x10e   :  { %v3836_v42 = vadd.f32 %v3835_v0, %v3834_v21  ;;  %v1017_v0 = vadd.f32 %v1016_v25, %v5574_v26 }
 0x10f   :  { %v5578_v57 = vadd.f32 %v3897_v47, %v3833_v36  ;;  %v3837_v22 = vpop.f32.mrf.mxu0  ;;  %v1040_v36 = vmul.f32 %v5574_v26, %v5574_v26 }
 0x111   :  { %v3898_v7 = vpop.f32.mrf.mxu1  ;;  %v3838_v48 = vpop.f32.mrf.mxu0 }
 0x112   :  { %2935 = vmatmul.mubr.bf16.gmra.mxu0 %v5368_v2  ;;  %v3839_v10 = vadd.f32 %v3838_v48, %v3837_v22  ;;  %v1035_v2 = vmul.f32 %v5549_v34, %v5549_v34 }
 0x113   :  { %2942 = vmatprep.mubr.bf16.mxu0 %v5370_v17  ;;  %v3899_v55 = vpop.f32.mrf.mxu1 }
 0x114   :  { %3032 = vmatmul.mubr.bf16.gmra.mxu1 %v5380_v61  ;;  %v3900_v3 = vadd.f32 %v3899_v55, %v3898_v7  ;;  %v3840_v37 = vpop.f32.mrf.mxu0 }
 0x115   :  { %v3901_v49 = vpop.f32.mrf.mxu1  ;;  %3039 = vmatprep.mubr.bf16.mxu1 %v5382_v35  ;;  %v1034_v35 = vmul.f32 %v5546_v24, %v5546_v24 }
 0x116   :  { %v5584_v16 = vadd.f32 %v3900_v3, %v3836_v42  ;;  %v3841_v30 = vpop.f32.mrf.mxu0  ;;  %v1041_v42 = vmul.f32 %v5578_v57, %v5578_v57 }
 0x117   :  { %v3902_v45 = vpop.f32.mrf.mxu1  ;;  %v3842_v8 = vadd.f32 %v3841_v30, %v3840_v37  ;;  %v3657_v30 = vcombine.low %v5388_v40, %v4624_v28 }
 0x118   :  { %v3903_v43 = vadd.f32 %v3902_v45, %v3901_v49  ;;  %v3843_v23 = vpop.f32.mrf.mxu0  ;;  %v1042_v55 = vmul.f32 %v5584_v16, %v5584_v16 }
 0x119   :  { %v3904_v9 = vpop.f32.mrf.mxu1 }
 0x11a   :  { %2943 = vmatmul.mubr.bf16.gmra.mxu0 %v5396_v56  ;;  %v5589_v17 = vadd.f32 %v3903_v43, %v3839_v10  ;;  %v3844_v61 = vpop.f32.mrf.mxu0  ;;  %v1050_v56 = vadd.f32 %v1035_v2, %v1034_v35  ;;  %v1018_v10 = vadd.f32 %v1017_v0, %v5578_v57 }
 0x11b   :  { %2950 = vmatprep.mubr.bf16.mxu0 %v5399_v41  ;;  %v3905_v19 = vpop.f32.mrf.mxu1  ;;  %v3845_v13 = vadd.f32 %v3844_v61, %v3843_v23  ;;  %v1037_v41 = vmul.f32 %v5557_v52, %v5557_v52 }
 0x11c   :  { %3040 = vmatmul.mubr.bf16.gmra.mxu1 %v5404_v15  ;;  %v3906_v12 = vadd.f32 %v3905_v19, %v3904_v9  ;;  %v1051_v4 = vadd.f32 %v1050_v56, %v1036_v20  ;;  %v1043_v43 = vmul.f32 %v5589_v17, %v5589_v17 }
 0x11d   :  { %v3907_v38 = vpop.f32.mrf.mxu1  ;;  %3047 = vmatprep.mubr.bf16.mxu1 %v5406_v51  ;;  %v3658_v51 = vcombine.high %v5388_v40, %v4624_v28 }
 0x11e   :  { %v5603_v60 = vadd.f32 %v3906_v12, %v3842_v8  ;;  %v1052_v46 = vadd.f32 %v1051_v4, %v1037_v41  ;;  %v1019_v8 = vadd.f32 %v1018_v10, %v5584_v16 }
 0x11f   :  { %v3908_v53 = vpop.f32.mrf.mxu1 }
 0x120   :  { %v3909_v15 = vadd.f32 %v3908_v53, %v3907_v38  ;;  %v3846_v14 = vpop.f32.mrf.mxu0  ;;  %v1053_v39 = vadd.f32 %v1052_v46, %v1038_v63  ;;  %v1020_v61 = vadd.f32 %v1019_v8, %v5589_v17  ;;  %v1044_v35 = vmul.f32 %v5603_v60, %v5603_v60 }
 0x121   :  { %v3910_v31 = vpop.f32.mrf.mxu1 }
 0x122   :  { %2951 = vmatmul.mubr.bf16.gmra.mxu0 %v5408_v44  ;;  %v5614_v58 = vadd.f32 %v3909_v15, %v3845_v13  ;;  %v3847_v32 = vpop.f32.mrf.mxu0  ;;  %v1054_v44 = vadd.f32 %v1053_v39, %v1039_v18  ;;  %v1021_v19 = vadd.f32 %v1020_v61, %v5603_v60 }
 0x123   :  { %2958 = vmatprep.mubr.bf16.mxu0 %v5391_v33  ;;  %v3911_v27 = vpop.f32.mrf.mxu1  ;;  %v3848_v21 = vadd.f32 %v3847_v32, %v3846_v14 }
 0x124   :  { %3048 = vmatmul.mubr.bf16.gmra.mxu1 %v5414_v11  ;;  %v3912_v47 = vadd.f32 %v3911_v27, %v3910_v31  ;;  %v3849_v22 = vpop.f32.mrf.mxu0  ;;  %v1055_v48 = vadd.f32 %v1054_v44, %v1040_v36  ;;  %v1045_v13 = vmul.f32 %v5614_v58, %v5614_v58  ;;  %v1022_v50 = vadd.f32 %v1021_v19, %v5614_v58 }
 0x125   :  { %v3913_v33 = vpop.f32.mrf.mxu1  ;;  %3055 = vmatprep.mubr.bf16.mxu1 %v3658_v51 }
 0x126   :  { %v5624_v7 = vadd.f32 %v3912_v47, %v3848_v21  ;;  %v3850_v11 = vpop.f32.mrf.mxu0  ;;  %v1056_v45 = vadd.f32 %v1055_v48, %v1041_v42 }
 0x127   :  { %v3914_v3 = vpop.f32.mrf.mxu1  ;;  %v3851_v37 = vadd.f32 %v3850_v11, %v3849_v22 }
 0x128   :  { %v3915_v49 = vadd.f32 %v3914_v3, %v3913_v33  ;;  %v3852_v23 = vpop.f32.mrf.mxu0  ;;  %v1057_v9 = vadd.f32 %v1056_v45, %v1042_v55  ;;  %v1046_v41 = vmul.f32 %v5624_v7, %v5624_v7  ;;  %v1023_v15 = vadd.f32 %v1022_v50, %v5624_v7 }
 0x12a   :  { %2959 = vmatmul.mubr.bf16.gmra.mxu0 %v5394_v59  ;;  %v5635_v2 = vadd.f32 %v3915_v49, %v3851_v37  ;;  %v3853_v5 = vpop.f32.mrf.mxu0  ;;  %v1058_v40 = vadd.f32 %v1057_v9, %v1043_v43 }
 0x12b   :  { %v3854_v28 = vadd.f32 %v3853_v5, %v3852_v23 }
 0x12c   :  { %v3916_v20 = vpop.f32.mrf.mxu1  ;;  %3056 = vmatmul.mubr.bf16.gmra.mxu1 %v3657_v30  ;;  %v3855_v12 = vpop.f32.mrf.mxu0  ;;  %v1059_v56 = vadd.f32 %v1058_v40, %v1044_v35  ;;  %v1047_v46 = vmul.f32 %v5635_v2, %v5635_v2  ;;  %v1024_v51 = vadd.f32 %v1023_v15, %v5635_v2 }
 0x12e   :  { %v3917_v59 = vpop.f32.mrf.mxu1  ;;  %v3856_v4 = vpop.f32.mrf.mxu0  ;;  %v1060_v53 = vadd.f32 %v1059_v56, %v1045_v13 }
 0x12f   :  { %v3918_v38 = vadd.f32 %v3917_v59, %v3916_v20  ;;  %v3857_v63 = vadd.f32 %v3856_v4, %v3855_v12 }
 0x130   :  { %v3919_v6 = vpop.f32.mrf.mxu1  ;;  %v1061_v31 = vadd.f32 %v1060_v53, %v1046_v41 }
 0x131   :  { %v5649_v54 = vadd.f32 %v3918_v38, %v3854_v28 }
 0x132   :  { %v3938_v18 = vpop.f32.mrf.mxu0  ;;  %v3920_v14 = vpop.f32.mrf.mxu1  ;;  %v1062_v27 = vadd.f32 %v1061_v31, %v1047_v46 }
 0x133   :  { %v1048_v39 = vmul.f32 %v5649_v54, %v5649_v54  ;;  %v3921_v25 = vadd.f32 %v3920_v14, %v3919_v6  ;;  %v1025_v21 = vadd.f32 %v1024_v51, %v5649_v54 }
 0x134   :  { %v3939_v36 = vpop.f32.mrf.mxu0  ;;  %v4002_v32 = vpop.f32.mrf.mxu1 }
 0x135   :  { %v5655_v47 = vadd.f32 %v3921_v25, %v3857_v63  ;;  %v3940_v44 = vadd.f32 %v3939_v36, %v3938_v18  ;;  %v1063_v22 = vadd.f32 %v1062_v27, %v1048_v39 }
 0x136   :  { %v3941_v0 = vpop.f32.mrf.mxu0  ;;  %v4003_v42 = vpop.f32.mrf.mxu1 }
 0x137   :  { %v5658_v33 = vadd.f32 %v1025_v21, %v5655_v47  ;;  %v1049_v48 = vmul.f32 %v5655_v47, %v5655_v47  ;;  %v4004_v10 = vadd.f32 %v4003_v42, %v4002_v32 }
 0x138   :  { %v3942_v55 = vpop.f32.mrf.mxu0  ;;  %v4005_v11 = vpop.f32.mrf.mxu1 }
 0x139   :  { %v5662_v3 = vadd.f32 %v1063_v22, %v1049_v48  ;;  %v1900_v37 = vadd.f32 %v4004_v10, %v3940_v44  ;;  %v3943_v30 = vadd.f32 %v3942_v55, %v3941_v0 }
 0x13a   :  { %v3944_v49 = vpop.f32.mrf.mxu0  ;;  %v4006_v45 = vpop.f32.mrf.mxu1 }
 0x13b   :  { %v3723_v8 = vpack.c.bf16 %v1900_v37, %v5546_v24  ;;  %v4007_v23 = vadd.f32 %v4006_v45, %v4005_v11  ;;  %v1984_v19 = vmul.f32 %v1900_v37, %v1900_v37 }
 0x13c   :  { %v3945_v43 = vpop.f32.mrf.mxu0  ;;  %v4008_v9 = vpop.f32.mrf.mxu1 }
 0x13d   :  { %3220 = vst [vmem:[%s5932_s4] sm:$0xff] %v3723_v8  ;;  %v3946_v61 = vadd.f32 %v3945_v43, %v3944_v49  ;;  %v1903_v5 = vadd.f32 %v4007_v23, %v3943_v30 }
 0x13e   :  { %v3947_v35 = vpop.f32.mrf.mxu0  ;;  %v4009_v20 = vpop.f32.mrf.mxu1 }
 0x13f   :  { %v4010_v28 = vadd.f32 %v4009_v20, %v4008_v9  ;;  %v1962_v13 = vadd.f32 %v1903_v5, %v1900_v37  ;;  %v1985_v12 = vmul.f32 %v1903_v5, %v1903_v5  ;;  %v3725_v59 = vpack.c.bf16 %v1903_v5, %v5549_v34 }
 0x140   :  { %v3948_v40 = vpop.f32.mrf.mxu0  ;;  %v4011_v56 = vpop.f32.mrf.mxu1 }
 0x141   :  { %v1908_v24 = vadd.f32 %v4010_v28, %v3946_v61  ;;  %v2000_v41 = vadd.f32 %v1985_v12, %v1984_v19  ;;  %3222 = vst [vmem:[%s5932_s4 + $0x10] sm:$0xff] %v3725_v59  ;;  %v3949_v38 = vadd.f32 %v3948_v40, %v3947_v35 }
 0x142   :  { %v3950_v50 = vpop.f32.mrf.mxu0  ;;  %v4012_v4 = vpop.f32.mrf.mxu1 }
 0x143   :  { %v1963_v6 = vadd.f32 %v1962_v13, %v1908_v24  ;;  %v1986_v63 = vmul.f32 %v1908_v24, %v1908_v24  ;;  %v3727_v15 = vpack.c.bf16 %v1908_v24, %v5554_v62  ;;  %v4013_v46 = vadd.f32 %v4012_v4, %v4011_v56 }
 0x144   :  { %v3951_v53 = vpop.f32.mrf.mxu0  ;;  %v4014_v18 = vpop.f32.mrf.mxu1 }
 0x145   :  { %v2001_v14 = vadd.f32 %v2000_v41, %v1986_v63  ;;  %v3952_v31 = vadd.f32 %v3951_v53, %v3950_v50  ;;  %3224 = vst [vmem:[%s5932_s4 + $0x20] sm:$0xff] %v3727_v15  ;;  %v1911_v51 = vadd.f32 %v4013_v46, %v3949_v38 }
 0x146   :  { %v3953_v34 = vpop.f32.mrf.mxu0  ;;  %v4015_v39 = vpop.f32.mrf.mxu1 }
 0x147   :  { %v4016_v25 = vadd.f32 %v4015_v39, %v4014_v18  ;;  %v1964_v32 = vadd.f32 %v1963_v6, %v1911_v51  ;;  %v1987_v27 = vmul.f32 %v1911_v51, %v1911_v51  ;;  %v3729_v21 = vpack.c.bf16 %v1911_v51, %v5557_v52 }
 0x148   :  { %v3954_v36 = vpop.f32.mrf.mxu0  ;;  %v4017_v44 = vpop.f32.mrf.mxu1 }
 0x149   :  { %v1916_v0 = vadd.f32 %v4016_v25, %v3952_v31  ;;  %v3955_v62 = vadd.f32 %v3954_v36, %v3953_v34  ;;  %v2002_v22 = vadd.f32 %v2001_v14, %v1987_v27  ;;  %3226 = vst [vmem:[%s5932_s4 + $0x30] sm:$0xff] %v3729_v21 }
 0x14a   :  { %v3956_v42 = vpop.f32.mrf.mxu0  ;;  %v4018_v48 = vpop.f32.mrf.mxu1 }
 0x14b   :  { %v1965_v10 = vadd.f32 %v1964_v32, %v1916_v0  ;;  %v1988_v55 = vmul.f32 %v1916_v0, %v1916_v0  ;;  %v3731_v11 = vpack.c.bf16 %v1916_v0, %v5563_v1  ;;  %v4019_v37 = vadd.f32 %v4018_v48, %v4017_v44 }
 0x14c   :  { %v3957_v49 = vpop.f32.mrf.mxu0  ;;  %v4020_v30 = vpop.f32.mrf.mxu1 }
 0x14d   :  { %v2003_v45 = vadd.f32 %v2002_v22, %v1988_v55  ;;  %3228 = vst [vmem:[%s5932_s4 + $0x40] sm:$0xff] %v3731_v11  ;;  %v1919_v52 = vadd.f32 %v4019_v37, %v3955_v62  ;;  %v3958_v8 = vadd.f32 %v3957_v49, %v3956_v42 }
 0x14e   :  { %v3959_v43 = vpop.f32.mrf.mxu0  ;;  %v4021_v23 = vpop.f32.mrf.mxu1 }
 0x14f   :  { %v1966_v9 = vadd.f32 %v1965_v10, %v1919_v52  ;;  %v1989_v61 = vmul.f32 %v1919_v52, %v1919_v52  ;;  %v3733_v35 = vpack.c.bf16 %v1919_v52, %v5569_v29  ;;  %v4022_v5 = vadd.f32 %v4021_v23, %v4020_v30 }
 0x150   :  { %v3960_v20 = vpop.f32.mrf.mxu0  ;;  %v4023_v28 = vpop.f32.mrf.mxu1 }
 0x151   :  { %v2004_v1 = vadd.f32 %v2003_v45, %v1989_v61  ;;  %3230 = vst [vmem:[%s5932_s4 + $0x50] sm:$0xff] %v3733_v35  ;;  %v1924_v40 = vadd.f32 %v4022_v5, %v3958_v8  ;;  %v3961_v19 = vadd.f32 %v3960_v20, %v3959_v43 }
 0x152   :  { %v3962_v13 = vpop.f32.mrf.mxu0  ;;  %v4024_v12 = vpop.f32.mrf.mxu1 }
 0x153   :  { %v1967_v59 = vadd.f32 %v1966_v9, %v1924_v40  ;;  %v1990_v56 = vmul.f32 %v1924_v40, %v1924_v40  ;;  %v3735_v24 = vpack.c.bf16 %v1924_v40, %v5574_v26  ;;  %v4025_v50 = vadd.f32 %v4024_v12, %v4023_v28 }
 0x154   :  { %v3963_v41 = vpop.f32.mrf.mxu0  ;;  %v4026_v38 = vpop.f32.mrf.mxu1 }
 0x155   :  { %v2005_v29 = vadd.f32 %v2004_v1, %v1990_v56  ;;  %3232 = vst [vmem:[%s5932_s4 + $0x60] sm:$0xff] %v3735_v24  ;;  %v1927_v4 = vadd.f32 %v4025_v50, %v3961_v19  ;;  %v3964_v6 = vadd.f32 %v3963_v41, %v3962_v13 }
 0x156   :  { %v3965_v63 = vpop.f32.mrf.mxu0  ;;  %v4027_v53 = vpop.f32.mrf.mxu1 }
 0x157   :  { %v1968_v15 = vadd.f32 %v1967_v59, %v1927_v4  ;;  %v1991_v46 = vmul.f32 %v1927_v4, %v1927_v4  ;;  %v3737_v18 = vpack.c.bf16 %v1927_v4, %v5578_v57  ;;  %v4028_v14 = vadd.f32 %v4027_v53, %v4026_v38 }
 0x158   :  { %v3966_v31 = vpop.f32.mrf.mxu0  ;;  %v4029_v34 = vpop.f32.mrf.mxu1 }
 0x159   :  { %v2006_v26 = vadd.f32 %v2005_v29, %v1991_v46  ;;  %3234 = vst [vmem:[%s5932_s4 + $0x70] sm:$0xff] %v3737_v18  ;;  %v1932_v51 = vadd.f32 %v4028_v14, %v3964_v6  ;;  %v3967_v39 = vadd.f32 %v3966_v31, %v3965_v63 }
 0x15a   :  { %v3968_v25 = vpop.f32.mrf.mxu0  ;;  %v4030_v36 = vpop.f32.mrf.mxu1 }
 0x15b   :  { %v1969_v32 = vadd.f32 %v1968_v15, %v1932_v51  ;;  %v1992_v27 = vmul.f32 %v1932_v51, %v1932_v51  ;;  %v3739_v21 = vpack.c.bf16 %v1932_v51, %v5584_v16  ;;  %v4031_v44 = vadd.f32 %v4030_v36, %v4029_v34 }
 0x15c   :  { %v3969_v0 = vpop.f32.mrf.mxu0  ;;  %v4032_v62 = vpop.f32.mrf.mxu1  ;;  %v1027_v51 = vrot.slane %v5658_v33, 4 }
 0x15d   :  { %v2007_v57 = vadd.f32 %v2006_v26, %v1992_v27  ;;  %3236 = vst [vmem:[%s5932_s4 + $0x80] sm:$0xff] %v3739_v21  ;;  %v1935_v42 = vadd.f32 %v4031_v44, %v3967_v39  ;;  %v3970_v22 = vadd.f32 %v3969_v0, %v3968_v25  ;;  %v1065_v44 = vrot.slane %v5662_v3, 4 }
 0x15e   :  { %v3971_v48 = vpop.f32.mrf.mxu0  ;;  %v4033_v10 = vpop.f32.mrf.mxu1 }
 0x15f   :  { %v1970_v55 = vadd.f32 %v1969_v32, %v1935_v42  ;;  %v1993_v11 = vmul.f32 %v1935_v42, %v1935_v42  ;;  %v3741_v37 = vpack.c.bf16 %v1935_v42, %v5589_v17  ;;  %v4034_v49 = vadd.f32 %v4033_v10, %v4032_v62 }
 0x160   :  { %v3972_v30 = vpop.f32.mrf.mxu0  ;;  %v4035_v45 = vpop.f32.mrf.mxu1 }
 0x161   :  { %v2008_v16 = vadd.f32 %v2007_v57, %v1993_v11  ;;  %3238 = vst [vmem:[%s5932_s4 + $0x90] sm:$0xff] %v3741_v37  ;;  %v1940_v52 = vadd.f32 %v4034_v49, %v3970_v22  ;;  %v3973_v8 = vadd.f32 %v3972_v30, %v3971_v48  ;;  %v1028_v22 = vadd.f32 %v1027_v51, %v5658_v33 }
 0x162   :  { %v3974_v43 = vpop.f32.mrf.mxu0  ;;  %v4036_v23 = vpop.f32.mrf.mxu1 }
 0x163   :  { %v1971_v9 = vadd.f32 %v1970_v55, %v1940_v52  ;;  %v1994_v61 = vmul.f32 %v1940_v52, %v1940_v52  ;;  %v3743_v35 = vpack.c.bf16 %v1940_v52, %v5603_v60  ;;  %v4037_v5 = vadd.f32 %v4036_v23, %v4035_v45 }
 0x164   :  { %v3975_v20 = vpop.f32.mrf.mxu0  ;;  %v4038_v28 = vpop.f32.mrf.mxu1  ;;  %v1066_v45 = vadd.f32 %v1065_v44, %v5662_v3 }
 0x165   :  { %v2009_v17 = vadd.f32 %v2008_v16, %v1994_v61  ;;  %3240 = vst [vmem:[%s5932_s4 + $0xa0] sm:$0xff] %v3743_v35  ;;  %v1943_v1 = vadd.f32 %v4037_v5, %v3973_v8  ;;  %v3976_v40 = vadd.f32 %v3975_v20, %v3974_v43  ;;  %v1029_v43 = vrot.slane %v1028_v22, 2 }
 0x166   :  { %v3977_v19 = vpop.f32.mrf.mxu0  ;;  %v4039_v13 = vpop.f32.mrf.mxu1 }
 0x167   :  { %v1972_v12 = vadd.f32 %v1971_v9, %v1943_v1  ;;  %v1995_v59 = vmul.f32 %v1943_v1, %v1943_v1  ;;  %v3745_v56 = vpack.c.bf16 %v1943_v1, %v5614_v58  ;;  %v4040_v24 = vadd.f32 %v4039_v13, %v4038_v28 }
 0x168   :  { %v3978_v50 = vpop.f32.mrf.mxu0  ;;  %v4041_v41 = vpop.f32.mrf.mxu1  ;;  %v1067_v28 = vrot.slane %v1066_v45, 2 }
 0x169   :  { %v2010_v60 = vadd.f32 %v2009_v17, %v1995_v59  ;;  %3242 = vst [vmem:[%s5932_s4 + $0xb0] sm:$0xff] %v3745_v56  ;;  %v1948_v38 = vadd.f32 %v4040_v24, %v3976_v40  ;;  %v3979_v29 = vadd.f32 %v3978_v50, %v3977_v19  ;;  %v1030_v19 = vadd.f32 %v1029_v43, %v1028_v22 }
 0x16a   :  { %v3980_v4 = vpop.f32.mrf.mxu0  ;;  %v4042_v6 = vpop.f32.mrf.mxu1 }
 0x16b   :  { %v1973_v63 = vadd.f32 %v1972_v12, %v1948_v38  ;;  %v1996_v53 = vmul.f32 %v1948_v38, %v1948_v38  ;;  %v3747_v15 = vpack.c.bf16 %v1948_v38, %v5624_v7  ;;  %v4043_v46 = vadd.f32 %v4042_v6, %v4041_v41 }
 0x16c   :  { %v3981_v18 = vpop.f32.mrf.mxu0  ;;  %v4044_v14 = vpop.f32.mrf.mxu1  ;;  %v1068_v41 = vadd.f32 %v1067_v28, %v1066_v45  ;;  %v1031_v6 = vrot.slane %v1030_v19, 1 }
 0x16d   :  { %v2011_v58 = vadd.f32 %v2010_v60, %v1996_v53  ;;  %3244 = vst [vmem:[%s5932_s4 + $0xc0] sm:$0xff] %v3747_v15  ;;  %v1951_v31 = vadd.f32 %v4043_v46, %v3979_v29  ;;  %v3982_v34 = vadd.f32 %v3981_v18, %v3980_v4 }
 0x16e   :  { %v3983_v26 = vpop.f32.mrf.mxu0  ;;  %v4045_v39 = vpop.f32.mrf.mxu1  ;;  %v1069_v51 = vrot.slane %v1068_v41, 1 }
 0x16f   :  { %v1974_v25 = vadd.f32 %v1973_v63, %v1951_v31  ;;  %v1997_v36 = vmul.f32 %v1951_v31, %v1951_v31  ;;  %v3749_v32 = vpack.c.bf16 %v1951_v31, %v5635_v2  ;;  %v4046_v27 = vadd.f32 %v4045_v39, %v4044_v14 }
 0x170   :  { %v3984_v7 = vpop.f32.mrf.mxu0  ;;  %v4047_v21 = vpop.f32.mrf.mxu1 }
 0x171   :  { %v2012_v0 = vadd.f32 %v2011_v58, %v1997_v36  ;;  %3246 = vst [vmem:[%s5932_s4 + $0xd0] sm:$0xff] %v3749_v32  ;;  %v1956_v62 = vadd.f32 %v4046_v27, %v3982_v34  ;;  %v3985_v57 = vadd.f32 %v3984_v7, %v3983_v26 }
 0x172   :  { %v4066_v42 = vpop.f32.mrf.mxu0  ;;  %v4048_v48 = vpop.f32.mrf.mxu1 }
 0x173   :  { %v1975_v10 = vadd.f32 %v1974_v25, %v1956_v62  ;;  %v1998_v55 = vmul.f32 %v1956_v62, %v1956_v62  ;;  %v3751_v2 = vpack.c.bf16 %v1956_v62, %v5649_v54  ;;  %v4049_v11 = vadd.f32 %v4048_v48, %v4047_v21 }
 0x174   :  { %v4067_v37 = vpop.f32.mrf.mxu0  ;;  %v4130_v49 = vpop.f32.mrf.mxu1  ;;  %v1032_v21 = vadd.f32 %v1031_v6, %v1030_v19 }
 0x175   :  { %v4068_v30 = vadd.f32 %v4067_v37, %v4066_v42  ;;  %v2013_v16 = vadd.f32 %v2012_v0, %v1998_v55  ;;  %3248 = vst [vmem:[%s5932_s4 + $0xe0] sm:$0xff] %v3751_v2  ;;  %v1959_v52 = vadd.f32 %v4049_v11, %v3985_v57  ;;  %v1070_v55 = vadd.f32 %v1069_v51, %v1068_v41 }
 0x176   :  { %v4069_v8 = vpop.f32.mrf.mxu0  ;;  %v4131_v33 = vpop.f32.mrf.mxu1 }
 0x177   :  { %v1976_v23 = vadd.f32 %v1975_v10, %v1959_v52  ;;  %v1999_v9 = vmul.f32 %v1959_v52, %v1959_v52  ;;  %v3753_v61 = vpack.c.bf16 %v1959_v52, %v5655_v47  ;;  %v4132_v54 = vadd.f32 %v4131_v33, %v4130_v49 }
 0x178   :  { %v4070_v35 = vpop.f32.mrf.mxu0  ;;  %v4133_v5 = vpop.f32.mrf.mxu1 }
 0x179   :  { %v4071_v20 = vadd.f32 %v4070_v35, %v4069_v8  ;;  %v1977_v17 = vrot.slane %v1976_v23, 4  ;;  %v2014_v3 = vadd.f32 %v2013_v16, %v1999_v9  ;;  %3250 = vst [vmem:[%s5932_s4 + $0xf0] sm:$0xff] %v3753_v61  ;;  %v5732_v1 = vadd.f32 %v4132_v54, %v4068_v30 }
 0x17a   :  { %v4072_v40 = vpop.f32.mrf.mxu0  ;;  %v4134_v13 = vpop.f32.mrf.mxu1 }
 0x17b   :  { %v1978_v12 = vadd.f32 %v1977_v17, %v1976_v23  ;;  %v2015_v59 = vrot.slane %v2014_v3, 4  ;;  %v4135_v56 = vadd.f32 %v4134_v13, %v4133_v5  ;;  %v2535_v63 = vmul.f32 %v5732_v1, %v5732_v1 }
 0x17c   :  { %v4073_v47 = vpop.f32.mrf.mxu0  ;;  %v4136_v24 = vpop.f32.mrf.mxu1 }
 0x17d   :  { %v4074_v50 = vadd.f32 %v4073_v47, %v4072_v40  ;;  %v1979_v60 = vrot.slane %v1978_v12, 2  ;;  %v2016_v38 = vadd.f32 %v2015_v59, %v2014_v3  ;;  %v5734_v29 = vadd.f32 %v4135_v56, %v4071_v20 }
 0x17e   :  { %v4075_v4 = vpop.f32.mrf.mxu0  ;;  %v4137_v53 = vpop.f32.mrf.mxu1 }
 0x17f   :  { %v1980_v15 = vadd.f32 %v1979_v60, %v1978_v12  ;;  %v2017_v46 = vrot.slane %v2016_v38, 2  ;;  %v2513_v18 = vadd.f32 %v5734_v29, %v5732_v1  ;;  %v2536_v14 = vmul.f32 %v5734_v29, %v5734_v29 }
 0x180   :  { %v4076_v58 = vpop.f32.mrf.mxu0  ;;  %v4138_v31 = vadd.f32 %v4137_v53, %v4136_v24  ;;  %v4139_v34 = vpop.f32.mrf.mxu1 }
 0x181   :  { %v4077_v26 = vadd.f32 %v4076_v58, %v4075_v4  ;;  %v1981_v39 = vrot.slane %v1980_v15, 1  ;;  %v2018_v25 = vadd.f32 %v2017_v46, %v2016_v38  ;;  %v2551_v36 = vadd.f32 %v2536_v14, %v2535_v63 }
 0x182   :  { %v4078_v32 = vpop.f32.mrf.mxu0  ;;  %v5742_v27 = vadd.f32 %v4138_v31, %v4074_v50  ;;  %v4140_v7 = vpop.f32.mrf.mxu1 }
 0x183   :  { %v1982_v44 = vadd.f32 %v1981_v39, %v1980_v15  ;;  %v2019_v0 = vrot.slane %v2018_v25, 1  ;;  %v4141_v62 = vadd.f32 %v4140_v7, %v4139_v34 }
 0x184   :  { %v4079_v57 = vpop.f32.mrf.mxu0  ;;  %v2514_v42 = vadd.f32 %v2513_v18, %v5742_v27  ;;  %v2537_v22 = vmul.f32 %v5742_v27, %v5742_v27  ;;  %v4142_v48 = vpop.f32.mrf.mxu1 }
 0x185   :  { %v4080_v10 = vadd.f32 %v4079_v57, %v4078_v32  ;;  %v5747_v2 = vadd.f32 %v1982_v44, %v1032_v21  ;;  %v2020_v11 = vadd.f32 %v2019_v0, %v2018_v25  ;;  %v5749_v37 = vadd.f32 %v4141_v62, %v4077_v26 }
 0x186   :  { %v4081_v49 = vpop.f32.mrf.mxu0  ;;  %v2552_v30 = vadd.f32 %v2551_v36, %v2537_v22  ;;  %v4143_v45 = vpop.f32.mrf.mxu1 }
 0x187   :  { %v5751_v16 = vadd.f32 %v2020_v11, %v1070_v55  ;;  %v2515_v52 = vadd.f32 %v2514_v42, %v5749_v37  ;;  %v2538_v8 = vmul.f32 %v5749_v37, %v5749_v37  ;;  %v4144_v43 = vadd.f32 %v4143_v45, %v4142_v48 }
 0x188   :  { %v4082_v33 = vpop.f32.mrf.mxu0  ;;  %v4145_v23 = vpop.f32.mrf.mxu1 }
 0x189   :  { %v4083_v9 = vadd.f32 %v4082_v33, %v4081_v49  ;;  %v2553_v61 = vadd.f32 %v2552_v30, %v2538_v8  ;;  %v5756_v54 = vadd.f32 %v4144_v43, %v4080_v10 }
 0x18a   :  { %v4084_v35 = vpop.f32.mrf.mxu0  ;;  %v4146_v5 = vpop.f32.mrf.mxu1 }
 0x18b   :  { %v2516_v20 = vadd.f32 %v2515_v52, %v5756_v54  ;;  %v2539_v28 = vmul.f32 %v5756_v54, %v5756_v54  ;;  %v4147_v17 = vadd.f32 %v4146_v5, %v4145_v23 }
 0x18c   :  { %v4085_v3 = vpop.f32.mrf.mxu0  ;;  %v4148_v40 = vpop.f32.mrf.mxu1 }
 0x18d   :  { %v4086_v19 = vadd.f32 %v4085_v3, %v4084_v35  ;;  %v2554_v13 = vadd.f32 %v2553_v61, %v2539_v28  ;;  %v5761_v12 = vadd.f32 %v4147_v17, %v4083_v9 }
 0x18e   :  { %v4087_v59 = vpop.f32.mrf.mxu0  ;;  %v4149_v56 = vpop.f32.mrf.mxu1 }
 0x18f   :  { %v2517_v47 = vadd.f32 %v2516_v20, %v5761_v12  ;;  %v2540_v24 = vmul.f32 %v5761_v12, %v5761_v12  ;;  %v4150_v50 = vadd.f32 %v4149_v56, %v4148_v40 }
 0x190   :  { %v4088_v41 = vpop.f32.mrf.mxu0  ;;  %v4151_v60 = vpop.f32.mrf.mxu1 }
 0x191   :  { %v4089_v38 = vadd.f32 %v4088_v41, %v4087_v59  ;;  %v2555_v4 = vadd.f32 %v2554_v13, %v2540_v24  ;;  %v5766_v6 = vadd.f32 %v4150_v50, %v4086_v19 }
 0x192   :  { %v4090_v63 = vpop.f32.mrf.mxu0  ;;  %v4152_v53 = vpop.f32.mrf.mxu1 }
 0x193   :  { %v2518_v15 = vadd.f32 %v2517_v47, %v5766_v6  ;;  %v2541_v46 = vmul.f32 %v5766_v6, %v5766_v6  ;;  %v4153_v18 = vadd.f32 %v4152_v53, %v4151_v60 }
 0x194   :  { %v4091_v14 = vpop.f32.mrf.mxu0  ;;  %v4154_v58 = vpop.f32.mrf.mxu1 }
 0x195   :  { %v4092_v31 = vadd.f32 %v4091_v14, %v4090_v63  ;;  %v2556_v34 = vadd.f32 %v2555_v4, %v2541_v46  ;;  %v5771_v26 = vadd.f32 %v4153_v18, %v4089_v38 }
 0x196   :  { %v4093_v51 = vpop.f32.mrf.mxu0  ;;  %v4155_v39 = vpop.f32.mrf.mxu1 }
 0x197   :  { %v2519_v25 = vadd.f32 %v2518_v15, %v5771_v26  ;;  %v2542_v36 = vmul.f32 %v5771_v26, %v5771_v26  ;;  %v4156_v32 = vadd.f32 %v4155_v39, %v4154_v58 }
 0x198   :  { %v4094_v7 = vpop.f32.mrf.mxu0  ;;  %v4157_v21 = vpop.f32.mrf.mxu1 }
 0x199   :  { %v4095_v44 = vadd.f32 %v4094_v7, %v4093_v51  ;;  %v2557_v0 = vadd.f32 %v2556_v34, %v2542_v36  ;;  %v5776_v62 = vadd.f32 %v4156_v32, %v4092_v31 }
 0x19a   :  { %v4096_v57 = vpop.f32.mrf.mxu0  ;;  %v4158_v42 = vpop.f32.mrf.mxu1 }
 0x19b   :  { %v2520_v22 = vadd.f32 %v2519_v25, %v5776_v62  ;;  %v2543_v48 = vmul.f32 %v5776_v62, %v5776_v62  ;;  %v4159_v10 = vadd.f32 %v4158_v42, %v4157_v21 }
 0x19c   :  { %v4097_v55 = vpop.f32.mrf.mxu0  ;;  %v4160_v11 = vpop.f32.mrf.mxu1 }
 0x19d   :  { %v4098_v49 = vadd.f32 %v4097_v55, %v4096_v57  ;;  %v2558_v30 = vadd.f32 %v2557_v0, %v2543_v48  ;;  %v5781_v45 = vadd.f32 %v4159_v10, %v4095_v44 }
 0x19e   :  { %v4099_v52 = vpop.f32.mrf.mxu0  ;;  %v4161_v8 = vpop.f32.mrf.mxu1 }
 0x19f   :  { %v2521_v43 = vadd.f32 %v2520_v22, %v5781_v45  ;;  %v2544_v33 = vmul.f32 %v5781_v45, %v5781_v45  ;;  %v4162_v23 = vadd.f32 %v4161_v8, %v4160_v11 }
 0x1a0   :  { %v4100_v9 = vpop.f32.mrf.mxu0  ;;  %v4163_v61 = vpop.f32.mrf.mxu1 }
 0x1a1   :  { %v4101_v35 = vadd.f32 %v4100_v9, %v4099_v52  ;;  %v2559_v5 = vadd.f32 %v2558_v30, %v2544_v33  ;;  %v5786_v20 = vadd.f32 %v4162_v23, %v4098_v49 }
 0x1a2   :  { %v4102_v28 = vpop.f32.mrf.mxu0  ;;  %v4164_v17 = vpop.f32.mrf.mxu1 }
 0x1a3   :  { %v2522_v3 = vadd.f32 %v2521_v43, %v5786_v20  ;;  %v2545_v40 = vmul.f32 %v5786_v20, %v5786_v20  ;;  %v4165_v19 = vadd.f32 %v4164_v17, %v4163_v61 }
 0x1a4   :  { %v4103_v13 = vpop.f32.mrf.mxu0  ;;  %v4166_v59 = vpop.f32.mrf.mxu1 }
 0x1a5   :  { %v4104_v56 = vadd.f32 %v4103_v13, %v4102_v28  ;;  %v2560_v47 = vadd.f32 %v2559_v5, %v2545_v40  ;;  %v5791_v24 = vadd.f32 %v4165_v19, %v4101_v35 }
 0x1a6   :  { %v4105_v50 = vpop.f32.mrf.mxu0  ;;  %v4167_v41 = vpop.f32.mrf.mxu1 }
 0x1a7   :  { %v2523_v60 = vadd.f32 %v2522_v3, %v5791_v24  ;;  %v2546_v38 = vmul.f32 %v5791_v24, %v5791_v24  ;;  %v4168_v4 = vadd.f32 %v4167_v41, %v4166_v59 }
 0x1a8   :  { %v4106_v63 = vpop.f32.mrf.mxu0  ;;  %v4169_v53 = vpop.f32.mrf.mxu1 }
 0x1a9   :  { %v4107_v15 = vadd.f32 %v4106_v63, %v4105_v50  ;;  %v2561_v46 = vadd.f32 %v2560_v47, %v2546_v38  ;;  %v5796_v18 = vadd.f32 %v4168_v4, %v4104_v56 }
 0x1aa   :  { %v4108_v14 = vpop.f32.mrf.mxu0  ;;  %v4170_v58 = vpop.f32.mrf.mxu1 }
 0x1ab   :  { %v2524_v31 = vadd.f32 %v2523_v60, %v5796_v18  ;;  %v2547_v34 = vmul.f32 %v5796_v18, %v5796_v18  ;;  %v4171_v51 = vadd.f32 %v4170_v58, %v4169_v53 }
 0x1ac   :  { %v4109_v39 = vpop.f32.mrf.mxu0  ;;  %v4172_v25 = vpop.f32.mrf.mxu1 }
 0x1ad   :  { %v4110_v36 = vadd.f32 %v4109_v39, %v4108_v14  ;;  %v2562_v32 = vadd.f32 %v2561_v46, %v2547_v34  ;;  %v5801_v7 = vadd.f32 %v4171_v51, %v4107_v15 }
 0x1ae   :  { %v4111_v21 = vpop.f32.mrf.mxu0  ;;  %v4173_v44 = vpop.f32.mrf.mxu1 }
 0x1af   :  { %v2525_v0 = vadd.f32 %v2524_v31, %v5801_v7  ;;  %v2548_v57 = vmul.f32 %v5801_v7, %v5801_v7  ;;  %v4174_v42 = vadd.f32 %v4173_v44, %v4172_v25 }
 0x1b0   :  { %v4112_v22 = vpop.f32.mrf.mxu0  ;;  %v4175_v48 = vpop.f32.mrf.mxu1 }
 0x1b1   :  { %v2563_v10 = vadd.f32 %v2562_v32, %v2548_v57  ;;  %v5806_v55 = vadd.f32 %v4174_v42, %v4110_v36  ;;  %v4113_v11 = vadd.f32 %v4112_v22, %v4111_v21 }
 0x1b2   :  { %v4194_v49 = vpop.f32.mrf.mxu0  ;;  %v4176_v30 = vpop.f32.mrf.mxu1 }
 0x1b3   :  { %v2526_v52 = vadd.f32 %v2525_v0, %v5806_v55  ;;  %v2549_v8 = vmul.f32 %v5806_v55, %v5806_v55  ;;  %v4177_v43 = vadd.f32 %v4176_v30, %v4175_v48 }
 0x1b4   :  { %v4195_v33 = vpop.f32.mrf.mxu0  ;;  %v4258_v23 = vpop.f32.mrf.mxu1 }
 0x1b5   :  { %v2564_v9 = vadd.f32 %v2563_v10, %v2549_v8  ;;  %v5811_v61 = vadd.f32 %v4177_v43, %v4113_v11  ;;  %v4196_v35 = vadd.f32 %v4195_v33, %v4194_v49 }
 0x1b6   :  { %v4197_v5 = vpop.f32.mrf.mxu0  ;;  %v4259_v28 = vpop.f32.mrf.mxu1 }
 0x1b7   :  { %v2527_v17 = vadd.f32 %v2526_v52, %v5811_v61  ;;  %v2550_v3 = vmul.f32 %v5811_v61, %v5811_v61  ;;  %v4260_v40 = vadd.f32 %v4259_v28, %v4258_v23 }
 0x1b8   :  { %v4198_v19 = vpop.f32.mrf.mxu0  ;;  %v4261_v13 = vpop.f32.mrf.mxu1 }
 0x1b9   :  { %v2528_v59 = vrot.slane %v2527_v17, 4  ;;  %v2565_v56 = vadd.f32 %v2564_v9, %v2550_v3  ;;  %v5816_v47 = vadd.f32 %v4260_v40, %v4196_v35  ;;  %v4199_v41 = vadd.f32 %v4198_v19, %v4197_v5 }
 0x1ba   :  { %v4200_v50 = vpop.f32.mrf.mxu0  ;;  %v4262_v60 = vpop.f32.mrf.mxu1 }
 0x1bb   :  { %v2529_v38 = vadd.f32 %v2528_v59, %v2527_v17  ;;  %v2566_v4 = vrot.slane %v2565_v56, 4  ;;  %v3724_v63 = vpack.c.bf16 %v5816_v47, %v5732_v1  ;;  %v4263_v15 = vadd.f32 %v4262_v60, %v4261_v13 }
 0x1bc   :  { %v4201_v53 = vpop.f32.mrf.mxu0  ;;  %v4264_v46 = vpop.f32.mrf.mxu1 }
 0x1bd   :  { %v2530_v14 = vrot.slane %v2529_v38, 2  ;;  %v2567_v58 = vadd.f32 %v2566_v4, %v2565_v56  ;;  %3221 = vst [vmem:[%s5932_s4 + $0x8] sm:$0xff] %v3724_v63  ;;  %v4202_v31 = vadd.f32 %v4201_v53, %v4200_v50  ;;  %v5823_v51 = vadd.f32 %v4263_v15, %v4199_v41 }
 0x1be   :  { %v4203_v34 = vpop.f32.mrf.mxu0  ;;  %v4265_v39 = vpop.f32.mrf.mxu1 }
 0x1bf   :  { %v2531_v25 = vadd.f32 %v2530_v14, %v2529_v38  ;;  %v2568_v36 = vrot.slane %v2567_v58, 2  ;;  %v4266_v32 = vadd.f32 %v4265_v39, %v4264_v46  ;;  %v3726_v1 = vpack.c.bf16 %v5823_v51, %v5734_v29 }
 0x1c0   :  { %v4204_v21 = vpop.f32.mrf.mxu0  ;;  %v4267_v44 = vpop.f32.mrf.mxu1 }
 0x1c1   :  { %v2532_v0 = vrot.slane %v2531_v25, 1  ;;  %v2569_v57 = vadd.f32 %v2568_v36, %v2567_v58  ;;  %v5827_v42 = vadd.f32 %v4266_v32, %v4202_v31  ;;  %3223 = vst [vmem:[%s5932_s4 + $0x18] sm:$0xff] %v3726_v1  ;;  %v4205_v48 = vadd.f32 %v4204_v21, %v4203_v34 }
 0x1c2   :  { %v4206_v22 = vpop.f32.mrf.mxu0  ;;  %v4268_v10 = vpop.f32.mrf.mxu1 }
 0x1c3   :  { %v2533_v11 = vadd.f32 %v2532_v0, %v2531_v25  ;;  %v2570_v49 = vrot.slane %v2569_v57, 1  ;;  %v3728_v52 = vpack.c.bf16 %v5827_v42, %v5742_v27  ;;  %v4269_v8 = vadd.f32 %v4268_v10, %v4267_v44 }
 0x1c4   :  { %v4207_v30 = vpop.f32.mrf.mxu0  ;;  %v4270_v29 = vpop.f32.mrf.mxu1 }
 0x1c5   :  { %v5835_v43 = vadd.f32 %v2533_v11, %v5747_v2  ;;  %v2571_v33 = vadd.f32 %v2570_v49, %v2569_v57  ;;  %v4208_v23 = vadd.f32 %v4207_v30, %v4206_v22  ;;  %3225 = vst [vmem:[%s5932_s4 + $0x28] sm:$0xff] %v3728_v52  ;;  %v5840_v35 = vadd.f32 %v4269_v8, %v4205_v48 }
 0x1c6   :  { %v4209_v9 = vpop.f32.mrf.mxu0  ;;  %v4271_v5 = vpop.f32.mrf.mxu1  ;;  %v3087_v22 = vmul.f32 %v5823_v51, %v5823_v51  ;;  %v3086_v49 = vmul.f32 %v5816_v47, %v5816_v47  ;;  %v3088_v30 = vmul.f32 %v5827_v42, %v5827_v42  ;;  %v3064_v52 = vadd.f32 %v5823_v51, %v5816_v47 }
 0x1c7   :  { %v5843_v28 = vadd.f32 %v2571_v33, %v5751_v16  ;;  %v4272_v17 = vadd.f32 %v4271_v5, %v4270_v29  ;;  %v3730_v3 = vpack.c.bf16 %v5840_v35, %v5749_v37 }
 0x1c8   :  { %v4210_v27 = vpop.f32.mrf.mxu0  ;;  %v4273_v2 = vpop.f32.mrf.mxu1 }
 0x1c9   :  { %v5847_v40 = vadd.f32 %v4272_v17, %v4208_v23  ;;  %v4211_v19 = vadd.f32 %v4210_v27, %v4209_v9  ;;  %3227 = vst [vmem:[%s5932_s4 + $0x38] sm:$0xff] %v3730_v3  ;;  %v3102_v23 = vadd.f32 %v3087_v22, %v3086_v49  ;;  %v3089_v9 = vmul.f32 %v5840_v35, %v5840_v35 }
 0x1ca   :  { %v4212_v13 = vpop.f32.mrf.mxu0  ;;  %v4274_v59 = vpop.f32.mrf.mxu1  ;;  %v3065_v17 = vadd.f32 %v3064_v52, %v5827_v42 }
 0x1cb   :  { %v3732_v56 = vpack.c.bf16 %v5847_v40, %v5756_v54  ;;  %v4275_v16 = vadd.f32 %v4274_v59, %v4273_v2 }
 0x1cc   :  { %v4213_v50 = vpop.f32.mrf.mxu0  ;;  %v4276_v41 = vpop.f32.mrf.mxu1  ;;  %v3066_v51 = vadd.f32 %v3065_v17, %v5840_v35 }
 0x1cd   :  { %3229 = vst [vmem:[%s5932_s4 + $0x48] sm:$0xff] %v3732_v56  ;;  %v5857_v37 = vadd.f32 %v4275_v16, %v4211_v19  ;;  %v4214_v60 = vadd.f32 %v4213_v50, %v4212_v13  ;;  %v3103_v19 = vadd.f32 %v3102_v23, %v3088_v30 }
 0x1ce   :  { %v4215_v38 = vpop.f32.mrf.mxu0  ;;  %v4277_v4 = vpop.f32.mrf.mxu1 }
 0x1cf   :  { %v3734_v63 = vpack.c.bf16 %v5857_v37, %v5761_v12  ;;  %v4278_v53 = vadd.f32 %v4277_v4, %v4276_v41  ;;  %v3104_v16 = vadd.f32 %v3103_v19, %v3089_v9  ;;  %v3091_v42 = vmul.f32 %v5857_v37, %v5857_v37 }
 0x1d0   :  { %v4216_v15 = vpop.f32.mrf.mxu0  ;;  %v4279_v46 = vpop.f32.mrf.mxu1  ;;  %v3067_v41 = vadd.f32 %v3066_v51, %v5847_v40 }
 0x1d1   :  { %3231 = vst [vmem:[%s5932_s4 + $0x58] sm:$0xff] %v3734_v63  ;;  %v3026_v54 = vadd.f32 %v4278_v53, %v4214_v60  ;;  %v4217_v14 = vadd.f32 %v4216_v15, %v4215_v38 }
 0x1d2   :  { %v4218_v58 = vpop.f32.mrf.mxu0  ;;  %v4280_v31 = vpop.f32.mrf.mxu1 }
 0x1d3   :  { %v3736_v34 = vpack.c.bf16 %v3026_v54, %v5766_v6  ;;  %v4281_v39 = vadd.f32 %v4280_v31, %v4279_v46  ;;  %v3092_v35 = vmul.f32 %v3026_v54, %v3026_v54 }
 0x1d4   :  { %v4219_v25 = vpop.f32.mrf.mxu0  ;;  %v4282_v36 = vpop.f32.mrf.mxu1 }
 0x1d5   :  { %3233 = vst [vmem:[%s5932_s4 + $0x68] sm:$0xff] %v3736_v34  ;;  %v3029_v12 = vadd.f32 %v4281_v39, %v4217_v14  ;;  %v4220_v32 = vadd.f32 %v4219_v25, %v4218_v58 }
 0x1d6   :  { %v4221_v21 = vpop.f32.mrf.mxu0  ;;  %v4283_v1 = vpop.f32.mrf.mxu1 }
 0x1d7   :  { %v3738_v44 = vpack.c.bf16 %v3029_v12, %v5771_v26  ;;  %v4284_v0 = vadd.f32 %v4283_v1, %v4282_v36  ;;  %v3093_v31 = vmul.f32 %v3029_v12, %v3029_v12 }
 0x1d8   :  { %v4222_v57 = vpop.f32.mrf.mxu0  ;;  %v4285_v48 = vpop.f32.mrf.mxu1 }
 0x1d9   :  { %3235 = vst [vmem:[%s5932_s4 + $0x78] sm:$0xff] %v3738_v44  ;;  %v3034_v6 = vadd.f32 %v4284_v0, %v4220_v32  ;;  %v4223_v10 = vadd.f32 %v4222_v57, %v4221_v21 }
 0x1da   :  { %v4224_v11 = vpop.f32.mrf.mxu0  ;;  %v4286_v26 = vpop.f32.mrf.mxu1 }
 0x1db   :  { %v3740_v8 = vpack.c.bf16 %v3034_v6, %v5776_v62  ;;  %v4287_v29 = vadd.f32 %v4286_v26, %v4285_v48  ;;  %v3090_v62 = vmul.f32 %v5847_v40, %v5847_v40  ;;  %v3094_v21 = vmul.f32 %v3034_v6, %v3034_v6 }
 0x1dc   :  { %v4225_v33 = vpop.f32.mrf.mxu0  ;;  %v4288_v5 = vpop.f32.mrf.mxu1 }
 0x1dd   :  { %3237 = vst [vmem:[%s5932_s4 + $0x88] sm:$0xff] %v3740_v8  ;;  %v3037_v27 = vadd.f32 %v4287_v29, %v4223_v10  ;;  %v4226_v3 = vadd.f32 %v4225_v33, %v4224_v11  ;;  %v3105_v63 = vadd.f32 %v3104_v16, %v3090_v62 }
 0x1de   :  { %v4227_v2 = vpop.f32.mrf.mxu0  ;;  %v4289_v47 = vpop.f32.mrf.mxu1 }
 0x1df   :  { %v3742_v13 = vpack.c.bf16 %v3037_v27, %v5781_v45  ;;  %v4290_v59 = vadd.f32 %v4289_v47, %v4288_v5  ;;  %v3068_v45 = vadd.f32 %v3067_v41, %v5857_v37  ;;  %v3106_v58 = vadd.f32 %v3105_v63, %v3091_v42 }
 0x1e0   :  { %v4228_v56 = vpop.f32.mrf.mxu0  ;;  %v4291_v50 = vpop.f32.mrf.mxu1  ;;  %v3095_v22 = vmul.f32 %v3037_v27, %v3037_v27 }
 0x1e1   :  { %3239 = vst [vmem:[%s5932_s4 + $0x98] sm:$0xff] %v3742_v13  ;;  %v3042_v60 = vadd.f32 %v4290_v59, %v4226_v3  ;;  %v4229_v38 = vadd.f32 %v4228_v56, %v4227_v2  ;;  %v3069_v40 = vadd.f32 %v3068_v45, %v3026_v54  ;;  %v3107_v32 = vadd.f32 %v3106_v58, %v3092_v35 }
 0x1e2   :  { %v4230_v4 = vpop.f32.mrf.mxu0  ;;  %v4292_v53 = vpop.f32.mrf.mxu1 }
 0x1e3   :  { %v3744_v15 = vpack.c.bf16 %v3042_v60, %v5786_v20  ;;  %v4293_v46 = vadd.f32 %v4292_v53, %v4291_v50  ;;  %v3070_v44 = vadd.f32 %v3069_v40, %v3029_v12  ;;  %v3108_v57 = vadd.f32 %v3107_v32, %v3093_v31 }
 0x1e4   :  { %v4231_v14 = vpop.f32.mrf.mxu0  ;;  %v4294_v34 = vpop.f32.mrf.mxu1  ;;  %v3096_v26 = vmul.f32 %v3042_v60, %v3042_v60 }
 0x1e5   :  { %3241 = vst [vmem:[%s5932_s4 + $0xa8] sm:$0xff] %v3744_v15  ;;  %v3045_v39 = vadd.f32 %v4293_v46, %v4229_v38  ;;  %v4232_v25 = vadd.f32 %v4231_v14, %v4230_v4  ;;  %v3071_v10 = vadd.f32 %v3070_v44, %v3034_v6  ;;  %v3109_v30 = vadd.f32 %v3108_v57, %v3094_v21 }
 0x1e6   :  { %v4233_v36 = vpop.f32.mrf.mxu0  ;;  %v4295_v1 = vpop.f32.mrf.mxu1 }
 0x1e7   :  { %v3746_v37 = vpack.c.bf16 %v3045_v39, %v5791_v24  ;;  %v4296_v20 = vadd.f32 %v4295_v1, %v4294_v34  ;;  %v3072_v8 = vadd.f32 %v3071_v10, %v3037_v27  ;;  %v3110_v33 = vadd.f32 %v3109_v30, %v3095_v22 }
 0x1e8   :  { %v4234_v0 = vpop.f32.mrf.mxu0  ;;  %v4297_v48 = vpop.f32.mrf.mxu1  ;;  %v3097_v23 = vmul.f32 %v3045_v39, %v3045_v39 }
 0x1e9   :  { %3243 = vst [vmem:[%s5932_s4 + $0xb8] sm:$0xff] %v3746_v37  ;;  %v3050_v54 = vadd.f32 %v4296_v20, %v4232_v25  ;;  %v4235_v11 = vadd.f32 %v4234_v0, %v4233_v36  ;;  %v3073_v5 = vadd.f32 %v3072_v8, %v3042_v60  ;;  %v3111_v2 = vadd.f32 %v3110_v33, %v3096_v26 }
 0x1ea   :  { %v4236_v49 = vpop.f32.mrf.mxu0  ;;  %v4298_v52 = vpop.f32.mrf.mxu1 }
 0x1eb   :  { %v3748_v12 = vpack.c.bf16 %v3050_v54, %v5796_v18  ;;  %v4299_v24 = vadd.f32 %v4298_v52, %v4297_v48  ;;  %v3098_v19 = vmul.f32 %v3050_v54, %v3050_v54  ;;  %v3074_v47 = vadd.f32 %v3073_v5, %v3045_v39 }
 0x1ec   :  { %v4237_v29 = vpop.f32.mrf.mxu0  ;;  %v4300_v9 = vpop.f32.mrf.mxu1  ;;  %v3112_v13 = vadd.f32 %v3111_v2, %v3097_v23 }
 0x1ed   :  { %3245 = vst [vmem:[%s5932_s4 + $0xc8] sm:$0xff] %v3748_v12  ;;  %v3053_v6 = vadd.f32 %v4299_v24, %v4235_v11  ;;  %v4238_v17 = vadd.f32 %v4237_v29, %v4236_v49  ;;  %v3075_v56 = vadd.f32 %v3074_v47, %v3050_v54 }
 0x1ee   :  { %v4239_v3 = vpop.f32.mrf.mxu0  ;;  %v4301_v62 = vpop.f32.mrf.mxu1  ;;  %v3113_v41 = vadd.f32 %v3112_v13, %v3098_v19 }
 0x1ef   :  { %v3750_v27 = vpack.c.bf16 %v3053_v6, %v5801_v7  ;;  %v4302_v18 = vadd.f32 %v4301_v62, %v4300_v9  ;;  %v3099_v16 = vmul.f32 %v3053_v6, %v3053_v6  ;;  %v3076_v38 = vadd.f32 %v3075_v56, %v3053_v6 }
 0x1f0   :  { %v4240_v51 = vpop.f32.mrf.mxu0  ;;  %v4303_v59 = vpop.f32.mrf.mxu1 }
 0x1f1   :  { %3247 = vst [vmem:[%s5932_s4 + $0xd8] sm:$0xff] %v3750_v27  ;;  %v3058_v42 = vadd.f32 %v4302_v18, %v4238_v17  ;;  %v4241_v50 = vadd.f32 %v4240_v51, %v4239_v3  ;;  %v3114_v7 = vadd.f32 %v3113_v41, %v3099_v16 }
 0x1f2   :  { %v4304_v60 = vpop.f32.mrf.mxu1 }
 0x1f3   :  { %v3100_v4 = vmul.f32 %v3058_v42, %v3058_v42  ;;  %v3752_v63 = vpack.c.bf16 %v3058_v42, %v5806_v55  ;;  %v4305_v35 = vadd.f32 %v4304_v60, %v4303_v59  ;;  %v3077_v53 = vadd.f32 %v3076_v38, %v3058_v42 }
 0x1f5   :  { %3249 = vst [vmem:[%s5932_s4 + $0xe8] sm:$0xff] %v3752_v63  ;;  %v3061_v45 = vadd.f32 %v4305_v35, %v4241_v50  ;;  %v3115_v15 = vadd.f32 %v3114_v7, %v3100_v4 }
 0x1f7   :  { %v3078_v46 = vadd.f32 %v3077_v53, %v3061_v45  ;;  %v3101_v14 = vmul.f32 %v3061_v45, %v3061_v45  ;;  %v3754_v58 = vpack.c.bf16 %v3061_v45, %v5811_v61 }
 0x1f9   :  { %v3079_v31 = vrot.slane %v3078_v46, 4  ;;  %v3116_v34 = vadd.f32 %v3115_v15, %v3101_v14  ;;  %3251 = vst [vmem:[%s5932_s4 + $0xf8] sm:$0xff] %v3754_v58 }
 0x1fb   :  { %v3080_v55 = vadd.f32 %v3079_v31, %v3078_v46  ;;  %v3117_v40 = vrot.slane %v3116_v34, 4 }
 0x1fd   :  { %v3081_v39 = vrot.slane %v3080_v55, 2  ;;  %v3118_v25 = vadd.f32 %v3117_v40, %v3116_v34 }
 0x1ff   :  { %v3082_v36 = vadd.f32 %v3081_v39, %v3080_v55  ;;  %v3119_v32 = vrot.slane %v3118_v25, 2 }
 0x201   :  { %v3083_v21 = vrot.slane %v3082_v36, 1  ;;  %v3120_v1 = vadd.f32 %v3119_v32, %v3118_v25 }
 0x203   :  { %v3084_v44 = vadd.f32 %v3083_v21, %v3082_v36  ;;  %v3121_v37 = vrot.slane %v3120_v1, 1 }
 0x205   :  { %v3122_v20 = vadd.f32 %v3121_v37, %v3120_v1  ;;  %v3085_v0 = vadd.f32 %v3084_v44, %v5835_v43 }
 0x207   :  { %v3123_v61 = vadd.f32 %v3122_v20, %v5843_v28 }
 0x209   :  { %v3253_v57 = vsel %vm290_vm0, %v3085_v0, %v3123_v61 }
 0x20a   :  { %3254 = vst [vmem:[%s5933_s5] sm:$0x3] %v3253_v57 }

</bundles_post_ra>
